<compile_context>
chip_gen: v7x
topology: tpu7x:2x2x1
jax: 0.10.0
libtpu: 0.0.40
codegen_flags: <defaults>
</compile_context>

<pallas_src>
import functools

import jax
import jax.numpy as jnp
from jax import lax
from jax.experimental import pallas as pl
from jax.experimental.pallas import tpu as pltpu


# ------------------------------ Pallas kernels ------------------------------

def _conv_bn_pool_kernel(a_ref, w_ref, gb_ref, out_ref, idx_ref, *, pool_k, n_win, eps):
    """matmul + train-mode BatchNorm (one scale/shift pass) + maxpool(argmax) + ReLU.

    a_ref rows are ordered (pool-tap j = di*k+dj major, window minor), so pooling
    is a running max over pool_k*pool_k contiguous (n_win, C) row blocks.
    """
    y = jnp.dot(a_ref[...], w_ref[...], preferred_element_type=jnp.float32)
    m = y.shape[0]
    inv_m = 1.0 / m
    mean = jnp.sum(y, axis=0, keepdims=True) * inv_m
    ex2 = jnp.sum(y * y, axis=0, keepdims=True) * inv_m
    var = jnp.maximum(ex2 - mean * mean, 0.0)          # biased variance (training mode)
    scale = gb_ref[0:1, :] * lax.rsqrt(var + eps)
    shift = gb_ref[1:2, :] - mean * scale
    best = y[0:n_win, :] * scale + shift
    idx = jnp.zeros((n_win, y.shape[1]), jnp.int32)
    for j in range(1, pool_k * pool_k):
        cand = y[j * n_win:(j + 1) * n_win, :] * scale + shift
        take = cand > best                              # strict > keeps first max (PyTorch)
        best = jnp.where(take, cand, best)
        idx = jnp.where(take, j, idx)
    out_ref[...] = jnp.maximum(best, 0.0)
    idx_ref[...] = idx


def _encoder_tail_kernel(a_ref, w2_ref, gb2_ref, w1_ref, w2f_ref, w3f_ref, w4f_ref,
                         vec_ref, b4_ref, idx_ref, out_ref, *, n_batch, eps):
    """conv2+bn2+maxpool2(argmax)+relu -> NCHW flatten -> fc1+bn3+relu
       -> fc2+bn4+relu -> tfc2+relu -> tfc1+relu, all on the VMEM accumulator."""
    n_win = 4 * n_batch

    # conv2 + bn2 (single scale/shift) + pool + relu
    y = jnp.dot(a_ref[...], w2_ref[...], preferred_element_type=jnp.float32)
    m = y.shape[0]
    inv_m = 1.0 / m
    mean = jnp.sum(y, axis=0, keepdims=True) * inv_m
    ex2 = jnp.sum(y * y, axis=0, keepdims=True) * inv_m
    var = jnp.maximum(ex2 - mean * mean, 0.0)
    scale = gb2_ref[0:1, :] * lax.rsqrt(var + eps)
    shift = gb2_ref[1:2, :] - mean * scale
    best = y[0:n_win, :] * scale + shift
    idx = jnp.zeros((n_win, y.shape[1]), jnp.int32)
    for j in range(1, 4):
        cand = y[j * n_win:(j + 1) * n_win, :] * scale + shift
        take = cand > best
        best = jnp.where(take, cand, best)
        idx = jnp.where(take, j, idx)
    idx_ref[...] = idx
    pooled = jnp.maximum(best, 0.0)                     # (4N, 64), rows ordered (n, hw)

    # fc1 with the PyTorch NCHW .view(-1, 256): x_fc[n, c*4+hw] = pooled[n*4+hw, c].
    # w1_ref column block hw holds fc1_w[:, c*4+hw]; pick row n*4+hw via tiny
    # selection matmuls -> only 128-aligned lane slices, no sublane relayout.
    y1 = jnp.dot(pooled, w1_ref[...], preferred_element_type=jnp.float32)   # (4N, 4*128)
    row_id = lax.broadcasted_iota(jnp.int32, (n_batch, n_win), 1)
    n_id = lax.broadcasted_iota(jnp.int32, (n_batch, n_win), 0)
    h = jnp.zeros((n_batch, 128), jnp.float32)
    for hw in range(4):
        sel = (row_id == n_id * 4 + hw).astype(jnp.float32)                  # (N, 4N)
        h = h + jnp.dot(sel, y1[:, hw * 128:(hw + 1) * 128],
                        preferred_element_type=jnp.float32)

    def bn(v, g, b):
        mm = v.shape[0]
        mu = jnp.sum(v, axis=0, keepdims=True) * (1.0 / mm)
        e2 = jnp.sum(v * v, axis=0, keepdims=True) * (1.0 / mm)
        vr = jnp.maximum(e2 - mu * mu, 0.0)
        sc = g * lax.rsqrt(vr + eps)
        return v * sc + (b - mu * sc)

    h = jnp.maximum(bn(h, vec_ref[0:1, :], vec_ref[1:2, :]), 0.0)            # bn3+relu
    h = jnp.dot(h, w2f_ref[...], preferred_element_type=jnp.float32)         # fc2
    h = jnp.maximum(bn(h, vec_ref[2:3, :], vec_ref[3:4, :]), 0.0)            # bn4+relu
    h = jnp.maximum(jnp.dot(h, w3f_ref[...], preferred_element_type=jnp.float32)
                    + vec_ref[4:5, :], 0.0)                                  # tfc2+relu
    h = jnp.maximum(jnp.dot(h, w4f_ref[...], preferred_element_type=jnp.float32)
                    + b4_ref[...], 0.0)                                      # tfc1+relu
    out_ref[...] = h


def _matmul_bias_kernel(a_ref, w_ref, b_ref, o_ref, *, relu):
    y = jnp.dot(a_ref[...], w_ref[...], preferred_element_type=jnp.float32) + b_ref[...]
    if relu:
        y = jnp.maximum(y, 0.0)
    o_ref[...] = y


# ------------------------------ pallas_call wrappers ------------------------------

def conv_bn_pool(a, w, gamma, beta, *, pool_k, n_win, eps=1e-5):
    M, K = a.shape
    C = w.shape[1]
    gb = jnp.stack([gamma, beta], axis=0)                # packed (2, C) epilogue operand
    return pl.pallas_call(
        functools.partial(_conv_bn_pool_kernel, pool_k=pool_k, n_win=n_win, eps=eps),
        out_shape=(jax.ShapeDtypeStruct((n_win, C), jnp.float32),
                   jax.ShapeDtypeStruct((n_win, C), jnp.int32)),
        grid=(1,),
        in_specs=[pl.BlockSpec((M, K), lambda i: (0, 0)),
                  pl.BlockSpec((K, C), lambda i: (0, 0)),
                  pl.BlockSpec((2, C), lambda i: (0, 0))],
        out_specs=(pl.BlockSpec((n_win, C), lambda i: (0, 0)),
                   pl.BlockSpec((n_win, C), lambda i: (0, 0))),
    )(a, w, gb)


def encoder_tail(a2, w2, gb2, w1cat, w2f, w3f, w4f, vec, b4, *, n_batch, eps=1e-5):
    ins = (a2, w2, gb2, w1cat, w2f, w3f, w4f, vec, b4)
    return pl.pallas_call(
        functools.partial(_encoder_tail_kernel, n_batch=n_batch, eps=eps),
        out_shape=(jax.ShapeDtypeStruct((4 * n_batch, 64), jnp.int32),
                   jax.ShapeDtypeStruct((n_batch, 256), jnp.float32)),
        grid=(1,),
        in_specs=[pl.BlockSpec(x.shape, lambda i: (0, 0)) for x in ins],
        out_specs=(pl.BlockSpec((4 * n_batch, 64), lambda i: (0, 0)),
                   pl.BlockSpec((n_batch, 256), lambda i: (0, 0))),
    )(*ins)


def _choose_tm(m, cap=512):
    """Largest tile <= cap that divides m, is a multiple of 8, and gives >= 2 steps."""
    if m <= 8 or m % 8 != 0:
        return m
    hi = min(cap, m // 2)
    hi -= hi % 8
    for t in range(hi, 7, -8):
        if m % t == 0:
            return t
    return m


def matmul_bias_act(a, w, b, *, relu):
    M, K = a.shape
    C = w.shape[1]
    tm = _choose_tm(M)                                  # fixed, batch-independent M tile
    return pl.pallas_call(
        functools.partial(_matmul_bias_kernel, relu=relu),
        out_shape=jax.ShapeDtypeStruct((M, C), jnp.float32),
        grid=(M // tm,),
        in_specs=[pl.BlockSpec((tm, K), lambda i: (i, 0)),
                  pl.BlockSpec((K, C), lambda i: (0, 0)),
                  pl.BlockSpec((1, C), lambda i: (0, 0))],
        out_specs=pl.BlockSpec((tm, C), lambda i: (i, 0)),
        compiler_params=pltpu.CompilerParams(dimension_semantics=("parallel",)),
    )(a, w, b.reshape(1, C))


# ------------------------------ XLA glue (small, relayout-light) ------------------------------

def _pool_major_patches(x, k, pool):
    """(N,H,W,C) -> (pool*pool * N*nph*npw, k*k*C) im2col rows, built directly with
    stride-`pool` slices: pool-tap (di,dj) major, window (n,ph,pw) minor, features (ki,kj,c)."""
    N, H, W, C = x.shape
    Ho, Wo = H - k + 1, W - k + 1
    nph, npw = Ho // pool, Wo // pool
    taps = []
    for di in range(pool):
        for dj in range(pool):
            pieces = [x[:, di + ki: di + ki + pool * nph: pool,
                          dj + kj: dj + kj + pool * npw: pool, :]
                      for ki in range(k) for kj in range(k)]
            taps.append(jnp.concatenate(pieces, axis=-1).reshape(N * nph * npw, k * k * C))
    return jnp.concatenate(taps, axis=0)


def _patches_rows(x, k):
    """(N,H,W,C) -> (N*Ho*Wo, k*k*C) im2col rows in (n,h,w) order; features (ki,kj,c)."""
    N, H, W, C = x.shape
    Ho, Wo = H - k + 1, W - k + 1
    pieces = [x[:, ki:ki + Ho, kj:kj + Wo, :] for ki in range(k) for kj in range(k)]
    return jnp.concatenate(pieces, axis=-1).reshape(N * Ho * Wo, k * k * C)


def _unpool(vals, idx, k):
    """MaxUnpool (non-overlapping windows): scatter to the saved within-window slot."""
    N, Hp, Wp, C = vals.shape
    pos = (jnp.arange(k)[:, None] * k + jnp.arange(k)[None, :]).reshape(1, 1, k, 1, k, 1)
    out = jnp.where(idx[:, :, None, :, None, :] == pos, vals[:, :, None, :, None, :], 0.0)
    return out.reshape(N, Hp * k, Wp * k, C)


def _pad_cols(v, n):
    return jnp.pad(v, (0, n - v.shape[0]))


def _pad2(m, r, c):
    return jnp.pad(m, ((0, r - m.shape[0]), (0, c - m.shape[1])))


def _conv_w_mat(w, k_rows=None):
    """Conv2d weight (O,I,kh,kw) -> (kh*kw*I [pad], O) with rows ordered (ki,kj,c)."""
    O, I, kh, kw = w.shape
    m = jnp.transpose(w, (2, 3, 1, 0)).reshape(kh * kw * I, O)
    if k_rows is not None and k_rows > kh * kw * I:
        m = jnp.pad(m, ((0, k_rows - kh * kw * I), (0, 0)))
    return m


def _tconv_w_mat(w_t, out_pad=None):
    """ConvTranspose2d weight (I,O,kh,kw) -> conv matrix for the pad+flipped-conv form."""
    I, O, kh, kw = w_t.shape
    wf = jnp.flip(w_t, axis=(2, 3))
    m = jnp.transpose(wf, (2, 3, 0, 1)).reshape(kh * kw * I, O)
    if out_pad is not None and out_pad > O:
        m = jnp.pad(m, ((0, 0), (0, out_pad - O)))
    return m


# ------------------------------- parameters -------------------------------

def init_params(key):
    ks = jax.random.split(key, 16)
    s = 0.05
    p = {
        "conv1_w": jax.random.normal(ks[0], (32, 1, 5, 5), jnp.float32) * s,
        "conv1_b": jax.random.normal(ks[1], (32,), jnp.float32) * s,     # folded away (BN)
        "conv2_w": jax.random.normal(ks[2], (64, 32, 5, 5), jnp.float32) * s,
        "conv2_b": jax.random.normal(ks[3], (64,), jnp.float32) * s,     # folded away (BN)
        "fc1_w": jax.random.normal(ks[4], (120, 256), jnp.float32) * s,
        "fc1_b": jax.random.normal(ks[5], (120,), jnp.float32) * s,      # folded away (BN)
        "fc2_w": jax.random.normal(ks[6], (50, 120), jnp.float32) * s,
        "fc2_b": jax.random.normal(ks[7], (50,), jnp.float32) * s,       # folded away (BN)
        "tfc2_w": jax.random.normal(ks[8], (120, 50), jnp.float32) * s,
        "tfc2_b": jax.random.normal(ks[9], (120,), jnp.float32) * s,
        "tfc1_w": jax.random.normal(ks[10], (256, 120), jnp.float32) * s,
        "tfc1_b": jax.random.normal(ks[11], (256,), jnp.float32) * s,
        "tconv2_w": jax.random.normal(ks[12], (64, 32, 5, 5), jnp.float32) * s,
        "tconv2_b": jax.random.normal(ks[13], (32,), jnp.float32) * s,
        "tconv1_w": jax.random.normal(ks[14], (32, 1, 5, 5), jnp.float32) * s,
        "tconv1_b": jax.random.normal(ks[15], (1,), jnp.float32) * s,
    }
    for name, c in (("bn1", 32), ("bn2", 64), ("bn3", 120), ("bn4", 50)):
        p[name + "_g"] = jnp.ones((c,), jnp.float32)    # PyTorch default gamma=1
        p[name + "_b"] = jnp.zeros((c,), jnp.float32)   # beta=0
    return p


# -------------------------------- forward ----------------------------------

def aefnet_forward(params, x_nchw):
    p = params
    N = x_nchw.shape[0]
    assert N % 2 == 0, "batch must be even so pool row blocks stay 8-aligned"
    x = jnp.transpose(x_nchw, (0, 2, 3, 1))                        # NHWC (N,28,28,1)

    # ---- K1: conv1 + bn1 + maxpool3(argmax) + relu ----
    a1 = jnp.pad(_pool_major_patches(x, 5, 3), ((0, 0), (0, 7)))   # (9*64N, 32); K 25->32
    h1, idx1 = conv_bn_pool(a1, _conv_w_mat(p["conv1_w"], 32),
                            p["bn1_g"], p["bn1_b"],
                            pool_k=3, n_win=N * 64)                # (64N, 32) each

    # ---- K2: conv2+bn2+pool2+relu -> fc1+bn3+relu -> fc2+bn4+relu -> tfc2+relu -> tfc1+relu
    # TODO(synk): Dropout2d treated as identity (eval mode); stochastic drop not reproduced.
    # TODO(synk): BatchNorm uses training-mode batch statistics (module in train()); running
    #             stats (eval mode) are not implemented.
    a2 = _pool_major_patches(h1.reshape(N, 8, 8, 32), 5, 2)        # (4*4N, 800)
    gb2 = jnp.stack([p["bn2_g"], p["bn2_b"]], axis=0)              # (2, 64)
    w1cat = jnp.pad(p["fc1_w"].T.reshape(64, 4, 120),
                    ((0, 0), (0, 0), (0, 8))).reshape(64, 512)     # col block hw = fc1_w[:, c*4+hw]
    w2f = _pad2(p["fc2_w"].T, 128, 128)
    w3f = _pad2(p["tfc2_w"].T, 128, 128)
    w4f = _pad2(p["tfc1_w"].T, 128, 256)
    vec = jnp.stack([_pad_cols(p["bn3_g"], 128), _pad_cols(p["bn3_b"], 128),
                     _pad_cols(p["bn4_g"], 128), _pad_cols(p["bn4_b"], 128),
                     _pad_cols(p["tfc2_b"], 128)], axis=0)         # (5, 128)
    idx2, h4 = encoder_tail(a2, _conv_w_mat(p["conv2_w"]), gb2, w1cat,
                            w2f, w3f, w4f, vec, p["tfc1_b"].reshape(1, 256),
                            n_batch=N)                             # (4N,64) int32, (N,256) f32

    # ---- K3: unpool2 + tconv2 + relu ----
    dec = jnp.transpose(h4.reshape(N, 64, 2, 2), (0, 2, 3, 1))     # NHWC (N,2,2,64)
    up2 = _unpool(dec, idx2.reshape(N, 2, 2, 64), 2)               # (N,4,4,64)
    up2 = jnp.pad(up2, ((0, 0), (4, 4), (4, 4), (0, 0)))           # (N,12,12,64)
    a3 = _patches_rows(up2, 5)                                     # (64N, 1600)
    h5 = matmul_bias_act(a3, _tconv_w_mat(p["tconv2_w"]),
                         p["tconv2_b"], relu=True)                 # (64N, 32)

    # ---- K4: unpool1 + tconv1 ----
    up1 = _unpool(h5.reshape(N, 8, 8, 32), idx1.reshape(N, 8, 8, 32), 3)    # (N,24,24,32)
    up1 = jnp.pad(up1, ((0, 0), (4, 4), (4, 4), (0, 0)))           # (N,32,32,32)
    a4 = _patches_rows(up1, 5)                                     # (784N, 800)
    out = matmul_bias_act(a4, _tconv_w_mat(p["tconv1_w"], out_pad=8),
                          _pad_cols(p["tconv1_b"], 8), relu=False)          # (784N, 8)
    return out[:, 0].reshape(N, 28, 28)[:, None, :, :]             # (N,1,28,28)


if __name__ == "__main__":
    key = jax.random.PRNGKey(0)
    pkey, xkey = jax.random.split(key)
    params = init_params(pkey)
    # Spatial size 28 is forced by the architecture (fc1 expects 64*2*2 = 256).
    x = jax.random.normal(xkey, (2, 1, 28, 28), jnp.float32)
    out = jax.jit(aefnet_forward)(params, x)
    out = jax.block_until_ready(out)
    assert out.shape == (2, 1, 28, 28), out.shape
    assert jnp.all(jnp.isfinite(out))
    print("KERNEL_OK")
</pallas_src>

<mosaic_0001>
module attributes {stable_mosaic.version = 11 : i64} {
  func.func @_conv_bn_pool_kernel(%arg0: i32, %arg1: memref<1152x32xf32, #tpu.memory_space<vmem>>, %arg2: memref<32x32xf32, #tpu.memory_space<vmem>>, %arg3: memref<2x32xf32, #tpu.memory_space<vmem>>, %arg4: memref<128x32xf32, #tpu.memory_space<vmem>>, %arg5: memref<128x32xi32, #tpu.memory_space<vmem>>) attributes {dimension_semantics = [#tpu.dimension_semantics<arbitrary>], iteration_bounds = array<i64: 1>, scalar_prefetch = 0 : i64, scratch_operands = 0 : i64, tpu.core_type = #tpu.core_type<tc>, window_params = [{pipeline_mode = #tpu.pipeline_mode<synchronous>, transform_indices = @transform_0, window_bounds = array<i64: 1152, 32>}, {pipeline_mode = #tpu.pipeline_mode<synchronous>, transform_indices = @transform_1, window_bounds = array<i64: 32, 32>}, {pipeline_mode = #tpu.pipeline_mode<synchronous>, transform_indices = @transform_2, window_bounds = array<i64: 2, 32>}, {pipeline_mode = #tpu.pipeline_mode<synchronous>, transform_indices = @transform_3, window_bounds = array<i64: 128, 32>}, {pipeline_mode = #tpu.pipeline_mode<synchronous>, transform_indices = @transform_4, window_bounds = array<i64: 128, 32>}]} {
    %c0 = arith.constant 0 : index
    %c0_0 = arith.constant 0 : index
    %0 = vector.load %arg1[%c0, %c0_0] : memref<1152x32xf32, #tpu.memory_space<vmem>>, vector<1152x32xf32>
    %c0_1 = arith.constant 0 : index
    %c0_2 = arith.constant 0 : index
    %1 = vector.load %arg2[%c0_1, %c0_2] : memref<32x32xf32, #tpu.memory_space<vmem>>, vector<32x32xf32>
    %cst = arith.constant dense<0.000000e+00> : vector<1152x32xf32>
    %2 = tpu.matmul %0, %1, %cst {dimension_numbers = #tpu.dot_dimension_numbers<[1], [0], [0], [1], [0, 0, 1, 1], [], []>} : vector<1152x32xf32>, vector<32x32xf32>, vector<1152x32xf32> -> vector<1152x32xf32>
    %cst_3 = arith.constant dense<0.000000e+00> : vector<32xf32>
    %3 = vector.multi_reduction <add>, %2, %cst_3 [0] : vector<1152x32xf32> to vector<32xf32>
    %4 = vector.shape_cast %3 : vector<32xf32> to vector<1x32xf32>
    %cst_4 = arith.constant 8.68055562E-4 : f32
    %5 = vector.broadcast %cst_4 : f32 to vector<1x32xf32>
    %6 = arith.mulf %4, %5 : vector<1x32xf32>
    %7 = arith.mulf %2, %2 : vector<1152x32xf32>
    %cst_5 = arith.constant dense<0.000000e+00> : vector<32xf32>
    %8 = vector.multi_reduction <add>, %7, %cst_5 [0] : vector<1152x32xf32> to vector<32xf32>
    %9 = vector.shape_cast %8 : vector<32xf32> to vector<1x32xf32>
    %cst_6 = arith.constant 8.68055562E-4 : f32
    %10 = vector.broadcast %cst_6 : f32 to vector<1x32xf32>
    %11 = arith.mulf %9, %10 : vector<1x32xf32>
    %12 = arith.mulf %6, %6 : vector<1x32xf32>
    %13 = arith.subf %11, %12 : vector<1x32xf32>
    %cst_7 = arith.constant 0.000000e+00 : f32
    %14 = vector.broadcast %cst_7 : f32 to vector<1x32xf32>
    %15 = arith.maximumf %13, %14 : vector<1x32xf32>
    %c0_8 = arith.constant 0 : index
    %c0_9 = arith.constant 0 : index
    %16 = vector.load %arg3[%c0_8, %c0_9] : memref<2x32xf32, #tpu.memory_space<vmem>>, vector<1x32xf32>
    %cst_10 = arith.constant 9.99999974E-6 : f32
    %17 = vector.broadcast %cst_10 : f32 to vector<1x32xf32>
    %18 = arith.addf %15, %17 : vector<1x32xf32>
    %19 = math.rsqrt %18 : vector<1x32xf32>
    %20 = arith.mulf %16, %19 : vector<1x32xf32>
    %c1 = arith.constant 1 : index
    %c0_11 = arith.constant 0 : index
    %21 = vector.load %arg3[%c1, %c0_11] : memref<2x32xf32, #tpu.memory_space<vmem>>, vector<1x32xf32>
    %22 = arith.mulf %6, %20 : vector<1x32xf32>
    %23 = arith.subf %21, %22 : vector<1x32xf32>
    %24 = vector.extract_strided_slice %2 {offsets = [0, 0], sizes = [128, 32], strides = [1, 1]} : vector<1152x32xf32> to vector<128x32xf32>
    %25 = vector.broadcast %20 : vector<1x32xf32> to vector<128x32xf32>
    %26 = arith.mulf %24, %25 : vector<128x32xf32>
    %27 = vector.broadcast %23 : vector<1x32xf32> to vector<128x32xf32>
    %28 = arith.addf %26, %27 : vector<128x32xf32>
    %c0_i32 = arith.constant 0 : i32
    %29 = vector.broadcast %c0_i32 : i32 to vector<128x32xi32>
    %30 = vector.extract_strided_slice %2 {offsets = [128, 0], sizes = [128, 32], strides = [1, 1]} : vector<1152x32xf32> to vector<128x32xf32>
    %31 = vector.broadcast %20 : vector<1x32xf32> to vector<128x32xf32>
    %32 = arith.mulf %30, %31 : vector<128x32xf32>
    %33 = vector.broadcast %23 : vector<1x32xf32> to vector<128x32xf32>
    %34 = arith.addf %32, %33 : vector<128x32xf32>
    %35 = arith.cmpf ogt, %34, %28 : vector<128x32xf32>
    %36 = arith.select %35, %34, %28 : vector<128x32xi1>, vector<128x32xf32>
    %c1_i32 = arith.constant 1 : i32
    %37 = vector.broadcast %c1_i32 : i32 to vector<128x32xi32>
    %38 = arith.select %35, %37, %29 : vector<128x32xi1>, vector<128x32xi32>
    %39 = vector.extract_strided_slice %2 {offsets = [256, 0], sizes = [128, 32], strides = [1, 1]} : vector<1152x32xf32> to vector<128x32xf32>
    %40 = vector.broadcast %20 : vector<1x32xf32> to vector<128x32xf32>
    %41 = arith.mulf %39, %40 : vector<128x32xf32>
    %42 = vector.broadcast %23 : vector<1x32xf32> to vector<128x32xf32>
    %43 = arith.addf %41, %42 : vector<128x32xf32>
    %44 = arith.cmpf ogt, %43, %36 : vector<128x32xf32>
    %45 = arith.select %44, %43, %36 : vector<128x32xi1>, vector<128x32xf32>
    %c2_i32 = arith.constant 2 : i32
    %46 = vector.broadcast %c2_i32 : i32 to vector<128x32xi32>
    %47 = arith.select %44, %46, %38 : vector<128x32xi1>, vector<128x32xi32>
    %48 = vector.extract_strided_slice %2 {offsets = [384, 0], sizes = [128, 32], strides = [1, 1]} : vector<1152x32xf32> to vector<128x32xf32>
    %49 = vector.broadcast %20 : vector<1x32xf32> to vector<128x32xf32>
    %50 = arith.mulf %48, %49 : vector<128x32xf32>
    %51 = vector.broadcast %23 : vector<1x32xf32> to vector<128x32xf32>
    %52 = arith.addf %50, %51 : vector<128x32xf32>
    %53 = arith.cmpf ogt, %52, %45 : vector<128x32xf32>
    %54 = arith.select %53, %52, %45 : vector<128x32xi1>, vector<128x32xf32>
    %c3_i32 = arith.constant 3 : i32
    %55 = vector.broadcast %c3_i32 : i32 to vector<128x32xi32>
    %56 = arith.select %53, %55, %47 : vector<128x32xi1>, vector<128x32xi32>
    %57 = vector.extract_strided_slice %2 {offsets = [512, 0], sizes = [128, 32], strides = [1, 1]} : vector<1152x32xf32> to vector<128x32xf32>
    %58 = vector.broadcast %20 : vector<1x32xf32> to vector<128x32xf32>
    %59 = arith.mulf %57, %58 : vector<128x32xf32>
    %60 = vector.broadcast %23 : vector<1x32xf32> to vector<128x32xf32>
    %61 = arith.addf %59, %60 : vector<128x32xf32>
    %62 = arith.cmpf ogt, %61, %54 : vector<128x32xf32>
    %63 = arith.select %62, %61, %54 : vector<128x32xi1>, vector<128x32xf32>
    %c4_i32 = arith.constant 4 : i32
    %64 = vector.broadcast %c4_i32 : i32 to vector<128x32xi32>
    %65 = arith.select %62, %64, %56 : vector<128x32xi1>, vector<128x32xi32>
    %66 = vector.extract_strided_slice %2 {offsets = [640, 0], sizes = [128, 32], strides = [1, 1]} : vector<1152x32xf32> to vector<128x32xf32>
    %67 = vector.broadcast %20 : vector<1x32xf32> to vector<128x32xf32>
    %68 = arith.mulf %66, %67 : vector<128x32xf32>
    %69 = vector.broadcast %23 : vector<1x32xf32> to vector<128x32xf32>
    %70 = arith.addf %68, %69 : vector<128x32xf32>
    %71 = arith.cmpf ogt, %70, %63 : vector<128x32xf32>
    %72 = arith.select %71, %70, %63 : vector<128x32xi1>, vector<128x32xf32>
    %c5_i32 = arith.constant 5 : i32
    %73 = vector.broadcast %c5_i32 : i32 to vector<128x32xi32>
    %74 = arith.select %71, %73, %65 : vector<128x32xi1>, vector<128x32xi32>
    %75 = vector.extract_strided_slice %2 {offsets = [768, 0], sizes = [128, 32], strides = [1, 1]} : vector<1152x32xf32> to vector<128x32xf32>
    %76 = vector.broadcast %20 : vector<1x32xf32> to vector<128x32xf32>
    %77 = arith.mulf %75, %76 : vector<128x32xf32>
    %78 = vector.broadcast %23 : vector<1x32xf32> to vector<128x32xf32>
    %79 = arith.addf %77, %78 : vector<128x32xf32>
    %80 = arith.cmpf ogt, %79, %72 : vector<128x32xf32>
    %81 = arith.select %80, %79, %72 : vector<128x32xi1>, vector<128x32xf32>
    %c6_i32 = arith.constant 6 : i32
    %82 = vector.broadcast %c6_i32 : i32 to vector<128x32xi32>
    %83 = arith.select %80, %82, %74 : vector<128x32xi1>, vector<128x32xi32>
    %84 = vector.extract_strided_slice %2 {offsets = [896, 0], sizes = [128, 32], strides = [1, 1]} : vector<1152x32xf32> to vector<128x32xf32>
    %85 = vector.broadcast %20 : vector<1x32xf32> to vector<128x32xf32>
    %86 = arith.mulf %84, %85 : vector<128x32xf32>
    %87 = vector.broadcast %23 : vector<1x32xf32> to vector<128x32xf32>
    %88 = arith.addf %86, %87 : vector<128x32xf32>
    %89 = arith.cmpf ogt, %88, %81 : vector<128x32xf32>
    %90 = arith.select %89, %88, %81 : vector<128x32xi1>, vector<128x32xf32>
    %c7_i32 = arith.constant 7 : i32
    %91 = vector.broadcast %c7_i32 : i32 to vector<128x32xi32>
    %92 = arith.select %89, %91, %83 : vector<128x32xi1>, vector<128x32xi32>
    %93 = vector.extract_strided_slice %2 {offsets = [1024, 0], sizes = [128, 32], strides = [1, 1]} : vector<1152x32xf32> to vector<128x32xf32>
    %94 = vector.broadcast %20 : vector<1x32xf32> to vector<128x32xf32>
    %95 = arith.mulf %93, %94 : vector<128x32xf32>
    %96 = vector.broadcast %23 : vector<1x32xf32> to vector<128x32xf32>
    %97 = arith.addf %95, %96 : vector<128x32xf32>
    %98 = arith.cmpf ogt, %97, %90 : vector<128x32xf32>
    %99 = arith.select %98, %97, %90 : vector<128x32xi1>, vector<128x32xf32>
    %c8_i32 = arith.constant 8 : i32
    %100 = vector.broadcast %c8_i32 : i32 to vector<128x32xi32>
    %101 = arith.select %98, %100, %92 : vector<128x32xi1>, vector<128x32xi32>
    %cst_12 = arith.constant 0.000000e+00 : f32
    %102 = vector.broadcast %cst_12 : f32 to vector<128x32xf32>
    %103 = arith.maximumf %99, %102 : vector<128x32xf32>
    %c0_13 = arith.constant 0 : index
    %c0_14 = arith.constant 0 : index
    %104 = vector.load %arg4[%c0_13, %c0_14] : memref<128x32xf32, #tpu.memory_space<vmem>>, vector<128x32xf32>
    tpu.vector_store %arg4[%c0_13, %c0_14], %103 {strides = array<i32>} : memref<128x32xf32, #tpu.memory_space<vmem>>, vector<128x32xf32>,
    %c0_15 = arith.constant 0 : index
    %c0_16 = arith.constant 0 : index
    %105 = vector.load %arg5[%c0_15, %c0_16] : memref<128x32xi32, #tpu.memory_space<vmem>>, vector<128x32xi32>
    tpu.vector_store %arg5[%c0_15, %c0_16], %101 {strides = array<i32>} : memref<128x32xi32, #tpu.memory_space<vmem>>, vector<128x32xi32>,
    return
  }
  func.func @transform_0(%arg0: i32) -> (i32, i32) {
    %c0_i32 = arith.constant 0 : i32
    %c0_i32_0 = arith.constant 0 : i32
    %c0_i32_1 = arith.constant 0 : i32
    return %c0_i32, %c0_i32_0 : i32, i32
  }
  func.func @transform_1(%arg0: i32) -> (i32, i32) {
    %c0_i32 = arith.constant 0 : i32
    %c0_i32_0 = arith.constant 0 : i32
    %c0_i32_1 = arith.constant 0 : i32
    return %c0_i32, %c0_i32_0 : i32, i32
  }
  func.func @transform_2(%arg0: i32) -> (i32, i32) {
    %c0_i32 = arith.constant 0 : i32
    %c0_i32_0 = arith.constant 0 : i32
    %c0_i32_1 = arith.constant 0 : i32
    return %c0_i32, %c0_i32_0 : i32, i32
  }
  func.func @transform_3(%arg0: i32) -> (i32, i32) {
    %c0_i32 = arith.constant 0 : i32
    %c0_i32_0 = arith.constant 0 : i32
    %c0_i32_1 = arith.constant 0 : i32
    return %c0_i32, %c0_i32_0 : i32, i32
  }
  func.func @transform_4(%arg0: i32) -> (i32, i32) {
    %c0_i32 = arith.constant 0 : i32
    %c0_i32_0 = arith.constant 0 : i32
    %c0_i32_1 = arith.constant 0 : i32
    return %c0_i32, %c0_i32_0 : i32, i32
  }
}

module attributes {stable_mosaic.version = 11 : i64} {
  func.func @_encoder_tail_kernel(%arg0: i32, %arg1: memref<32x800xf32, #tpu.memory_space<vmem>>, %arg2: memref<800x64xf32, #tpu.memory_space<vmem>>, %arg3: memref<2x64xf32, #tpu.memory_space<vmem>>, %arg4: memref<64x512xf32, #tpu.memory_space<vmem>>, %arg5: memref<128x128xf32, #tpu.memory_space<vmem>>, %arg6: memref<128x128xf32, #tpu.memory_space<vmem>>, %arg7: memref<128x256xf32, #tpu.memory_space<vmem>>, %arg8: memref<5x128xf32, #tpu.memory_space<vmem>>, %arg9: memref<1x256xf32, #tpu.memory_space<vmem>>, %arg10: memref<8x64xi32, #tpu.memory_space<vmem>>, %arg11: memref<2x256xf32, #tpu.memory_space<vmem>>) attributes {dimension_semantics = [#tpu.dimension_semantics<arbitrary>], iteration_bounds = array<i64: 1>, scalar_prefetch = 0 : i64, scratch_operands = 0 : i64, tpu.core_type = #tpu.core_type<tc>, window_params = [{pipeline_mode = #tpu.pipeline_mode<synchronous>, transform_indices = @transform_0, window_bounds = array<i64: 32, 800>}, {pipeline_mode = #tpu.pipeline_mode<synchronous>, transform_indices = @transform_1, window_bounds = array<i64: 800, 64>}, {pipeline_mode = #tpu.pipeline_mode<synchronous>, transform_indices = @transform_2, window_bounds = array<i64: 2, 64>}, {pipeline_mode = #tpu.pipeline_mode<synchronous>, transform_indices = @transform_3, window_bounds = array<i64: 64, 512>}, {pipeline_mode = #tpu.pipeline_mode<synchronous>, transform_indices = @transform_4, window_bounds = array<i64: 128, 128>}, {pipeline_mode = #tpu.pipeline_mode<synchronous>, transform_indices = @transform_5, window_bounds = array<i64: 128, 128>}, {pipeline_mode = #tpu.pipeline_mode<synchronous>, transform_indices = @transform_6, window_bounds = array<i64: 128, 256>}, {pipeline_mode = #tpu.pipeline_mode<synchronous>, transform_indices = @transform_7, window_bounds = array<i64: 5, 128>}, {pipeline_mode = #tpu.pipeline_mode<synchronous>, transform_indices = @transform_8, window_bounds = array<i64: 1, 256>}, {pipeline_mode = #tpu.pipeline_mode<synchronous>, transform_indices = @transform_9, window_bounds = array<i64: 8, 64>}, {pipeline_mode = #tpu.pipeline_mode<synchronous>, transform_indices = @transform_10, window_bounds = array<i64: 2, 256>}]} {
    %c0 = arith.constant 0 : index
    %c0_0 = arith.constant 0 : index
    %0 = vector.load %arg1[%c0, %c0_0] : memref<32x800xf32, #tpu.memory_space<vmem>>, vector<32x800xf32>
    %c0_1 = arith.constant 0 : index
    %c0_2 = arith.constant 0 : index
    %1 = vector.load %arg2[%c0_1, %c0_2] : memref<800x64xf32, #tpu.memory_space<vmem>>, vector<800x64xf32>
    %cst = arith.constant dense<0.000000e+00> : vector<32x64xf32>
    %2 = tpu.matmul %0, %1, %cst {dimension_numbers = #tpu.dot_dimension_numbers<[1], [0], [0], [1], [0, 0, 1, 1], [], []>} : vector<32x800xf32>, vector<800x64xf32>, vector<32x64xf32> -> vector<32x64xf32>
    %cst_3 = arith.constant dense<0.000000e+00> : vector<64xf32>
    %3 = vector.multi_reduction <add>, %2, %cst_3 [0] : vector<32x64xf32> to vector<64xf32>
    %4 = vector.shape_cast %3 : vector<64xf32> to vector<1x64xf32>
    %cst_4 = arith.constant 3.125000e-02 : f32
    %5 = vector.broadcast %cst_4 : f32 to vector<1x64xf32>
    %6 = arith.mulf %4, %5 : vector<1x64xf32>
    %7 = arith.mulf %2, %2 : vector<32x64xf32>
    %cst_5 = arith.constant dense<0.000000e+00> : vector<64xf32>
    %8 = vector.multi_reduction <add>, %7, %cst_5 [0] : vector<32x64xf32> to vector<64xf32>
    %9 = vector.shape_cast %8 : vector<64xf32> to vector<1x64xf32>
    %cst_6 = arith.constant 3.125000e-02 : f32
    %10 = vector.broadcast %cst_6 : f32 to vector<1x64xf32>
    %11 = arith.mulf %9, %10 : vector<1x64xf32>
    %12 = arith.mulf %6, %6 : vector<1x64xf32>
    %13 = arith.subf %11, %12 : vector<1x64xf32>
    %cst_7 = arith.constant 0.000000e+00 : f32
    %14 = vector.broadcast %cst_7 : f32 to vector<1x64xf32>
    %15 = arith.maximumf %13, %14 : vector<1x64xf32>
    %c0_8 = arith.constant 0 : index
    %c0_9 = arith.constant 0 : index
    %16 = vector.load %arg3[%c0_8, %c0_9] : memref<2x64xf32, #tpu.memory_space<vmem>>, vector<1x64xf32>
    %cst_10 = arith.constant 9.99999974E-6 : f32
    %17 = vector.broadcast %cst_10 : f32 to vector<1x64xf32>
    %18 = arith.addf %15, %17 : vector<1x64xf32>
    %19 = math.rsqrt %18 : vector<1x64xf32>
    %20 = arith.mulf %16, %19 : vector<1x64xf32>
    %c1 = arith.constant 1 : index
    %c0_11 = arith.constant 0 : index
    %21 = vector.load %arg3[%c1, %c0_11] : memref<2x64xf32, #tpu.memory_space<vmem>>, vector<1x64xf32>
    %22 = arith.mulf %6, %20 : vector<1x64xf32>
    %23 = arith.subf %21, %22 : vector<1x64xf32>
    %24 = vector.extract_strided_slice %2 {offsets = [0, 0], sizes = [8, 64], strides = [1, 1]} : vector<32x64xf32> to vector<8x64xf32>
    %25 = vector.broadcast %20 : vector<1x64xf32> to vector<8x64xf32>
    %26 = arith.mulf %24, %25 : vector<8x64xf32>
    %27 = vector.broadcast %23 : vector<1x64xf32> to vector<8x64xf32>
    %28 = arith.addf %26, %27 : vector<8x64xf32>
    %c0_i32 = arith.constant 0 : i32
    %29 = vector.broadcast %c0_i32 : i32 to vector<8x64xi32>
    %30 = vector.extract_strided_slice %2 {offsets = [8, 0], sizes = [8, 64], strides = [1, 1]} : vector<32x64xf32> to vector<8x64xf32>
    %31 = vector.broadcast %20 : vector<1x64xf32> to vector<8x64xf32>
    %32 = arith.mulf %30, %31 : vector<8x64xf32>
    %33 = vector.broadcast %23 : vector<1x64xf32> to vector<8x64xf32>
    %34 = arith.addf %32, %33 : vector<8x64xf32>
    %35 = arith.cmpf ogt, %34, %28 : vector<8x64xf32>
    %36 = arith.select %35, %34, %28 : vector<8x64xi1>, vector<8x64xf32>
    %c1_i32 = arith.constant 1 : i32
    %37 = vector.broadcast %c1_i32 : i32 to vector<8x64xi32>
    %38 = arith.select %35, %37, %29 : vector<8x64xi1>, vector<8x64xi32>
    %39 = vector.extract_strided_slice %2 {offsets = [16, 0], sizes = [8, 64], strides = [1, 1]} : vector<32x64xf32> to vector<8x64xf32>
    %40 = vector.broadcast %20 : vector<1x64xf32> to vector<8x64xf32>
    %41 = arith.mulf %39, %40 : vector<8x64xf32>
    %42 = vector.broadcast %23 : vector<1x64xf32> to vector<8x64xf32>
    %43 = arith.addf %41, %42 : vector<8x64xf32>
    %44 = arith.cmpf ogt, %43, %36 : vector<8x64xf32>
    %45 = arith.select %44, %43, %36 : vector<8x64xi1>, vector<8x64xf32>
    %c2_i32 = arith.constant 2 : i32
    %46 = vector.broadcast %c2_i32 : i32 to vector<8x64xi32>
    %47 = arith.select %44, %46, %38 : vector<8x64xi1>, vector<8x64xi32>
    %48 = vector.extract_strided_slice %2 {offsets = [24, 0], sizes = [8, 64], strides = [1, 1]} : vector<32x64xf32> to vector<8x64xf32>
    %49 = vector.broadcast %20 : vector<1x64xf32> to vector<8x64xf32>
    %50 = arith.mulf %48, %49 : vector<8x64xf32>
    %51 = vector.broadcast %23 : vector<1x64xf32> to vector<8x64xf32>
    %52 = arith.addf %50, %51 : vector<8x64xf32>
    %53 = arith.cmpf ogt, %52, %45 : vector<8x64xf32>
    %54 = arith.select %53, %52, %45 : vector<8x64xi1>, vector<8x64xf32>
    %c3_i32 = arith.constant 3 : i32
    %55 = vector.broadcast %c3_i32 : i32 to vector<8x64xi32>
    %56 = arith.select %53, %55, %47 : vector<8x64xi1>, vector<8x64xi32>
    %c0_12 = arith.constant 0 : index
    %c0_13 = arith.constant 0 : index
    %57 = vector.load %arg10[%c0_12, %c0_13] : memref<8x64xi32, #tpu.memory_space<vmem>>, vector<8x64xi32>
    tpu.vector_store %arg10[%c0_12, %c0_13], %56 {strides = array<i32>} : memref<8x64xi32, #tpu.memory_space<vmem>>, vector<8x64xi32>,
    %cst_14 = arith.constant 0.000000e+00 : f32
    %58 = vector.broadcast %cst_14 : f32 to vector<8x64xf32>
    %59 = arith.maximumf %54, %58 : vector<8x64xf32>
    %c0_15 = arith.constant 0 : index
    %c0_16 = arith.constant 0 : index
    %60 = vector.load %arg4[%c0_15, %c0_16] : memref<64x512xf32, #tpu.memory_space<vmem>>, vector<64x512xf32>
    %cst_17 = arith.constant dense<0.000000e+00> : vector<8x512xf32>
    %61 = tpu.matmul %59, %60, %cst_17 {dimension_numbers = #tpu.dot_dimension_numbers<[1], [0], [0], [1], [0, 0, 1, 1], [], []>} : vector<8x64xf32>, vector<64x512xf32>, vector<8x512xf32> -> vector<8x512xf32>
    %62 = tpu.iota {dimensions = array<i32: 1>} : vector<2x8xi32>
    %63 = tpu.iota {dimensions = array<i32: 0>} : vector<2x8xi32>
    %cst_18 = arith.constant 0.000000e+00 : f32
    %64 = vector.broadcast %cst_18 : f32 to vector<2x128xf32>
    %c4_i32 = arith.constant 4 : i32
    %65 = vector.broadcast %c4_i32 : i32 to vector<2x8xi32>
    %66 = arith.muli %63, %65 : vector<2x8xi32>
    %c0_i32_19 = arith.constant 0 : i32
    %67 = vector.broadcast %c0_i32_19 : i32 to vector<2x8xi32>
    %68 = arith.addi %66, %67 : vector<2x8xi32>
    %69 = arith.cmpi eq, %62, %68 : vector<2x8xi32>
    %70 = arith.extui %69 : vector<2x8xi1> to vector<2x8xi32>
    %71 = arith.sitofp %70 : vector<2x8xi32> to vector<2x8xf32>
    %72 = vector.extract_strided_slice %61 {offsets = [0, 0], sizes = [8, 128], strides = [1, 1]} : vector<8x512xf32> to vector<8x128xf32>
    %cst_20 = arith.constant dense<0.000000e+00> : vector<2x128xf32>
    %73 = tpu.matmul %71, %72, %cst_20 {dimension_numbers = #tpu.dot_dimension_numbers<[1], [0], [0], [1], [0, 0, 1, 1], [], []>} : vector<2x8xf32>, vector<8x128xf32>, vector<2x128xf32> -> vector<2x128xf32>
    %74 = arith.addf %64, %73 : vector<2x128xf32>
    %c4_i32_21 = arith.constant 4 : i32
    %75 = vector.broadcast %c4_i32_21 : i32 to vector<2x8xi32>
    %76 = arith.muli %63, %75 : vector<2x8xi32>
    %c1_i32_22 = arith.constant 1 : i32
    %77 = vector.broadcast %c1_i32_22 : i32 to vector<2x8xi32>
    %78 = arith.addi %76, %77 : vector<2x8xi32>
    %79 = arith.cmpi eq, %62, %78 : vector<2x8xi32>
    %80 = arith.extui %79 : vector<2x8xi1> to vector<2x8xi32>
    %81 = arith.sitofp %80 : vector<2x8xi32> to vector<2x8xf32>
    %82 = vector.extract_strided_slice %61 {offsets = [0, 128], sizes = [8, 128], strides = [1, 1]} : vector<8x512xf32> to vector<8x128xf32>
    %cst_23 = arith.constant dense<0.000000e+00> : vector<2x128xf32>
    %83 = tpu.matmul %81, %82, %cst_23 {dimension_numbers = #tpu.dot_dimension_numbers<[1], [0], [0], [1], [0, 0, 1, 1], [], []>} : vector<2x8xf32>, vector<8x128xf32>, vector<2x128xf32> -> vector<2x128xf32>
    %84 = arith.addf %74, %83 : vector<2x128xf32>
    %c4_i32_24 = arith.constant 4 : i32
    %85 = vector.broadcast %c4_i32_24 : i32 to vector<2x8xi32>
    %86 = arith.muli %63, %85 : vector<2x8xi32>
    %c2_i32_25 = arith.constant 2 : i32
    %87 = vector.broadcast %c2_i32_25 : i32 to vector<2x8xi32>
    %88 = arith.addi %86, %87 : vector<2x8xi32>
    %89 = arith.cmpi eq, %62, %88 : vector<2x8xi32>
    %90 = arith.extui %89 : vector<2x8xi1> to vector<2x8xi32>
    %91 = arith.sitofp %90 : vector<2x8xi32> to vector<2x8xf32>
    %92 = vector.extract_strided_slice %61 {offsets = [0, 256], sizes = [8, 128], strides = [1, 1]} : vector<8x512xf32> to vector<8x128xf32>
    %cst_26 = arith.constant dense<0.000000e+00> : vector<2x128xf32>
    %93 = tpu.matmul %91, %92, %cst_26 {dimension_numbers = #tpu.dot_dimension_numbers<[1], [0], [0], [1], [0, 0, 1, 1], [], []>} : vector<2x8xf32>, vector<8x128xf32>, vector<2x128xf32> -> vector<2x128xf32>
    %94 = arith.addf %84, %93 : vector<2x128xf32>
    %c4_i32_27 = arith.constant 4 : i32
    %95 = vector.broadcast %c4_i32_27 : i32 to vector<2x8xi32>
    %96 = arith.muli %63, %95 : vector<2x8xi32>
    %c3_i32_28 = arith.constant 3 : i32
    %97 = vector.broadcast %c3_i32_28 : i32 to vector<2x8xi32>
    %98 = arith.addi %96, %97 : vector<2x8xi32>
    %99 = arith.cmpi eq, %62, %98 : vector<2x8xi32>
    %100 = arith.extui %99 : vector<2x8xi1> to vector<2x8xi32>
    %101 = arith.sitofp %100 : vector<2x8xi32> to vector<2x8xf32>
    %102 = vector.extract_strided_slice %61 {offsets = [0, 384], sizes = [8, 128], strides = [1, 1]} : vector<8x512xf32> to vector<8x128xf32>
    %cst_29 = arith.constant dense<0.000000e+00> : vector<2x128xf32>
    %103 = tpu.matmul %101, %102, %cst_29 {dimension_numbers = #tpu.dot_dimension_numbers<[1], [0], [0], [1], [0, 0, 1, 1], [], []>} : vector<2x8xf32>, vector<8x128xf32>, vector<2x128xf32> -> vector<2x128xf32>
    %104 = arith.addf %94, %103 : vector<2x128xf32>
    %c0_30 = arith.constant 0 : index
    %c0_31 = arith.constant 0 : index
    %105 = vector.load %arg8[%c0_30, %c0_31] : memref<5x128xf32, #tpu.memory_space<vmem>>, vector<1x128xf32>
    %c1_32 = arith.constant 1 : index
    %c0_33 = arith.constant 0 : index
    %106 = vector.load %arg8[%c1_32, %c0_33] : memref<5x128xf32, #tpu.memory_space<vmem>>, vector<1x128xf32>
    %cst_34 = arith.constant dense<0.000000e+00> : vector<128xf32>
    %107 = vector.multi_reduction <add>, %104, %cst_34 [0] : vector<2x128xf32> to vector<128xf32>
    %108 = vector.shape_cast %107 : vector<128xf32> to vector<1x128xf32>
    %cst_35 = arith.constant 5.000000e-01 : f32
    %109 = vector.broadcast %cst_35 : f32 to vector<1x128xf32>
    %110 = arith.mulf %108, %109 : vector<1x128xf32>
    %111 = arith.mulf %104, %104 : vector<2x128xf32>
    %cst_36 = arith.constant dense<0.000000e+00> : vector<128xf32>
    %112 = vector.multi_reduction <add>, %111, %cst_36 [0] : vector<2x128xf32> to vector<128xf32>
    %113 = vector.shape_cast %112 : vector<128xf32> to vector<1x128xf32>
    %cst_37 = arith.constant 5.000000e-01 : f32
    %114 = vector.broadcast %cst_37 : f32 to vector<1x128xf32>
    %115 = arith.mulf %113, %114 : vector<1x128xf32>
    %116 = arith.mulf %110, %110 : vector<1x128xf32>
    %117 = arith.subf %115, %116 : vector<1x128xf32>
    %cst_38 = arith.constant 0.000000e+00 : f32
    %118 = vector.broadcast %cst_38 : f32 to vector<1x128xf32>
    %119 = arith.maximumf %117, %118 : vector<1x128xf32>
    %cst_39 = arith.constant 9.99999974E-6 : f32
    %120 = vector.broadcast %cst_39 : f32 to vector<1x128xf32>
    %121 = arith.addf %119, %120 : vector<1x128xf32>
    %122 = math.rsqrt %121 : vector<1x128xf32>
    %123 = arith.mulf %105, %122 : vector<1x128xf32>
    %124 = vector.broadcast %123 : vector<1x128xf32> to vector<2x128xf32>
    %125 = arith.mulf %104, %124 : vector<2x128xf32>
    %126 = arith.mulf %110, %123 : vector<1x128xf32>
    %127 = arith.subf %106, %126 : vector<1x128xf32>
    %128 = vector.broadcast %127 : vector<1x128xf32> to vector<2x128xf32>
    %129 = arith.addf %125, %128 : vector<2x128xf32>
    %cst_40 = arith.constant 0.000000e+00 : f32
    %130 = vector.broadcast %cst_40 : f32 to vector<2x128xf32>
    %131 = arith.maximumf %129, %130 : vector<2x128xf32>
    %c0_41 = arith.constant 0 : index
    %c0_42 = arith.constant 0 : index
    %132 = vector.load %arg5[%c0_41, %c0_42] : memref<128x128xf32, #tpu.memory_space<vmem>>, vector<128x128xf32>
    %cst_43 = arith.constant dense<0.000000e+00> : vector<2x128xf32>
    %133 = tpu.matmul %131, %132, %cst_43 {dimension_numbers = #tpu.dot_dimension_numbers<[1], [0], [0], [1], [0, 0, 1, 1], [], []>} : vector<2x128xf32>, vector<128x128xf32>, vector<2x128xf32> -> vector<2x128xf32>
    %c2 = arith.constant 2 : index
    %c0_44 = arith.constant 0 : index
    %134 = vector.load %arg8[%c2, %c0_44] : memref<5x128xf32, #tpu.memory_space<vmem>>, vector<1x128xf32>
    %c3 = arith.constant 3 : index
    %c0_45 = arith.constant 0 : index
    %135 = vector.load %arg8[%c3, %c0_45] : memref<5x128xf32, #tpu.memory_space<vmem>>, vector<1x128xf32>
    %cst_46 = arith.constant dense<0.000000e+00> : vector<128xf32>
    %136 = vector.multi_reduction <add>, %133, %cst_46 [0] : vector<2x128xf32> to vector<128xf32>
    %137 = vector.shape_cast %136 : vector<128xf32> to vector<1x128xf32>
    %cst_47 = arith.constant 5.000000e-01 : f32
    %138 = vector.broadcast %cst_47 : f32 to vector<1x128xf32>
    %139 = arith.mulf %137, %138 : vector<1x128xf32>
    %140 = arith.mulf %133, %133 : vector<2x128xf32>
    %cst_48 = arith.constant dense<0.000000e+00> : vector<128xf32>
    %141 = vector.multi_reduction <add>, %140, %cst_48 [0] : vector<2x128xf32> to vector<128xf32>
    %142 = vector.shape_cast %141 : vector<128xf32> to vector<1x128xf32>
    %cst_49 = arith.constant 5.000000e-01 : f32
    %143 = vector.broadcast %cst_49 : f32 to vector<1x128xf32>
    %144 = arith.mulf %142, %143 : vector<1x128xf32>
    %145 = arith.mulf %139, %139 : vector<1x128xf32>
    %146 = arith.subf %144, %145 : vector<1x128xf32>
    %cst_50 = arith.constant 0.000000e+00 : f32
    %147 = vector.broadcast %cst_50 : f32 to vector<1x128xf32>
    %148 = arith.maximumf %146, %147 : vector<1x128xf32>
    %cst_51 = arith.constant 9.99999974E-6 : f32
    %149 = vector.broadcast %cst_51 : f32 to vector<1x128xf32>
    %150 = arith.addf %148, %149 : vector<1x128xf32>
    %151 = math.rsqrt %150 : vector<1x128xf32>
    %152 = arith.mulf %134, %151 : vector<1x128xf32>
    %153 = vector.broadcast %152 : vector<1x128xf32> to vector<2x128xf32>
    %154 = arith.mulf %133, %153 : vector<2x128xf32>
    %155 = arith.mulf %139, %152 : vector<1x128xf32>
    %156 = arith.subf %135, %155 : vector<1x128xf32>
    %157 = vector.broadcast %156 : vector<1x128xf32> to vector<2x128xf32>
    %158 = arith.addf %154, %157 : vector<2x128xf32>
    %cst_52 = arith.constant 0.000000e+00 : f32
    %159 = vector.broadcast %cst_52 : f32 to vector<2x128xf32>
    %160 = arith.maximumf %158, %159 : vector<2x128xf32>
    %c0_53 = arith.constant 0 : index
    %c0_54 = arith.constant 0 : index
    %161 = vector.load %arg6[%c0_53, %c0_54] : memref<128x128xf32, #tpu.memory_space<vmem>>, vector<128x128xf32>
    %cst_55 = arith.constant dense<0.000000e+00> : vector<2x128xf32>
    %162 = tpu.matmul %160, %161, %cst_55 {dimension_numbers = #tpu.dot_dimension_numbers<[1], [0], [0], [1], [0, 0, 1, 1], [], []>} : vector<2x128xf32>, vector<128x128xf32>, vector<2x128xf32> -> vector<2x128xf32>
    %c4 = arith.constant 4 : index
    %c0_56 = arith.constant 0 : index
    %163 = vector.load %arg8[%c4, %c0_56] : memref<5x128xf32, #tpu.memory_space<vmem>>, vector<1x128xf32>
    %164 = vector.broadcast %163 : vector<1x128xf32> to vector<2x128xf32>
    %165 = arith.addf %162, %164 : vector<2x128xf32>
    %cst_57 = arith.constant 0.000000e+00 : f32
    %166 = vector.broadcast %cst_57 : f32 to vector<2x128xf32>
    %167 = arith.maximumf %165, %166 : vector<2x128xf32>
    %c0_58 = arith.constant 0 : index
    %c0_59 = arith.constant 0 : index
    %168 = vector.load %arg7[%c0_58, %c0_59] : memref<128x256xf32, #tpu.memory_space<vmem>>, vector<128x256xf32>
    %cst_60 = arith.constant dense<0.000000e+00> : vector<2x256xf32>
    %169 = tpu.matmul %167, %168, %cst_60 {dimension_numbers = #tpu.dot_dimension_numbers<[1], [0], [0], [1], [0, 0, 1, 1], [], []>} : vector<2x128xf32>, vector<128x256xf32>, vector<2x256xf32> -> vector<2x256xf32>
    %c0_61 = arith.constant 0 : index
    %c0_62 = arith.constant 0 : index
    %170 = vector.load %arg9[%c0_61, %c0_62] : memref<1x256xf32, #tpu.memory_space<vmem>>, vector<1x256xf32>
    %171 = vector.broadcast %170 : vector<1x256xf32> to vector<2x256xf32>
    %172 = arith.addf %169, %171 : vector<2x256xf32>
    %cst_63 = arith.constant 0.000000e+00 : f32
    %173 = vector.broadcast %cst_63 : f32 to vector<2x256xf32>
    %174 = arith.maximumf %172, %173 : vector<2x256xf32>
    %c0_64 = arith.constant 0 : index
    %c0_65 = arith.constant 0 : index
    %175 = vector.load %arg11[%c0_64, %c0_65] : memref<2x256xf32, #tpu.memory_space<vmem>>, vector<2x256xf32>
    tpu.vector_store %arg11[%c0_64, %c0_65], %174 {strides = array<i32>} : memref<2x256xf32, #tpu.memory_space<vmem>>, vector<2x256xf32>,
    return
  }
  func.func @transform_0(%arg0: i32) -> (i32, i32) {
    %c0_i32 = arith.constant 0 : i32
    %c0_i32_0 = arith.constant 0 : i32
    %c0_i32_1 = arith.constant 0 : i32
    return %c0_i32, %c0_i32_0 : i32, i32
  }
  func.func @transform_1(%arg0: i32) -> (i32, i32) {
    %c0_i32 = arith.constant 0 : i32
    %c0_i32_0 = arith.constant 0 : i32
    %c0_i32_1 = arith.constant 0 : i32
    return %c0_i32, %c0_i32_0 : i32, i32
  }
  func.func @transform_2(%arg0: i32) -> (i32, i32) {
    %c0_i32 = arith.constant 0 : i32
    %c0_i32_0 = arith.constant 0 : i32
    %c0_i32_1 = arith.constant 0 : i32
    return %c0_i32, %c0_i32_0 : i32, i32
  }
  func.func @transform_3(%arg0: i32) -> (i32, i32) {
    %c0_i32 = arith.constant 0 : i32
    %c0_i32_0 = arith.constant 0 : i32
    %c0_i32_1 = arith.constant 0 : i32
    return %c0_i32, %c0_i32_0 : i32, i32
  }
  func.func @transform_4(%arg0: i32) -> (i32, i32) {
    %c0_i32 = arith.constant 0 : i32
    %c0_i32_0 = arith.constant 0 : i32
    %c0_i32_1 = arith.constant 0 : i32
    return %c0_i32, %c0_i32_0 : i32, i32
  }
  func.func @transform_5(%arg0: i32) -> (i32, i32) {
    %c0_i32 = arith.constant 0 : i32
    %c0_i32_0 = arith.constant 0 : i32
    %c0_i32_1 = arith.constant 0 : i32
    return %c0_i32, %c0_i32_0 : i32, i32
  }
  func.func @transform_6(%arg0: i32) -> (i32, i32) {
    %c0_i32 = arith.constant 0 : i32
    %c0_i32_0 = arith.constant 0 : i32
    %c0_i32_1 = arith.constant 0 : i32
    return %c0_i32, %c0_i32_0 : i32, i32
  }
  func.func @transform_7(%arg0: i32) -> (i32, i32) {
    %c0_i32 = arith.constant 0 : i32
    %c0_i32_0 = arith.constant 0 : i32
    %c0_i32_1 = arith.constant 0 : i32
    return %c0_i32, %c0_i32_0 : i32, i32
  }
  func.func @transform_8(%arg0: i32) -> (i32, i32) {
    %c0_i32 = arith.constant 0 : i32
    %c0_i32_0 = arith.constant 0 : i32
    %c0_i32_1 = arith.constant 0 : i32
    return %c0_i32, %c0_i32_0 : i32, i32
  }
  func.func @transform_9(%arg0: i32) -> (i32, i32) {
    %c0_i32 = arith.constant 0 : i32
    %c0_i32_0 = arith.constant 0 : i32
    %c0_i32_1 = arith.constant 0 : i32
    return %c0_i32, %c0_i32_0 : i32, i32
  }
  func.func @transform_10(%arg0: i32) -> (i32, i32) {
    %c0_i32 = arith.constant 0 : i32
    %c0_i32_0 = arith.constant 0 : i32
    %c0_i32_1 = arith.constant 0 : i32
    return %c0_i32, %c0_i32_0 : i32, i32
  }
}

module attributes {stable_mosaic.version = 11 : i64} {
  func.func @_matmul_bias_kernel(%arg0: i32, %arg1: memref<64x1600xf32, #tpu.memory_space<vmem>>, %arg2: memref<1600x32xf32, #tpu.memory_space<vmem>>, %arg3: memref<1x32xf32, #tpu.memory_space<vmem>>, %arg4: memref<64x32xf32, #tpu.memory_space<vmem>>) attributes {dimension_semantics = [#tpu.dimension_semantics<parallel>], iteration_bounds = array<i64: 2>, scalar_prefetch = 0 : i64, scratch_operands = 0 : i64, tpu.core_type = #tpu.core_type<tc>, window_params = [{transform_indices = @transform_0, window_bounds = array<i64: 64, 1600>}, {pipeline_mode = #tpu.pipeline_mode<synchronous>, transform_indices = @transform_1, window_bounds = array<i64: 1600, 32>}, {pipeline_mode = #tpu.pipeline_mode<synchronous>, transform_indices = @transform_2, window_bounds = array<i64: 1, 32>}, {transform_indices = @transform_3, window_bounds = array<i64: 64, 32>}]} {
    %c0 = arith.constant 0 : index
    %c0_0 = arith.constant 0 : index
    %0 = vector.load %arg1[%c0, %c0_0] : memref<64x1600xf32, #tpu.memory_space<vmem>>, vector<64x1600xf32>
    %c0_1 = arith.constant 0 : index
    %c0_2 = arith.constant 0 : index
    %1 = vector.load %arg2[%c0_1, %c0_2] : memref<1600x32xf32, #tpu.memory_space<vmem>>, vector<1600x32xf32>
    %cst = arith.constant dense<0.000000e+00> : vector<64x32xf32>
    %2 = tpu.matmul %0, %1, %cst {dimension_numbers = #tpu.dot_dimension_numbers<[1], [0], [0], [1], [0, 0, 1, 1], [], []>} : vector<64x1600xf32>, vector<1600x32xf32>, vector<64x32xf32> -> vector<64x32xf32>
    %c0_3 = arith.constant 0 : index
    %c0_4 = arith.constant 0 : index
    %3 = vector.load %arg3[%c0_3, %c0_4] : memref<1x32xf32, #tpu.memory_space<vmem>>, vector<1x32xf32>
    %4 = vector.broadcast %3 : vector<1x32xf32> to vector<64x32xf32>
    %5 = arith.addf %2, %4 : vector<64x32xf32>
    %cst_5 = arith.constant 0.000000e+00 : f32
    %6 = vector.broadcast %cst_5 : f32 to vector<64x32xf32>
    %7 = arith.maximumf %5, %6 : vector<64x32xf32>
    %c0_6 = arith.constant 0 : index
    %c0_7 = arith.constant 0 : index
    %8 = vector.load %arg4[%c0_6, %c0_7] : memref<64x32xf32, #tpu.memory_space<vmem>>, vector<64x32xf32>
    tpu.vector_store %arg4[%c0_6, %c0_7], %7 {strides = array<i32>} : memref<64x32xf32, #tpu.memory_space<vmem>>, vector<64x32xf32>,
    return
  }
  func.func @transform_0(%arg0: i32) -> (i32, i32) {
    %c0_i32 = arith.constant 0 : i32
    %c0_i32_0 = arith.constant 0 : i32
    return %arg0, %c0_i32 : i32, i32
  }
  func.func @transform_1(%arg0: i32) -> (i32, i32) {
    %c0_i32 = arith.constant 0 : i32
    %c0_i32_0 = arith.constant 0 : i32
    %c0_i32_1 = arith.constant 0 : i32
    return %c0_i32, %c0_i32_0 : i32, i32
  }
  func.func @transform_2(%arg0: i32) -> (i32, i32) {
    %c0_i32 = arith.constant 0 : i32
    %c0_i32_0 = arith.constant 0 : i32
    %c0_i32_1 = arith.constant 0 : i32
    return %c0_i32, %c0_i32_0 : i32, i32
  }
  func.func @transform_3(%arg0: i32) -> (i32, i32) {
    %c0_i32 = arith.constant 0 : i32
    %c0_i32_0 = arith.constant 0 : i32
    return %arg0, %c0_i32 : i32, i32
  }
}

module attributes {stable_mosaic.version = 11 : i64} {
  func.func @_matmul_bias_kernel(%arg0: i32, %arg1: memref<392x800xf32, #tpu.memory_space<vmem>>, %arg2: memref<800x8xf32, #tpu.memory_space<vmem>>, %arg3: memref<1x8xf32, #tpu.memory_space<vmem>>, %arg4: memref<392x8xf32, #tpu.memory_space<vmem>>) attributes {dimension_semantics = [#tpu.dimension_semantics<parallel>], iteration_bounds = array<i64: 4>, scalar_prefetch = 0 : i64, scratch_operands = 0 : i64, tpu.core_type = #tpu.core_type<tc>, window_params = [{transform_indices = @transform_0, window_bounds = array<i64: 392, 800>}, {pipeline_mode = #tpu.pipeline_mode<synchronous>, transform_indices = @transform_1, window_bounds = array<i64: 800, 8>}, {pipeline_mode = #tpu.pipeline_mode<synchronous>, transform_indices = @transform_2, window_bounds = array<i64: 1, 8>}, {transform_indices = @transform_3, window_bounds = array<i64: 392, 8>}]} {
    %c0 = arith.constant 0 : index
    %c0_0 = arith.constant 0 : index
    %0 = vector.load %arg1[%c0, %c0_0] : memref<392x800xf32, #tpu.memory_space<vmem>>, vector<392x800xf32>
    %c0_1 = arith.constant 0 : index
    %c0_2 = arith.constant 0 : index
    %1 = vector.load %arg2[%c0_1, %c0_2] : memref<800x8xf32, #tpu.memory_space<vmem>>, vector<800x8xf32>
    %cst = arith.constant dense<0.000000e+00> : vector<392x8xf32>
    %2 = tpu.matmul %0, %1, %cst {dimension_numbers = #tpu.dot_dimension_numbers<[1], [0], [0], [1], [0, 0, 1, 1], [], []>} : vector<392x800xf32>, vector<800x8xf32>, vector<392x8xf32> -> vector<392x8xf32>
    %c0_3 = arith.constant 0 : index
    %c0_4 = arith.constant 0 : index
    %3 = vector.load %arg3[%c0_3, %c0_4] : memref<1x8xf32, #tpu.memory_space<vmem>>, vector<1x8xf32>
    %4 = vector.broadcast %3 : vector<1x8xf32> to vector<392x8xf32>
    %5 = arith.addf %2, %4 : vector<392x8xf32>
    %c0_5 = arith.constant 0 : index
    %c0_6 = arith.constant 0 : index
    %6 = vector.load %arg4[%c0_5, %c0_6] : memref<392x8xf32, #tpu.memory_space<vmem>>, vector<392x8xf32>
    tpu.vector_store %arg4[%c0_5, %c0_6], %5 {strides = array<i32>} : memref<392x8xf32, #tpu.memory_space<vmem>>, vector<392x8xf32>,
    return
  }
  func.func @transform_0(%arg0: i32) -> (i32, i32) {
    %c0_i32 = arith.constant 0 : i32
    %c0_i32_0 = arith.constant 0 : i32
    return %arg0, %c0_i32 : i32, i32
  }
  func.func @transform_1(%arg0: i32) -> (i32, i32) {
    %c0_i32 = arith.constant 0 : i32
    %c0_i32_0 = arith.constant 0 : i32
    %c0_i32_1 = arith.constant 0 : i32
    return %c0_i32, %c0_i32_0 : i32, i32
  }
  func.func @transform_2(%arg0: i32) -> (i32, i32) {
    %c0_i32 = arith.constant 0 : i32
    %c0_i32_0 = arith.constant 0 : i32
    %c0_i32_1 = arith.constant 0 : i32
    return %c0_i32, %c0_i32_0 : i32, i32
  }
  func.func @transform_3(%arg0: i32) -> (i32, i32) {
    %c0_i32 = arith.constant 0 : i32
    %c0_i32_0 = arith.constant 0 : i32
    return %arg0, %c0_i32 : i32, i32
  }
}

</mosaic_0001>

<bundles_post_ra>
// kernel: aefnet_forward.4
= control target key start
LH: loop header
LB: loop body
LE: loop exit
PB: predicated region body
PF: predicated region fallthrough
CT: control target
= control target key end

     0   :  { %vm7133_vm0 = vcmask 261120   ;;  %s6985_s1 = inlined_call_operand.vmem [shape: f32[32,32], index: 1, kind: input, shape index: {}]   ;;  %s6986_s0 = inlined_call_operand.vmem [shape: f32[1152,32], index: 0, kind: input, shape index: {}]   ;;  %s6987_s2 = inlined_call_operand.vmem [shape: f32[2,32], index: 2, kind: input, shape index: {}]   ;;  %s6988_s4 = inlined_call_operand.vmem [shape: s32[128,32], index: 4, kind: output, shape index: {1}]   ;;  %s6989_s3 = inlined_call_operand.vmem [shape: f32[128,32], index: 3, kind: output, shape index: {0}]  }
   0x1   :  { %v160_v0 = vld [vmem:[%s6985_s1] sm:$0xff]  ;;  %v161_v1 = vld [vmem:[%s6985_s1 + $0x8] sm:$0xff]  ;;  %v162_v2 = vld [vmem:[%s6985_s1 + $0x10] sm:$0xff] }
   0x2   :  { %v3376_v3 = vpack.c.bf16 %v161_v1, %v160_v0  ;;  %v163_v4 = vld [vmem:[%s6985_s1 + $0x18] sm:$0xff]  ;;  %v16_v5 = vld [vmem:[%s6986_s0] sm:$0xff]  ;;  %v17_v7 = vld [vmem:[%s6986_s0 + $0x8] sm:$0xff] }
   0x3   :  { %v3380_v6 = vpack.c.bf16 %v163_v4, %v162_v2  ;;  %3160 = vmatprep.mubr.msk.f32.mxu0 %vm7133_vm0, %v16_v5  ;;  %v18_v8 = vld [vmem:[%s6986_s0 + $0x10] sm:$0xff]  ;;  %v19_v9 = vld [vmem:[%s6986_s0 + $0x18] sm:$0xff]  ;;  %v20_v10 = vld [vmem:[%s6986_s0 + $0x20] sm:$0xff] }
   0x4   :  { %3377 = vmatprep.subr.bf16.mxu0 %v3376_v3  ;;  %3384 = vmatprep.subr.bf16.mxu1 %v3376_v3  ;;  %v21_v11 = vld [vmem:[%s6986_s0 + $0x28] sm:$0xff]  ;;  %v22_v12 = vld [vmem:[%s6986_s0 + $0x30] sm:$0xff]  ;;  %v23_v13 = vld [vmem:[%s6986_s0 + $0x38] sm:$0xff] }
   0x5   :  { %3379 = vmatpush3.bf16.msra.mxu0 %v3376_v3  ;;  %3386 = vmatpush3.bf16.msra.mxu1 %v3376_v3  ;;  %v24_v14 = vld [vmem:[%s6986_s0 + $0x40] sm:$0xff]  ;;  %v25_v15 = vld [vmem:[%s6986_s0 + $0x48] sm:$0xff]  ;;  %v26_v16 = vld [vmem:[%s6986_s0 + $0x50] sm:$0xff] }
   0x6   :  { %3381 = vmatprep.subr.bf16.mxu0 %v3380_v6  ;;  %3385 = vmatprep.subr.bf16.mxu1 %v3380_v6  ;;  %v88_v17 = vld [vmem:[%s6986_s0 + $0x240] sm:$0xff]  ;;  %v89_v18 = vld [vmem:[%s6986_s0 + $0x248] sm:$0xff]  ;;  %v90_v19 = vld [vmem:[%s6986_s0 + $0x250] sm:$0xff] }
   0x7   :  { %3268 = vmatprep.mubr.msk.f32.mxu1 %vm7133_vm0, %v88_v17  ;;  %v27_v20 = vld [vmem:[%s6986_s0 + $0x58] sm:$0xff]  ;;  %v28_v22 = vld [vmem:[%s6986_s0 + $0x60] sm:$0xff]  ;;  %v29_v24 = vld [vmem:[%s6986_s0 + $0x68] sm:$0xff] }
   0x8   :  { %v91_v21 = vld [vmem:[%s6986_s0 + $0x258] sm:$0xff]  ;;  %v92_v23 = vld [vmem:[%s6986_s0 + $0x260] sm:$0xff]  ;;  %v93_v25 = vld [vmem:[%s6986_s0 + $0x268] sm:$0xff] }
   0x9   :  { %3383 = vmatpush3.bf16.msra.mxu0 %v3380_v6  ;;  %3387 = vmatpush3.bf16.msra.mxu1 %v3380_v6  ;;  %v30_v26 = vld [vmem:[%s6986_s0 + $0x70] sm:$0xff]  ;;  %v31_v28 = vld [vmem:[%s6986_s0 + $0x78] sm:$0xff]  ;;  %v32_v30 = vld [vmem:[%s6986_s0 + $0x80] sm:$0xff] }
   0xa   :  { %v94_v27 = vld [vmem:[%s6986_s0 + $0x270] sm:$0xff]  ;;  %v95_v29 = vld [vmem:[%s6986_s0 + $0x278] sm:$0xff]  ;;  %v96_v31 = vld [vmem:[%s6986_s0 + $0x280] sm:$0xff] }
   0xb   :  { %v33_v32 = vld [vmem:[%s6986_s0 + $0x88] sm:$0xff]  ;;  %v34_v34 = vld [vmem:[%s6986_s0 + $0x90] sm:$0xff]  ;;  %v35_v36 = vld [vmem:[%s6986_s0 + $0x98] sm:$0xff] }
   0xc   :  { %3161 = vmatmul.mubr.msk.f32.vlgmr.msra.gmra.mrb[0].mxu0 %vm7133_vm0, %v17_v7  ;;  %3269 = vmatmul.mubr.msk.f32.vlgmr.msra.gmra.mrb[0].mxu1 %vm7133_vm0, %v89_v18  ;;  %v97_v33 = vld [vmem:[%s6986_s0 + $0x288] sm:$0xff]  ;;  %v98_v35 = vld [vmem:[%s6986_s0 + $0x290] sm:$0xff]  ;;  %v99_v37 = vld [vmem:[%s6986_s0 + $0x298] sm:$0xff] }
   0xd   :  { %3163 = vmatprep.mubr.msk.f32.mxu0 %vm7133_vm0, %v18_v8  ;;  %3271 = vmatprep.mubr.msk.f32.mxu1 %vm7133_vm0, %v90_v19  ;;  %v36_v38 = vld [vmem:[%s6986_s0 + $0xa0] sm:$0xff]  ;;  %v37_v40 = vld [vmem:[%s6986_s0 + $0xa8] sm:$0xff]  ;;  %v38_v42 = vld [vmem:[%s6986_s0 + $0xb0] sm:$0xff] }
   0xe   :  { %v100_v39 = vld [vmem:[%s6986_s0 + $0x2a0] sm:$0xff]  ;;  %v101_v41 = vld [vmem:[%s6986_s0 + $0x2a8] sm:$0xff]  ;;  %v102_v43 = vld [vmem:[%s6986_s0 + $0x2b0] sm:$0xff] }
   0xf   :  { %v39_v44 = vld [vmem:[%s6986_s0 + $0xb8] sm:$0xff]  ;;  %v40_v46 = vld [vmem:[%s6986_s0 + $0xc0] sm:$0xff]  ;;  %v41_v48 = vld [vmem:[%s6986_s0 + $0xc8] sm:$0xff] }
  0x10   :  { %3164 = vmatmul.mubr.msk.f32.gmra.mrb[2].mxu0 %vm7133_vm0, %v19_v9  ;;  %3272 = vmatmul.mubr.msk.f32.gmra.mrb[2].mxu1 %vm7133_vm0, %v91_v21  ;;  %v103_v45 = vld [vmem:[%s6986_s0 + $0x2b8] sm:$0xff]  ;;  %v104_v47 = vld [vmem:[%s6986_s0 + $0x2c0] sm:$0xff]  ;;  %v105_v49 = vld [vmem:[%s6986_s0 + $0x2c8] sm:$0xff] }
  0x11   :  { %3166 = vmatprep.mubr.msk.f32.mxu0 %vm7133_vm0, %v20_v10  ;;  %3274 = vmatprep.mubr.msk.f32.mxu1 %vm7133_vm0, %v92_v23  ;;  %v42_v50 = vld [vmem:[%s6986_s0 + $0xd0] sm:$0xff]  ;;  %v43_v52 = vld [vmem:[%s6986_s0 + $0xd8] sm:$0xff]  ;;  %v44_v54 = vld [vmem:[%s6986_s0 + $0xe0] sm:$0xff] }
  0x12   :  { %v106_v51 = vld [vmem:[%s6986_s0 + $0x2d0] sm:$0xff]  ;;  %v107_v53 = vld [vmem:[%s6986_s0 + $0x2d8] sm:$0xff]  ;;  %v108_v55 = vld [vmem:[%s6986_s0 + $0x2e0] sm:$0xff] }
  0x13   :  { %v45_v56 = vld [vmem:[%s6986_s0 + $0xe8] sm:$0xff]  ;;  %v46_v58 = vld [vmem:[%s6986_s0 + $0xf0] sm:$0xff]  ;;  %v47_v60 = vld [vmem:[%s6986_s0 + $0xf8] sm:$0xff] }
  0x14   :  { %3167 = vmatmul.mubr.msk.f32.gmra.mrb[4].mxu0 %vm7133_vm0, %v21_v11  ;;  %3275 = vmatmul.mubr.msk.f32.gmra.mrb[4].mxu1 %vm7133_vm0, %v93_v25  ;;  %v109_v57 = vld [vmem:[%s6986_s0 + $0x2e8] sm:$0xff]  ;;  %v110_v59 = vld [vmem:[%s6986_s0 + $0x2f0] sm:$0xff]  ;;  %v111_v61 = vld [vmem:[%s6986_s0 + $0x2f8] sm:$0xff] }
  0x15   :  { %3169 = vmatprep.mubr.msk.f32.mxu0 %vm7133_vm0, %v22_v12  ;;  %3277 = vmatprep.mubr.msk.f32.mxu1 %vm7133_vm0, %v94_v27  ;;  %v48_v62 = vld [vmem:[%s6986_s0 + $0x100] sm:$0xff]  ;;  %v49_v0 = vld [vmem:[%s6986_s0 + $0x108] sm:$0xff]  ;;  %v50_v2 = vld [vmem:[%s6986_s0 + $0x110] sm:$0xff] }
  0x16   :  { %v112_v63 = vld [vmem:[%s6986_s0 + $0x300] sm:$0xff]  ;;  %v113_v1 = vld [vmem:[%s6986_s0 + $0x308] sm:$0xff]  ;;  %v114_v3 = vld [vmem:[%s6986_s0 + $0x310] sm:$0xff] }
  0x17   :  { %v51_v4 = vld [vmem:[%s6986_s0 + $0x118] sm:$0xff]  ;;  %v52_v6 = vld [vmem:[%s6986_s0 + $0x120] sm:$0xff]  ;;  %v53_v8 = vld [vmem:[%s6986_s0 + $0x128] sm:$0xff] }
  0x18   :  { %3170 = vmatmul.mubr.msk.f32.gmra.mrb[6].mxu0 %vm7133_vm0, %v23_v13  ;;  %3278 = vmatmul.mubr.msk.f32.gmra.mrb[6].mxu1 %vm7133_vm0, %v95_v29  ;;  %v115_v5 = vld [vmem:[%s6986_s0 + $0x318] sm:$0xff]  ;;  %v116_v7 = vld [vmem:[%s6986_s0 + $0x320] sm:$0xff]  ;;  %v117_v9 = vld [vmem:[%s6986_s0 + $0x328] sm:$0xff] }
  0x19   :  { %3172 = vmatprep.mubr.msk.f32.mxu0 %vm7133_vm0, %v24_v14  ;;  %3280 = vmatprep.mubr.msk.f32.mxu1 %vm7133_vm0, %v96_v31  ;;  %v54_v10 = vld [vmem:[%s6986_s0 + $0x130] sm:$0xff]  ;;  %v55_v12 = vld [vmem:[%s6986_s0 + $0x138] sm:$0xff]  ;;  %v56_v14 = vld [vmem:[%s6986_s0 + $0x140] sm:$0xff] }
  0x1a   :  { %v118_v11 = vld [vmem:[%s6986_s0 + $0x330] sm:$0xff]  ;;  %v119_v13 = vld [vmem:[%s6986_s0 + $0x338] sm:$0xff]  ;;  %v121_v17 = vld [vmem:[%s6986_s0 + $0x348] sm:$0xff] }
  0x1b   :  { %v58_v18 = vld [vmem:[%s6986_s0 + $0x150] sm:$0xff]  ;;  %v60_v21 = vld [vmem:[%s6986_s0 + $0x160] sm:$0xff]  ;;  %v61_v23 = vld [vmem:[%s6986_s0 + $0x168] sm:$0xff] }
  0x1c   :  { %3173 = vmatmul.mubr.msk.f32.gmra.mrb[8].mxu0 %vm7133_vm0, %v25_v15  ;;  %3281 = vmatmul.mubr.msk.f32.gmra.mrb[8].mxu1 %vm7133_vm0, %v97_v33  ;;  %v120_v15 = vld [vmem:[%s6986_s0 + $0x340] sm:$0xff]  ;;  %v122_v19 = vld [vmem:[%s6986_s0 + $0x350] sm:$0xff]  ;;  %v63_v27 = vld [vmem:[%s6986_s0 + $0x178] sm:$0xff] }
  0x1d   :  { %3175 = vmatprep.mubr.msk.f32.mxu0 %vm7133_vm0, %v26_v16  ;;  %3283 = vmatprep.mubr.msk.f32.mxu1 %vm7133_vm0, %v98_v35  ;;  %v57_v16 = vld [vmem:[%s6986_s0 + $0x148] sm:$0xff]  ;;  %v62_v25 = vld [vmem:[%s6986_s0 + $0x170] sm:$0xff]  ;;  %v64_v29 = vld [vmem:[%s6986_s0 + $0x180] sm:$0xff] }
  0x1e   :  { %v65_v31 = vld [vmem:[%s6986_s0 + $0x188] sm:$0xff]  ;;  %v66_v33 = vld [vmem:[%s6986_s0 + $0x190] sm:$0xff]  ;;  %v67_v35 = vld [vmem:[%s6986_s0 + $0x198] sm:$0xff] }
  0x20   :  { %3176 = vmatmul.mubr.msk.f32.gmra.mrb[10].mxu0 %vm7133_vm0, %v27_v20  ;;  %3284 = vmatmul.mubr.msk.f32.gmra.mrb[10].mxu1 %vm7133_vm0, %v99_v37  ;;  %v59_v20 = vld [vmem:[%s6986_s0 + $0x158] sm:$0xff]  ;;  %v68_v37 = vld [vmem:[%s6986_s0 + $0x1a0] sm:$0xff] }
  0x21   :  { %3178 = vmatprep.mubr.msk.f32.mxu0 %vm7133_vm0, %v28_v22  ;;  %3286 = vmatprep.mubr.msk.f32.mxu1 %vm7133_vm0, %v100_v39  ;;  %v123_v22 = vld [vmem:[%s6986_s0 + $0x358] sm:$0xff]  ;;  %v69_v39 = vld [vmem:[%s6986_s0 + $0x1a8] sm:$0xff] }
  0x24   :  { %3179 = vmatmul.mubr.msk.f32.gmra.mrb[12].mxu0 %vm7133_vm0, %v29_v24  ;;  %3287 = vmatmul.mubr.msk.f32.gmra.mrb[12].mxu1 %vm7133_vm0, %v101_v41  ;;  %v124_v24 = vld [vmem:[%s6986_s0 + $0x360] sm:$0xff]  ;;  %v70_v41 = vld [vmem:[%s6986_s0 + $0x1b0] sm:$0xff] }
  0x25   :  { %3181 = vmatprep.mubr.msk.f32.mxu0 %vm7133_vm0, %v30_v26  ;;  %3289 = vmatprep.mubr.msk.f32.mxu1 %vm7133_vm0, %v102_v43  ;;  %v125_v26 = vld [vmem:[%s6986_s0 + $0x368] sm:$0xff]  ;;  %v71_v43 = vld [vmem:[%s6986_s0 + $0x1b8] sm:$0xff] }
  0x28   :  { %3182 = vmatmul.mubr.msk.f32.gmra.mrb[14].mxu0 %vm7133_vm0, %v31_v28  ;;  %3290 = vmatmul.mubr.msk.f32.gmra.mrb[14].mxu1 %vm7133_vm0, %v103_v45  ;;  %v126_v28 = vld [vmem:[%s6986_s0 + $0x370] sm:$0xff]  ;;  %v72_v45 = vld [vmem:[%s6986_s0 + $0x1c0] sm:$0xff] }
  0x29   :  { %3184 = vmatprep.mubr.msk.f32.mxu0 %vm7133_vm0, %v32_v30  ;;  %3292 = vmatprep.mubr.msk.f32.mxu1 %vm7133_vm0, %v104_v47  ;;  %v127_v30 = vld [vmem:[%s6986_s0 + $0x378] sm:$0xff]  ;;  %v73_v47 = vld [vmem:[%s6986_s0 + $0x1c8] sm:$0xff] }
  0x2c   :  { %3185 = vmatmul.mubr.msk.f32.gmra.mrb[16].mxu0 %vm7133_vm0, %v33_v32  ;;  %3293 = vmatmul.mubr.msk.f32.gmra.mrb[16].mxu1 %vm7133_vm0, %v105_v49  ;;  %v128_v32 = vld [vmem:[%s6986_s0 + $0x380] sm:$0xff]  ;;  %v74_v49 = vld [vmem:[%s6986_s0 + $0x1d0] sm:$0xff] }
  0x2d   :  { %3187 = vmatprep.mubr.msk.f32.mxu0 %vm7133_vm0, %v34_v34  ;;  %3295 = vmatprep.mubr.msk.f32.mxu1 %vm7133_vm0, %v106_v51  ;;  %v129_v34 = vld [vmem:[%s6986_s0 + $0x388] sm:$0xff]  ;;  %v75_v51 = vld [vmem:[%s6986_s0 + $0x1d8] sm:$0xff] }
  0x30   :  { %3188 = vmatmul.mubr.msk.f32.gmra.mrb[18].mxu0 %vm7133_vm0, %v35_v36  ;;  %3296 = vmatmul.mubr.msk.f32.gmra.mrb[18].mxu1 %vm7133_vm0, %v107_v53  ;;  %v130_v36 = vld [vmem:[%s6986_s0 + $0x390] sm:$0xff]  ;;  %v76_v53 = vld [vmem:[%s6986_s0 + $0x1e0] sm:$0xff] }
  0x31   :  { %3190 = vmatprep.mubr.msk.f32.mxu0 %vm7133_vm0, %v36_v38  ;;  %3298 = vmatprep.mubr.msk.f32.mxu1 %vm7133_vm0, %v108_v55  ;;  %v131_v38 = vld [vmem:[%s6986_s0 + $0x398] sm:$0xff]  ;;  %v77_v55 = vld [vmem:[%s6986_s0 + $0x1e8] sm:$0xff] }
  0x34   :  { %3191 = vmatmul.mubr.msk.f32.gmra.mrb[20].mxu0 %vm7133_vm0, %v37_v40  ;;  %3299 = vmatmul.mubr.msk.f32.gmra.mrb[20].mxu1 %vm7133_vm0, %v109_v57  ;;  %v132_v40 = vld [vmem:[%s6986_s0 + $0x3a0] sm:$0xff]  ;;  %v78_v57 = vld [vmem:[%s6986_s0 + $0x1f0] sm:$0xff] }
  0x35   :  { %3193 = vmatprep.mubr.msk.f32.mxu0 %vm7133_vm0, %v38_v42  ;;  %3301 = vmatprep.mubr.msk.f32.mxu1 %vm7133_vm0, %v110_v59  ;;  %v133_v42 = vld [vmem:[%s6986_s0 + $0x3a8] sm:$0xff]  ;;  %v79_v59 = vld [vmem:[%s6986_s0 + $0x1f8] sm:$0xff] }
  0x38   :  { %3194 = vmatmul.mubr.msk.f32.gmra.mrb[22].mxu0 %vm7133_vm0, %v39_v44  ;;  %3302 = vmatmul.mubr.msk.f32.gmra.mrb[22].mxu1 %vm7133_vm0, %v111_v61  ;;  %v134_v44 = vld [vmem:[%s6986_s0 + $0x3b0] sm:$0xff]  ;;  %v80_v61 = vld [vmem:[%s6986_s0 + $0x200] sm:$0xff] }
  0x39   :  { %3196 = vmatprep.mubr.msk.f32.mxu0 %vm7133_vm0, %v40_v46  ;;  %3304 = vmatprep.mubr.msk.f32.mxu1 %vm7133_vm0, %v112_v63  ;;  %v135_v46 = vld [vmem:[%s6986_s0 + $0x3b8] sm:$0xff]  ;;  %v81_v63 = vld [vmem:[%s6986_s0 + $0x208] sm:$0xff] }
  0x3c   :  { %3197 = vmatmul.mubr.msk.f32.gmra.mrb[24].mxu0 %vm7133_vm0, %v41_v48  ;;  %3305 = vmatmul.mubr.msk.f32.gmra.mrb[24].mxu1 %vm7133_vm0, %v113_v1  ;;  %v136_v48 = vld [vmem:[%s6986_s0 + $0x3c0] sm:$0xff]  ;;  %v82_v1 = vld [vmem:[%s6986_s0 + $0x210] sm:$0xff] }
  0x3d   :  { %3199 = vmatprep.mubr.msk.f32.mxu0 %vm7133_vm0, %v42_v50  ;;  %3307 = vmatprep.mubr.msk.f32.mxu1 %vm7133_vm0, %v114_v3  ;;  %v137_v50 = vld [vmem:[%s6986_s0 + $0x3c8] sm:$0xff]  ;;  %v83_v3 = vld [vmem:[%s6986_s0 + $0x218] sm:$0xff] }
  0x40   :  { %3200 = vmatmul.mubr.msk.f32.gmra.mrb[26].mxu0 %vm7133_vm0, %v43_v52  ;;  %3308 = vmatmul.mubr.msk.f32.gmra.mrb[26].mxu1 %vm7133_vm0, %v115_v5  ;;  %v138_v52 = vld [vmem:[%s6986_s0 + $0x3d0] sm:$0xff]  ;;  %v84_v5 = vld [vmem:[%s6986_s0 + $0x220] sm:$0xff] }
  0x41   :  { %3202 = vmatprep.mubr.msk.f32.mxu0 %vm7133_vm0, %v44_v54  ;;  %3310 = vmatprep.mubr.msk.f32.mxu1 %vm7133_vm0, %v116_v7  ;;  %v139_v54 = vld [vmem:[%s6986_s0 + $0x3d8] sm:$0xff]  ;;  %v85_v7 = vld [vmem:[%s6986_s0 + $0x228] sm:$0xff] }
  0x44   :  { %3203 = vmatmul.mubr.msk.f32.gmra.mrb[28].mxu0 %vm7133_vm0, %v45_v56  ;;  %3311 = vmatmul.mubr.msk.f32.gmra.mrb[28].mxu1 %vm7133_vm0, %v117_v9  ;;  %v140_v56 = vld [vmem:[%s6986_s0 + $0x3e0] sm:$0xff]  ;;  %v86_v9 = vld [vmem:[%s6986_s0 + $0x230] sm:$0xff] }
  0x45   :  { %3205 = vmatprep.mubr.msk.f32.mxu0 %vm7133_vm0, %v46_v58  ;;  %3313 = vmatprep.mubr.msk.f32.mxu1 %vm7133_vm0, %v118_v11  ;;  %v141_v58 = vld [vmem:[%s6986_s0 + $0x3e8] sm:$0xff]  ;;  %v87_v11 = vld [vmem:[%s6986_s0 + $0x238] sm:$0xff] }
  0x48   :  { %3206 = vmatmul.mubr.msk.f32.gmra.mrb[30].mxu0 %vm7133_vm0, %v47_v60  ;;  %3314 = vmatmul.mubr.msk.f32.gmra.mrb[30].mxu1 %vm7133_vm0, %v119_v13  ;;  %v142_v60 = vld [vmem:[%s6986_s0 + $0x3f0] sm:$0xff]  ;;  %v151_v13 = vld [vmem:[%s6986_s0 + $0x438] sm:$0xff] }
  0x49   :  { %3208 = vmatprep.mubr.msk.f32.mxu0 %vm7133_vm0, %v48_v62  ;;  %3316 = vmatprep.mubr.msk.f32.mxu1 %vm7133_vm0, %v120_v15  ;;  %v143_v62 = vld [vmem:[%s6986_s0 + $0x3f8] sm:$0xff]  ;;  %v153_v15 = vld [vmem:[%s6986_s0 + $0x448] sm:$0xff] }
  0x4c   :  { %3209 = vmatmul.mubr.msk.f32.gmra.mrb[32].mxu0 %vm7133_vm0, %v49_v0  ;;  %3317 = vmatmul.mubr.msk.f32.gmra.mrb[32].mxu1 %vm7133_vm0, %v121_v17  ;;  %v144_v0 = vld [vmem:[%s6986_s0 + $0x400] sm:$0xff]  ;;  %v155_v17 = vld [vmem:[%s6986_s0 + $0x458] sm:$0xff] }
  0x4d   :  { %3211 = vmatprep.mubr.msk.f32.mxu0 %vm7133_vm0, %v50_v2  ;;  %3319 = vmatprep.mubr.msk.f32.mxu1 %vm7133_vm0, %v122_v19  ;;  %v145_v2 = vld [vmem:[%s6986_s0 + $0x408] sm:$0xff] }
  0x4e   :  { %v157_v19 = vld [vmem:[%s6986_s0 + $0x468] sm:$0xff] }
  0x50   :  { %3212 = vmatmul.mubr.msk.f32.gmra.mrb[34].mxu0 %vm7133_vm0, %v51_v4  ;;  %3320 = vmatmul.mubr.msk.f32.gmra.mrb[34].mxu1 %vm7133_vm0, %v123_v22  ;;  %v146_v4 = vld [vmem:[%s6986_s0 + $0x410] sm:$0xff] }
  0x51   :  { %3214 = vmatprep.mubr.msk.f32.mxu0 %vm7133_vm0, %v52_v6  ;;  %3322 = vmatprep.mubr.msk.f32.mxu1 %vm7133_vm0, %v124_v24  ;;  %v147_v6 = vld [vmem:[%s6986_s0 + $0x418] sm:$0xff] }
  0x54   :  { %3215 = vmatmul.mubr.msk.f32.gmra.mrb[36].mxu0 %vm7133_vm0, %v53_v8  ;;  %3323 = vmatmul.mubr.msk.f32.gmra.mrb[36].mxu1 %vm7133_vm0, %v125_v26  ;;  %v148_v8 = vld [vmem:[%s6986_s0 + $0x420] sm:$0xff] }
  0x55   :  { %3217 = vmatprep.mubr.msk.f32.mxu0 %vm7133_vm0, %v54_v10  ;;  %3325 = vmatprep.mubr.msk.f32.mxu1 %vm7133_vm0, %v126_v28  ;;  %v149_v10 = vld [vmem:[%s6986_s0 + $0x428] sm:$0xff] }
  0x58   :  { %3218 = vmatmul.mubr.msk.f32.gmra.mrb[38].mxu0 %vm7133_vm0, %v55_v12  ;;  %3326 = vmatmul.mubr.msk.f32.gmra.mrb[38].mxu1 %vm7133_vm0, %v127_v30  ;;  %v150_v12 = vld [vmem:[%s6986_s0 + $0x430] sm:$0xff] }
  0x59   :  { %3220 = vmatprep.mubr.msk.f32.mxu0 %vm7133_vm0, %v56_v14  ;;  %3328 = vmatprep.mubr.msk.f32.mxu1 %vm7133_vm0, %v128_v32  ;;  %v152_v14 = vld [vmem:[%s6986_s0 + $0x440] sm:$0xff] }
  0x5c   :  { %3221 = vmatmul.mubr.msk.f32.gmra.mrb[40].mxu0 %vm7133_vm0, %v57_v16  ;;  %3329 = vmatmul.mubr.msk.f32.gmra.mrb[40].mxu1 %vm7133_vm0, %v129_v34  ;;  %v154_v16 = vld [vmem:[%s6986_s0 + $0x450] sm:$0xff] }
  0x5d   :  { %3223 = vmatprep.mubr.msk.f32.mxu0 %vm7133_vm0, %v58_v18  ;;  %3331 = vmatprep.mubr.msk.f32.mxu1 %vm7133_vm0, %v130_v36  ;;  %v156_v18 = vld [vmem:[%s6986_s0 + $0x460] sm:$0xff] }
  0x60   :  { %3224 = vmatmul.mubr.msk.f32.gmra.mrb[42].mxu0 %vm7133_vm0, %v59_v20  ;;  %3332 = vmatmul.mubr.msk.f32.gmra.mrb[42].mxu1 %vm7133_vm0, %v131_v38  ;;  %v158_v20 = vld [vmem:[%s6986_s0 + $0x470] sm:$0xff] }
  0x61   :  { %3226 = vmatprep.mubr.msk.f32.mxu0 %vm7133_vm0, %v60_v21  ;;  %3334 = vmatprep.mubr.msk.f32.mxu1 %vm7133_vm0, %v132_v40  ;;  %v159_v21 = vld [vmem:[%s6986_s0 + $0x478] sm:$0xff] }
  0x64   :  { %3227 = vmatmul.mubr.msk.f32.gmra.mrb[44].mxu0 %vm7133_vm0, %v61_v23  ;;  %3335 = vmatmul.mubr.msk.f32.gmra.mrb[44].mxu1 %vm7133_vm0, %v133_v42 }
  0x65   :  { %3229 = vmatprep.mubr.msk.f32.mxu0 %vm7133_vm0, %v62_v25  ;;  %3337 = vmatprep.mubr.msk.f32.mxu1 %vm7133_vm0, %v134_v44 }
  0x68   :  { %3230 = vmatmul.mubr.msk.f32.gmra.mrb[46].mxu0 %vm7133_vm0, %v63_v27  ;;  %3338 = vmatmul.mubr.msk.f32.gmra.mrb[46].mxu1 %vm7133_vm0, %v135_v46 }
  0x69   :  { %3232 = vmatprep.mubr.msk.f32.mxu0 %vm7133_vm0, %v64_v29  ;;  %3340 = vmatprep.mubr.msk.f32.mxu1 %vm7133_vm0, %v136_v48 }
  0x6c   :  { %3233 = vmatmul.mubr.msk.f32.gmra.mrb[48].mxu0 %vm7133_vm0, %v65_v31  ;;  %3341 = vmatmul.mubr.msk.f32.gmra.mrb[48].mxu1 %vm7133_vm0, %v137_v50 }
  0x6d   :  { %3235 = vmatprep.mubr.msk.f32.mxu0 %vm7133_vm0, %v66_v33  ;;  %3343 = vmatprep.mubr.msk.f32.mxu1 %vm7133_vm0, %v138_v52 }
  0x70   :  { %3236 = vmatmul.mubr.msk.f32.gmra.mrb[50].mxu0 %vm7133_vm0, %v67_v35  ;;  %3344 = vmatmul.mubr.msk.f32.gmra.mrb[50].mxu1 %vm7133_vm0, %v139_v54 }
  0x71   :  { %3238 = vmatprep.mubr.msk.f32.mxu0 %vm7133_vm0, %v68_v37  ;;  %3346 = vmatprep.mubr.msk.f32.mxu1 %vm7133_vm0, %v140_v56 }
  0x74   :  { %3239 = vmatmul.mubr.msk.f32.gmra.mrb[52].mxu0 %vm7133_vm0, %v69_v39  ;;  %3347 = vmatmul.mubr.msk.f32.gmra.mrb[52].mxu1 %vm7133_vm0, %v141_v58 }
  0x75   :  { %3241 = vmatprep.mubr.msk.f32.mxu0 %vm7133_vm0, %v70_v41  ;;  %3349 = vmatprep.mubr.msk.f32.mxu1 %vm7133_vm0, %v142_v60 }
  0x78   :  { %3242 = vmatmul.mubr.msk.f32.gmra.mrb[54].mxu0 %vm7133_vm0, %v71_v43  ;;  %3350 = vmatmul.mubr.msk.f32.gmra.mrb[54].mxu1 %vm7133_vm0, %v143_v62 }
  0x79   :  { %3244 = vmatprep.mubr.msk.f32.mxu0 %vm7133_vm0, %v72_v45  ;;  %3352 = vmatprep.mubr.msk.f32.mxu1 %vm7133_vm0, %v144_v0 }
  0x7c   :  { %3245 = vmatmul.mubr.msk.f32.gmra.mrb[56].mxu0 %vm7133_vm0, %v73_v47  ;;  %3353 = vmatmul.mubr.msk.f32.gmra.mrb[56].mxu1 %vm7133_vm0, %v145_v2 }
  0x7d   :  { %3247 = vmatprep.mubr.msk.f32.mxu0 %vm7133_vm0, %v74_v49  ;;  %3355 = vmatprep.mubr.msk.f32.mxu1 %vm7133_vm0, %v146_v4 }
  0x80   :  { %3248 = vmatmul.mubr.msk.f32.gmra.mrb[58].mxu0 %vm7133_vm0, %v75_v51  ;;  %3356 = vmatmul.mubr.msk.f32.gmra.mrb[58].mxu1 %vm7133_vm0, %v147_v6 }
  0x81   :  { %3250 = vmatprep.mubr.msk.f32.mxu0 %vm7133_vm0, %v76_v53  ;;  %3358 = vmatprep.mubr.msk.f32.mxu1 %vm7133_vm0, %v148_v8 }
  0x84   :  { %3251 = vmatmul.mubr.msk.f32.gmra.mrb[60].mxu0 %vm7133_vm0, %v77_v55  ;;  %3359 = vmatmul.mubr.msk.f32.gmra.mrb[60].mxu1 %vm7133_vm0, %v149_v10 }
  0x85   :  { %3253 = vmatprep.mubr.msk.f32.mxu0 %vm7133_vm0, %v78_v57  ;;  %3361 = vmatprep.mubr.msk.f32.mxu1 %vm7133_vm0, %v150_v12 }
  0x88   :  { %3254 = vmatmul.mubr.msk.f32.gmra.mrb[62].mxu0 %vm7133_vm0, %v79_v59  ;;  %3362 = vmatmul.mubr.msk.f32.gmra.mrb[62].mxu1 %vm7133_vm0, %v151_v13 }
  0x89   :  { %3256 = vmatprep.mubr.msk.f32.mxu0 %vm7133_vm0, %v80_v61  ;;  %3364 = vmatprep.mubr.msk.f32.mxu1 %vm7133_vm0, %v152_v14 }
  0x8c   :  { %3257 = vmatmul.mubr.msk.f32.gmra.mrb[64].mxu0 %vm7133_vm0, %v81_v63  ;;  %3365 = vmatmul.mubr.msk.f32.gmra.mrb[64].mxu1 %vm7133_vm0, %v153_v15 }
  0x8d   :  { %3259 = vmatprep.mubr.msk.f32.mxu0 %vm7133_vm0, %v82_v1  ;;  %3367 = vmatprep.mubr.msk.f32.mxu1 %vm7133_vm0, %v154_v16 }
  0x90   :  { %3260 = vmatmul.mubr.msk.f32.gmra.mrb[66].mxu0 %vm7133_vm0, %v83_v3  ;;  %3368 = vmatmul.mubr.msk.f32.gmra.mrb[66].mxu1 %vm7133_vm0, %v155_v17 }
  0x91   :  { %3262 = vmatprep.mubr.msk.f32.mxu0 %vm7133_vm0, %v84_v5  ;;  %3370 = vmatprep.mubr.msk.f32.mxu1 %vm7133_vm0, %v156_v18 }
  0x94   :  { %3263 = vmatmul.mubr.msk.f32.gmra.mrb[68].mxu0 %vm7133_vm0, %v85_v7  ;;  %3371 = vmatmul.mubr.msk.f32.gmra.mrb[68].mxu1 %vm7133_vm0, %v157_v19 }
  0x95   :  { %3265 = vmatprep.mubr.msk.f32.mxu0 %vm7133_vm0, %v86_v9  ;;  %3373 = vmatprep.mubr.msk.f32.mxu1 %vm7133_vm0, %v158_v20 }
  0x98   :  { %3266 = vmatmul.mubr.msk.f32.gmra.mrb[70].mxu0 %vm7133_vm0, %v87_v11  ;;  %3374 = vmatmul.mubr.msk.f32.gmra.mrb[70].mxu1 %vm7133_vm0, %v159_v21 }
  0xdf   :  { %v4005_v22 = vpop.f32.mrb[0].mxu0  ;;  %v4062_v1 = vpop.f32.mrb[0].mxu1 }
  0xe0   :  { %7190 = vst [vmem:[#allocation2_spill] sm:$0xff] %v4005_v22  ;;  %v1383_v23 = vsel %vm7133_vm0, %v4005_v22, 0.0  ;;  %v1677_v24 = vmul.f32 %v4005_v22, %v4005_v22  ;;  %v4011_v25 = vpop.f32.mrb[1].mxu0  ;;  %7199 = vst [vmem:[#allocation11_spill] sm:$0xff] %v4062_v1  ;;  %v4066_v5 = vpop.f32.mrb[1].mxu1 }
  0xe1   :  { %7191 = vst [vmem:[#allocation3_spill] sm:$0xff] %v4011_v25  ;;  %v1382_v26 = vsel %vm7133_vm0, %v4011_v25, 0.0  ;;  %v1676_v27 = vmul.f32 %v4011_v25, %v4011_v25  ;;  %7201 = vst [vmem:[#allocation13_spill] sm:$0xff] %v4066_v5 }
  0xe2   :  { %v1821_v28 = vsel %vm7133_vm0, %v1677_v24, 0.0  ;;  %v1384_v29 = vadd.f32 %v1383_v23, %v1382_v26 }
  0xe3   :  { %v1820_v30 = vsel %vm7133_vm0, %v1676_v27, 0.0  ;;  %v4019_v31 = vpop.f32.mrb[2].mxu0  ;;  %v4080_v15 = vpop.f32.mrb[2].mxu1 }
  0xe4   :  { %7192 = vst [vmem:[#allocation4_spill] sm:$0xff] %v4019_v31  ;;  %v1822_v32 = vadd.f32 %v1821_v28, %v1820_v30  ;;  %v4021_v33 = vpop.f32.mrb[3].mxu0  ;;  %v1679_v34 = vmul.f32 %v4019_v31, %v4019_v31  ;;  %v1387_v38 = vsel %vm7133_vm0, %v4019_v31, 0.0  ;;  %7203 = vst [vmem:[#allocation15_spill] sm:$0xff] %v4080_v15  ;;  %v4084_v19 = vpop.f32.mrb[3].mxu1 }
  0xe5   :  { %7193 = vst [vmem:[#allocation5_spill] sm:$0xff] %v4021_v33  ;;  %v1385_v35 = vsel %vm7133_vm0, %v4021_v33, 0.0  ;;  %v1678_v36 = vmul.f32 %v4021_v33, %v4021_v33  ;;  %7205 = vst [vmem:[#allocation17_spill] sm:$0xff] %v4084_v19 }
  0xe6   :  { %v1386_v37 = vadd.f32 %v1385_v35, %v1384_v29  ;;  %v1825_v44 = vsel %vm7133_vm0, %v1679_v34, 0.0 }
  0xe7   :  { %v1823_v39 = vsel %vm7133_vm0, %v1678_v36, 0.0  ;;  %v4032_v40 = vpop.f32.mrb[4].mxu0 }
  0xe8   :  { %7194 = vst [vmem:[#allocation6_spill] sm:$0xff] %v4032_v40  ;;  %v1388_v41 = vadd.f32 %v1387_v38, %v1386_v37  ;;  %v1824_v42 = vadd.f32 %v1823_v39, %v1822_v32  ;;  %v4034_v43 = vpop.f32.mrb[5].mxu0  ;;  %v1681_v45 = vmul.f32 %v4032_v40, %v4032_v40  ;;  %v1391_v50 = vsel %vm7133_vm0, %v4032_v40, 0.0  ;;  %v4098_v32 = vpop.f32.mrb[4].mxu1 }
  0xe9   :  { %7195 = vst [vmem:[#allocation7_spill] sm:$0xff] %v4034_v43  ;;  %v1389_v46 = vsel %vm7133_vm0, %v4034_v43, 0.0  ;;  %v1680_v47 = vmul.f32 %v4034_v43, %v4034_v43  ;;  %7207 = vst [vmem:[#allocation19_spill] sm:$0xff] %v4098_v32  ;;  %v4102_v37 = vpop.f32.mrb[5].mxu1 }
  0xea   :  { %v1826_v48 = vadd.f32 %v1825_v44, %v1824_v42  ;;  %v1390_v49 = vadd.f32 %v1389_v46, %v1388_v41  ;;  %v1829_v56 = vsel %vm7133_vm0, %v1681_v45, 0.0  ;;  %7209 = vst [vmem:[#allocation21_spill] sm:$0xff] %v4102_v37 }
  0xeb   :  { %v1827_v51 = vsel %vm7133_vm0, %v1680_v47, 0.0  ;;  %v4046_v52 = vpop.f32.mrb[6].mxu0 }
  0xec   :  { %7196 = vst [vmem:[#allocation8_spill] sm:$0xff] %v4046_v52  ;;  %v1392_v53 = vadd.f32 %v1391_v50, %v1390_v49  ;;  %v1828_v54 = vadd.f32 %v1827_v51, %v1826_v48  ;;  %v4048_v55 = vpop.f32.mrb[7].mxu0  ;;  %v1683_v57 = vmul.f32 %v4046_v52, %v4046_v52  ;;  %v1395_v62 = vsel %vm7133_vm0, %v4046_v52, 0.0  ;;  %v4116_v49 = vpop.f32.mrb[6].mxu1 }
  0xed   :  { %7197 = vst [vmem:[#allocation9_spill] sm:$0xff] %v4048_v55  ;;  %v1393_v58 = vsel %vm7133_vm0, %v4048_v55, 0.0  ;;  %v1682_v59 = vmul.f32 %v4048_v55, %v4048_v55  ;;  %7211 = vst [vmem:[#allocation23_spill] sm:$0xff] %v4116_v49 }
  0xee   :  { %v1830_v60 = vadd.f32 %v1829_v56, %v1828_v54  ;;  %v1394_v61 = vadd.f32 %v1393_v58, %v1392_v53  ;;  %v1833_v6 = vsel %vm7133_vm0, %v1683_v57, 0.0  ;;  %v4120_v54 = vpop.f32.mrb[7].mxu1 }
  0xef   :  { %v1831_v63 = vsel %vm7133_vm0, %v1682_v59, 0.0  ;;  %v4060_v0 = vpop.f32.mrb[8].mxu0  ;;  %7213 = vst [vmem:[#allocation25_spill] sm:$0xff] %v4120_v54 }
  0xf0   :  { %7198 = vst [vmem:[#allocation10_spill] sm:$0xff] %v4060_v0  ;;  %v1396_v2 = vadd.f32 %v1395_v62, %v1394_v61  ;;  %v1832_v3 = vadd.f32 %v1831_v63, %v1830_v60  ;;  %v4064_v4 = vpop.f32.mrb[9].mxu0  ;;  %v1685_v7 = vmul.f32 %v4060_v0, %v4060_v0  ;;  %v1399_v12 = vsel %vm7133_vm0, %v4060_v0, 0.0 }
  0xf1   :  { %7200 = vst [vmem:[#allocation12_spill] sm:$0xff] %v4064_v4  ;;  %v1397_v8 = vsel %vm7133_vm0, %v4064_v4, 0.0  ;;  %v1684_v9 = vmul.f32 %v4064_v4, %v4064_v4 }
  0xf2   :  { %v1834_v10 = vadd.f32 %v1833_v6, %v1832_v3  ;;  %v1398_v11 = vadd.f32 %v1397_v8, %v1396_v2  ;;  %v1837_v20 = vsel %vm7133_vm0, %v1685_v7, 0.0  ;;  %v4134_v3 = vpop.f32.mrb[8].mxu1 }
  0xf3   :  { %v1835_v13 = vsel %vm7133_vm0, %v1684_v9, 0.0  ;;  %v4078_v14 = vpop.f32.mrb[10].mxu0  ;;  %7215 = vst [vmem:[#allocation27_spill] sm:$0xff] %v4134_v3  ;;  %v4138_v9 = vpop.f32.mrb[9].mxu1 }
  0xf4   :  { %7202 = vst [vmem:[#allocation14_spill] sm:$0xff] %v4078_v14  ;;  %v1400_v16 = vadd.f32 %v1399_v12, %v1398_v11  ;;  %v1836_v17 = vadd.f32 %v1835_v13, %v1834_v10  ;;  %v4082_v18 = vpop.f32.mrb[11].mxu0  ;;  %v1687_v21 = vmul.f32 %v4078_v14, %v4078_v14  ;;  %v1403_v28 = vsel %vm7133_vm0, %v4078_v14, 0.0  ;;  %7217 = vst [vmem:[#allocation29_spill] sm:$0xff] %v4138_v9 }
  0xf5   :  { %7204 = vst [vmem:[#allocation16_spill] sm:$0xff] %v4082_v18  ;;  %v1401_v23 = vsel %vm7133_vm0, %v4082_v18, 0.0  ;;  %v1686_v24 = vmul.f32 %v4082_v18, %v4082_v18 }
  0xf6   :  { %v1838_v26 = vadd.f32 %v1837_v20, %v1836_v17  ;;  %v1402_v27 = vadd.f32 %v1401_v23, %v1400_v16  ;;  %v1841_v38 = vsel %vm7133_vm0, %v1687_v21, 0.0 }
  0xf7   :  { %v1839_v29 = vsel %vm7133_vm0, %v1686_v24, 0.0  ;;  %v4096_v30 = vpop.f32.mrb[12].mxu0  ;;  %v4152_v24 = vpop.f32.mrb[10].mxu1 }
  0xf8   :  { %7206 = vst [vmem:[#allocation18_spill] sm:$0xff] %v4096_v30  ;;  %v1404_v34 = vadd.f32 %v1403_v28, %v1402_v27  ;;  %v1840_v35 = vadd.f32 %v1839_v29, %v1838_v26  ;;  %v4100_v36 = vpop.f32.mrb[13].mxu0  ;;  %v1689_v39 = vmul.f32 %v4096_v30, %v4096_v30  ;;  %v1407_v46 = vsel %vm7133_vm0, %v4096_v30, 0.0  ;;  %7219 = vst [vmem:[#allocation31_spill] sm:$0xff] %v4152_v24  ;;  %v4156_v29 = vpop.f32.mrb[11].mxu1 }
  0xf9   :  { %7208 = vst [vmem:[#allocation20_spill] sm:$0xff] %v4100_v36  ;;  %v1405_v41 = vsel %vm7133_vm0, %v4100_v36, 0.0  ;;  %v1688_v42 = vmul.f32 %v4100_v36, %v4100_v36  ;;  %7221 = vst [vmem:[#allocation33_spill] sm:$0xff] %v4156_v29 }
  0xfa   :  { %v1842_v44 = vadd.f32 %v1841_v38, %v1840_v35  ;;  %v1406_v45 = vadd.f32 %v1405_v41, %v1404_v34  ;;  %v1845_v56 = vsel %vm7133_vm0, %v1689_v39, 0.0 }
  0xfb   :  { %v1843_v47 = vsel %vm7133_vm0, %v1688_v42, 0.0  ;;  %v4114_v48 = vpop.f32.mrb[14].mxu0 }
  0xfc   :  { %7210 = vst [vmem:[#allocation22_spill] sm:$0xff] %v4114_v48  ;;  %v1408_v50 = vadd.f32 %v1407_v46, %v1406_v45  ;;  %v1844_v51 = vadd.f32 %v1843_v47, %v1842_v44  ;;  %v4118_v53 = vpop.f32.mrb[15].mxu0  ;;  %v1691_v57 = vmul.f32 %v4114_v48, %v4114_v48  ;;  %v1411_v62 = vsel %vm7133_vm0, %v4114_v48, 0.0  ;;  %v4170_v47 = vpop.f32.mrb[12].mxu1 }
  0xfd   :  { %7212 = vst [vmem:[#allocation24_spill] sm:$0xff] %v4118_v53  ;;  %v1409_v58 = vsel %vm7133_vm0, %v4118_v53, 0.0  ;;  %v1690_v59 = vmul.f32 %v4118_v53, %v4118_v53  ;;  %7223 = vst [vmem:[#allocation35_spill] sm:$0xff] %v4170_v47 }
  0xfe   :  { %v1846_v60 = vadd.f32 %v1845_v56, %v1844_v51  ;;  %v1410_v61 = vadd.f32 %v1409_v58, %v1408_v50  ;;  %v1849_v10 = vsel %vm7133_vm0, %v1691_v57, 0.0  ;;  %v4174_v57 = vpop.f32.mrb[13].mxu1 }
  0xff   :  { %v1847_v63 = vsel %vm7133_vm0, %v1690_v59, 0.0  ;;  %v4132_v2 = vpop.f32.mrb[16].mxu0  ;;  %7225 = vst [vmem:[#allocation37_spill] sm:$0xff] %v4174_v57 }
 0x100   :  { %7214 = vst [vmem:[#allocation26_spill] sm:$0xff] %v4132_v2  ;;  %v1848_v6 = vadd.f32 %v1847_v63, %v1846_v60  ;;  %v4136_v7 = vpop.f32.mrb[17].mxu0  ;;  %v1412_v8 = vadd.f32 %v1411_v62, %v1410_v61  ;;  %v1693_v11 = vmul.f32 %v4132_v2, %v4132_v2  ;;  %v1415_v20 = vsel %vm7133_vm0, %v4132_v2, 0.0 }
 0x101   :  { %7216 = vst [vmem:[#allocation28_spill] sm:$0xff] %v4136_v7  ;;  %v1413_v12 = vsel %vm7133_vm0, %v4136_v7, 0.0  ;;  %v1692_v13 = vmul.f32 %v4136_v7, %v4136_v7 }
 0x102   :  { %v1414_v16 = vadd.f32 %v1413_v12, %v1412_v8  ;;  %v1850_v17 = vadd.f32 %v1849_v10, %v1848_v6  ;;  %v1853_v34 = vsel %vm7133_vm0, %v1693_v11, 0.0  ;;  %v4188_v11 = vpop.f32.mrb[14].mxu1 }
 0x103   :  { %v1851_v21 = vsel %vm7133_vm0, %v1692_v13, 0.0  ;;  %v4150_v23 = vpop.f32.mrb[18].mxu0  ;;  %7227 = vst [vmem:[#allocation39_spill] sm:$0xff] %v4188_v11 }
 0x104   :  { %7218 = vst [vmem:[#allocation30_spill] sm:$0xff] %v4150_v23  ;;  %v1852_v26 = vadd.f32 %v1851_v21, %v1850_v17  ;;  %v4154_v27 = vpop.f32.mrb[19].mxu0  ;;  %v1416_v28 = vadd.f32 %v1415_v20, %v1414_v16  ;;  %v1695_v35 = vmul.f32 %v4150_v23, %v4150_v23  ;;  %v1419_v44 = vsel %vm7133_vm0, %v4150_v23, 0.0  ;;  %v4192_v17 = vpop.f32.mrb[15].mxu1 }
 0x105   :  { %7220 = vst [vmem:[#allocation32_spill] sm:$0xff] %v4154_v27  ;;  %v1417_v38 = vsel %vm7133_vm0, %v4154_v27, 0.0  ;;  %v1694_v39 = vmul.f32 %v4154_v27, %v4154_v27  ;;  %7229 = vst [vmem:[#allocation41_spill] sm:$0xff] %v4192_v17 }
 0x106   :  { %v1418_v41 = vadd.f32 %v1417_v38, %v1416_v28  ;;  %v1854_v42 = vadd.f32 %v1853_v34, %v1852_v26  ;;  %v1857_v58 = vsel %vm7133_vm0, %v1695_v35, 0.0 }
 0x107   :  { %v1855_v45 = vsel %vm7133_vm0, %v1694_v39, 0.0  ;;  %v4168_v46 = vpop.f32.mrb[20].mxu0 }
 0x108   :  { %7222 = vst [vmem:[#allocation34_spill] sm:$0xff] %v4168_v46  ;;  %v1856_v50 = vadd.f32 %v1855_v45, %v1854_v42  ;;  %v4172_v51 = vpop.f32.mrb[21].mxu0  ;;  %v1420_v56 = vadd.f32 %v1419_v44, %v1418_v41  ;;  %v1697_v59 = vmul.f32 %v4168_v46, %v4168_v46  ;;  %v1423_v6 = vsel %vm7133_vm0, %v4168_v46, 0.0  ;;  %v4206_v42 = vpop.f32.mrb[16].mxu1 }
 0x109   :  { %7224 = vst [vmem:[#allocation36_spill] sm:$0xff] %v4172_v51  ;;  %v1421_v60 = vsel %vm7133_vm0, %v4172_v51, 0.0  ;;  %v1696_v61 = vmul.f32 %v4172_v51, %v4172_v51  ;;  %7231 = vst [vmem:[#allocation43_spill] sm:$0xff] %v4206_v42 }
 0x10a   :  { %v1422_v62 = vadd.f32 %v1421_v60, %v1420_v56  ;;  %v1858_v63 = vadd.f32 %v1857_v58, %v1856_v50  ;;  %v1861_v20 = vsel %vm7133_vm0, %v1697_v59, 0.0  ;;  %v4210_v56 = vpop.f32.mrb[17].mxu1 }
 0x10b   :  { %v1859_v8 = vsel %vm7133_vm0, %v1696_v61, 0.0  ;;  %v4186_v10 = vpop.f32.mrb[22].mxu0  ;;  %7233 = vst [vmem:[#allocation45_spill] sm:$0xff] %v4210_v56 }
 0x10c   :  { %7226 = vst [vmem:[#allocation38_spill] sm:$0xff] %v4186_v10  ;;  %v1860_v12 = vadd.f32 %v1859_v8, %v1858_v63  ;;  %v4190_v13 = vpop.f32.mrb[23].mxu0  ;;  %v1424_v16 = vadd.f32 %v1423_v6, %v1422_v62  ;;  %v1699_v21 = vmul.f32 %v4186_v10, %v4186_v10  ;;  %v1427_v38 = vsel %vm7133_vm0, %v4186_v10, 0.0 }
 0x10d   :  { %7228 = vst [vmem:[#allocation40_spill] sm:$0xff] %v4190_v13  ;;  %v1425_v26 = vsel %vm7133_vm0, %v4190_v13, 0.0  ;;  %v1698_v28 = vmul.f32 %v4190_v13, %v4190_v13 }
 0x10e   :  { %v1426_v34 = vadd.f32 %v1425_v26, %v1424_v16  ;;  %v1862_v35 = vadd.f32 %v1861_v20, %v1860_v12  ;;  %v1865_v58 = vsel %vm7133_vm0, %v1699_v21, 0.0  ;;  %v4224_v16 = vpop.f32.mrb[18].mxu1 }
 0x10f   :  { %v1863_v39 = vsel %vm7133_vm0, %v1698_v28, 0.0  ;;  %v4204_v41 = vpop.f32.mrb[24].mxu0  ;;  %7235 = vst [vmem:[#allocation47_spill] sm:$0xff] %v4224_v16  ;;  %v4228_v28 = vpop.f32.mrb[19].mxu1 }
 0x110   :  { %7230 = vst [vmem:[#allocation42_spill] sm:$0xff] %v4204_v41  ;;  %v1864_v44 = vadd.f32 %v1863_v39, %v1862_v35  ;;  %v4208_v45 = vpop.f32.mrb[25].mxu0  ;;  %v1428_v50 = vadd.f32 %v1427_v38, %v1426_v34  ;;  %v1701_v59 = vmul.f32 %v4204_v41, %v4204_v41  ;;  %v1431_v6 = vsel %vm7133_vm0, %v4204_v41, 0.0  ;;  %7237 = vst [vmem:[#allocation49_spill] sm:$0xff] %v4228_v28 }
 0x111   :  { %7232 = vst [vmem:[#allocation44_spill] sm:$0xff] %v4208_v45  ;;  %v1429_v60 = vsel %vm7133_vm0, %v4208_v45, 0.0  ;;  %v1700_v61 = vmul.f32 %v4208_v45, %v4208_v45 }
 0x112   :  { %v1430_v62 = vadd.f32 %v1429_v60, %v1428_v50  ;;  %v1866_v63 = vadd.f32 %v1865_v58, %v1864_v44  ;;  %v1869_v34 = vsel %vm7133_vm0, %v1701_v59, 0.0 }
 0x113   :  { %v1867_v8 = vsel %vm7133_vm0, %v1700_v61, 0.0  ;;  %v4222_v12 = vpop.f32.mrb[26].mxu0 }
 0x114   :  { %7234 = vst [vmem:[#allocation46_spill] sm:$0xff] %v4222_v12  ;;  %v1868_v20 = vadd.f32 %v1867_v8, %v1866_v63  ;;  %v4226_v21 = vpop.f32.mrb[27].mxu0  ;;  %v1432_v26 = vadd.f32 %v1431_v6, %v1430_v62  ;;  %v1703_v35 = vmul.f32 %v4222_v12, %v4222_v12  ;;  %v1435_v58 = vsel %vm7133_vm0, %v4222_v12, 0.0  ;;  %v4242_v62 = vpop.f32.mrb[20].mxu1 }
 0x115   :  { %7236 = vst [vmem:[#allocation48_spill] sm:$0xff] %v4226_v21  ;;  %v1433_v38 = vsel %vm7133_vm0, %v4226_v21, 0.0  ;;  %v1702_v39 = vmul.f32 %v4226_v21, %v4226_v21  ;;  %7239 = vst [vmem:[#allocation51_spill] sm:$0xff] %v4242_v62  ;;  %v4246_v8 = vpop.f32.mrb[21].mxu1 }
 0x116   :  { %v1434_v44 = vadd.f32 %v1433_v38, %v1432_v26  ;;  %v1870_v50 = vadd.f32 %v1869_v34, %v1868_v20  ;;  %7241 = vst [vmem:[#allocation53_spill] sm:$0xff] %v4246_v8  ;;  %v1873_v41 = vsel %vm7133_vm0, %v1703_v35, 0.0 }
 0x117   :  { %v1871_v60 = vsel %vm7133_vm0, %v1702_v39, 0.0  ;;  %v4240_v61 = vpop.f32.mrb[28].mxu0 }
 0x118   :  { %7238 = vst [vmem:[#allocation50_spill] sm:$0xff] %v4240_v61  ;;  %v1872_v59 = vadd.f32 %v1871_v60, %v1870_v50  ;;  %v4244_v63 = vpop.f32.mrb[29].mxu0  ;;  %v1436_v6 = vadd.f32 %v1435_v58, %v1434_v44  ;;  %v1705_v20 = vmul.f32 %v4240_v61, %v4240_v61  ;;  %v1439_v50 = vsel %vm7133_vm0, %v4240_v61, 0.0  ;;  %v4260_v60 = vpop.f32.mrb[22].mxu1 }
 0x119   :  { %7240 = vst [vmem:[#allocation52_spill] sm:$0xff] %v4244_v63  ;;  %v1437_v26 = vsel %vm7133_vm0, %v4244_v63, 0.0  ;;  %v1704_v34 = vmul.f32 %v4244_v63, %v4244_v63  ;;  %7243 = vst [vmem:[#allocation55_spill] sm:$0xff] %v4260_v60  ;;  %v4264_v45 = vpop.f32.mrb[23].mxu1 }
 0x11a   :  { %v1438_v38 = vadd.f32 %v1437_v26, %v1436_v6  ;;  %v1874_v39 = vadd.f32 %v1873_v41, %v1872_v59  ;;  %7245 = vst [vmem:[#allocation57_spill] sm:$0xff] %v4264_v45  ;;  %v1877_v10 = vsel %vm7133_vm0, %v1705_v20, 0.0 }
 0x11b   :  { %v1875_v44 = vsel %vm7133_vm0, %v1704_v34, 0.0  ;;  %v4258_v58 = vpop.f32.mrb[30].mxu0 }
 0x11c   :  { %7242 = vst [vmem:[#allocation54_spill] sm:$0xff] %v4258_v58  ;;  %v1876_v35 = vadd.f32 %v1875_v44, %v1874_v39  ;;  %v4262_v12 = vpop.f32.mrb[31].mxu0  ;;  %v1440_v21 = vadd.f32 %v1439_v50, %v1438_v38  ;;  %v1707_v41 = vmul.f32 %v4258_v58, %v4258_v58  ;;  %v1443_v39 = vsel %vm7133_vm0, %v4258_v58, 0.0  ;;  %v4278_v44 = vpop.f32.mrb[24].mxu1 }
 0x11d   :  { %7244 = vst [vmem:[#allocation56_spill] sm:$0xff] %v4262_v12  ;;  %v1441_v59 = vsel %vm7133_vm0, %v4262_v12, 0.0  ;;  %v1706_v6 = vmul.f32 %v4262_v12, %v4262_v12  ;;  %7247 = vst [vmem:[#allocation59_spill] sm:$0xff] %v4278_v44  ;;  %v4282_v13 = vpop.f32.mrb[25].mxu1 }
 0x11e   :  { %v1442_v26 = vadd.f32 %v1441_v59, %v1440_v21  ;;  %v1878_v34 = vadd.f32 %v1877_v10, %v1876_v35  ;;  %7249 = vst [vmem:[#allocation61_spill] sm:$0xff] %v4282_v13  ;;  %v1881_v46 = vsel %vm7133_vm0, %v1707_v41, 0.0 }
 0x11f   :  { %v1879_v38 = vsel %vm7133_vm0, %v1706_v6, 0.0  ;;  %v4276_v50 = vpop.f32.mrb[32].mxu0 }
 0x120   :  { %7246 = vst [vmem:[#allocation58_spill] sm:$0xff] %v4276_v50  ;;  %v1880_v20 = vadd.f32 %v1879_v38, %v1878_v34  ;;  %v4280_v61 = vpop.f32.mrb[33].mxu0  ;;  %v1444_v63 = vadd.f32 %v1443_v39, %v1442_v26  ;;  %v1709_v10 = vmul.f32 %v4276_v50, %v4276_v50  ;;  %v1447_v34 = vsel %vm7133_vm0, %v4276_v50, 0.0  ;;  %v4296_v38 = vpop.f32.mrb[26].mxu1 }
 0x121   :  { %7248 = vst [vmem:[#allocation60_spill] sm:$0xff] %v4280_v61  ;;  %v1445_v21 = vsel %vm7133_vm0, %v4280_v61, 0.0  ;;  %v1708_v35 = vmul.f32 %v4280_v61, %v4280_v61  ;;  %7251 = vst [vmem:[#allocation63_spill] sm:$0xff] %v4296_v38  ;;  %v4300_v51 = vpop.f32.mrb[27].mxu1 }
 0x122   :  { %v1446_v59 = vadd.f32 %v1445_v21, %v1444_v63  ;;  %v1882_v6 = vadd.f32 %v1881_v46, %v1880_v20  ;;  %7253 = vst [vmem:[#allocation65_spill] sm:$0xff] %v4300_v51  ;;  %v1885_v23 = vsel %vm7133_vm0, %v1709_v10, 0.0 }
 0x123   :  { %v1883_v26 = vsel %vm7133_vm0, %v1708_v35, 0.0  ;;  %v4294_v39 = vpop.f32.mrb[34].mxu0 }
 0x124   :  { %7250 = vst [vmem:[#allocation62_spill] sm:$0xff] %v4294_v39  ;;  %v1884_v41 = vadd.f32 %v1883_v26, %v1882_v6  ;;  %v4298_v58 = vpop.f32.mrb[35].mxu0  ;;  %v1448_v12 = vadd.f32 %v1447_v34, %v1446_v59  ;;  %v1711_v46 = vmul.f32 %v4294_v39, %v4294_v39  ;;  %v1451_v6 = vsel %vm7133_vm0, %v4294_v39, 0.0  ;;  %v4314_v26 = vpop.f32.mrb[28].mxu1 }
 0x125   :  { %7252 = vst [vmem:[#allocation64_spill] sm:$0xff] %v4298_v58  ;;  %v1449_v63 = vsel %vm7133_vm0, %v4298_v58, 0.0  ;;  %v1710_v20 = vmul.f32 %v4298_v58, %v4298_v58  ;;  %7255 = vst [vmem:[#allocation67_spill] sm:$0xff] %v4314_v26  ;;  %v4318_v27 = vpop.f32.mrb[29].mxu1 }
 0x126   :  { %v1450_v21 = vadd.f32 %v1449_v63, %v1448_v12  ;;  %v1886_v35 = vadd.f32 %v1885_v23, %v1884_v41  ;;  %7257 = vst [vmem:[#allocation69_spill] sm:$0xff] %v4318_v27  ;;  %v1889_v2 = vsel %vm7133_vm0, %v1711_v46, 0.0 }
 0x127   :  { %v1887_v59 = vsel %vm7133_vm0, %v1710_v20, 0.0  ;;  %v4312_v34 = vpop.f32.mrb[36].mxu0 }
 0x128   :  { %7254 = vst [vmem:[#allocation66_spill] sm:$0xff] %v4312_v34  ;;  %v1888_v10 = vadd.f32 %v1887_v59, %v1886_v35  ;;  %v4316_v50 = vpop.f32.mrb[37].mxu0  ;;  %v1452_v61 = vadd.f32 %v1451_v6, %v1450_v21  ;;  %v1713_v23 = vmul.f32 %v4312_v34, %v4312_v34  ;;  %v1455_v35 = vsel %vm7133_vm0, %v4312_v34, 0.0  ;;  %v4332_v59 = vpop.f32.mrb[30].mxu1 }
 0x129   :  { %7256 = vst [vmem:[#allocation68_spill] sm:$0xff] %v4316_v50  ;;  %v1453_v12 = vsel %vm7133_vm0, %v4316_v50, 0.0  ;;  %v1712_v41 = vmul.f32 %v4316_v50, %v4316_v50  ;;  %7259 = vst [vmem:[#allocation71_spill] sm:$0xff] %v4332_v59  ;;  %v4336_v7 = vpop.f32.mrb[31].mxu1 }
 0x12a   :  { %v1454_v63 = vadd.f32 %v1453_v12, %v1452_v61  ;;  %v1890_v20 = vadd.f32 %v1889_v2, %v1888_v10  ;;  %7261 = vst [vmem:[#allocation73_spill] sm:$0xff] %v4336_v7  ;;  %v1893_v48 = vsel %vm7133_vm0, %v1713_v23, 0.0 }
 0x12b   :  { %v1891_v21 = vsel %vm7133_vm0, %v1712_v41, 0.0  ;;  %v4330_v6 = vpop.f32.mrb[38].mxu0 }
 0x12c   :  { %7258 = vst [vmem:[#allocation70_spill] sm:$0xff] %v4330_v6  ;;  %v1892_v46 = vadd.f32 %v1891_v21, %v1890_v20  ;;  %v4334_v39 = vpop.f32.mrb[39].mxu0  ;;  %v1456_v58 = vadd.f32 %v1455_v35, %v1454_v63  ;;  %v1715_v2 = vmul.f32 %v4330_v6, %v4330_v6  ;;  %v1459_v20 = vsel %vm7133_vm0, %v4330_v6, 0.0  ;;  %v4350_v21 = vpop.f32.mrb[32].mxu1 }
 0x12d   :  { %7260 = vst [vmem:[#allocation72_spill] sm:$0xff] %v4334_v39  ;;  %v1457_v61 = vsel %vm7133_vm0, %v4334_v39, 0.0  ;;  %v1714_v10 = vmul.f32 %v4334_v39, %v4334_v39  ;;  %7263 = vst [vmem:[#allocation75_spill] sm:$0xff] %v4350_v21  ;;  %v4354_v53 = vpop.f32.mrb[33].mxu1 }
 0x12e   :  { %v1458_v12 = vadd.f32 %v1457_v61, %v1456_v58  ;;  %v1894_v41 = vadd.f32 %v1893_v48, %v1892_v46  ;;  %7265 = vst [vmem:[#allocation77_spill] sm:$0xff] %v4354_v53  ;;  %v1897_v30 = vsel %vm7133_vm0, %v1715_v2, 0.0 }
 0x12f   :  { %v1895_v63 = vsel %vm7133_vm0, %v1714_v10, 0.0  ;;  %v4348_v35 = vpop.f32.mrb[40].mxu0 }
 0x130   :  { %7262 = vst [vmem:[#allocation74_spill] sm:$0xff] %v4348_v35  ;;  %v1896_v23 = vadd.f32 %v1895_v63, %v1894_v41  ;;  %v4352_v34 = vpop.f32.mrb[41].mxu0  ;;  %v1460_v50 = vadd.f32 %v1459_v20, %v1458_v12  ;;  %v1717_v48 = vmul.f32 %v4348_v35, %v4348_v35  ;;  %v1463_v41 = vsel %vm7133_vm0, %v4348_v35, 0.0  ;;  %v4368_v63 = vpop.f32.mrb[34].mxu1 }
 0x131   :  { %7264 = vst [vmem:[#allocation76_spill] sm:$0xff] %v4352_v34  ;;  %v1461_v58 = vsel %vm7133_vm0, %v4352_v34, 0.0  ;;  %v1716_v46 = vmul.f32 %v4352_v34, %v4352_v34  ;;  %7267 = vst [vmem:[#allocation79_spill] sm:$0xff] %v4368_v63  ;;  %v4372_v36 = vpop.f32.mrb[35].mxu1 }
 0x132   :  { %v1462_v61 = vadd.f32 %v1461_v58, %v1460_v50  ;;  %v1898_v10 = vadd.f32 %v1897_v30, %v1896_v23  ;;  %7269 = vst [vmem:[#allocation81_spill] sm:$0xff] %v4372_v36  ;;  %v1901_v14 = vsel %vm7133_vm0, %v1717_v48, 0.0 }
 0x133   :  { %v1899_v12 = vsel %vm7133_vm0, %v1716_v46, 0.0  ;;  %v4366_v20 = vpop.f32.mrb[42].mxu0 }
 0x134   :  { %7266 = vst [vmem:[#allocation78_spill] sm:$0xff] %v4366_v20  ;;  %v1900_v2 = vadd.f32 %v1899_v12, %v1898_v10  ;;  %v4370_v6 = vpop.f32.mrb[43].mxu0  ;;  %v1464_v39 = vadd.f32 %v1463_v41, %v1462_v61  ;;  %v1719_v30 = vmul.f32 %v4366_v20, %v4366_v20  ;;  %v1467_v10 = vsel %vm7133_vm0, %v4366_v20, 0.0  ;;  %v4386_v12 = vpop.f32.mrb[36].mxu1 }
 0x135   :  { %7268 = vst [vmem:[#allocation80_spill] sm:$0xff] %v4370_v6  ;;  %v1465_v50 = vsel %vm7133_vm0, %v4370_v6, 0.0  ;;  %v1718_v23 = vmul.f32 %v4370_v6, %v4370_v6  ;;  %7271 = vst [vmem:[#allocation83_spill] sm:$0xff] %v4386_v12  ;;  %v4390_v18 = vpop.f32.mrb[37].mxu1 }
 0x136   :  { %v1466_v58 = vadd.f32 %v1465_v50, %v1464_v39  ;;  %v1902_v46 = vadd.f32 %v1901_v14, %v1900_v2  ;;  %7273 = vst [vmem:[#allocation85_spill] sm:$0xff] %v4390_v18  ;;  %v1905_v0 = vsel %vm7133_vm0, %v1719_v30, 0.0 }
 0x137   :  { %v1903_v61 = vsel %vm7133_vm0, %v1718_v23, 0.0  ;;  %v4384_v41 = vpop.f32.mrb[44].mxu0 }
 0x138   :  { %7270 = vst [vmem:[#allocation82_spill] sm:$0xff] %v4384_v41  ;;  %v1904_v48 = vadd.f32 %v1903_v61, %v1902_v46  ;;  %v4388_v35 = vpop.f32.mrb[45].mxu0  ;;  %v1468_v34 = vadd.f32 %v1467_v10, %v1466_v58  ;;  %v1721_v14 = vmul.f32 %v4384_v41, %v4384_v41  ;;  %v1471_v46 = vsel %vm7133_vm0, %v4384_v41, 0.0  ;;  %v4404_v61 = vpop.f32.mrb[38].mxu1 }
 0x139   :  { %7272 = vst [vmem:[#allocation84_spill] sm:$0xff] %v4388_v35  ;;  %v1469_v39 = vsel %vm7133_vm0, %v4388_v35, 0.0  ;;  %v1720_v2 = vmul.f32 %v4388_v35, %v4388_v35  ;;  %7275 = vst [vmem:[#allocation87_spill] sm:$0xff] %v4404_v61  ;;  %v4408_v4 = vpop.f32.mrb[39].mxu1 }
 0x13a   :  { %v1470_v50 = vadd.f32 %v1469_v39, %v1468_v34  ;;  %v1906_v23 = vadd.f32 %v1905_v0, %v1904_v48  ;;  %7277 = vst [vmem:[#allocation89_spill] sm:$0xff] %v4408_v4  ;;  %v1909_v52 = vsel %vm7133_vm0, %v1721_v14, 0.0 }
 0x13b   :  { %v1907_v58 = vsel %vm7133_vm0, %v1720_v2, 0.0  ;;  %v4402_v10 = vpop.f32.mrb[46].mxu0 }
 0x13c   :  { %7274 = vst [vmem:[#allocation86_spill] sm:$0xff] %v4402_v10  ;;  %v1908_v30 = vadd.f32 %v1907_v58, %v1906_v23  ;;  %v4406_v20 = vpop.f32.mrb[47].mxu0  ;;  %v1472_v6 = vadd.f32 %v1471_v46, %v1470_v50  ;;  %v1723_v0 = vmul.f32 %v4402_v10, %v4402_v10  ;;  %v1475_v23 = vsel %vm7133_vm0, %v4402_v10, 0.0  ;;  %v4422_v58 = vpop.f32.mrb[40].mxu1 }
 0x13d   :  { %7276 = vst [vmem:[#allocation88_spill] sm:$0xff] %v4406_v20  ;;  %v1473_v34 = vsel %vm7133_vm0, %v4406_v20, 0.0  ;;  %v1722_v48 = vmul.f32 %v4406_v20, %v4406_v20  ;;  %7279 = vst [vmem:[#allocation91_spill] sm:$0xff] %v4422_v58  ;;  %v4426_v55 = vpop.f32.mrb[41].mxu1 }
 0x13e   :  { %v1474_v39 = vadd.f32 %v1473_v34, %v1472_v6  ;;  %v1910_v2 = vadd.f32 %v1909_v52, %v1908_v30  ;;  %7281 = vst [vmem:[#allocation93_spill] sm:$0xff] %v4426_v55  ;;  %v1913_v40 = vsel %vm7133_vm0, %v1723_v0, 0.0 }
 0x13f   :  { %v1911_v50 = vsel %vm7133_vm0, %v1722_v48, 0.0  ;;  %v4420_v46 = vpop.f32.mrb[48].mxu0 }
 0x140   :  { %7278 = vst [vmem:[#allocation90_spill] sm:$0xff] %v4420_v46  ;;  %v1912_v14 = vadd.f32 %v1911_v50, %v1910_v2  ;;  %v4424_v41 = vpop.f32.mrb[49].mxu0  ;;  %v1476_v35 = vadd.f32 %v1475_v23, %v1474_v39  ;;  %v1725_v52 = vmul.f32 %v4420_v46, %v4420_v46  ;;  %v1479_v2 = vsel %vm7133_vm0, %v4420_v46, 0.0  ;;  %v4440_v50 = vpop.f32.mrb[42].mxu1 }
 0x141   :  { %7280 = vst [vmem:[#allocation92_spill] sm:$0xff] %v4424_v41  ;;  %v1477_v6 = vsel %vm7133_vm0, %v4424_v41, 0.0  ;;  %v1724_v30 = vmul.f32 %v4424_v41, %v4424_v41  ;;  %7283 = vst [vmem:[#allocation95_spill] sm:$0xff] %v4440_v50  ;;  %v4444_v43 = vpop.f32.mrb[43].mxu1 }
 0x142   :  { %v1478_v34 = vadd.f32 %v1477_v6, %v1476_v35  ;;  %v1914_v48 = vadd.f32 %v1913_v40, %v1912_v14  ;;  %7285 = vst [vmem:[#allocation97_spill] sm:$0xff] %v4444_v43  ;;  %v1917_v31 = vsel %vm7133_vm0, %v1725_v52, 0.0 }
 0x143   :  { %v1915_v39 = vsel %vm7133_vm0, %v1724_v30, 0.0  ;;  %v4438_v23 = vpop.f32.mrb[50].mxu0 }
 0x144   :  { %7282 = vst [vmem:[#allocation94_spill] sm:$0xff] %v4438_v23  ;;  %v1916_v0 = vadd.f32 %v1915_v39, %v1914_v48  ;;  %v4442_v10 = vpop.f32.mrb[51].mxu0  ;;  %v1480_v20 = vadd.f32 %v1479_v2, %v1478_v34  ;;  %v1727_v40 = vmul.f32 %v4438_v23, %v4438_v23  ;;  %v1483_v48 = vsel %vm7133_vm0, %v4438_v23, 0.0  ;;  %v4458_v39 = vpop.f32.mrb[44].mxu1 }
 0x145   :  { %7284 = vst [vmem:[#allocation96_spill] sm:$0xff] %v4442_v10  ;;  %v1481_v35 = vsel %vm7133_vm0, %v4442_v10, 0.0  ;;  %v1726_v14 = vmul.f32 %v4442_v10, %v4442_v10  ;;  %7287 = vst [vmem:[#allocation99_spill] sm:$0xff] %v4458_v39  ;;  %v4462_v33 = vpop.f32.mrb[45].mxu1 }
 0x146   :  { %v1482_v6 = vadd.f32 %v1481_v35, %v1480_v20  ;;  %v1918_v30 = vadd.f32 %v1917_v31, %v1916_v0  ;;  %7289 = vst [vmem:[#allocation101_spill] sm:$0xff] %v4462_v33  ;;  %v1921_v22 = vsel %vm7133_vm0, %v1727_v40, 0.0 }
 0x147   :  { %v1919_v34 = vsel %vm7133_vm0, %v1726_v14, 0.0  ;;  %v4456_v2 = vpop.f32.mrb[52].mxu0 }
 0x148   :  { %7286 = vst [vmem:[#allocation98_spill] sm:$0xff] %v4456_v2  ;;  %v1920_v52 = vadd.f32 %v1919_v34, %v1918_v30  ;;  %v4460_v46 = vpop.f32.mrb[53].mxu0  ;;  %v1484_v41 = vadd.f32 %v1483_v48, %v1482_v6  ;;  %v1729_v31 = vmul.f32 %v4456_v2, %v4456_v2  ;;  %v1487_v30 = vsel %vm7133_vm0, %v4456_v2, 0.0  ;;  %v4476_v34 = vpop.f32.mrb[46].mxu1 }
 0x149   :  { %7288 = vst [vmem:[#allocation100_spill] sm:$0xff] %v4460_v46  ;;  %v1485_v20 = vsel %vm7133_vm0, %v4460_v46, 0.0  ;;  %v1728_v0 = vmul.f32 %v4460_v46, %v4460_v46  ;;  %7291 = vst [vmem:[#allocation103_spill] sm:$0xff] %v4476_v34  ;;  %v4480_v25 = vpop.f32.mrb[47].mxu1 }
 0x14a   :  { %v1486_v35 = vadd.f32 %v1485_v20, %v1484_v41  ;;  %v1922_v14 = vadd.f32 %v1921_v22, %v1920_v52  ;;  %7293 = vst [vmem:[#allocation105_spill] sm:$0xff] %v4480_v25  ;;  %v1925_v39 = vsel %vm7133_vm0, %v1729_v31, 0.0 }
 0x14b   :  { %v1923_v6 = vsel %vm7133_vm0, %v1728_v0, 0.0  ;;  %v4474_v48 = vpop.f32.mrb[54].mxu0 }
 0x14c   :  { %7290 = vst [vmem:[#allocation102_spill] sm:$0xff] %v4474_v48  ;;  %v1924_v40 = vadd.f32 %v1923_v6, %v1922_v14  ;;  %v4478_v23 = vpop.f32.mrb[55].mxu0  ;;  %v1488_v10 = vadd.f32 %v1487_v30, %v1486_v35  ;;  %v1731_v22 = vmul.f32 %v4474_v48, %v4474_v48  ;;  %v1491_v14 = vsel %vm7133_vm0, %v4474_v48, 0.0  ;;  %v4494_v6 = vpop.f32.mrb[48].mxu1 }
 0x14d   :  { %7292 = vst [vmem:[#allocation104_spill] sm:$0xff] %v4478_v23  ;;  %v1489_v41 = vsel %vm7133_vm0, %v4478_v23, 0.0  ;;  %v1730_v52 = vmul.f32 %v4478_v23, %v4478_v23  ;;  %7295 = vst [vmem:[#allocation107_spill] sm:$0xff] %v4494_v6  ;;  %v4498_v34 = vpop.f32.mrb[49].mxu1 }
 0x14e   :  { %v1490_v20 = vadd.f32 %v1489_v41, %v1488_v10  ;;  %v1926_v0 = vadd.f32 %v1925_v39, %v1924_v40  ;;  %7297 = vst [vmem:[#allocation109_spill] sm:$0xff] %v4498_v34  ;;  %v1929_v25 = vsel %vm7133_vm0, %v1731_v22, 0.0 }
 0x14f   :  { %v1927_v35 = vsel %vm7133_vm0, %v1730_v52, 0.0  ;;  %v4492_v30 = vpop.f32.mrb[56].mxu0 }
 0x150   :  { %7294 = vst [vmem:[#allocation106_spill] sm:$0xff] %v4492_v30  ;;  %v1928_v31 = vadd.f32 %v1927_v35, %v1926_v0  ;;  %v4496_v2 = vpop.f32.mrb[57].mxu0  ;;  %v1492_v46 = vadd.f32 %v1491_v14, %v1490_v20  ;;  %v1733_v10 = vmul.f32 %v4492_v30, %v4492_v30  ;;  %v1495_v0 = vsel %vm7133_vm0, %v4492_v30, 0.0  ;;  %v4512_v35 = vpop.f32.mrb[50].mxu1 }
 0x151   :  { %7296 = vst [vmem:[#allocation108_spill] sm:$0xff] %v4496_v2  ;;  %v1493_v39 = vsel %vm7133_vm0, %v4496_v2, 0.0  ;;  %v1732_v40 = vmul.f32 %v4496_v2, %v4496_v2  ;;  %7299 = vst [vmem:[#allocation111_spill] sm:$0xff] %v4512_v35  ;;  %v4516_v6 = vpop.f32.mrb[51].mxu1 }
 0x152   :  { %v1494_v41 = vadd.f32 %v1493_v39, %v1492_v46  ;;  %v1930_v52 = vadd.f32 %v1929_v25, %v1928_v31  ;;  %7301 = vst [vmem:[#allocation113_spill] sm:$0xff] %v4516_v6  ;;  %v1933_v34 = vsel %vm7133_vm0, %v1733_v10, 0.0 }
 0x153   :  { %v1931_v20 = vsel %vm7133_vm0, %v1732_v40, 0.0  ;;  %v4510_v14 = vpop.f32.mrb[58].mxu0 }
 0x154   :  { %7298 = vst [vmem:[#allocation110_spill] sm:$0xff] %v4510_v14  ;;  %v1932_v22 = vadd.f32 %v1931_v20, %v1930_v52  ;;  %v4514_v48 = vpop.f32.mrb[59].mxu0  ;;  %v1496_v23 = vadd.f32 %v1495_v0, %v1494_v41  ;;  %v1735_v25 = vmul.f32 %v4510_v14, %v4510_v14  ;;  %v1499_v52 = vsel %vm7133_vm0, %v4510_v14, 0.0  ;;  %v4530_v20 = vpop.f32.mrb[52].mxu1 }
 0x155   :  { %7300 = vst [vmem:[#allocation112_spill] sm:$0xff] %v4514_v48  ;;  %v1497_v46 = vsel %vm7133_vm0, %v4514_v48, 0.0  ;;  %v1734_v31 = vmul.f32 %v4514_v48, %v4514_v48  ;;  %7303 = vst [vmem:[#allocation115_spill] sm:$0xff] %v4530_v20  ;;  %v4534_v35 = vpop.f32.mrb[53].mxu1 }
 0x156   :  { %v1498_v39 = vadd.f32 %v1497_v46, %v1496_v23  ;;  %v1934_v40 = vadd.f32 %v1933_v34, %v1932_v22  ;;  %7305 = vst [vmem:[#allocation117_spill] sm:$0xff] %v4534_v35  ;;  %v1937_v6 = vsel %vm7133_vm0, %v1735_v25, 0.0 }
 0x157   :  { %v1935_v41 = vsel %vm7133_vm0, %v1734_v31, 0.0  ;;  %v4528_v0 = vpop.f32.mrb[60].mxu0 }
 0x158   :  { %7302 = vst [vmem:[#allocation114_spill] sm:$0xff] %v4528_v0  ;;  %v1936_v10 = vadd.f32 %v1935_v41, %v1934_v40  ;;  %v4532_v30 = vpop.f32.mrb[61].mxu0  ;;  %v1500_v2 = vadd.f32 %v1499_v52, %v1498_v39  ;;  %v1737_v23 = vmul.f32 %v4528_v0, %v4528_v0  ;;  %v1503_v40 = vsel %vm7133_vm0, %v4528_v0, 0.0  ;;  %v4548_v41 = vpop.f32.mrb[54].mxu1 }
 0x159   :  { %7304 = vst [vmem:[#allocation116_spill] sm:$0xff] %v4532_v30  ;;  %v1501_v34 = vsel %vm7133_vm0, %v4532_v30, 0.0  ;;  %v1736_v22 = vmul.f32 %v4532_v30, %v4532_v30  ;;  %7307 = vst [vmem:[#allocation119_spill] sm:$0xff] %v4548_v41  ;;  %v4552_v20 = vpop.f32.mrb[55].mxu1 }
 0x15a   :  { %v1502_v46 = vadd.f32 %v1501_v34, %v1500_v2  ;;  %v1938_v31 = vadd.f32 %v1937_v6, %v1936_v10  ;;  %7309 = vst [vmem:[#allocation121_spill] sm:$0xff] %v4552_v20  ;;  %v1941_v35 = vsel %vm7133_vm0, %v1737_v23, 0.0 }
 0x15b   :  { %v1939_v39 = vsel %vm7133_vm0, %v1736_v22, 0.0  ;;  %v4546_v52 = vpop.f32.mrb[62].mxu0 }
 0x15c   :  { %7306 = vst [vmem:[#allocation118_spill] sm:$0xff] %v4546_v52  ;;  %v1940_v25 = vadd.f32 %v1939_v39, %v1938_v31  ;;  %v4550_v14 = vpop.f32.mrb[63].mxu0  ;;  %v1504_v48 = vadd.f32 %v1503_v40, %v1502_v46  ;;  %v1739_v2 = vmul.f32 %v4546_v52, %v4546_v52  ;;  %v1507_v31 = vsel %vm7133_vm0, %v4546_v52, 0.0  ;;  %v4566_v39 = vpop.f32.mrb[56].mxu1 }
 0x15d   :  { %7308 = vst [vmem:[#allocation120_spill] sm:$0xff] %v4550_v14  ;;  %v1505_v6 = vsel %vm7133_vm0, %v4550_v14, 0.0  ;;  %v1738_v10 = vmul.f32 %v4550_v14, %v4550_v14  ;;  %7311 = vst [vmem:[#allocation123_spill] sm:$0xff] %v4566_v39  ;;  %v4570_v41 = vpop.f32.mrb[57].mxu1 }
 0x15e   :  { %v1506_v34 = vadd.f32 %v1505_v6, %v1504_v48  ;;  %v1942_v22 = vadd.f32 %v1941_v35, %v1940_v25  ;;  %7313 = vst [vmem:[#allocation125_spill] sm:$0xff] %v4570_v41  ;;  %v1945_v20 = vsel %vm7133_vm0, %v1739_v2, 0.0 }
 0x15f   :  { %v1943_v46 = vsel %vm7133_vm0, %v1738_v10, 0.0  ;;  %v4564_v40 = vpop.f32.mrb[64].mxu0 }
 0x160   :  { %7310 = vst [vmem:[#allocation122_spill] sm:$0xff] %v4564_v40  ;;  %v1944_v23 = vadd.f32 %v1943_v46, %v1942_v22  ;;  %v4568_v0 = vpop.f32.mrb[65].mxu0  ;;  %v1508_v30 = vadd.f32 %v1507_v31, %v1506_v34  ;;  %v1741_v48 = vmul.f32 %v4564_v40, %v4564_v40  ;;  %v1511_v22 = vsel %vm7133_vm0, %v4564_v40, 0.0  ;;  %v4584_v46 = vpop.f32.mrb[58].mxu1 }
 0x161   :  { %7312 = vst [vmem:[#allocation124_spill] sm:$0xff] %v4568_v0  ;;  %v1509_v35 = vsel %vm7133_vm0, %v4568_v0, 0.0  ;;  %v1740_v25 = vmul.f32 %v4568_v0, %v4568_v0  ;;  %7315 = vst [vmem:[#allocation127_spill] sm:$0xff] %v4584_v46  ;;  %v4588_v39 = vpop.f32.mrb[59].mxu1 }
 0x162   :  { %v1510_v6 = vadd.f32 %v1509_v35, %v1508_v30  ;;  %v1946_v10 = vadd.f32 %v1945_v20, %v1944_v23  ;;  %7317 = vst [vmem:[#allocation129_spill] sm:$0xff] %v4588_v39  ;;  %v1949_v41 = vsel %vm7133_vm0, %v1741_v48, 0.0 }
 0x163   :  { %v1947_v34 = vsel %vm7133_vm0, %v1740_v25, 0.0  ;;  %v4582_v31 = vpop.f32.mrb[66].mxu0 }
 0x164   :  { %7314 = vst [vmem:[#allocation126_spill] sm:$0xff] %v4582_v31  ;;  %v1948_v2 = vadd.f32 %v1947_v34, %v1946_v10  ;;  %v4586_v52 = vpop.f32.mrb[67].mxu0  ;;  %v1512_v14 = vadd.f32 %v1511_v22, %v1510_v6  ;;  %v1743_v30 = vmul.f32 %v4582_v31, %v4582_v31  ;;  %v1515_v10 = vsel %vm7133_vm0, %v4582_v31, 0.0  ;;  %v4602_v34 = vpop.f32.mrb[60].mxu1 }
 0x165   :  { %7316 = vst [vmem:[#allocation128_spill] sm:$0xff] %v4586_v52  ;;  %v1513_v20 = vsel %vm7133_vm0, %v4586_v52, 0.0  ;;  %v1742_v23 = vmul.f32 %v4586_v52, %v4586_v52  ;;  %7319 = vst [vmem:[#allocation131_spill] sm:$0xff] %v4602_v34  ;;  %v4606_v46 = vpop.f32.mrb[61].mxu1  ;;  %v1748_v34 = vmul.f32 %v4066_v5, %v4066_v5 }
 0x166   :  { %v1514_v35 = vadd.f32 %v1513_v20, %v1512_v14  ;;  %v1950_v25 = vadd.f32 %v1949_v41, %v1948_v2  ;;  %7321 = vst [vmem:[#allocation133_spill] sm:$0xff] %v4606_v46  ;;  %v1953_v39 = vsel %vm7133_vm0, %v1743_v30, 0.0 }
 0x167   :  { %v1951_v6 = vsel %vm7133_vm0, %v1742_v23, 0.0  ;;  %v4600_v22 = vpop.f32.mrb[68].mxu0 }
 0x168   :  { %7318 = vst [vmem:[#allocation130_spill] sm:$0xff] %v4600_v22  ;;  %v1952_v48 = vadd.f32 %v1951_v6, %v1950_v25  ;;  %v4604_v40 = vpop.f32.mrb[69].mxu0  ;;  %v1516_v0 = vadd.f32 %v1515_v10, %v1514_v35  ;;  %v1745_v14 = vmul.f32 %v4600_v22, %v4600_v22  ;;  %v1519_v25 = vsel %vm7133_vm0, %v4600_v22, 0.0  ;;  %v4620_v6 = vpop.f32.mrb[62].mxu1 }
 0x169   :  { %7320 = vst [vmem:[#allocation132_spill] sm:$0xff] %v4604_v40  ;;  %v1517_v41 = vsel %vm7133_vm0, %v4604_v40, 0.0  ;;  %v1744_v2 = vmul.f32 %v4604_v40, %v4604_v40  ;;  %7323 = vst [vmem:[#allocation135_spill] sm:$0xff] %v4620_v6  ;;  %v4626_v46 = vpop.f32.mrb[63].mxu1 }
 0x16a   :  { %v1518_v20 = vadd.f32 %v1517_v41, %v1516_v0  ;;  %v1954_v23 = vadd.f32 %v1953_v39, %v1952_v48  ;;  %7325 = vst [vmem:[#allocation137_spill] sm:$0xff] %v4626_v46  ;;  %v1957_v0 = vsel %vm7133_vm0, %v1745_v14, 0.0  ;;  %v4640_v14 = vpop.f32.mrb[64].mxu1 }
 0x16b   :  { %v1955_v35 = vsel %vm7133_vm0, %v1744_v2, 0.0  ;;  %v4618_v10 = vpop.f32.mrb[70].mxu0  ;;  %7326 = vst [vmem:[#allocation138_spill] sm:$0xff] %v4640_v14  ;;  %v4642_v6 = vpop.f32.mrb[65].mxu1 }
 0x16c   :  { %7322 = vst [vmem:[#allocation134_spill] sm:$0xff] %v4618_v10  ;;  %v1956_v30 = vadd.f32 %v1955_v35, %v1954_v23  ;;  %v4622_v31 = vpop.f32.mrb[71].mxu0  ;;  %v1520_v52 = vadd.f32 %v1519_v25, %v1518_v20  ;;  %v1747_v39 = vmul.f32 %v4618_v10, %v4618_v10  ;;  %v1523_v20 = vsel %vm7133_vm0, %v4618_v10, 0.0  ;;  %7327 = vst [vmem:[#allocation139_spill] sm:$0xff] %v4642_v6 }
 0x16d   :  { %7324 = vst [vmem:[#allocation136_spill] sm:$0xff] %v4622_v31  ;;  %v1521_v48 = vsel %vm7133_vm0, %v4622_v31, 0.0  ;;  %v1746_v41 = vmul.f32 %v4622_v31, %v4622_v31  ;;  %v1525_v35 = vsel %vm7133_vm0, %v4066_v5, 0.0  ;;  %v1527_v5 = vsel %vm7133_vm0, %v4062_v1, 0.0 }
 0x16e   :  { %v1522_v2 = vadd.f32 %v1521_v48, %v1520_v52  ;;  %v1958_v23 = vadd.f32 %v1957_v0, %v1956_v30  ;;  %v1961_v46 = vsel %vm7133_vm0, %v1747_v39, 0.0  ;;  %v1749_v52 = vmul.f32 %v4062_v1, %v4062_v1 }
 0x16f   :  { %v1959_v25 = vsel %vm7133_vm0, %v1746_v41, 0.0  ;;  %v1963_v30 = vsel %vm7133_vm0, %v1748_v34, 0.0  ;;  %v1750_v0 = vmul.f32 %v4084_v19, %v4084_v19  ;;  %v1751_v34 = vmul.f32 %v4080_v15, %v4080_v15 }
 0x170   :  { %v1524_v22 = vadd.f32 %v1523_v20, %v1522_v2  ;;  %v1960_v40 = vadd.f32 %v1959_v25, %v1958_v23  ;;  %v1529_v2 = vsel %vm7133_vm0, %v4084_v19, 0.0  ;;  %v4654_v23 = vpop.f32.mrb[66].mxu1  ;;  %v1965_v10 = vsel %vm7133_vm0, %v1749_v52, 0.0 }
 0x171   :  { %7328 = vst [vmem:[#allocation140_spill] sm:$0xff] %v4654_v23  ;;  %v4656_v25 = vpop.f32.mrb[67].mxu1  ;;  %v1531_v19 = vsel %vm7133_vm0, %v4080_v15, 0.0  ;;  %v1969_v1 = vsel %vm7133_vm0, %v1751_v34, 0.0 }
 0x172   :  { %v1962_v48 = vadd.f32 %v1961_v46, %v1960_v40  ;;  %v1526_v41 = vadd.f32 %v1525_v35, %v1524_v22  ;;  %7329 = vst [vmem:[#allocation141_spill] sm:$0xff] %v4656_v25  ;;  %v1967_v40 = vsel %vm7133_vm0, %v1750_v0, 0.0  ;;  %v1752_v46 = vmul.f32 %v4102_v37, %v4102_v37 }
 0x173   :  { %v1753_v0 = vmul.f32 %v4098_v32, %v4098_v32 }
 0x174   :  { %v1528_v20 = vadd.f32 %v1527_v5, %v1526_v41  ;;  %v1964_v39 = vadd.f32 %v1963_v30, %v1962_v48  ;;  %v1533_v5 = vsel %vm7133_vm0, %v4102_v37, 0.0  ;;  %v4668_v30 = vpop.f32.mrb[68].mxu1  ;;  %v1535_v37 = vsel %vm7133_vm0, %v4098_v32, 0.0 }
 0x175   :  { %7330 = vst [vmem:[#allocation142_spill] sm:$0xff] %v4668_v30  ;;  %v4670_v41 = vpop.f32.mrb[69].mxu1  ;;  %v1973_v15 = vsel %vm7133_vm0, %v1753_v0, 0.0  ;;  %v1758_v32 = vmul.f32 %v4156_v29, %v4156_v29 }
 0x176   :  { %v1966_v22 = vadd.f32 %v1965_v10, %v1964_v39  ;;  %v1530_v35 = vadd.f32 %v1529_v2, %v1528_v20  ;;  %7331 = vst [vmem:[#allocation143_spill] sm:$0xff] %v4670_v41  ;;  %v1971_v10 = vsel %vm7133_vm0, %v1752_v46, 0.0  ;;  %v1754_v2 = vmul.f32 %v4120_v54, %v4120_v54 }
 0x177   :  { %v1755_v46 = vmul.f32 %v4116_v49, %v4116_v49 }
 0x178   :  { %v1532_v48 = vadd.f32 %v1531_v19, %v1530_v35  ;;  %v1968_v52 = vadd.f32 %v1967_v40, %v1966_v22  ;;  %v1537_v19 = vsel %vm7133_vm0, %v4120_v54, 0.0  ;;  %v4682_v40 = vpop.f32.mrb[70].mxu1  ;;  %v1539_v54 = vsel %vm7133_vm0, %v4116_v49, 0.0 }
 0x179   :  { %7332 = vst [vmem:[#allocation144_spill] sm:$0xff] %v4682_v40  ;;  %v4684_v35 = vpop.f32.mrb[71].mxu1  ;;  %v1977_v0 = vsel %vm7133_vm0, %v1755_v46, 0.0 }
 0x17a   :  { %v1970_v20 = vadd.f32 %v1969_v1, %v1968_v52  ;;  %v1534_v39 = vadd.f32 %v1533_v5, %v1532_v48  ;;  %7333 = vst [vmem:[#allocation145_spill] sm:$0xff] %v4684_v35  ;;  %v1975_v1 = vsel %vm7133_vm0, %v1754_v2, 0.0  ;;  %v1756_v5 = vmul.f32 %v4138_v9, %v4138_v9 }
 0x17c   :  { %v1536_v22 = vadd.f32 %v1535_v37, %v1534_v39  ;;  %v1972_v34 = vadd.f32 %v1971_v10, %v1970_v20  ;;  %v1541_v37 = vsel %vm7133_vm0, %v4138_v9, 0.0  ;;  %v1757_v39 = vmul.f32 %v4134_v3, %v4134_v3 }
 0x17d   :  { %v1979_v2 = vsel %vm7133_vm0, %v1756_v5, 0.0  ;;  %v1983_v5 = vsel %vm7133_vm0, %v1758_v32, 0.0 }
 0x17e   :  { %v1974_v48 = vadd.f32 %v1973_v15, %v1972_v34  ;;  %v1538_v52 = vadd.f32 %v1537_v19, %v1536_v22  ;;  %v1543_v22 = vsel %vm7133_vm0, %v4134_v3, 0.0  ;;  %v1545_v34 = vsel %vm7133_vm0, %v4156_v29, 0.0 }
 0x17f   :  { %v1981_v46 = vsel %vm7133_vm0, %v1757_v39, 0.0 }
 0x180   :  { %v1540_v10 = vadd.f32 %v1539_v54, %v1538_v52  ;;  %v1976_v20 = vadd.f32 %v1975_v1, %v1974_v48  ;;  %v1759_v48 = vmul.f32 %v4152_v24, %v4152_v24  ;;  %v1760_v52 = vmul.f32 %v4174_v57, %v4174_v57 }
 0x182   :  { %v1978_v15 = vadd.f32 %v1977_v0, %v1976_v20  ;;  %v1542_v19 = vadd.f32 %v1541_v37, %v1540_v10  ;;  %v1547_v10 = vsel %vm7133_vm0, %v4152_v24, 0.0  ;;  %v1549_v0 = vsel %vm7133_vm0, %v4174_v57, 0.0 }
 0x183   :  { %v1985_v39 = vsel %vm7133_vm0, %v1759_v48, 0.0  ;;  %v1987_v32 = vsel %vm7133_vm0, %v1760_v52, 0.0 }
 0x184   :  { %v1544_v54 = vadd.f32 %v1543_v22, %v1542_v19  ;;  %v1980_v1 = vadd.f32 %v1979_v2, %v1978_v15  ;;  %v1761_v15 = vmul.f32 %v4170_v47, %v4170_v47  ;;  %v1762_v22 = vmul.f32 %v4192_v17, %v4192_v17 }
 0x186   :  { %v1982_v20 = vadd.f32 %v1981_v46, %v1980_v1  ;;  %v1546_v37 = vadd.f32 %v1545_v34, %v1544_v54  ;;  %v1551_v54 = vsel %vm7133_vm0, %v4170_v47, 0.0  ;;  %v1553_v46 = vsel %vm7133_vm0, %v4192_v17, 0.0 }
 0x187   :  { %v1989_v48 = vsel %vm7133_vm0, %v1761_v15, 0.0  ;;  %v1991_v52 = vsel %vm7133_vm0, %v1762_v22, 0.0 }
 0x188   :  { %v1548_v19 = vadd.f32 %v1547_v10, %v1546_v37  ;;  %v1984_v2 = vadd.f32 %v1983_v5, %v1982_v20  ;;  %v1763_v20 = vmul.f32 %v4188_v11, %v4188_v11  ;;  %v1764_v10 = vmul.f32 %v4210_v56, %v4210_v56 }
 0x18a   :  { %v1986_v1 = vadd.f32 %v1985_v39, %v1984_v2  ;;  %v1550_v34 = vadd.f32 %v1549_v0, %v1548_v19  ;;  %v1555_v19 = vsel %vm7133_vm0, %v4188_v11, 0.0  ;;  %v1557_v39 = vsel %vm7133_vm0, %v4210_v56, 0.0 }
 0x18b   :  { %v1993_v15 = vsel %vm7133_vm0, %v1763_v20, 0.0  ;;  %v1995_v22 = vsel %vm7133_vm0, %v1764_v10, 0.0 }
 0x18c   :  { %v1988_v37 = vadd.f32 %v1987_v32, %v1986_v1  ;;  %v1552_v5 = vadd.f32 %v1551_v54, %v1550_v34  ;;  %v1765_v34 = vmul.f32 %v4206_v42, %v4206_v42  ;;  %v1766_v54 = vmul.f32 %v4228_v28, %v4228_v28 }
 0x18e   :  { %v1554_v2 = vadd.f32 %v1553_v46, %v1552_v5  ;;  %v1990_v0 = vadd.f32 %v1989_v48, %v1988_v37  ;;  %v1559_v5 = vsel %vm7133_vm0, %v4206_v42, 0.0  ;;  %v1561_v48 = vsel %vm7133_vm0, %v4228_v28, 0.0 }
 0x18f   :  { %v1997_v20 = vsel %vm7133_vm0, %v1765_v34, 0.0  ;;  %v1999_v10 = vsel %vm7133_vm0, %v1766_v54, 0.0 }
 0x190   :  { %v1992_v32 = vadd.f32 %v1991_v52, %v1990_v0  ;;  %v1556_v1 = vadd.f32 %v1555_v19, %v1554_v2  ;;  %v1767_v0 = vmul.f32 %v4224_v16, %v4224_v16  ;;  %v1768_v19 = vmul.f32 %v4246_v8, %v4246_v8 }
 0x192   :  { %v1558_v46 = vadd.f32 %v1557_v39, %v1556_v1  ;;  %v1994_v37 = vadd.f32 %v1993_v15, %v1992_v32  ;;  %v1563_v1 = vsel %vm7133_vm0, %v4224_v16, 0.0  ;;  %v1565_v15 = vsel %vm7133_vm0, %v4246_v8, 0.0 }
 0x193   :  { %v2001_v34 = vsel %vm7133_vm0, %v1767_v0, 0.0  ;;  %v2003_v54 = vsel %vm7133_vm0, %v1768_v19, 0.0  ;;  %v3391_v16 = vmov 0  }
 0x194   :  { %v1996_v52 = vadd.f32 %v1995_v22, %v1994_v37  ;;  %v1560_v2 = vadd.f32 %v1559_v5, %v1558_v46  ;;  %v1769_v37 = vmul.f32 %v4242_v62, %v4242_v62  ;;  %v1770_v5 = vmul.f32 %v4264_v45, %v4264_v45 }
 0x196   :  { %v1562_v39 = vadd.f32 %v1561_v48, %v1560_v2  ;;  %v1998_v32 = vadd.f32 %v1997_v20, %v1996_v52  ;;  %v1567_v2 = vsel %vm7133_vm0, %v4242_v62, 0.0  ;;  %v1569_v20 = vsel %vm7133_vm0, %v4264_v45, 0.0 }
 0x197   :  { %v2005_v0 = vsel %vm7133_vm0, %v1769_v37, 0.0  ;;  %v2007_v19 = vsel %vm7133_vm0, %v1770_v5, 0.0 }
 0x198   :  { %v2000_v22 = vadd.f32 %v1999_v10, %v1998_v32  ;;  %v1564_v46 = vadd.f32 %v1563_v1, %v1562_v39  ;;  %v1771_v32 = vmul.f32 %v4260_v60, %v4260_v60  ;;  %v1772_v1 = vmul.f32 %v4282_v13, %v4282_v13 }
 0x19a   :  { %v1566_v48 = vadd.f32 %v1565_v15, %v1564_v46  ;;  %v2002_v52 = vadd.f32 %v2001_v34, %v2000_v22  ;;  %v1571_v46 = vsel %vm7133_vm0, %v4260_v60, 0.0  ;;  %v1573_v34 = vsel %vm7133_vm0, %v4282_v13, 0.0 }
 0x19b   :  { %v2009_v37 = vsel %vm7133_vm0, %v1771_v32, 0.0  ;;  %v2011_v5 = vsel %vm7133_vm0, %v1772_v1, 0.0 }
 0x19c   :  { %v2004_v10 = vadd.f32 %v2003_v54, %v2002_v52  ;;  %v1568_v39 = vadd.f32 %v1567_v2, %v1566_v48  ;;  %v1773_v52 = vmul.f32 %v4278_v44, %v4278_v44  ;;  %v1774_v2 = vmul.f32 %v4300_v51, %v4300_v51 }
 0x19e   :  { %v1570_v15 = vadd.f32 %v1569_v20, %v1568_v39  ;;  %v2006_v22 = vadd.f32 %v2005_v0, %v2004_v10  ;;  %v1575_v39 = vsel %vm7133_vm0, %v4278_v44, 0.0  ;;  %v1577_v0 = vsel %vm7133_vm0, %v4300_v51, 0.0 }
 0x19f   :  { %v2013_v32 = vsel %vm7133_vm0, %v1773_v52, 0.0  ;;  %v2015_v1 = vsel %vm7133_vm0, %v1774_v2, 0.0 }
 0x1a0   :  { %v2008_v54 = vadd.f32 %v2007_v19, %v2006_v22  ;;  %v1572_v48 = vadd.f32 %v1571_v46, %v1570_v15  ;;  %v1775_v22 = vmul.f32 %v4296_v38, %v4296_v38  ;;  %v1776_v46 = vmul.f32 %v4318_v27, %v4318_v27 }
 0x1a2   :  { %v1574_v20 = vadd.f32 %v1573_v34, %v1572_v48  ;;  %v2010_v10 = vadd.f32 %v2009_v37, %v2008_v54  ;;  %v1579_v48 = vsel %vm7133_vm0, %v4296_v38, 0.0  ;;  %v1581_v37 = vsel %vm7133_vm0, %v4318_v27, 0.0 }
 0x1a3   :  { %v2017_v52 = vsel %vm7133_vm0, %v1775_v22, 0.0  ;;  %v2019_v2 = vsel %vm7133_vm0, %v1776_v46, 0.0 }
 0x1a4   :  { %v2012_v19 = vadd.f32 %v2011_v5, %v2010_v10  ;;  %v1576_v15 = vadd.f32 %v1575_v39, %v1574_v20  ;;  %v1777_v10 = vmul.f32 %v4314_v26, %v4314_v26  ;;  %v1778_v39 = vmul.f32 %v4336_v7, %v4336_v7 }
 0x1a6   :  { %v1578_v34 = vadd.f32 %v1577_v0, %v1576_v15  ;;  %v2014_v54 = vadd.f32 %v2013_v32, %v2012_v19  ;;  %v1583_v15 = vsel %vm7133_vm0, %v4314_v26, 0.0  ;;  %v1585_v32 = vsel %vm7133_vm0, %v4336_v7, 0.0  ;;  %v7383_v7 = vld [vmem:[#allocation56_spill] sm:$0xff] }
 0x1a7   :  { %v2021_v22 = vsel %vm7133_vm0, %v1777_v10, 0.0  ;;  %v2023_v46 = vsel %vm7133_vm0, %v1778_v39, 0.0 }
 0x1a8   :  { %v2016_v5 = vadd.f32 %v2015_v1, %v2014_v54  ;;  %v1580_v20 = vadd.f32 %v1579_v48, %v1578_v34  ;;  %v1779_v54 = vmul.f32 %v4332_v59, %v4332_v59  ;;  %v1780_v48 = vmul.f32 %v4354_v53, %v4354_v53 }
 0x1aa   :  { %v1582_v0 = vadd.f32 %v1581_v37, %v1580_v20  ;;  %v2018_v19 = vadd.f32 %v2017_v52, %v2016_v5  ;;  %v1587_v20 = vsel %vm7133_vm0, %v4332_v59, 0.0  ;;  %v1589_v52 = vsel %vm7133_vm0, %v4354_v53, 0.0 }
 0x1ab   :  { %v2025_v10 = vsel %vm7133_vm0, %v1779_v54, 0.0  ;;  %v2027_v39 = vsel %vm7133_vm0, %v1780_v48, 0.0 }
 0x1ac   :  { %v2020_v1 = vadd.f32 %v2019_v2, %v2018_v19  ;;  %v1584_v34 = vadd.f32 %v1583_v15, %v1582_v0  ;;  %v1781_v19 = vmul.f32 %v4350_v21, %v4350_v21  ;;  %v1782_v15 = vmul.f32 %v4372_v36, %v4372_v36 }
 0x1ae   :  { %v1586_v37 = vadd.f32 %v1585_v32, %v1584_v34  ;;  %v2022_v5 = vadd.f32 %v2021_v22, %v2020_v1  ;;  %v1591_v34 = vsel %vm7133_vm0, %v4350_v21, 0.0  ;;  %v1593_v22 = vsel %vm7133_vm0, %v4372_v36, 0.0 }
 0x1af   :  { %v2029_v54 = vsel %vm7133_vm0, %v1781_v19, 0.0  ;;  %v2031_v48 = vsel %vm7133_vm0, %v1782_v15, 0.0 }
 0x1b0   :  { %v2024_v2 = vadd.f32 %v2023_v46, %v2022_v5  ;;  %v1588_v0 = vadd.f32 %v1587_v20, %v1586_v37  ;;  %v1783_v5 = vmul.f32 %v4368_v63, %v4368_v63  ;;  %v1784_v20 = vmul.f32 %v4390_v18, %v4390_v18 }
 0x1b2   :  { %v1590_v32 = vadd.f32 %v1589_v52, %v1588_v0  ;;  %v2026_v1 = vadd.f32 %v2025_v10, %v2024_v2  ;;  %v1595_v0 = vsel %vm7133_vm0, %v4368_v63, 0.0  ;;  %v1597_v10 = vsel %vm7133_vm0, %v4390_v18, 0.0 }
 0x1b3   :  { %v2033_v19 = vsel %vm7133_vm0, %v1783_v5, 0.0  ;;  %v2035_v15 = vsel %vm7133_vm0, %v1784_v20, 0.0 }
 0x1b4   :  { %v2028_v46 = vadd.f32 %v2027_v39, %v2026_v1  ;;  %v1592_v37 = vadd.f32 %v1591_v34, %v1590_v32  ;;  %v1785_v1 = vmul.f32 %v4386_v12, %v4386_v12  ;;  %v1786_v34 = vmul.f32 %v4408_v4, %v4408_v4 }
 0x1b6   :  { %v1594_v52 = vadd.f32 %v1593_v22, %v1592_v37  ;;  %v2030_v2 = vadd.f32 %v2029_v54, %v2028_v46  ;;  %v1599_v37 = vsel %vm7133_vm0, %v4386_v12, 0.0  ;;  %v1601_v54 = vsel %vm7133_vm0, %v4408_v4, 0.0  ;;  %v7374_v4 = vld [vmem:[#allocation34_spill] sm:$0xff] }
 0x1b7   :  { %v2037_v5 = vsel %vm7133_vm0, %v1785_v1, 0.0  ;;  %v2039_v20 = vsel %vm7133_vm0, %v1786_v34, 0.0 }
 0x1b8   :  { %v2032_v39 = vadd.f32 %v2031_v48, %v2030_v2  ;;  %v1596_v32 = vadd.f32 %v1595_v0, %v1594_v52  ;;  %v1787_v2 = vmul.f32 %v4404_v61, %v4404_v61  ;;  %v1788_v0 = vmul.f32 %v4426_v55, %v4426_v55 }
 0x1ba   :  { %v1598_v22 = vadd.f32 %v1597_v10, %v1596_v32  ;;  %v2034_v46 = vadd.f32 %v2033_v19, %v2032_v39  ;;  %v1603_v32 = vsel %vm7133_vm0, %v4404_v61, 0.0  ;;  %v1605_v19 = vsel %vm7133_vm0, %v4426_v55, 0.0  ;;  %v7372_v55 = vld [vmem:[#allocation30_spill] sm:$0xff]  ;;  %v7373_v61 = vld [vmem:[#allocation36_spill] sm:$0xff] }
 0x1bb   :  { %v2041_v1 = vsel %vm7133_vm0, %v1787_v2, 0.0  ;;  %v2043_v34 = vsel %vm7133_vm0, %v1788_v0, 0.0 }
 0x1bc   :  { %v2036_v48 = vadd.f32 %v2035_v15, %v2034_v46  ;;  %v1600_v52 = vadd.f32 %v1599_v37, %v1598_v22  ;;  %v1789_v46 = vmul.f32 %v4422_v58, %v4422_v58  ;;  %v1790_v37 = vmul.f32 %v4444_v43, %v4444_v43 }
 0x1be   :  { %v1602_v10 = vadd.f32 %v1601_v54, %v1600_v52  ;;  %v2038_v39 = vadd.f32 %v2037_v5, %v2036_v48  ;;  %v1607_v52 = vsel %vm7133_vm0, %v4422_v58, 0.0  ;;  %v1609_v5 = vsel %vm7133_vm0, %v4444_v43, 0.0  ;;  %v7335_v43 = vld [vmem:[#allocation105_spill] sm:$0xff] }
 0x1bf   :  { %v2045_v2 = vsel %vm7133_vm0, %v1789_v46, 0.0  ;;  %v2047_v0 = vsel %vm7133_vm0, %v1790_v37, 0.0  ;;  %v1794_v58 = vmul.f32 %v7335_v43, %v7335_v43 }
 0x1c0   :  { %v2040_v15 = vadd.f32 %v2039_v20, %v2038_v39  ;;  %v1604_v22 = vadd.f32 %v1603_v32, %v1602_v10  ;;  %v1791_v39 = vmul.f32 %v4440_v50, %v4440_v50  ;;  %v1792_v32 = vmul.f32 %v4462_v33, %v4462_v33 }
 0x1c2   :  { %v1606_v54 = vadd.f32 %v1605_v19, %v1604_v22  ;;  %v2042_v48 = vadd.f32 %v2041_v1, %v2040_v15  ;;  %v1611_v22 = vsel %vm7133_vm0, %v4440_v50, 0.0  ;;  %v1613_v1 = vsel %vm7133_vm0, %v4462_v33, 0.0  ;;  %v7337_v33 = vld [vmem:[#allocation109_spill] sm:$0xff] }
 0x1c3   :  { %v2049_v46 = vsel %vm7133_vm0, %v1791_v39, 0.0  ;;  %v2051_v37 = vsel %vm7133_vm0, %v1792_v32, 0.0  ;;  %v2055_v32 = vsel %vm7133_vm0, %v1794_v58, 0.0  ;;  %v1796_v50 = vmul.f32 %v7337_v33, %v7337_v33 }
 0x1c4   :  { %v2044_v20 = vadd.f32 %v2043_v34, %v2042_v48  ;;  %v1608_v10 = vadd.f32 %v1607_v52, %v1606_v54  ;;  %v7334_v48 = vld [vmem:[#allocation99_spill] sm:$0xff] }
 0x1c5   :  { %v1793_v52 = vmul.f32 %v7334_v48, %v7334_v48  ;;  %v2059_v58 = vsel %vm7133_vm0, %v1796_v50, 0.0 }
 0x1c6   :  { %v1610_v19 = vadd.f32 %v1609_v5, %v1608_v10  ;;  %v2046_v15 = vadd.f32 %v2045_v2, %v2044_v20  ;;  %v1615_v10 = vsel %vm7133_vm0, %v7334_v48, 0.0  ;;  %v1617_v2 = vsel %vm7133_vm0, %v7335_v43, 0.0  ;;  %v7339_v43 = vld [vmem:[#allocation113_spill] sm:$0xff] }
 0x1c7   :  { %v2053_v39 = vsel %vm7133_vm0, %v1793_v52, 0.0  ;;  %v1798_v48 = vmul.f32 %v7339_v43, %v7339_v43 }
 0x1c8   :  { %v2048_v34 = vadd.f32 %v2047_v0, %v2046_v15  ;;  %v1612_v54 = vadd.f32 %v1611_v22, %v1610_v19  ;;  %v7336_v15 = vld [vmem:[#allocation103_spill] sm:$0xff] }
 0x1c9   :  { %v1795_v22 = vmul.f32 %v7336_v15, %v7336_v15  ;;  %v2063_v50 = vsel %vm7133_vm0, %v1798_v48, 0.0 }
 0x1ca   :  { %v1614_v5 = vadd.f32 %v1613_v1, %v1612_v54  ;;  %v2050_v20 = vadd.f32 %v2049_v46, %v2048_v34  ;;  %v1619_v54 = vsel %vm7133_vm0, %v7336_v15, 0.0  ;;  %v1621_v46 = vsel %vm7133_vm0, %v7337_v33, 0.0  ;;  %v7341_v33 = vld [vmem:[#allocation117_spill] sm:$0xff] }
 0x1cb   :  { %v2057_v52 = vsel %vm7133_vm0, %v1795_v22, 0.0  ;;  %v1800_v15 = vmul.f32 %v7341_v33, %v7341_v33 }
 0x1cc   :  { %v2052_v0 = vadd.f32 %v2051_v37, %v2050_v20  ;;  %v1616_v19 = vadd.f32 %v1615_v10, %v1614_v5  ;;  %v7338_v20 = vld [vmem:[#allocation107_spill] sm:$0xff] }
 0x1cd   :  { %v1797_v10 = vmul.f32 %v7338_v20, %v7338_v20  ;;  %v2067_v48 = vsel %vm7133_vm0, %v1800_v15, 0.0 }
 0x1ce   :  { %v1618_v1 = vadd.f32 %v1617_v2, %v1616_v19  ;;  %v2054_v34 = vadd.f32 %v2053_v39, %v2052_v0  ;;  %v1623_v19 = vsel %vm7133_vm0, %v7338_v20, 0.0  ;;  %v1625_v39 = vsel %vm7133_vm0, %v7339_v43, 0.0  ;;  %v7343_v43 = vld [vmem:[#allocation121_spill] sm:$0xff] }
 0x1cf   :  { %v2061_v22 = vsel %vm7133_vm0, %v1797_v10, 0.0  ;;  %v1802_v20 = vmul.f32 %v7343_v43, %v7343_v43 }
 0x1d0   :  { %v2056_v37 = vadd.f32 %v2055_v32, %v2054_v34  ;;  %v1620_v5 = vadd.f32 %v1619_v54, %v1618_v1  ;;  %v7340_v34 = vld [vmem:[#allocation111_spill] sm:$0xff] }
 0x1d1   :  { %v1799_v54 = vmul.f32 %v7340_v34, %v7340_v34  ;;  %v2071_v15 = vsel %vm7133_vm0, %v1802_v20, 0.0 }
 0x1d2   :  { %v1622_v2 = vadd.f32 %v1621_v46, %v1620_v5  ;;  %v2058_v0 = vadd.f32 %v2057_v52, %v2056_v37  ;;  %v1627_v5 = vsel %vm7133_vm0, %v7340_v34, 0.0  ;;  %v1629_v52 = vsel %vm7133_vm0, %v7341_v33, 0.0  ;;  %v7345_v33 = vld [vmem:[#allocation125_spill] sm:$0xff] }
 0x1d3   :  { %v2065_v10 = vsel %vm7133_vm0, %v1799_v54, 0.0  ;;  %v1804_v34 = vmul.f32 %v7345_v33, %v7345_v33 }
 0x1d4   :  { %v2060_v32 = vadd.f32 %v2059_v58, %v2058_v0  ;;  %v1624_v1 = vadd.f32 %v1623_v19, %v1622_v2  ;;  %v7342_v0 = vld [vmem:[#allocation115_spill] sm:$0xff] }
 0x1d5   :  { %v1801_v19 = vmul.f32 %v7342_v0, %v7342_v0  ;;  %v2075_v20 = vsel %vm7133_vm0, %v1804_v34, 0.0 }
 0x1d6   :  { %v1626_v46 = vadd.f32 %v1625_v39, %v1624_v1  ;;  %v2062_v37 = vadd.f32 %v2061_v22, %v2060_v32  ;;  %v1631_v1 = vsel %vm7133_vm0, %v7342_v0, 0.0  ;;  %v1633_v22 = vsel %vm7133_vm0, %v7343_v43, 0.0  ;;  %v7347_v43 = vld [vmem:[#allocation129_spill] sm:$0xff] }
 0x1d7   :  { %v2069_v54 = vsel %vm7133_vm0, %v1801_v19, 0.0  ;;  %v1806_v0 = vmul.f32 %v7347_v43, %v7347_v43 }
 0x1d8   :  { %v2064_v58 = vadd.f32 %v2063_v50, %v2062_v37  ;;  %v1628_v2 = vadd.f32 %v1627_v5, %v1626_v46  ;;  %v7344_v37 = vld [vmem:[#allocation119_spill] sm:$0xff] }
 0x1d9   :  { %v1803_v5 = vmul.f32 %v7344_v37, %v7344_v37  ;;  %v2079_v34 = vsel %vm7133_vm0, %v1806_v0, 0.0 }
 0x1da   :  { %v1630_v39 = vadd.f32 %v1629_v52, %v1628_v2  ;;  %v2066_v32 = vadd.f32 %v2065_v10, %v2064_v58  ;;  %v1635_v2 = vsel %vm7133_vm0, %v7344_v37, 0.0  ;;  %v1637_v10 = vsel %vm7133_vm0, %v7345_v33, 0.0  ;;  %v7349_v33 = vld [vmem:[#allocation133_spill] sm:$0xff] }
 0x1db   :  { %v2073_v19 = vsel %vm7133_vm0, %v1803_v5, 0.0  ;;  %v1808_v37 = vmul.f32 %v7349_v33, %v7349_v33 }
 0x1dc   :  { %v2068_v50 = vadd.f32 %v2067_v48, %v2066_v32  ;;  %v1632_v46 = vadd.f32 %v1631_v1, %v1630_v39  ;;  %v7346_v32 = vld [vmem:[#allocation123_spill] sm:$0xff] }
 0x1dd   :  { %v1805_v1 = vmul.f32 %v7346_v32, %v7346_v32  ;;  %v2083_v0 = vsel %vm7133_vm0, %v1808_v37, 0.0 }
 0x1de   :  { %v1634_v52 = vadd.f32 %v1633_v22, %v1632_v46  ;;  %v2070_v58 = vadd.f32 %v2069_v54, %v2068_v50  ;;  %v1639_v46 = vsel %vm7133_vm0, %v7346_v32, 0.0  ;;  %v1641_v54 = vsel %vm7133_vm0, %v7347_v43, 0.0  ;;  %v7351_v43 = vld [vmem:[#allocation137_spill] sm:$0xff] }
 0x1df   :  { %v2077_v5 = vsel %vm7133_vm0, %v1805_v1, 0.0  ;;  %v1810_v32 = vmul.f32 %v7351_v43, %v7351_v43 }
 0x1e0   :  { %v2072_v48 = vadd.f32 %v2071_v15, %v2070_v58  ;;  %v1636_v39 = vadd.f32 %v1635_v2, %v1634_v52  ;;  %v7348_v58 = vld [vmem:[#allocation127_spill] sm:$0xff] }
 0x1e1   :  { %v1807_v2 = vmul.f32 %v7348_v58, %v7348_v58  ;;  %v2087_v37 = vsel %vm7133_vm0, %v1810_v32, 0.0 }
 0x1e2   :  { %v1638_v22 = vadd.f32 %v1637_v10, %v1636_v39  ;;  %v2074_v50 = vadd.f32 %v2073_v19, %v2072_v48  ;;  %v1643_v39 = vsel %vm7133_vm0, %v7348_v58, 0.0  ;;  %v1645_v19 = vsel %vm7133_vm0, %v7349_v33, 0.0  ;;  %v7371_v58 = vld [vmem:[#allocation32_spill] sm:$0xff] }
 0x1e3   :  { %v2081_v1 = vsel %vm7133_vm0, %v1807_v2, 0.0  ;;  %v1812_v33 = vmul.f32 %v4642_v6, %v4642_v6 }
 0x1e4   :  { %v2076_v15 = vadd.f32 %v2075_v20, %v2074_v50  ;;  %v1640_v52 = vadd.f32 %v1639_v46, %v1638_v22  ;;  %v7350_v50 = vld [vmem:[#allocation131_spill] sm:$0xff] }
 0x1e5   :  { %v1809_v46 = vmul.f32 %v7350_v50, %v7350_v50  ;;  %v2091_v32 = vsel %vm7133_vm0, %v1812_v33, 0.0 }
 0x1e6   :  { %v1642_v10 = vadd.f32 %v1641_v54, %v1640_v52  ;;  %v2078_v48 = vadd.f32 %v2077_v5, %v2076_v15  ;;  %v1647_v52 = vsel %vm7133_vm0, %v7350_v50, 0.0  ;;  %v1649_v5 = vsel %vm7133_vm0, %v7351_v43, 0.0  ;;  %v7370_v50 = vld [vmem:[#allocation26_spill] sm:$0xff] }
 0x1e7   :  { %v2085_v2 = vsel %vm7133_vm0, %v1809_v46, 0.0 }
 0x1e8   :  { %v2080_v20 = vadd.f32 %v2079_v34, %v2078_v48  ;;  %v1644_v22 = vadd.f32 %v1643_v39, %v1642_v10  ;;  %v7352_v48 = vld [vmem:[#allocation135_spill] sm:$0xff] }
 0x1e9   :  { %v1811_v39 = vmul.f32 %v7352_v48, %v7352_v48 }
 0x1ea   :  { %v1646_v54 = vadd.f32 %v1645_v19, %v1644_v22  ;;  %v2082_v15 = vadd.f32 %v2081_v1, %v2080_v20  ;;  %v1651_v22 = vsel %vm7133_vm0, %v7352_v48, 0.0  ;;  %v1653_v1 = vsel %vm7133_vm0, %v4642_v6, 0.0  ;;  %v7367_v6 = vld [vmem:[#allocation24_spill] sm:$0xff] }
 0x1eb   :  { %v2089_v46 = vsel %vm7133_vm0, %v1811_v39, 0.0 }
 0x1ec   :  { %v2084_v34 = vadd.f32 %v2083_v0, %v2082_v15  ;;  %v1648_v10 = vadd.f32 %v1647_v52, %v1646_v54  ;;  %v1813_v15 = vmul.f32 %v4640_v14, %v4640_v14  ;;  %v1814_v52 = vmul.f32 %v4656_v25, %v4656_v25 }
 0x1ee   :  { %v1650_v19 = vadd.f32 %v1649_v5, %v1648_v10  ;;  %v2086_v20 = vadd.f32 %v2085_v2, %v2084_v34  ;;  %v1655_v10 = vsel %vm7133_vm0, %v4640_v14, 0.0  ;;  %v1657_v2 = vsel %vm7133_vm0, %v4656_v25, 0.0 }
 0x1ef   :  { %v2093_v39 = vsel %vm7133_vm0, %v1813_v15, 0.0  ;;  %v2095_v33 = vsel %vm7133_vm0, %v1814_v52, 0.0 }
 0x1f0   :  { %v2088_v0 = vadd.f32 %v2087_v37, %v2086_v20  ;;  %v1652_v54 = vadd.f32 %v1651_v22, %v1650_v19  ;;  %v1815_v20 = vmul.f32 %v4654_v23, %v4654_v23  ;;  %v1816_v22 = vmul.f32 %v4670_v41, %v4670_v41 }
 0x1f2   :  { %v1654_v5 = vadd.f32 %v1653_v1, %v1652_v54  ;;  %v2090_v34 = vadd.f32 %v2089_v46, %v2088_v0  ;;  %v1659_v54 = vsel %vm7133_vm0, %v4654_v23, 0.0  ;;  %v1661_v46 = vsel %vm7133_vm0, %v4670_v41, 0.0 }
 0x1f3   :  { %v2097_v15 = vsel %vm7133_vm0, %v1815_v20, 0.0  ;;  %v2099_v52 = vsel %vm7133_vm0, %v1816_v22, 0.0 }
 0x1f4   :  { %v2092_v37 = vadd.f32 %v2091_v32, %v2090_v34  ;;  %v1656_v19 = vadd.f32 %v1655_v10, %v1654_v5  ;;  %v1817_v34 = vmul.f32 %v4668_v30, %v4668_v30  ;;  %v1818_v10 = vmul.f32 %v4684_v35, %v4684_v35 }
 0x1f6   :  { %v1658_v1 = vadd.f32 %v1657_v2, %v1656_v19  ;;  %v2094_v0 = vadd.f32 %v2093_v39, %v2092_v37  ;;  %v1663_v19 = vsel %vm7133_vm0, %v4668_v30, 0.0  ;;  %v1665_v39 = vsel %vm7133_vm0, %v4684_v35, 0.0 }
 0x1f7   :  { %v2101_v20 = vsel %vm7133_vm0, %v1817_v34, 0.0  ;;  %v2103_v22 = vsel %vm7133_vm0, %v1818_v10, 0.0 }
 0x1f8   :  { %v2096_v32 = vadd.f32 %v2095_v33, %v2094_v0  ;;  %v1660_v5 = vadd.f32 %v1659_v54, %v1658_v1  ;;  %v1819_v0 = vmul.f32 %v4682_v40, %v4682_v40 }
 0x1fa   :  { %v1662_v2 = vadd.f32 %v1661_v46, %v1660_v5  ;;  %v2098_v37 = vadd.f32 %v2097_v15, %v2096_v32  ;;  %v1667_v46 = vsel %vm7133_vm0, %v4682_v40, 0.0  ;;  %v2105_v15 = vsel %vm7133_vm0, %v1819_v0, 0.0 }
 0x1fb   :  { %v2124_v0 = vlaneseq }
 0x1fc   :  { %v2100_v33 = vadd.f32 %v2099_v52, %v2098_v37  ;;  %v1664_v1 = vadd.f32 %v1663_v19, %v1662_v2 }
 0x1fe   :  { %v1666_v54 = vadd.f32 %v1665_v39, %v1664_v1  ;;  %v2102_v41 = vadd.f32 %v2101_v20, %v2100_v33 }
 0x200   :  { %v1668_v32 = vadd.f32 %v1667_v46, %v1666_v54  ;;  %v2104_v5 = vadd.f32 %v2103_v22, %v2102_v41  ;;  %v2125_v46 = vshrl.u32 %v2124_v0, 7  ;;  %v7360_v0 = vld [vmem:[#allocation8_spill] sm:$0xff] }
 0x202   :  { %v1669_v30 = vrot.slane %v1668_v32, 4  ;;  %v2106_v35 = vadd.f32 %v2105_v15, %v2104_v5  ;;  %v7353_v15 = vld [vmem:[#allocation3_spill] sm:$0xff] }
 0x204   :  { %v1670_v52 = vadd.f32 %v1669_v30, %v1668_v32  ;;  %v2107_v2 = vrot.slane %v2106_v35, 4  ;;  %v2117_v30 = vld [vmem:[%s6987_s2] sm:$0x1] }
 0x206   :  { %v1671_v37 = vrot.slane %v1670_v52, 2  ;;  %v2108_v34 = vadd.f32 %v2107_v2, %v2106_v35  ;;  %v2126_v35 = vsub.s32 0, %v2125_v46  ;;  %v7354_v2 = vld [vmem:[#allocation2_spill] sm:$0xff] }
 0x208   :  { %v1672_v19 = vadd.f32 %v1671_v37, %v1670_v52  ;;  %v2109_v23 = vrot.slane %v2108_v34, 2 }
 0x20a   :  { %v1673_v25 = vrot.slane %v1672_v19, 1  ;;  %v2110_v14 = vadd.f32 %v2109_v23, %v2108_v34  ;;  %v2121_v23 = vld [vmem:[%s6987_s2 + $0x1] sm:$0x1]  ;;  %v7355_v34 = vld [vmem:[#allocation5_spill] sm:$0xff] }
 0x20c   :  { %v1674_v10 = vadd.f32 %v1673_v25, %v1672_v19  ;;  %v2111_v39 = vrot.slane %v2110_v14, 1 }
 0x20e   :  { %v1675_v33 = vmul.f32 0.00086805556, %v1674_v10  ;;  %v2112_v1 = vadd.f32 %v2111_v39, %v2110_v14  ;;  %v7356_v10 = vld [vmem:[#allocation4_spill] sm:$0xff] }
 0x210   :  { %v2113_v20 = vmul.f32 0.00086805556, %v2112_v1  ;;  %v2114_v40 = vmul.f32 %v1675_v33, %v1675_v33  ;;  %v7357_v1 = vld [vmem:[#allocation7_spill] sm:$0xff] }
 0x212   :  { %v2115_v54 = vsub.f32 %v2113_v20, %v2114_v40 }
 0x214   :  { %v2116_v41 = vmax.f32 %v2115_v54, 0.0 }
 0x216   :  { %v2118_v22 = vadd.f32 1e-05, %v2116_v41  ;;  %v7359_v41 = vld [vmem:[#allocation9_spill] sm:$0xff] }
 0x218   :  { %3389 = vrsqrt.f32 %v2118_v22 }
 0x222   :  { %v3390_v32 = vpop.eup %3389 }
 0x223   :  { %v2120_v5 = vmul.f32 %v3390_v32, %v2117_v30  ;;  %v7361_v30 = vld [vmem:[#allocation12_spill] sm:$0xff] }
 0x225   :  { %v2122_v14 = vmul.f32 %v2120_v5, %v1675_v33  ;;  %v5019_v25 = vrot.slane %v2120_v5, %v2126_v35  ;;  %v7358_v33 = vld [vmem:[#allocation6_spill] sm:$0xff] }
 0x226   :  { %v7362_v5 = vld [vmem:[#allocation10_spill] sm:$0xff] }
 0x227   :  { %v2123_v40 = vsub.f32 %v2121_v23, %v2122_v14  ;;  %v2128_v52 = vmul.f32 %v5019_v25, %v7353_v15  ;;  %v2129_v37 = vmul.f32 %v7354_v2, %v5019_v25  ;;  %v2130_v19 = vmul.f32 %v5019_v25, %v7355_v34  ;;  %v7363_v14 = vld [vmem:[#allocation16_spill] sm:$0xff]  ;;  %v7364_v2 = vld [vmem:[#allocation14_spill] sm:$0xff] }
 0x228   :  { %v2131_v39 = vmul.f32 %v7356_v10, %v5019_v25  ;;  %v2132_v20 = vmul.f32 %v5019_v25, %v7357_v1  ;;  %v2133_v54 = vmul.f32 %v7358_v33, %v5019_v25  ;;  %v2134_v22 = vmul.f32 %v5019_v25, %v7359_v41  ;;  %v7365_v10 = vld [vmem:[#allocation20_spill] sm:$0xff]  ;;  %v7366_v33 = vld [vmem:[#allocation18_spill] sm:$0xff] }
 0x229   :  { %v2135_v46 = vmul.f32 %v7360_v0, %v5019_v25  ;;  %v2136_v32 = vmul.f32 %v5019_v25, %v7361_v30  ;;  %v2137_v23 = vmul.f32 %v7362_v5, %v5019_v25  ;;  %v2138_v15 = vmul.f32 %v5019_v25, %v7363_v14  ;;  %v7368_v30 = vld [vmem:[#allocation22_spill] sm:$0xff]  ;;  %v7369_v5 = vld [vmem:[#allocation28_spill] sm:$0xff] }
 0x22a   :  { %v2139_v34 = vmul.f32 %v7364_v2, %v5019_v25  ;;  %v2140_v1 = vmul.f32 %v5019_v25, %v7365_v10  ;;  %v2141_v41 = vmul.f32 %v7366_v33, %v5019_v25  ;;  %v2142_v0 = vmul.f32 %v5019_v25, %v7367_v6 }
 0x22b   :  { %v2143_v48 = vmul.f32 %v7368_v30, %v5019_v25  ;;  %v5053_v43 = vrot.slane %v2123_v40, %v2126_v35  ;;  %v2164_v14 = vmul.f32 %v5019_v25, %v7369_v5  ;;  %v2165_v2 = vmul.f32 %v7370_v50, %v5019_v25 }
 0x22c   :  { %v2166_v10 = vmul.f32 %v5019_v25, %v7371_v58  ;;  %v2167_v33 = vmul.f32 %v7372_v55, %v5019_v25  ;;  %v2168_v6 = vmul.f32 %v5019_v25, %v7373_v61  ;;  %v2169_v30 = vmul.f32 %v7374_v4, %v5019_v25 }
 0x22d   :  { %v5068_v35 = vadd.f32 %v5053_v43, %v2128_v52  ;;  %v5071_v40 = vadd.f32 %v5053_v43, %v2129_v37  ;;  %v5074_v50 = vadd.f32 %v5053_v43, %v2130_v19  ;;  %v5077_v58 = vadd.f32 %v5053_v43, %v2131_v39 }
 0x22e   :  { %v5080_v55 = vadd.f32 %v5053_v43, %v2132_v20  ;;  %v5083_v61 = vadd.f32 %v5053_v43, %v2133_v54  ;;  %v5086_v4 = vadd.f32 %v5053_v43, %v2134_v22  ;;  %v5089_v52 = vadd.f32 %v5053_v43, %v2135_v46 }
 0x22f   :  { %v5092_v37 = vadd.f32 %v5053_v43, %v2136_v32  ;;  %v5095_v19 = vadd.f32 %v5053_v43, %v2137_v23  ;;  %v5098_v39 = vadd.f32 %v5053_v43, %v2138_v15  ;;  %v5101_v20 = vadd.f32 %v5053_v43, %v2139_v34  ;;  %v7375_v23 = vld [vmem:[#allocation40_spill] sm:$0xff]  ;;  %v7376_v15 = vld [vmem:[#allocation38_spill] sm:$0xff] }
 0x230   :  { %v5104_v54 = vadd.f32 %v5053_v43, %v2140_v1  ;;  %v5107_v22 = vadd.f32 %v5053_v43, %v2141_v41  ;;  %v5110_v46 = vadd.f32 %v5053_v43, %v2142_v0  ;;  %v5113_v32 = vadd.f32 %v5053_v43, %v2143_v48  ;;  %v7377_v34 = vld [vmem:[#allocation44_spill] sm:$0xff]  ;;  %v7378_v1 = vld [vmem:[#allocation42_spill] sm:$0xff] }
 0x231   :  { %v2170_v5 = vmul.f32 %v5019_v25, %v7375_v23  ;;  %v2171_v12 = vmul.f32 %v7376_v15, %v5019_v25  ;;  %v2172_v18 = vmul.f32 %v5019_v25, %v7377_v34  ;;  %v2173_v63 = vmul.f32 %v7378_v1, %v5019_v25  ;;  %v7379_v41 = vld [vmem:[#allocation48_spill] sm:$0xff]  ;;  %v7380_v0 = vld [vmem:[#allocation46_spill] sm:$0xff] }
 0x232   :  { %v2174_v36 = vmul.f32 %v5019_v25, %v7379_v41  ;;  %v2175_v21 = vmul.f32 %v7380_v0, %v5019_v25  ;;  %v7381_v48 = vld [vmem:[#allocation52_spill] sm:$0xff]  ;;  %v7382_v23 = vld [vmem:[#allocation50_spill] sm:$0xff]  ;;  %v2178_v15 = vmul.f32 %v5019_v25, %v7383_v7  ;;  %v2180_v1 = vadd.f32 %v2164_v14, %v5053_v43 }
 0x233   :  { %v2176_v53 = vmul.f32 %v5019_v25, %v7381_v48  ;;  %v2177_v59 = vmul.f32 %v7382_v23, %v5019_v25  ;;  %v7384_v34 = vld [vmem:[#allocation54_spill] sm:$0xff]  ;;  %v2181_v27 = vadd.f32 %v2165_v2, %v5053_v43  ;;  %v2182_v41 = vadd.f32 %v2166_v10, %v5053_v43 }
 0x234   :  { %v2179_v26 = vmul.f32 %v7384_v34, %v5019_v25  ;;  %v2183_v0 = vadd.f32 %v2167_v33, %v5053_v43  ;;  %v2184_v38 = vadd.f32 %v2168_v6, %v5053_v43  ;;  %v2185_v48 = vadd.f32 %v2169_v30, %v5053_v43 }
 0x235   :  { %v2186_v23 = vadd.f32 %v2170_v5, %v5053_v43  ;;  %v2187_v51 = vadd.f32 %v2171_v12, %v5053_v43  ;;  %v2188_v7 = vadd.f32 %v2172_v18, %v5053_v43  ;;  %v2189_v34 = vadd.f32 %v2173_v63, %v5053_v43 }
 0x236   :  { %v2190_v14 = vadd.f32 %v2174_v36, %v5053_v43  ;;  %v2191_v2 = vadd.f32 %v2175_v21, %v5053_v43  ;;  %v2192_v10 = vadd.f32 %v2176_v53, %v5053_v43  ;;  %v2193_v33 = vadd.f32 %v2177_v59, %v5053_v43 }
 0x237   :  { %v2194_v6 = vadd.f32 %v2178_v15, %v5053_v43  ;;  %v2195_v30 = vadd.f32 %v2179_v26, %v5053_v43  ;;  %vm2196_vm1 = vcmp.gt.f32.partialorder %v2180_v1, %v5068_v35  ;;  %vm2197_vm2 = vcmp.gt.f32.partialorder %v2181_v27, %v5071_v40 }
 0x238   :  { %vm2198_vm3 = vcmp.gt.f32.partialorder %v2182_v41, %v5074_v50  ;;  %vm2199_vm4 = vcmp.gt.f32.partialorder %v2183_v0, %v5077_v58  ;;  %vm2200_vm5 = vcmp.gt.f32.partialorder %v2184_v38, %v5080_v55  ;;  %vm2201_vm6 = vcmp.gt.f32.partialorder %v2185_v48, %v5083_v61 }
 0x239   :  { %vm2202_vm7 = vcmp.gt.f32.partialorder %v2186_v23, %v5086_v4  ;;  %vm2203_vm8 = vcmp.gt.f32.partialorder %v2187_v51, %v5089_v52  ;;  %vm2204_vm9 = vcmp.gt.f32.partialorder %v2188_v7, %v5092_v37  ;;  %vm2205_vm10 = vcmp.gt.f32.partialorder %v2189_v34, %v5095_v19 }
 0x23a   :  { %vm2206_vm11 = vcmp.gt.f32.partialorder %v2190_v14, %v5098_v39  ;;  %vm2207_vm12 = vcmp.gt.f32.partialorder %v2191_v2, %v5101_v20  ;;  %vm2208_vm13 = vcmp.gt.f32.partialorder %v2192_v10, %v5104_v54  ;;  %vm2209_vm14 = vcmp.gt.f32.partialorder %v2193_v33, %v5107_v22 }
 0x23b   :  { %vm2210_vm15 = vcmp.gt.f32.partialorder %v2194_v6, %v5110_v46  ;;  %vm2211_vm0 = vcmp.gt.f32.partialorder %v2195_v30, %v5113_v32  ;;  %v5170_v18 = vsel %vm2196_vm1, %v2180_v1, %v5068_v35  ;;  %v5175_v36 = vsel %vm2197_vm2, %v2181_v27, %v5071_v40 }
 0x23c   :  { %v5180_v53 = vsel %vm2198_vm3, %v2182_v41, %v5074_v50  ;;  %v5185_v26 = vsel %vm2199_vm4, %v2183_v0, %v5077_v58  ;;  %v5190_v59 = vsel %vm2200_vm5, %v2184_v38, %v5080_v55  ;;  %v5195_v21 = vsel %vm2201_vm6, %v2185_v48, %v5083_v61  ;;  %v7389_v0 = vld [vmem:[#allocation68_spill] sm:$0xff]  ;;  %v7390_v48 = vld [vmem:[#allocation66_spill] sm:$0xff] }
 0x23d   :  { %v5200_v63 = vsel %vm2202_vm7, %v2186_v23, %v5086_v4  ;;  %v5205_v12 = vsel %vm2203_vm8, %v2187_v51, %v5089_v52  ;;  %v5210_v5 = vsel %vm2204_vm9, %v2188_v7, %v5092_v37  ;;  %v5215_v15 = vsel %vm2205_vm10, %v2189_v34, %v5095_v19  ;;  %v7385_v37 = vld [vmem:[#allocation60_spill] sm:$0xff]  ;;  %v7392_v7 = vld [vmem:[#allocation70_spill] sm:$0xff] }
 0x23e   :  { %v5220_v44 = vsel %vm2206_vm11, %v2190_v14, %v5098_v39  ;;  %v5225_v13 = vsel %vm2207_vm12, %v2191_v2, %v5101_v20  ;;  %v5230_v60 = vsel %vm2208_vm13, %v2192_v10, %v5104_v54  ;;  %v5235_v45 = vsel %vm2209_vm14, %v2193_v33, %v5107_v22  ;;  %v7386_v39 = vld [vmem:[#allocation58_spill] sm:$0xff]  ;;  %v7387_v54 = vld [vmem:[#allocation64_spill] sm:$0xff] }
 0x23f   :  { %v5240_v62 = vsel %vm2210_vm15, %v2194_v6, %v5110_v46  ;;  %v5245_v8 = vsel %vm2211_vm0, %v2195_v30, %v5113_v32  ;;  %v5249_v28 = vsel %vm2196_vm1, 1, %v3391_v16  ;;  %v5253_v42 = vsel %vm2197_vm2, 1, %v3391_v16  ;;  %v7388_v22 = vld [vmem:[#allocation62_spill] sm:$0xff]  ;;  %v7393_v14 = vld [vmem:[#allocation76_spill] sm:$0xff] }
 0x240   :  { %v5257_v56 = vsel %vm2198_vm3, 1, %v3391_v16  ;;  %v5261_v11 = vsel %vm2199_vm4, 1, %v3391_v16  ;;  %v5265_v17 = vsel %vm2200_vm5, 1, %v3391_v16  ;;  %v5269_v35 = vsel %vm2201_vm6, 1, %v3391_v16  ;;  %v7394_v10 = vld [vmem:[#allocation74_spill] sm:$0xff]  ;;  %v7395_v6 = vld [vmem:[#allocation80_spill] sm:$0xff] }
 0x241   :  { %v5273_v27 = vsel %vm2202_vm7, 1, %v3391_v16  ;;  %v5277_v40 = vsel %vm2203_vm8, 1, %v3391_v16  ;;  %v5281_v50 = vsel %vm2204_vm9, 1, %v3391_v16  ;;  %v5285_v38 = vsel %vm2205_vm10, 1, %v3391_v16 }
 0x242   :  { %v5289_v58 = vsel %vm2206_vm11, 1, %v3391_v16  ;;  %v5293_v55 = vsel %vm2207_vm12, 1, %v3391_v16  ;;  %v5297_v51 = vsel %vm2208_vm13, 1, %v3391_v16  ;;  %v5301_v61 = vsel %vm2209_vm14, 1, %v3391_v16 }
 0x243   :  { %v5305_v4 = vsel %vm2210_vm15, 1, %v3391_v16  ;;  %v5309_v52 = vsel %vm2211_vm0, 1, %v3391_v16  ;;  %v2244_v19 = vmul.f32 %v5019_v25, %v7385_v37  ;;  %v2245_v20 = vmul.f32 %v7386_v39, %v5019_v25  ;;  %v7391_v16 = vld [vmem:[#allocation72_spill] sm:$0xff]  ;;  %v7396_v37 = vld [vmem:[#allocation78_spill] sm:$0xff] }
 0x244   :  { %v2246_v1 = vmul.f32 %v5019_v25, %v7387_v54  ;;  %v2247_v41 = vmul.f32 %v7388_v22, %v5019_v25  ;;  %v2248_v46 = vmul.f32 %v5019_v25, %v7389_v0  ;;  %v2249_v32 = vmul.f32 %v7390_v48, %v5019_v25  ;;  %v7397_v54 = vld [vmem:[#allocation84_spill] sm:$0xff]  ;;  %v7398_v0 = vld [vmem:[#allocation82_spill] sm:$0xff] }
 0x245   :  { %v2250_v23 = vmul.f32 %v5019_v25, %v7391_v16  ;;  %v2251_v34 = vmul.f32 %v7392_v7, %v5019_v25  ;;  %v2252_v2 = vmul.f32 %v5019_v25, %v7393_v14  ;;  %v2253_v33 = vmul.f32 %v7394_v10, %v5019_v25  ;;  %v7399_v16 = vld [vmem:[#allocation88_spill] sm:$0xff]  ;;  %v7400_v14 = vld [vmem:[#allocation86_spill] sm:$0xff] }
 0x246   :  { %v2254_v30 = vmul.f32 %v5019_v25, %v7395_v6  ;;  %v2255_v39 = vmul.f32 %v7396_v37, %v5019_v25  ;;  %v2256_v22 = vmul.f32 %v5019_v25, %v7397_v54  ;;  %v2257_v48 = vmul.f32 %v7398_v0, %v5019_v25 }
 0x247   :  { %v2258_v7 = vmul.f32 %v5019_v25, %v7399_v16  ;;  %v2259_v47 = vmul.f32 %v7400_v14, %v5019_v25  ;;  %v2260_v10 = vadd.f32 %v2244_v19, %v5053_v43  ;;  %v2261_v57 = vadd.f32 %v2245_v20, %v5053_v43 }
 0x248   :  { %v2262_v6 = vadd.f32 %v2246_v1, %v5053_v43  ;;  %v2263_v37 = vadd.f32 %v2247_v41, %v5053_v43  ;;  %v2264_v24 = vadd.f32 %v2248_v46, %v5053_v43  ;;  %v2265_v54 = vadd.f32 %v2249_v32, %v5053_v43 }
 0x249   :  { %v2266_v0 = vadd.f32 %v2250_v23, %v5053_v43  ;;  %v2267_v29 = vadd.f32 %v2251_v34, %v5053_v43  ;;  %v2268_v16 = vadd.f32 %v2252_v2, %v5053_v43  ;;  %v2269_v14 = vadd.f32 %v2253_v33, %v5053_v43 }
 0x24a   :  { %v2270_v19 = vadd.f32 %v2254_v30, %v5053_v43  ;;  %v2271_v20 = vadd.f32 %v2255_v39, %v5053_v43  ;;  %v2272_v1 = vadd.f32 %v2256_v22, %v5053_v43  ;;  %v2273_v41 = vadd.f32 %v2257_v48, %v5053_v43 }
 0x24b   :  { %v2274_v46 = vadd.f32 %v2258_v7, %v5053_v43  ;;  %v2275_v32 = vadd.f32 %v2259_v47, %v5053_v43  ;;  %vm2276_vm0 = vcmp.gt.f32.partialorder %v2260_v10, %v5170_v18  ;;  %vm2277_vm1 = vcmp.gt.f32.partialorder %v2261_v57, %v5175_v36 }
 0x24c   :  { %vm2278_vm2 = vcmp.gt.f32.partialorder %v2262_v6, %v5180_v53  ;;  %vm2279_vm3 = vcmp.gt.f32.partialorder %v2263_v37, %v5185_v26  ;;  %vm2280_vm4 = vcmp.gt.f32.partialorder %v2264_v24, %v5190_v59  ;;  %vm2281_vm5 = vcmp.gt.f32.partialorder %v2265_v54, %v5195_v21 }
 0x24d   :  { %vm2282_vm6 = vcmp.gt.f32.partialorder %v2266_v0, %v5200_v63  ;;  %vm2283_vm7 = vcmp.gt.f32.partialorder %v2267_v29, %v5205_v12  ;;  %vm2284_vm8 = vcmp.gt.f32.partialorder %v2268_v16, %v5210_v5  ;;  %vm2285_vm9 = vcmp.gt.f32.partialorder %v2269_v14, %v5215_v15 }
 0x24e   :  { %vm2286_vm10 = vcmp.gt.f32.partialorder %v2270_v19, %v5220_v44  ;;  %vm2287_vm11 = vcmp.gt.f32.partialorder %v2271_v20, %v5225_v13  ;;  %vm2288_vm12 = vcmp.gt.f32.partialorder %v2272_v1, %v5230_v60  ;;  %vm2289_vm13 = vcmp.gt.f32.partialorder %v2273_v41, %v5235_v45 }
 0x24f   :  { %vm2290_vm14 = vcmp.gt.f32.partialorder %v2274_v46, %v5240_v62  ;;  %vm2291_vm15 = vcmp.gt.f32.partialorder %v2275_v32, %v5245_v8  ;;  %v5378_v47 = vsel %vm2276_vm0, %v2260_v10, %v5170_v18  ;;  %v5383_v23 = vsel %vm2277_vm1, %v2261_v57, %v5175_v36 }
 0x250   :  { %v5388_v34 = vsel %vm2278_vm2, %v2262_v6, %v5180_v53  ;;  %v5393_v2 = vsel %vm2279_vm3, %v2263_v37, %v5185_v26  ;;  %v5398_v33 = vsel %vm2280_vm4, %v2264_v24, %v5190_v59  ;;  %v5403_v30 = vsel %vm2281_vm5, %v2265_v54, %v5195_v21  ;;  %v7407_v53 = vld [vmem:[#allocation92_spill] sm:$0xff]  ;;  %v7408_v26 = vld [vmem:[#allocation90_spill] sm:$0xff] }
 0x251   :  { %v5408_v39 = vsel %vm2282_vm6, %v2266_v0, %v5200_v63  ;;  %v5413_v22 = vsel %vm2283_vm7, %v2267_v29, %v5205_v12  ;;  %v5418_v48 = vsel %vm2284_vm8, %v2268_v16, %v5210_v5  ;;  %v5423_v7 = vsel %vm2285_vm9, %v2269_v14, %v5215_v15  ;;  %v7409_v21 = vld [vmem:[#allocation96_spill] sm:$0xff]  ;;  %v7410_v63 = vld [vmem:[#allocation94_spill] sm:$0xff] }
 0x252   :  { %7401 = vst [vmem:[#allocation3_spill] sm:$0xff] %v5423_v7  ;;  %v5428_v3 = vsel %vm2286_vm10, %v2270_v19, %v5220_v44  ;;  %v5433_v9 = vsel %vm2287_vm11, %v2271_v20, %v5225_v13  ;;  %v5438_v49 = vsel %vm2288_vm12, %v2272_v1, %v5230_v60  ;;  %v5443_v31 = vsel %vm2289_vm13, %v2273_v41, %v5235_v45  ;;  %v7412_v15 = vld [vmem:[#allocation98_spill] sm:$0xff]  ;;  %v7419_v6 = vld [vmem:[#allocation116_spill] sm:$0xff] }
 0x253   :  { %7402 = vst [vmem:[#allocation2_spill] sm:$0xff] %v5428_v3  ;;  %7403 = vst [vmem:[#allocation5_spill] sm:$0xff] %v5433_v9  ;;  %v5448_v7 = vsel %vm2290_vm14, %v2274_v46, %v5240_v62  ;;  %v5453_v3 = vsel %vm2291_vm15, %v2275_v32, %v5245_v8  ;;  %v5458_v9 = vsel %vm2276_vm0, 2, %v5249_v28  ;;  %v5478_v28 = vsel %vm2280_vm4, 2, %v5265_v17  ;;  %v7411_v62 = vld [vmem:[#allocation100_spill] sm:$0xff]  ;;  %v7420_v54 = vld [vmem:[#allocation114_spill] sm:$0xff] }
 0x254   :  { %7404 = vst [vmem:[#allocation4_spill] sm:$0xff] %v5438_v49  ;;  %7405 = vst [vmem:[#allocation7_spill] sm:$0xff] %v5443_v31  ;;  %v5463_v49 = vsel %vm2277_vm1, 2, %v5253_v42  ;;  %v5468_v31 = vsel %vm2278_vm2, 2, %v5257_v56  ;;  %v5483_v57 = vsel %vm2281_vm5, 2, %v5269_v35  ;;  %v5488_v42 = vsel %vm2282_vm6, 2, %v5273_v27 }
 0x255   :  { %7406 = vst [vmem:[#allocation6_spill] sm:$0xff] %v5448_v7  ;;  %v5473_v7 = vsel %vm2279_vm3, 2, %v5261_v11  ;;  %v5493_v11 = vsel %vm2283_vm7, 2, %v5277_v40  ;;  %v5498_v24 = vsel %vm2284_vm8, 2, %v5281_v50  ;;  %v5503_v17 = vsel %vm2285_vm9, 2, %v5285_v38  ;;  %v7413_v35 = vld [vmem:[#allocation104_spill] sm:$0xff] }
 0x256   :  { %v5508_v56 = vsel %vm2286_vm10, 2, %v5289_v58  ;;  %v5513_v29 = vsel %vm2287_vm11, 2, %v5293_v55  ;;  %v5518_v18 = vsel %vm2288_vm12, 2, %v5297_v51  ;;  %v5523_v36 = vsel %vm2289_vm13, 2, %v5301_v61  ;;  %v7414_v40 = vld [vmem:[#allocation102_spill] sm:$0xff]  ;;  %v7415_v38 = vld [vmem:[#allocation108_spill] sm:$0xff] }
 0x257   :  { %v5528_v44 = vsel %vm2290_vm14, 2, %v5305_v4  ;;  %v5533_v13 = vsel %vm2291_vm15, 2, %v5309_v52  ;;  %v2324_v60 = vmul.f32 %v5019_v25, %v7407_v53  ;;  %v2325_v59 = vmul.f32 %v7408_v26, %v5019_v25  ;;  %v7416_v55 = vld [vmem:[#allocation106_spill] sm:$0xff]  ;;  %v7417_v61 = vld [vmem:[#allocation112_spill] sm:$0xff] }
 0x258   :  { %v2326_v45 = vmul.f32 %v5019_v25, %v7409_v21  ;;  %v2327_v12 = vmul.f32 %v7410_v63, %v5019_v25  ;;  %v2328_v5 = vmul.f32 %v5019_v25, %v7411_v62  ;;  %v2329_v8 = vmul.f32 %v7412_v15, %v5019_v25  ;;  %v7418_v52 = vld [vmem:[#allocation110_spill] sm:$0xff]  ;;  %v7421_v16 = vld [vmem:[#allocation120_spill] sm:$0xff] }
 0x259   :  { %v2330_v27 = vmul.f32 %v5019_v25, %v7413_v35  ;;  %v2331_v50 = vmul.f32 %v7414_v40, %v5019_v25  ;;  %v2332_v58 = vmul.f32 %v5019_v25, %v7415_v38  ;;  %v2333_v51 = vmul.f32 %v7416_v55, %v5019_v25  ;;  %v7422_v19 = vld [vmem:[#allocation118_spill] sm:$0xff]  ;;  %v7423_v35 = vld [vmem:[#allocation3_spill] sm:$0xff] }
 0x25a   :  { %v2334_v4 = vmul.f32 %v5019_v25, %v7417_v61  ;;  %v2335_v10 = vmul.f32 %v7418_v52, %v5019_v25  ;;  %v2336_v37 = vmul.f32 %v5019_v25, %v7419_v6  ;;  %v2337_v0 = vmul.f32 %v7420_v54, %v5019_v25  ;;  %v7425_v40 = vld [vmem:[#allocation5_spill] sm:$0xff] }
 0x25b   :  { %v2338_v14 = vmul.f32 %v5019_v25, %v7421_v16  ;;  %v2339_v20 = vmul.f32 %v7422_v19, %v5019_v25  ;;  %v2340_v1 = vadd.f32 %v2324_v60, %v5053_v43  ;;  %v2341_v41 = vadd.f32 %v2325_v59, %v5053_v43  ;;  %v7427_v38 = vld [vmem:[#allocation7_spill] sm:$0xff] }
 0x25c   :  { %v2342_v46 = vadd.f32 %v2326_v45, %v5053_v43  ;;  %v2343_v32 = vadd.f32 %v2327_v12, %v5053_v43  ;;  %v2344_v53 = vadd.f32 %v2328_v5, %v5053_v43  ;;  %v2345_v26 = vadd.f32 %v2329_v8, %v5053_v43 }
 0x25d   :  { %v2346_v21 = vadd.f32 %v2330_v27, %v5053_v43  ;;  %v2347_v63 = vadd.f32 %v2331_v50, %v5053_v43  ;;  %v2348_v62 = vadd.f32 %v2332_v58, %v5053_v43  ;;  %v2349_v15 = vadd.f32 %v2333_v51, %v5053_v43  ;;  %v7424_v27 = vld [vmem:[#allocation2_spill] sm:$0xff]  ;;  %v7426_v50 = vld [vmem:[#allocation4_spill] sm:$0xff] }
 0x25e   :  { %v2350_v60 = vadd.f32 %v2334_v4, %v5053_v43  ;;  %v2351_v59 = vadd.f32 %v2335_v10, %v5053_v43  ;;  %v2352_v45 = vadd.f32 %v2336_v37, %v5053_v43  ;;  %v2353_v12 = vadd.f32 %v2337_v0, %v5053_v43  ;;  %v7428_v58 = vld [vmem:[#allocation6_spill] sm:$0xff] }
 0x25f   :  { %v2354_v5 = vadd.f32 %v2338_v14, %v5053_v43  ;;  %v2355_v8 = vadd.f32 %v2339_v20, %v5053_v43  ;;  %vm2356_vm0 = vcmp.gt.f32.partialorder %v2340_v1, %v5378_v47  ;;  %vm2357_vm1 = vcmp.gt.f32.partialorder %v2341_v41, %v5383_v23 }
 0x260   :  { %vm2358_vm2 = vcmp.gt.f32.partialorder %v2342_v46, %v5388_v34  ;;  %vm2359_vm3 = vcmp.gt.f32.partialorder %v2343_v32, %v5393_v2  ;;  %vm2360_vm4 = vcmp.gt.f32.partialorder %v2344_v53, %v5398_v33  ;;  %vm2361_vm5 = vcmp.gt.f32.partialorder %v2345_v26, %v5403_v30 }
 0x261   :  { %vm2362_vm6 = vcmp.gt.f32.partialorder %v2346_v21, %v5408_v39  ;;  %vm2363_vm7 = vcmp.gt.f32.partialorder %v2347_v63, %v5413_v22  ;;  %vm2364_vm8 = vcmp.gt.f32.partialorder %v2348_v62, %v5418_v48  ;;  %vm2365_vm9 = vcmp.gt.f32.partialorder %v2349_v15, %v7423_v35 }
 0x262   :  { %vm2366_vm10 = vcmp.gt.f32.partialorder %v2350_v60, %v7424_v27  ;;  %vm2367_vm11 = vcmp.gt.f32.partialorder %v2351_v59, %v7425_v40  ;;  %vm2368_vm12 = vcmp.gt.f32.partialorder %v2352_v45, %v7426_v50  ;;  %vm2369_vm13 = vcmp.gt.f32.partialorder %v2353_v12, %v7427_v38 }
 0x263   :  { %vm2370_vm14 = vcmp.gt.f32.partialorder %v2354_v5, %v7428_v58  ;;  %vm2371_vm15 = vcmp.gt.f32.partialorder %v2355_v8, %v5453_v3  ;;  %v5602_v55 = vsel %vm2356_vm0, %v2340_v1, %v5378_v47  ;;  %v5607_v51 = vsel %vm2357_vm1, %v2341_v41, %v5383_v23  ;;  %v7442_v1 = vld [vmem:[#allocation134_spill] sm:$0xff] }
 0x264   :  { %v5612_v61 = vsel %vm2358_vm2, %v2342_v46, %v5388_v34  ;;  %v5617_v4 = vsel %vm2359_vm3, %v2343_v32, %v5393_v2  ;;  %v5622_v52 = vsel %vm2360_vm4, %v2344_v53, %v5398_v33  ;;  %v5627_v10 = vsel %vm2361_vm5, %v2345_v26, %v5403_v30  ;;  %v7443_v46 = vld [vmem:[#allocation13_spill] sm:$0xff]  ;;  %v7444_v53 = vld [vmem:[#allocation11_spill] sm:$0xff] }
 0x265   :  { %v5632_v6 = vsel %vm2362_vm6, %v2346_v21, %v5408_v39  ;;  %v5637_v37 = vsel %vm2363_vm7, %v2347_v63, %v5413_v22  ;;  %v5642_v54 = vsel %vm2364_vm8, %v2348_v62, %v5418_v48  ;;  %v5647_v0 = vsel %vm2365_vm9, %v2349_v15, %v7423_v35  ;;  %v7445_v21 = vld [vmem:[#allocation17_spill] sm:$0xff]  ;;  %v7446_v62 = vld [vmem:[#allocation15_spill] sm:$0xff] }
 0x266   :  { %7429 = vst [vmem:[#allocation9_spill] sm:$0xff] %v5647_v0  ;;  %v5652_v16 = vsel %vm2366_vm10, %v2350_v60, %v7424_v27  ;;  %v5657_v14 = vsel %vm2367_vm11, %v2351_v59, %v7425_v40  ;;  %v5662_v19 = vsel %vm2368_vm12, %v2352_v45, %v7426_v50  ;;  %v5667_v20 = vsel %vm2369_vm13, %v2353_v12, %v7427_v38  ;;  %v7447_v60 = vld [vmem:[#allocation21_spill] sm:$0xff]  ;;  %v7448_v45 = vld [vmem:[#allocation19_spill] sm:$0xff] }
 0x267   :  { %7430 = vst [vmem:[#allocation8_spill] sm:$0xff] %v5652_v16  ;;  %7431 = vst [vmem:[#allocation12_spill] sm:$0xff] %v5657_v14  ;;  %v5672_v0 = vsel %vm2370_vm14, %v2354_v5, %v7428_v58  ;;  %v5677_v16 = vsel %vm2371_vm15, %v2355_v8, %v5453_v3  ;;  %v5682_v14 = vsel %vm2356_vm0, 3, %v5458_v9  ;;  %v5702_v9 = vsel %vm2360_vm4, 3, %v5478_v28  ;;  %v7449_v5 = vld [vmem:[#allocation25_spill] sm:$0xff]  ;;  %v7450_v35 = vld [vmem:[#allocation23_spill] sm:$0xff] }
 0x268   :  { %7432 = vst [vmem:[#allocation10_spill] sm:$0xff] %v5662_v19  ;;  %7433 = vst [vmem:[#allocation16_spill] sm:$0xff] %v5667_v20  ;;  %v5687_v19 = vsel %vm2357_vm1, 3, %v5463_v49  ;;  %v5692_v20 = vsel %vm2358_vm2, 3, %v5468_v31  ;;  %v5707_v49 = vsel %vm2361_vm5, 3, %v5483_v57  ;;  %v5712_v31 = vsel %vm2362_vm6, 3, %v5488_v42 }
 0x269   :  { %7434 = vst [vmem:[#allocation14_spill] sm:$0xff] %v5672_v0  ;;  %v5697_v0 = vsel %vm2359_vm3, 3, %v5473_v7  ;;  %v5717_v47 = vsel %vm2363_vm7, 3, %v5493_v11  ;;  %v5722_v23 = vsel %vm2364_vm8, 3, %v5498_v24  ;;  %v5727_v34 = vsel %vm2365_vm9, 3, %v5503_v17  ;;  %v7435_v7 = vld [vmem:[#allocation124_spill] sm:$0xff] }
 0x26a   :  { %v5732_v2 = vsel %vm2366_vm10, 3, %v5508_v56  ;;  %v5737_v33 = vsel %vm2367_vm11, 3, %v5513_v29  ;;  %v5742_v30 = vsel %vm2368_vm12, 3, %v5518_v18  ;;  %v5747_v39 = vsel %vm2369_vm13, 3, %v5523_v36  ;;  %v7436_v57 = vld [vmem:[#allocation122_spill] sm:$0xff]  ;;  %v7437_v11 = vld [vmem:[#allocation128_spill] sm:$0xff] }
 0x26b   :  { %v5752_v22 = vsel %vm2370_vm14, 3, %v5528_v44  ;;  %v5757_v48 = vsel %vm2371_vm15, 3, %v5533_v13  ;;  %v2404_v28 = vmul.f32 %v5019_v25, %v7435_v7  ;;  %v2405_v42 = vmul.f32 %v7436_v57, %v5019_v25  ;;  %v7438_v17 = vld [vmem:[#allocation126_spill] sm:$0xff]  ;;  %v7439_v29 = vld [vmem:[#allocation132_spill] sm:$0xff] }
 0x26c   :  { %v2406_v24 = vmul.f32 %v5019_v25, %v7437_v11  ;;  %v2407_v56 = vmul.f32 %v7438_v17, %v5019_v25  ;;  %v2408_v18 = vmul.f32 %v5019_v25, %v7439_v29  ;;  %v7440_v36 = vld [vmem:[#allocation130_spill] sm:$0xff]  ;;  %v7441_v44 = vld [vmem:[#allocation136_spill] sm:$0xff]  ;;  %v2411_v41 = vmul.f32 %v7442_v1, %v5019_v25 }
 0x26d   :  { %v2409_v3 = vmul.f32 %v7440_v36, %v5019_v25  ;;  %v2410_v13 = vmul.f32 %v5019_v25, %v7441_v44  ;;  %v2412_v32 = vmul.f32 %v5019_v25, %v7443_v46  ;;  %v2413_v26 = vmul.f32 %v7444_v53, %v5019_v25  ;;  %v7451_v44 = vld [vmem:[#allocation9_spill] sm:$0xff] }
 0x26e   :  { %v2414_v63 = vmul.f32 %v5019_v25, %v7445_v21  ;;  %v2415_v15 = vmul.f32 %v7446_v62, %v5019_v25  ;;  %v2416_v59 = vmul.f32 %v5019_v25, %v7447_v60  ;;  %v2417_v12 = vmul.f32 %v7448_v45, %v5019_v25  ;;  %v7453_v1 = vld [vmem:[#allocation12_spill] sm:$0xff] }
 0x26f   :  { %v2418_v8 = vmul.f32 %v5019_v25, %v7449_v5  ;;  %v2419_v27 = vmul.f32 %v7450_v35, %v5019_v25  ;;  %v2420_v40 = vadd.f32 %v2404_v28, %v5053_v43  ;;  %v2421_v50 = vadd.f32 %v2405_v42, %v5053_v43  ;;  %v7455_v46 = vld [vmem:[#allocation16_spill] sm:$0xff] }
 0x270   :  { %v2422_v38 = vadd.f32 %v2406_v24, %v5053_v43  ;;  %v2423_v58 = vadd.f32 %v2407_v56, %v5053_v43  ;;  %v2424_v7 = vadd.f32 %v2408_v18, %v5053_v43  ;;  %v2425_v57 = vadd.f32 %v2409_v3, %v5053_v43 }
 0x271   :  { %v2426_v11 = vadd.f32 %v2410_v13, %v5053_v43  ;;  %v2427_v17 = vadd.f32 %v2411_v41, %v5053_v43  ;;  %v2428_v29 = vadd.f32 %v2412_v32, %v5053_v43  ;;  %v2429_v36 = vadd.f32 %v2413_v26, %v5053_v43  ;;  %v7452_v13 = vld [vmem:[#allocation8_spill] sm:$0xff]  ;;  %v7454_v41 = vld [vmem:[#allocation10_spill] sm:$0xff] }
 0x272   :  { %v2430_v28 = vadd.f32 %v2414_v63, %v5053_v43  ;;  %v2431_v42 = vadd.f32 %v2415_v15, %v5053_v43  ;;  %v2432_v24 = vadd.f32 %v2416_v59, %v5053_v43  ;;  %v2433_v56 = vadd.f32 %v2417_v12, %v5053_v43  ;;  %v7456_v32 = vld [vmem:[#allocation14_spill] sm:$0xff] }
 0x273   :  { %v2434_v18 = vadd.f32 %v2418_v8, %v5053_v43  ;;  %v2435_v3 = vadd.f32 %v2419_v27, %v5053_v43  ;;  %vm2436_vm0 = vcmp.gt.f32.partialorder %v2420_v40, %v5602_v55  ;;  %vm2437_vm1 = vcmp.gt.f32.partialorder %v2421_v50, %v5607_v51 }
 0x274   :  { %vm2438_vm2 = vcmp.gt.f32.partialorder %v2422_v38, %v5612_v61  ;;  %vm2439_vm3 = vcmp.gt.f32.partialorder %v2423_v58, %v5617_v4  ;;  %vm2440_vm4 = vcmp.gt.f32.partialorder %v2424_v7, %v5622_v52  ;;  %vm2441_vm5 = vcmp.gt.f32.partialorder %v2425_v57, %v5627_v10 }
 0x275   :  { %vm2442_vm6 = vcmp.gt.f32.partialorder %v2426_v11, %v5632_v6  ;;  %vm2443_vm7 = vcmp.gt.f32.partialorder %v2427_v17, %v5637_v37  ;;  %vm2444_vm8 = vcmp.gt.f32.partialorder %v2428_v29, %v5642_v54  ;;  %vm2445_vm9 = vcmp.gt.f32.partialorder %v2429_v36, %v7451_v44 }
 0x276   :  { %vm2446_vm10 = vcmp.gt.f32.partialorder %v2430_v28, %v7452_v13  ;;  %vm2447_vm11 = vcmp.gt.f32.partialorder %v2431_v42, %v7453_v1  ;;  %vm2448_vm12 = vcmp.gt.f32.partialorder %v2432_v24, %v7454_v41  ;;  %vm2449_vm13 = vcmp.gt.f32.partialorder %v2433_v56, %v7455_v46 }
 0x277   :  { %vm2450_vm14 = vcmp.gt.f32.partialorder %v2434_v18, %v7456_v32  ;;  %vm2451_vm15 = vcmp.gt.f32.partialorder %v2435_v3, %v5677_v16  ;;  %v5826_v53 = vsel %vm2436_vm0, %v2420_v40, %v5602_v55  ;;  %v5831_v26 = vsel %vm2437_vm1, %v2421_v50, %v5607_v51  ;;  %v7470_v40 = vld [vmem:[#allocation39_spill] sm:$0xff] }
 0x278   :  { %v5836_v21 = vsel %vm2438_vm2, %v2422_v38, %v5612_v61  ;;  %v5841_v63 = vsel %vm2439_vm3, %v2423_v58, %v5617_v4  ;;  %v5846_v62 = vsel %vm2440_vm4, %v2424_v7, %v5622_v52  ;;  %v5851_v15 = vsel %vm2441_vm5, %v2425_v57, %v5627_v10  ;;  %v7471_v38 = vld [vmem:[#allocation45_spill] sm:$0xff]  ;;  %v7472_v7 = vld [vmem:[#allocation43_spill] sm:$0xff] }
 0x279   :  { %v5856_v60 = vsel %vm2442_vm6, %v2426_v11, %v5632_v6  ;;  %v5861_v59 = vsel %vm2443_vm7, %v2427_v17, %v5637_v37  ;;  %v5866_v45 = vsel %vm2444_vm8, %v2428_v29, %v5642_v54  ;;  %v5871_v12 = vsel %vm2445_vm9, %v2429_v36, %v7451_v44  ;;  %v7473_v11 = vld [vmem:[#allocation49_spill] sm:$0xff]  ;;  %v7474_v29 = vld [vmem:[#allocation47_spill] sm:$0xff] }
 0x27a   :  { %7457 = vst [vmem:[#allocation20_spill] sm:$0xff] %v5871_v12  ;;  %v5876_v5 = vsel %vm2446_vm10, %v2430_v28, %v7452_v13  ;;  %v5881_v8 = vsel %vm2447_vm11, %v2431_v42, %v7453_v1  ;;  %v5886_v35 = vsel %vm2448_vm12, %v2432_v24, %v7454_v41  ;;  %v5891_v27 = vsel %vm2449_vm13, %v2433_v56, %v7455_v46  ;;  %v7475_v28 = vld [vmem:[#allocation53_spill] sm:$0xff]  ;;  %v7476_v24 = vld [vmem:[#allocation51_spill] sm:$0xff] }
 0x27b   :  { %7458 = vst [vmem:[#allocation18_spill] sm:$0xff] %v5876_v5  ;;  %7459 = vst [vmem:[#allocation24_spill] sm:$0xff] %v5881_v8  ;;  %v5896_v12 = vsel %vm2450_vm14, %v2434_v18, %v7456_v32  ;;  %v5901_v5 = vsel %vm2451_vm15, %v2435_v3, %v5677_v16  ;;  %v5906_v8 = vsel %vm2436_vm0, 4, %v5682_v14  ;;  %v5926_v55 = vsel %vm2440_vm4, 4, %v5702_v9  ;;  %v7477_v18 = vld [vmem:[#allocation57_spill] sm:$0xff]  ;;  %v7478_v44 = vld [vmem:[#allocation55_spill] sm:$0xff] }
 0x27c   :  { %7460 = vst [vmem:[#allocation22_spill] sm:$0xff] %v5886_v35  ;;  %7461 = vst [vmem:[#allocation28_spill] sm:$0xff] %v5891_v27  ;;  %v5911_v35 = vsel %vm2437_vm1, 4, %v5687_v19  ;;  %v5916_v27 = vsel %vm2438_vm2, 4, %v5692_v20  ;;  %v5931_v51 = vsel %vm2441_vm5, 4, %v5707_v49  ;;  %v5936_v61 = vsel %vm2442_vm6, 4, %v5712_v31 }
 0x27d   :  { %7462 = vst [vmem:[#allocation26_spill] sm:$0xff] %v5896_v12  ;;  %v5921_v12 = vsel %vm2439_vm3, 4, %v5697_v0  ;;  %v5941_v4 = vsel %vm2443_vm7, 4, %v5717_v47  ;;  %v5946_v52 = vsel %vm2444_vm8, 4, %v5722_v23  ;;  %v5951_v10 = vsel %vm2445_vm9, 4, %v5727_v34  ;;  %v7463_v20 = vld [vmem:[#allocation29_spill] sm:$0xff] }
 0x27e   :  { %v5956_v6 = vsel %vm2446_vm10, 4, %v5732_v2  ;;  %v5961_v37 = vsel %vm2447_vm11, 4, %v5737_v33  ;;  %v5966_v54 = vsel %vm2448_vm12, 4, %v5742_v30  ;;  %v5971_v0 = vsel %vm2449_vm13, 4, %v5747_v39  ;;  %v7464_v49 = vld [vmem:[#allocation27_spill] sm:$0xff]  ;;  %v7465_v47 = vld [vmem:[#allocation33_spill] sm:$0xff] }
 0x27f   :  { %v5976_v14 = vsel %vm2450_vm14, 4, %v5752_v22  ;;  %v5981_v19 = vsel %vm2451_vm15, 4, %v5757_v48  ;;  %v2484_v9 = vmul.f32 %v5019_v25, %v7463_v20  ;;  %v2485_v31 = vmul.f32 %v7464_v49, %v5019_v25  ;;  %v7466_v34 = vld [vmem:[#allocation31_spill] sm:$0xff]  ;;  %v7467_v33 = vld [vmem:[#allocation37_spill] sm:$0xff] }
 0x280   :  { %v2486_v23 = vmul.f32 %v5019_v25, %v7465_v47  ;;  %v2487_v2 = vmul.f32 %v7466_v34, %v5019_v25  ;;  %v2488_v30 = vmul.f32 %v5019_v25, %v7467_v33  ;;  %v7468_v39 = vld [vmem:[#allocation35_spill] sm:$0xff]  ;;  %v7469_v22 = vld [vmem:[#allocation41_spill] sm:$0xff]  ;;  %v2491_v50 = vmul.f32 %v7470_v40, %v5019_v25 }
 0x281   :  { %v2489_v16 = vmul.f32 %v7468_v39, %v5019_v25  ;;  %v2490_v48 = vmul.f32 %v5019_v25, %v7469_v22  ;;  %v2492_v58 = vmul.f32 %v5019_v25, %v7471_v38  ;;  %v2493_v57 = vmul.f32 %v7472_v7, %v5019_v25  ;;  %v7479_v22 = vld [vmem:[#allocation20_spill] sm:$0xff] }
 0x282   :  { %v2494_v17 = vmul.f32 %v5019_v25, %v7473_v11  ;;  %v2495_v36 = vmul.f32 %v7474_v29, %v5019_v25  ;;  %v2496_v42 = vmul.f32 %v5019_v25, %v7475_v28  ;;  %v2497_v56 = vmul.f32 %v7476_v24, %v5019_v25  ;;  %v7481_v40 = vld [vmem:[#allocation24_spill] sm:$0xff] }
 0x283   :  { %v2498_v3 = vmul.f32 %v5019_v25, %v7477_v18  ;;  %v2499_v13 = vmul.f32 %v7478_v44, %v5019_v25  ;;  %v2500_v1 = vadd.f32 %v2484_v9, %v5053_v43  ;;  %v2501_v41 = vadd.f32 %v2485_v31, %v5053_v43  ;;  %v7483_v38 = vld [vmem:[#allocation28_spill] sm:$0xff] }
 0x284   :  { %v2502_v46 = vadd.f32 %v2486_v23, %v5053_v43  ;;  %v2503_v32 = vadd.f32 %v2487_v2, %v5053_v43  ;;  %v2504_v20 = vadd.f32 %v2488_v30, %v5053_v43  ;;  %v2505_v49 = vadd.f32 %v2489_v16, %v5053_v43 }
 0x285   :  { %v2506_v47 = vadd.f32 %v2490_v48, %v5053_v43  ;;  %v2507_v34 = vadd.f32 %v2491_v50, %v5053_v43  ;;  %v2508_v33 = vadd.f32 %v2492_v58, %v5053_v43  ;;  %v2509_v39 = vadd.f32 %v2493_v57, %v5053_v43  ;;  %v7480_v48 = vld [vmem:[#allocation18_spill] sm:$0xff] }
 0x286   :  { %v2510_v9 = vadd.f32 %v2494_v17, %v5053_v43  ;;  %v2511_v31 = vadd.f32 %v2495_v36, %v5053_v43  ;;  %v2512_v23 = vadd.f32 %v2496_v42, %v5053_v43  ;;  %v2513_v2 = vadd.f32 %v2497_v56, %v5053_v43  ;;  %v7482_v50 = vld [vmem:[#allocation22_spill] sm:$0xff] }
 0x287   :  { %v2514_v30 = vadd.f32 %v2498_v3, %v5053_v43  ;;  %v2515_v16 = vadd.f32 %v2499_v13, %v5053_v43  ;;  %vm2516_vm0 = vcmp.gt.f32.partialorder %v2500_v1, %v5826_v53  ;;  %vm2517_vm1 = vcmp.gt.f32.partialorder %v2501_v41, %v5831_v26  ;;  %v7484_v58 = vld [vmem:[#allocation26_spill] sm:$0xff] }
 0x288   :  { %vm2518_vm2 = vcmp.gt.f32.partialorder %v2502_v46, %v5836_v21  ;;  %vm2519_vm3 = vcmp.gt.f32.partialorder %v2503_v32, %v5841_v63  ;;  %vm2520_vm4 = vcmp.gt.f32.partialorder %v2504_v20, %v5846_v62  ;;  %vm2521_vm5 = vcmp.gt.f32.partialorder %v2505_v49, %v5851_v15 }
 0x289   :  { %vm2522_vm6 = vcmp.gt.f32.partialorder %v2506_v47, %v5856_v60  ;;  %vm2523_vm7 = vcmp.gt.f32.partialorder %v2507_v34, %v5861_v59  ;;  %vm2524_vm8 = vcmp.gt.f32.partialorder %v2508_v33, %v5866_v45  ;;  %vm2525_vm9 = vcmp.gt.f32.partialorder %v2509_v39, %v7479_v22 }
 0x28a   :  { %vm2526_vm10 = vcmp.gt.f32.partialorder %v2510_v9, %v7480_v48  ;;  %vm2527_vm11 = vcmp.gt.f32.partialorder %v2511_v31, %v7481_v40  ;;  %vm2528_vm12 = vcmp.gt.f32.partialorder %v2512_v23, %v7482_v50  ;;  %vm2529_vm13 = vcmp.gt.f32.partialorder %v2513_v2, %v7483_v38 }
 0x28b   :  { %vm2530_vm14 = vcmp.gt.f32.partialorder %v2514_v30, %v7484_v58  ;;  %vm2531_vm15 = vcmp.gt.f32.partialorder %v2515_v16, %v5901_v5  ;;  %v6050_v7 = vsel %vm2516_vm0, %v2500_v1, %v5826_v53  ;;  %v6055_v57 = vsel %vm2517_vm1, %v2501_v41, %v5831_v26  ;;  %v7498_v1 = vld [vmem:[#allocation71_spill] sm:$0xff] }
 0x28c   :  { %v6060_v11 = vsel %vm2518_vm2, %v2502_v46, %v5836_v21  ;;  %v6065_v17 = vsel %vm2519_vm3, %v2503_v32, %v5841_v63  ;;  %v6070_v29 = vsel %vm2520_vm4, %v2504_v20, %v5846_v62  ;;  %v6075_v36 = vsel %vm2521_vm5, %v2505_v49, %v5851_v15  ;;  %v7499_v46 = vld [vmem:[#allocation77_spill] sm:$0xff]  ;;  %v7500_v20 = vld [vmem:[#allocation75_spill] sm:$0xff] }
 0x28d   :  { %v6080_v28 = vsel %vm2522_vm6, %v2506_v47, %v5856_v60  ;;  %v6085_v42 = vsel %vm2523_vm7, %v2507_v34, %v5861_v59  ;;  %v6090_v24 = vsel %vm2524_vm8, %v2508_v33, %v5866_v45  ;;  %v6095_v56 = vsel %vm2525_vm9, %v2509_v39, %v7479_v22  ;;  %v7501_v47 = vld [vmem:[#allocation81_spill] sm:$0xff]  ;;  %v7502_v33 = vld [vmem:[#allocation79_spill] sm:$0xff] }
 0x28e   :  { %7485 = vst [vmem:[#allocation32_spill] sm:$0xff] %v6095_v56  ;;  %v6100_v18 = vsel %vm2526_vm10, %v2510_v9, %v7480_v48  ;;  %v6105_v3 = vsel %vm2527_vm11, %v2511_v31, %v7481_v40  ;;  %v6110_v44 = vsel %vm2528_vm12, %v2512_v23, %v7482_v50  ;;  %v6115_v13 = vsel %vm2529_vm13, %v2513_v2, %v7483_v38  ;;  %v7503_v9 = vld [vmem:[#allocation85_spill] sm:$0xff]  ;;  %v7504_v23 = vld [vmem:[#allocation83_spill] sm:$0xff] }
 0x28f   :  { %7486 = vst [vmem:[#allocation30_spill] sm:$0xff] %v6100_v18  ;;  %7487 = vst [vmem:[#allocation36_spill] sm:$0xff] %v6105_v3  ;;  %v6120_v56 = vsel %vm2530_vm14, %v2514_v30, %v7484_v58  ;;  %v6125_v18 = vsel %vm2531_vm15, %v2515_v16, %v5901_v5  ;;  %v6130_v3 = vsel %vm2516_vm0, 5, %v5906_v8  ;;  %v6150_v53 = vsel %vm2520_vm4, 5, %v5926_v55  ;;  %v7505_v30 = vld [vmem:[#allocation89_spill] sm:$0xff]  ;;  %v7506_v22 = vld [vmem:[#allocation87_spill] sm:$0xff] }
 0x290   :  { %7488 = vst [vmem:[#allocation34_spill] sm:$0xff] %v6110_v44  ;;  %7489 = vst [vmem:[#allocation40_spill] sm:$0xff] %v6115_v13  ;;  %v6135_v44 = vsel %vm2517_vm1, 5, %v5911_v35  ;;  %v6140_v13 = vsel %vm2518_vm2, 5, %v5916_v27  ;;  %v6155_v26 = vsel %vm2521_vm5, 5, %v5931_v51  ;;  %v6160_v21 = vsel %vm2522_vm6, 5, %v5936_v61 }
 0x291   :  { %7490 = vst [vmem:[#allocation38_spill] sm:$0xff] %v6120_v56  ;;  %v6145_v56 = vsel %vm2519_vm3, 5, %v5921_v12  ;;  %v6165_v63 = vsel %vm2523_vm7, 5, %v5941_v4  ;;  %v6170_v62 = vsel %vm2524_vm8, 5, %v5946_v52  ;;  %v6175_v15 = vsel %vm2525_vm9, 5, %v5951_v10  ;;  %v7491_v27 = vld [vmem:[#allocation61_spill] sm:$0xff] }
 0x292   :  { %v6180_v60 = vsel %vm2526_vm10, 5, %v5956_v6  ;;  %v6185_v59 = vsel %vm2527_vm11, 5, %v5961_v37  ;;  %v6190_v45 = vsel %vm2528_vm12, 5, %v5966_v54  ;;  %v6195_v12 = vsel %vm2529_vm13, 5, %v5971_v0  ;;  %v7492_v51 = vld [vmem:[#allocation59_spill] sm:$0xff]  ;;  %v7493_v4 = vld [vmem:[#allocation65_spill] sm:$0xff] }
 0x293   :  { %v6200_v8 = vsel %vm2530_vm14, 5, %v5976_v14  ;;  %v6205_v35 = vsel %vm2531_vm15, 5, %v5981_v19  ;;  %v2564_v55 = vmul.f32 %v5019_v25, %v7491_v27  ;;  %v2565_v61 = vmul.f32 %v7492_v51, %v5019_v25  ;;  %v7494_v10 = vld [vmem:[#allocation63_spill] sm:$0xff]  ;;  %v7495_v37 = vld [vmem:[#allocation69_spill] sm:$0xff] }
 0x294   :  { %v2566_v52 = vmul.f32 %v5019_v25, %v7493_v4  ;;  %v2567_v6 = vmul.f32 %v7494_v10, %v5019_v25  ;;  %v2568_v54 = vmul.f32 %v5019_v25, %v7495_v37  ;;  %v7496_v0 = vld [vmem:[#allocation67_spill] sm:$0xff]  ;;  %v7497_v14 = vld [vmem:[#allocation73_spill] sm:$0xff]  ;;  %v2571_v41 = vmul.f32 %v7498_v1, %v5019_v25 }
 0x295   :  { %v2569_v5 = vmul.f32 %v7496_v0, %v5019_v25  ;;  %v2570_v19 = vmul.f32 %v5019_v25, %v7497_v14  ;;  %v2572_v32 = vmul.f32 %v5019_v25, %v7499_v46  ;;  %v2573_v49 = vmul.f32 %v7500_v20, %v5019_v25  ;;  %v7507_v14 = vld [vmem:[#allocation32_spill] sm:$0xff] }
 0x296   :  { %v2574_v34 = vmul.f32 %v5019_v25, %v7501_v47  ;;  %v2575_v39 = vmul.f32 %v7502_v33, %v5019_v25  ;;  %v2576_v31 = vmul.f32 %v5019_v25, %v7503_v9  ;;  %v2577_v2 = vmul.f32 %v7504_v23, %v5019_v25  ;;  %v7509_v1 = vld [vmem:[#allocation36_spill] sm:$0xff] }
 0x297   :  { %v2578_v16 = vmul.f32 %v5019_v25, %v7505_v30  ;;  %v2579_v48 = vmul.f32 %v7506_v22, %v5019_v25  ;;  %v2580_v40 = vadd.f32 %v2564_v55, %v5053_v43  ;;  %v2581_v50 = vadd.f32 %v2565_v61, %v5053_v43  ;;  %v7511_v46 = vld [vmem:[#allocation40_spill] sm:$0xff] }
 0x298   :  { %v2582_v38 = vadd.f32 %v2566_v52, %v5053_v43  ;;  %v2583_v58 = vadd.f32 %v2567_v6, %v5053_v43  ;;  %v2584_v27 = vadd.f32 %v2568_v54, %v5053_v43  ;;  %v2585_v51 = vadd.f32 %v2569_v5, %v5053_v43 }
 0x299   :  { %v2586_v4 = vadd.f32 %v2570_v19, %v5053_v43  ;;  %v2587_v10 = vadd.f32 %v2571_v41, %v5053_v43  ;;  %v2588_v37 = vadd.f32 %v2572_v32, %v5053_v43  ;;  %v2589_v0 = vadd.f32 %v2573_v49, %v5053_v43  ;;  %v7508_v19 = vld [vmem:[#allocation30_spill] sm:$0xff] }
 0x29a   :  { %v2590_v55 = vadd.f32 %v2574_v34, %v5053_v43  ;;  %v2591_v61 = vadd.f32 %v2575_v39, %v5053_v43  ;;  %v2592_v52 = vadd.f32 %v2576_v31, %v5053_v43  ;;  %v2593_v6 = vadd.f32 %v2577_v2, %v5053_v43  ;;  %v7510_v41 = vld [vmem:[#allocation34_spill] sm:$0xff] }
 0x29b   :  { %v2594_v54 = vadd.f32 %v2578_v16, %v5053_v43  ;;  %v2595_v5 = vadd.f32 %v2579_v48, %v5053_v43  ;;  %vm2596_vm0 = vcmp.gt.f32.partialorder %v2580_v40, %v6050_v7  ;;  %vm2597_vm1 = vcmp.gt.f32.partialorder %v2581_v50, %v6055_v57  ;;  %v7512_v32 = vld [vmem:[#allocation38_spill] sm:$0xff] }
 0x29c   :  { %vm2598_vm2 = vcmp.gt.f32.partialorder %v2582_v38, %v6060_v11  ;;  %vm2599_vm3 = vcmp.gt.f32.partialorder %v2583_v58, %v6065_v17  ;;  %vm2600_vm4 = vcmp.gt.f32.partialorder %v2584_v27, %v6070_v29  ;;  %vm2601_vm5 = vcmp.gt.f32.partialorder %v2585_v51, %v6075_v36 }
 0x29d   :  { %vm2602_vm6 = vcmp.gt.f32.partialorder %v2586_v4, %v6080_v28  ;;  %vm2603_vm7 = vcmp.gt.f32.partialorder %v2587_v10, %v6085_v42  ;;  %vm2604_vm8 = vcmp.gt.f32.partialorder %v2588_v37, %v6090_v24  ;;  %vm2605_vm9 = vcmp.gt.f32.partialorder %v2589_v0, %v7507_v14 }
 0x29e   :  { %vm2606_vm10 = vcmp.gt.f32.partialorder %v2590_v55, %v7508_v19  ;;  %vm2607_vm11 = vcmp.gt.f32.partialorder %v2591_v61, %v7509_v1  ;;  %vm2608_vm12 = vcmp.gt.f32.partialorder %v2592_v52, %v7510_v41  ;;  %vm2609_vm13 = vcmp.gt.f32.partialorder %v2593_v6, %v7511_v46 }
 0x29f   :  { %vm2610_vm14 = vcmp.gt.f32.partialorder %v2594_v54, %v7512_v32  ;;  %vm2611_vm15 = vcmp.gt.f32.partialorder %v2595_v5, %v6125_v18  ;;  %v6274_v20 = vsel %vm2596_vm0, %v2580_v40, %v6050_v7  ;;  %v6279_v49 = vsel %vm2597_vm1, %v2581_v50, %v6055_v57  ;;  %v7526_v40 = vld [vmem:[#allocation103_spill] sm:$0xff] }
 0x2a0   :  { %v6284_v47 = vsel %vm2598_vm2, %v2582_v38, %v6060_v11  ;;  %v6289_v34 = vsel %vm2599_vm3, %v2583_v58, %v6065_v17  ;;  %v6294_v33 = vsel %vm2600_vm4, %v2584_v27, %v6070_v29  ;;  %v6299_v39 = vsel %vm2601_vm5, %v2585_v51, %v6075_v36  ;;  %v7527_v38 = vld [vmem:[#allocation109_spill] sm:$0xff]  ;;  %v7528_v27 = vld [vmem:[#allocation107_spill] sm:$0xff] }
 0x2a1   :  { %v6304_v9 = vsel %vm2602_vm6, %v2586_v4, %v6080_v28  ;;  %v6309_v31 = vsel %vm2603_vm7, %v2587_v10, %v6085_v42  ;;  %v6314_v23 = vsel %vm2604_vm8, %v2588_v37, %v6090_v24  ;;  %v6319_v2 = vsel %vm2605_vm9, %v2589_v0, %v7507_v14  ;;  %v7529_v4 = vld [vmem:[#allocation113_spill] sm:$0xff]  ;;  %v7530_v37 = vld [vmem:[#allocation111_spill] sm:$0xff] }
 0x2a2   :  { %7513 = vst [vmem:[#allocation44_spill] sm:$0xff] %v6319_v2  ;;  %v6324_v30 = vsel %vm2606_vm10, %v2590_v55, %v7508_v19  ;;  %v6329_v16 = vsel %vm2607_vm11, %v2591_v61, %v7509_v1  ;;  %v6334_v22 = vsel %vm2608_vm12, %v2592_v52, %v7510_v41  ;;  %v6339_v48 = vsel %vm2609_vm13, %v2593_v6, %v7511_v46  ;;  %v7531_v55 = vld [vmem:[#allocation117_spill] sm:$0xff]  ;;  %v7532_v52 = vld [vmem:[#allocation115_spill] sm:$0xff] }
 0x2a3   :  { %7514 = vst [vmem:[#allocation42_spill] sm:$0xff] %v6324_v30  ;;  %7515 = vst [vmem:[#allocation48_spill] sm:$0xff] %v6329_v16  ;;  %v6344_v2 = vsel %vm2610_vm14, %v2594_v54, %v7512_v32  ;;  %v6349_v30 = vsel %vm2611_vm15, %v2595_v5, %v6125_v18  ;;  %v6354_v16 = vsel %vm2596_vm0, 6, %v6130_v3  ;;  %v6374_v7 = vsel %vm2600_vm4, 6, %v6150_v53  ;;  %v7533_v54 = vld [vmem:[#allocation121_spill] sm:$0xff]  ;;  %v7534_v14 = vld [vmem:[#allocation119_spill] sm:$0xff] }
 0x2a4   :  { %7516 = vst [vmem:[#allocation46_spill] sm:$0xff] %v6334_v22  ;;  %7517 = vst [vmem:[#allocation52_spill] sm:$0xff] %v6339_v48  ;;  %v6359_v22 = vsel %vm2597_vm1, 6, %v6135_v44  ;;  %v6364_v48 = vsel %vm2598_vm2, 6, %v6140_v13  ;;  %v6379_v57 = vsel %vm2601_vm5, 6, %v6155_v26  ;;  %v6384_v11 = vsel %vm2602_vm6, 6, %v6160_v21 }
 0x2a5   :  { %7518 = vst [vmem:[#allocation50_spill] sm:$0xff] %v6344_v2  ;;  %v6369_v2 = vsel %vm2599_vm3, 6, %v6145_v56  ;;  %v6389_v17 = vsel %vm2603_vm7, 6, %v6165_v63  ;;  %v6394_v29 = vsel %vm2604_vm8, 6, %v6170_v62  ;;  %v6399_v36 = vsel %vm2605_vm9, 6, %v6175_v15  ;;  %v7519_v13 = vld [vmem:[#allocation93_spill] sm:$0xff] }
 0x2a6   :  { %v6404_v28 = vsel %vm2606_vm10, 6, %v6180_v60  ;;  %v6409_v42 = vsel %vm2607_vm11, 6, %v6185_v59  ;;  %v6414_v24 = vsel %vm2608_vm12, 6, %v6190_v45  ;;  %v6419_v56 = vsel %vm2609_vm13, 6, %v6195_v12  ;;  %v7520_v26 = vld [vmem:[#allocation91_spill] sm:$0xff]  ;;  %v7521_v63 = vld [vmem:[#allocation97_spill] sm:$0xff] }
 0x2a7   :  { %v6424_v3 = vsel %vm2610_vm14, 6, %v6200_v8  ;;  %v6429_v44 = vsel %vm2611_vm15, 6, %v6205_v35  ;;  %v2644_v53 = vmul.f32 %v5019_v25, %v7519_v13  ;;  %v2645_v21 = vmul.f32 %v7520_v26, %v5019_v25  ;;  %v7522_v15 = vld [vmem:[#allocation95_spill] sm:$0xff]  ;;  %v7523_v59 = vld [vmem:[#allocation101_spill] sm:$0xff] }
 0x2a8   :  { %v2646_v62 = vmul.f32 %v5019_v25, %v7521_v63  ;;  %v2647_v60 = vmul.f32 %v7522_v15, %v5019_v25  ;;  %v2648_v45 = vmul.f32 %v5019_v25, %v7523_v59  ;;  %v7524_v12 = vld [vmem:[#allocation99_spill] sm:$0xff]  ;;  %v7525_v8 = vld [vmem:[#allocation105_spill] sm:$0xff]  ;;  %v2651_v50 = vmul.f32 %v7526_v40, %v5019_v25 }
 0x2a9   :  { %v2649_v18 = vmul.f32 %v7524_v12, %v5019_v25  ;;  %v2650_v35 = vmul.f32 %v5019_v25, %v7525_v8  ;;  %v2652_v58 = vmul.f32 %v5019_v25, %v7527_v38  ;;  %v2653_v51 = vmul.f32 %v7528_v27, %v5019_v25  ;;  %v7535_v8 = vld [vmem:[#allocation44_spill] sm:$0xff] }
 0x2aa   :  { %v2654_v10 = vmul.f32 %v5019_v25, %v7529_v4  ;;  %v2655_v0 = vmul.f32 %v7530_v37, %v5019_v25  ;;  %v2656_v61 = vmul.f32 %v5019_v25, %v7531_v55  ;;  %v2657_v6 = vmul.f32 %v7532_v52, %v5019_v25  ;;  %v7537_v40 = vld [vmem:[#allocation48_spill] sm:$0xff] }
 0x2ab   :  { %v2658_v5 = vmul.f32 %v5019_v25, %v7533_v54  ;;  %v2659_v19 = vmul.f32 %v7534_v14, %v5019_v25  ;;  %v2660_v1 = vadd.f32 %v2644_v53, %v5053_v43  ;;  %v2661_v41 = vadd.f32 %v2645_v21, %v5053_v43  ;;  %v7539_v38 = vld [vmem:[#allocation52_spill] sm:$0xff] }
 0x2ac   :  { %v2662_v46 = vadd.f32 %v2646_v62, %v5053_v43  ;;  %v2663_v32 = vadd.f32 %v2647_v60, %v5053_v43  ;;  %v2664_v13 = vadd.f32 %v2648_v45, %v5053_v43  ;;  %v2665_v26 = vadd.f32 %v2649_v18, %v5053_v43 }
 0x2ad   :  { %v2666_v63 = vadd.f32 %v2650_v35, %v5053_v43  ;;  %v2667_v15 = vadd.f32 %v2651_v50, %v5053_v43  ;;  %v2668_v59 = vadd.f32 %v2652_v58, %v5053_v43  ;;  %v2669_v12 = vadd.f32 %v2653_v51, %v5053_v43  ;;  %v7536_v35 = vld [vmem:[#allocation42_spill] sm:$0xff] }
 0x2ae   :  { %v2670_v53 = vadd.f32 %v2654_v10, %v5053_v43  ;;  %v2671_v21 = vadd.f32 %v2655_v0, %v5053_v43  ;;  %v2672_v62 = vadd.f32 %v2656_v61, %v5053_v43  ;;  %v2673_v60 = vadd.f32 %v2657_v6, %v5053_v43  ;;  %v7538_v50 = vld [vmem:[#allocation46_spill] sm:$0xff] }
 0x2af   :  { %v2674_v45 = vadd.f32 %v2658_v5, %v5053_v43  ;;  %v2675_v18 = vadd.f32 %v2659_v19, %v5053_v43  ;;  %vm2676_vm0 = vcmp.gt.f32.partialorder %v2660_v1, %v6274_v20  ;;  %vm2677_vm1 = vcmp.gt.f32.partialorder %v2661_v41, %v6279_v49  ;;  %v7540_v58 = vld [vmem:[#allocation50_spill] sm:$0xff] }
 0x2b0   :  { %vm2678_vm2 = vcmp.gt.f32.partialorder %v2662_v46, %v6284_v47  ;;  %vm2679_vm3 = vcmp.gt.f32.partialorder %v2663_v32, %v6289_v34  ;;  %vm2680_vm4 = vcmp.gt.f32.partialorder %v2664_v13, %v6294_v33  ;;  %vm2681_vm5 = vcmp.gt.f32.partialorder %v2665_v26, %v6299_v39 }
 0x2b1   :  { %vm2682_vm6 = vcmp.gt.f32.partialorder %v2666_v63, %v6304_v9  ;;  %vm2683_vm7 = vcmp.gt.f32.partialorder %v2667_v15, %v6309_v31  ;;  %vm2684_vm8 = vcmp.gt.f32.partialorder %v2668_v59, %v6314_v23  ;;  %vm2685_vm9 = vcmp.gt.f32.partialorder %v2669_v12, %v7535_v8 }
 0x2b2   :  { %vm2686_vm10 = vcmp.gt.f32.partialorder %v2670_v53, %v7536_v35  ;;  %vm2687_vm11 = vcmp.gt.f32.partialorder %v2671_v21, %v7537_v40  ;;  %vm2688_vm12 = vcmp.gt.f32.partialorder %v2672_v62, %v7538_v50  ;;  %vm2689_vm13 = vcmp.gt.f32.partialorder %v2673_v60, %v7539_v38 }
 0x2b3   :  { %vm2690_vm14 = vcmp.gt.f32.partialorder %v2674_v45, %v7540_v58  ;;  %vm2691_vm15 = vcmp.gt.f32.partialorder %v2675_v18, %v6349_v30  ;;  %v6498_v27 = vsel %vm2676_vm0, %v2660_v1, %v6274_v20  ;;  %v6503_v51 = vsel %vm2677_vm1, %v2661_v41, %v6279_v49  ;;  %v7554_v1 = vld [vmem:[#allocation135_spill] sm:$0xff] }
 0x2b4   :  { %v6508_v4 = vsel %vm2678_vm2, %v2662_v46, %v6284_v47  ;;  %v6513_v10 = vsel %vm2679_vm3, %v2663_v32, %v6289_v34  ;;  %v6518_v37 = vsel %vm2680_vm4, %v2664_v13, %v6294_v33  ;;  %v6523_v0 = vsel %vm2681_vm5, %v2665_v26, %v6299_v39  ;;  %v7555_v46 = vld [vmem:[#allocation139_spill] sm:$0xff]  ;;  %v7556_v13 = vld [vmem:[#allocation138_spill] sm:$0xff] }
 0x2b5   :  { %v6528_v55 = vsel %vm2682_vm6, %v2666_v63, %v6304_v9  ;;  %v6533_v61 = vsel %vm2683_vm7, %v2667_v15, %v6309_v31  ;;  %v6538_v52 = vsel %vm2684_vm8, %v2668_v59, %v6314_v23  ;;  %v6543_v6 = vsel %vm2685_vm9, %v2669_v12, %v7535_v8  ;;  %v7557_v63 = vld [vmem:[#allocation141_spill] sm:$0xff]  ;;  %v7558_v59 = vld [vmem:[#allocation140_spill] sm:$0xff] }
 0x2b6   :  { %7541 = vst [vmem:[#allocation56_spill] sm:$0xff] %v6543_v6  ;;  %v6548_v54 = vsel %vm2686_vm10, %v2670_v53, %v7536_v35  ;;  %v6553_v5 = vsel %vm2687_vm11, %v2671_v21, %v7537_v40  ;;  %v6558_v14 = vsel %vm2688_vm12, %v2672_v62, %v7538_v50  ;;  %v6563_v19 = vsel %vm2689_vm13, %v2673_v60, %v7539_v38  ;;  %v7559_v53 = vld [vmem:[#allocation143_spill] sm:$0xff]  ;;  %v7560_v62 = vld [vmem:[#allocation142_spill] sm:$0xff]  ;;  %v7562_v8 = vld [vmem:[#allocation144_spill] sm:$0xff] }
 0x2b7   :  { %7542 = vst [vmem:[#allocation54_spill] sm:$0xff] %v6548_v54  ;;  %7543 = vst [vmem:[#allocation60_spill] sm:$0xff] %v6553_v5  ;;  %v6568_v6 = vsel %vm2690_vm14, %v2674_v45, %v7540_v58  ;;  %v6573_v54 = vsel %vm2691_vm15, %v2675_v18, %v6349_v30  ;;  %v6578_v5 = vsel %vm2676_vm0, 7, %v6354_v16  ;;  %v6598_v20 = vsel %vm2680_vm4, 7, %v6374_v7  ;;  %v7561_v45 = vld [vmem:[#allocation145_spill] sm:$0xff] }
 0x2b8   :  { %7544 = vst [vmem:[#allocation58_spill] sm:$0xff] %v6558_v14  ;;  %7545 = vst [vmem:[#allocation64_spill] sm:$0xff] %v6563_v19  ;;  %v6583_v14 = vsel %vm2677_vm1, 7, %v6359_v22  ;;  %v6588_v19 = vsel %vm2678_vm2, 7, %v6364_v48  ;;  %v6603_v49 = vsel %vm2681_vm5, 7, %v6379_v57  ;;  %v6608_v47 = vsel %vm2682_vm6, 7, %v6384_v11 }
 0x2b9   :  { %7546 = vst [vmem:[#allocation62_spill] sm:$0xff] %v6568_v6  ;;  %v6593_v6 = vsel %vm2679_vm3, 7, %v6369_v2  ;;  %v6613_v34 = vsel %vm2683_vm7, 7, %v6389_v17  ;;  %v6618_v33 = vsel %vm2684_vm8, 7, %v6394_v29  ;;  %v6623_v39 = vsel %vm2685_vm9, 7, %v6399_v36  ;;  %v7547_v48 = vld [vmem:[#allocation125_spill] sm:$0xff] }
 0x2ba   :  { %v6628_v9 = vsel %vm2686_vm10, 7, %v6404_v28  ;;  %v6633_v31 = vsel %vm2687_vm11, 7, %v6409_v42  ;;  %v6638_v23 = vsel %vm2688_vm12, 7, %v6414_v24  ;;  %v6643_v2 = vsel %vm2689_vm13, 7, %v6419_v56  ;;  %v7548_v57 = vld [vmem:[#allocation123_spill] sm:$0xff]  ;;  %v7549_v17 = vld [vmem:[#allocation129_spill] sm:$0xff] }
 0x2bb   :  { %v6648_v16 = vsel %vm2690_vm14, 7, %v6424_v3  ;;  %v6653_v22 = vsel %vm2691_vm15, 7, %v6429_v44  ;;  %v2724_v7 = vmul.f32 %v5019_v25, %v7547_v48  ;;  %v2725_v11 = vmul.f32 %v7548_v57, %v5019_v25  ;;  %v7550_v36 = vld [vmem:[#allocation127_spill] sm:$0xff]  ;;  %v7551_v42 = vld [vmem:[#allocation133_spill] sm:$0xff] }
 0x2bc   :  { %v2726_v29 = vmul.f32 %v5019_v25, %v7549_v17  ;;  %v2727_v28 = vmul.f32 %v7550_v36, %v5019_v25  ;;  %v2728_v24 = vmul.f32 %v5019_v25, %v7551_v42  ;;  %v7552_v56 = vld [vmem:[#allocation131_spill] sm:$0xff]  ;;  %v7553_v3 = vld [vmem:[#allocation137_spill] sm:$0xff]  ;;  %v2731_v41 = vmul.f32 %v7554_v1, %v5019_v25 }
 0x2bd   :  { %v2729_v30 = vmul.f32 %v7552_v56, %v5019_v25  ;;  %v2730_v44 = vmul.f32 %v5019_v25, %v7553_v3  ;;  %v2732_v32 = vmul.f32 %v5019_v25, %v7555_v46  ;;  %v2733_v26 = vmul.f32 %v7556_v13, %v5019_v25 }
 0x2be   :  { %v2734_v15 = vmul.f32 %v5019_v25, %v7557_v63  ;;  %v2735_v12 = vmul.f32 %v7558_v59, %v5019_v25  ;;  %v2736_v21 = vmul.f32 %v5019_v25, %v7559_v53  ;;  %v2737_v60 = vmul.f32 %v7560_v62, %v5019_v25  ;;  %v7565_v3 = vld [vmem:[#allocation60_spill] sm:$0xff] }
 0x2bf   :  { %v2738_v18 = vmul.f32 %v5019_v25, %v7561_v45  ;;  %v2739_v35 = vmul.f32 %v7562_v8, %v5019_v25  ;;  %v2740_v40 = vadd.f32 %v2724_v7, %v5053_v43  ;;  %v2741_v50 = vadd.f32 %v2725_v11, %v5053_v43  ;;  %v7567_v1 = vld [vmem:[#allocation64_spill] sm:$0xff] }
 0x2c0   :  { %v2742_v38 = vadd.f32 %v2726_v29, %v5053_v43  ;;  %v2743_v58 = vadd.f32 %v2727_v28, %v5053_v43  ;;  %v2744_v48 = vadd.f32 %v2728_v24, %v5053_v43  ;;  %v2745_v57 = vadd.f32 %v2729_v30, %v5053_v43  ;;  %v7563_v30 = vld [vmem:[#allocation56_spill] sm:$0xff] }
 0x2c1   :  { %v2746_v17 = vadd.f32 %v2730_v44, %v5053_v43  ;;  %v2747_v36 = vadd.f32 %v2731_v41, %v5053_v43  ;;  %v2748_v42 = vadd.f32 %v2732_v32, %v5053_v43  ;;  %v2749_v25 = vadd.f32 %v2733_v26, %v5053_v43  ;;  %v7566_v44 = vld [vmem:[#allocation58_spill] sm:$0xff] }
 0x2c2   :  { %v2750_v7 = vadd.f32 %v2734_v15, %v5053_v43  ;;  %v2751_v11 = vadd.f32 %v2735_v12, %v5053_v43  ;;  %v2752_v29 = vadd.f32 %v2736_v21, %v5053_v43  ;;  %v2753_v28 = vadd.f32 %v2737_v60, %v5053_v43  ;;  %v7568_v41 = vld [vmem:[#allocation62_spill] sm:$0xff] }
 0x2c3   :  { %v2754_v24 = vadd.f32 %v2738_v18, %v5053_v43  ;;  %v2755_v56 = vadd.f32 %v2739_v35, %v5053_v43  ;;  %vm2756_vm0 = vcmp.gt.f32.partialorder %v2740_v40, %v6498_v27  ;;  %vm2757_vm1 = vcmp.gt.f32.partialorder %v2741_v50, %v6503_v51  ;;  %v7564_v43 = vld [vmem:[#allocation54_spill] sm:$0xff] }
 0x2c4   :  { %vm2758_vm2 = vcmp.gt.f32.partialorder %v2742_v38, %v6508_v4  ;;  %vm2759_vm3 = vcmp.gt.f32.partialorder %v2743_v58, %v6513_v10  ;;  %vm2760_vm4 = vcmp.gt.f32.partialorder %v2744_v48, %v6518_v37  ;;  %vm2761_vm5 = vcmp.gt.f32.partialorder %v2745_v57, %v6523_v0 }
 0x2c5   :  { %vm2762_vm6 = vcmp.gt.f32.partialorder %v2746_v17, %v6528_v55  ;;  %vm2763_vm7 = vcmp.gt.f32.partialorder %v2747_v36, %v6533_v61  ;;  %vm2764_vm8 = vcmp.gt.f32.partialorder %v2748_v42, %v6538_v52  ;;  %vm2765_vm9 = vcmp.gt.f32.partialorder %v2749_v25, %v7563_v30 }
 0x2c6   :  { %vm2766_vm10 = vcmp.gt.f32.partialorder %v2750_v7, %v7564_v43  ;;  %vm2767_vm11 = vcmp.gt.f32.partialorder %v2751_v11, %v7565_v3  ;;  %vm2768_vm12 = vcmp.gt.f32.partialorder %v2752_v29, %v7566_v44  ;;  %vm2769_vm13 = vcmp.gt.f32.partialorder %v2753_v28, %v7567_v1 }
 0x2c7   :  { %vm2770_vm14 = vcmp.gt.f32.partialorder %v2754_v24, %v7568_v41  ;;  %vm2771_vm15 = vcmp.gt.f32.partialorder %v2755_v56, %v6573_v54  ;;  %v2772_v46 = vsel %vm2756_vm0, %v2740_v40, %v6498_v27  ;;  %v2773_v32 = vsel %vm2757_vm1, %v2741_v50, %v6503_v51 }
 0x2c8   :  { %v6728_v13 = vsel %vm2758_vm2, %v2742_v38, %v6508_v4  ;;  %v6733_v26 = vsel %vm2759_vm3, %v2743_v58, %v6513_v10  ;;  %v6738_v63 = vsel %vm2760_vm4, %v2744_v48, %v6518_v37  ;;  %v6743_v15 = vsel %vm2761_vm5, %v2745_v57, %v6523_v0 }
 0x2c9   :  { %v6748_v59 = vsel %vm2762_vm6, %v2746_v17, %v6528_v55  ;;  %v6753_v12 = vsel %vm2763_vm7, %v2747_v36, %v6533_v61  ;;  %v6758_v53 = vsel %vm2764_vm8, %v2748_v42, %v6538_v52  ;;  %v6763_v21 = vsel %vm2765_vm9, %v2749_v25, %v7563_v30 }
 0x2ca   :  { %v6768_v62 = vsel %vm2766_vm10, %v2750_v7, %v7564_v43  ;;  %v6773_v60 = vsel %vm2767_vm11, %v2751_v11, %v7565_v3  ;;  %v6778_v45 = vsel %vm2768_vm12, %v2752_v29, %v7566_v44  ;;  %v6783_v18 = vsel %vm2769_vm13, %v2753_v28, %v7567_v1 }
 0x2cb   :  { %7569 = vst [vmem:[#allocation68_spill] sm:$0xff] %v6773_v60  ;;  %7570 = vst [vmem:[#allocation66_spill] sm:$0xff] %v6778_v45  ;;  %v6788_v8 = vsel %vm2770_vm14, %v2754_v24, %v7568_v41  ;;  %v6793_v35 = vsel %vm2771_vm15, %v2755_v56, %v6573_v54  ;;  %v2788_v60 = vsel %vm2756_vm0, 8, %v6578_v5  ;;  %v2789_v45 = vsel %vm2757_vm1, 8, %v6583_v14 }
 0x2cc   :  { %7571 = vst [vmem:[#allocation72_spill] sm:$0xff] %v6783_v18  ;;  %7572 = vst [vmem:[#allocation70_spill] sm:$0xff] %v6788_v8  ;;  %v2790_v18 = vsel %vm2758_vm2, 8, %v6588_v19  ;;  %v2791_v8 = vsel %vm2759_vm3, 8, %v6593_v6  ;;  %v2793_v27 = vsel %vm2761_vm5, 8, %v6603_v49  ;;  %vm7574_vm0 = vcmask 261120  }
 0x2cd   :  { %7573 = vst [vmem:[#allocation76_spill] sm:$0xff] %v6793_v35  ;;  %v2792_v35 = vsel %vm2760_vm4, 8, %v6598_v20  ;;  %2836 = vst.msk [vmem:[%s6988_s4] sm:$0xff] %vm7574_vm0, %v2788_v60  ;;  %v2794_v51 = vsel %vm2762_vm6, 8, %v6608_v47  ;;  %v2795_v4 = vsel %vm2763_vm7, 8, %v6613_v34  ;;  %v2796_v10 = vsel %vm2764_vm8, 8, %v6618_v33 }
 0x2ce   :  { %vm7575_vm1 = vmmov %vm7574_vm0  ;;  %v2797_v37 = vsel %vm2765_vm9, 8, %v6623_v39  ;;  %v2798_v0 = vsel %vm2766_vm10, 8, %v6628_v9  ;;  %v2799_v55 = vsel %vm2767_vm11, 8, %v6633_v31  ;;  %v2800_v61 = vsel %vm2768_vm12, 8, %v6638_v23 }
 0x2cf   :  { %2837 = vst.msk [vmem:[%s6988_s4 + $0x8] sm:$0xff] %vm7575_vm1, %v2789_v45  ;;  %vm7576_vm2 = vmmov %vm7574_vm0  ;;  %v2801_v52 = vsel %vm2769_vm13, 8, %v6643_v2  ;;  %v2802_v6 = vsel %vm2770_vm14, 8, %v6648_v16  ;;  %v2803_v5 = vsel %vm2771_vm15, 8, %v6653_v22  ;;  %v2804_v14 = vmax.f32 %v2772_v46, 0.0 }
 0x2d0   :  { %2838 = vst.msk [vmem:[%s6988_s4 + $0x10] sm:$0xff] %vm7576_vm2, %v2790_v18  ;;  %vm7577_vm3 = vmmov %vm7574_vm0  ;;  %v2805_v19 = vmax.f32 %v2773_v32, 0.0  ;;  %v2806_v54 = vmax.f32 %v6728_v13, 0.0  ;;  %v2807_v20 = vmax.f32 %v6733_v26, 0.0  ;;  %v2808_v49 = vmax.f32 %v6738_v63, 0.0 }
 0x2d1   :  { %2839 = vst.msk [vmem:[%s6988_s4 + $0x18] sm:$0xff] %vm7577_vm3, %v2791_v8  ;;  %vm7578_vm4 = vmmov %vm7574_vm0  ;;  %v2809_v47 = vmax.f32 %v6743_v15, 0.0  ;;  %v2810_v34 = vmax.f32 %v6748_v59, 0.0  ;;  %v2811_v33 = vmax.f32 %v6753_v12, 0.0  ;;  %v2812_v39 = vmax.f32 %v6758_v53, 0.0 }
 0x2d2   :  { %2840 = vst.msk [vmem:[%s6988_s4 + $0x20] sm:$0xff] %vm7578_vm4, %v2792_v35  ;;  %vm7579_vm5 = vmmov %vm7574_vm0  ;;  %v2813_v9 = vmax.f32 %v6763_v21, 0.0  ;;  %v2814_v31 = vmax.f32 %v6768_v62, 0.0  ;;  %v7591_v23 = vld [vmem:[#allocation68_spill] sm:$0xff]  ;;  %v7592_v16 = vld [vmem:[#allocation66_spill] sm:$0xff] }
 0x2d3   :  { %2841 = vst.msk [vmem:[%s6988_s4 + $0x28] sm:$0xff] %vm7579_vm5, %v2793_v27  ;;  %vm7580_vm6 = vmmov %vm7574_vm0  ;;  %v2815_v2 = vmax.f32 %v7591_v23, 0.0  ;;  %v2816_v22 = vmax.f32 %v7592_v16, 0.0  ;;  %v7593_v40 = vld [vmem:[#allocation72_spill] sm:$0xff]  ;;  %v7598_v38 = vld [vmem:[#allocation70_spill] sm:$0xff] }
 0x2d4   :  { %2842 = vst.msk [vmem:[%s6988_s4 + $0x30] sm:$0xff] %vm7580_vm6, %v2794_v51  ;;  %vm7581_vm7 = vmmov %vm7574_vm0  ;;  %v2817_v50 = vmax.f32 %v7593_v40, 0.0  ;;  %v2818_v58 = vmax.f32 %v7598_v38, 0.0  ;;  %v7599_v48 = vld [vmem:[#allocation76_spill] sm:$0xff] }
 0x2d5   :  { %2843 = vst.msk [vmem:[%s6988_s4 + $0x38] sm:$0xff] %vm7581_vm7, %v2795_v4  ;;  %vm7582_vm8 = vmmov %vm7574_vm0  ;;  %v2819_v57 = vmax.f32 %v7599_v48, 0.0 }
 0x2d6   :  { %2844 = vst.msk [vmem:[%s6988_s4 + $0x40] sm:$0xff] %vm7582_vm8, %v2796_v10  ;;  %vm7583_vm9 = vmmov %vm7574_vm0 }
 0x2d7   :  { %2845 = vst.msk [vmem:[%s6988_s4 + $0x48] sm:$0xff] %vm7583_vm9, %v2797_v37  ;;  %vm7584_vm10 = vmmov %vm7574_vm0 }
 0x2d8   :  { %2846 = vst.msk [vmem:[%s6988_s4 + $0x50] sm:$0xff] %vm7584_vm10, %v2798_v0  ;;  %vm7585_vm11 = vmmov %vm7574_vm0 }
 0x2d9   :  { %2847 = vst.msk [vmem:[%s6988_s4 + $0x58] sm:$0xff] %vm7585_vm11, %v2799_v55  ;;  %vm7586_vm12 = vmmov %vm7574_vm0 }
 0x2da   :  { %2848 = vst.msk [vmem:[%s6988_s4 + $0x60] sm:$0xff] %vm7586_vm12, %v2800_v61  ;;  %vm7587_vm13 = vmmov %vm7574_vm0 }
 0x2db   :  { %2849 = vst.msk [vmem:[%s6988_s4 + $0x68] sm:$0xff] %vm7587_vm13, %v2801_v52  ;;  %vm7588_vm14 = vmmov %vm7574_vm0 }
 0x2dc   :  { %2850 = vst.msk [vmem:[%s6988_s4 + $0x70] sm:$0xff] %vm7588_vm14, %v2802_v6  ;;  %vm7589_vm15 = vmmov %vm7574_vm0 }
 0x2dd   :  { %2851 = vst.msk [vmem:[%s6988_s4 + $0x78] sm:$0xff] %vm7589_vm15, %v2803_v5  ;;  %vm7590_vm1 = vmmov %vm7574_vm0 }
 0x2de   :  { %2820 = vst.msk [vmem:[%s6989_s3] sm:$0xff] %vm7574_vm0, %v2804_v14  ;;  %vm7594_vm2 = vmmov %vm7574_vm0 }
 0x2df   :  { %2821 = vst.msk [vmem:[%s6989_s3 + $0x8] sm:$0xff] %vm7590_vm1, %v2805_v19  ;;  %vm7595_vm3 = vmmov %vm7574_vm0 }
 0x2e0   :  { %2822 = vst.msk [vmem:[%s6989_s3 + $0x10] sm:$0xff] %vm7594_vm2, %v2806_v54  ;;  %vm7596_vm4 = vmmov %vm7574_vm0 }
 0x2e1   :  { %2823 = vst.msk [vmem:[%s6989_s3 + $0x18] sm:$0xff] %vm7595_vm3, %v2807_v20  ;;  %vm7597_vm5 = vmmov %vm7574_vm0 }
 0x2e2   :  { %2824 = vst.msk [vmem:[%s6989_s3 + $0x20] sm:$0xff] %vm7596_vm4, %v2808_v49  ;;  %vm7600_vm6 = vmmov %vm7574_vm0 }
 0x2e3   :  { %2825 = vst.msk [vmem:[%s6989_s3 + $0x28] sm:$0xff] %vm7597_vm5, %v2809_v47  ;;  %vm7601_vm7 = vmmov %vm7574_vm0 }
 0x2e4   :  { %2826 = vst.msk [vmem:[%s6989_s3 + $0x30] sm:$0xff] %vm7600_vm6, %v2810_v34  ;;  %vm7602_vm8 = vmmov %vm7574_vm0 }
 0x2e5   :  { %2827 = vst.msk [vmem:[%s6989_s3 + $0x38] sm:$0xff] %vm7601_vm7, %v2811_v33  ;;  %vm7603_vm9 = vmmov %vm7574_vm0 }
 0x2e6   :  { %2828 = vst.msk [vmem:[%s6989_s3 + $0x40] sm:$0xff] %vm7602_vm8, %v2812_v39  ;;  %vm7604_vm10 = vmmov %vm7574_vm0 }
 0x2e7   :  { %2829 = vst.msk [vmem:[%s6989_s3 + $0x48] sm:$0xff] %vm7603_vm9, %v2813_v9  ;;  %vm7605_vm11 = vmmov %vm7574_vm0 }
 0x2e8   :  { %2830 = vst.msk [vmem:[%s6989_s3 + $0x50] sm:$0xff] %vm7604_vm10, %v2814_v31  ;;  %vm7606_vm12 = vmmov %vm7574_vm0 }
 0x2e9   :  { %2831 = vst.msk [vmem:[%s6989_s3 + $0x58] sm:$0xff] %vm7605_vm11, %v2815_v2  ;;  %vm7607_vm13 = vmmov %vm7574_vm0 }
 0x2ea   :  { %2832 = vst.msk [vmem:[%s6989_s3 + $0x60] sm:$0xff] %vm7606_vm12, %v2816_v22  ;;  %vm7608_vm14 = vmmov %vm7574_vm0 }
 0x2eb   :  { %2833 = vst.msk [vmem:[%s6989_s3 + $0x68] sm:$0xff] %vm7607_vm13, %v2817_v50  ;;  %vm7609_vm15 = vmmov %vm7574_vm0 }
 0x2ec   :  { %2834 = vst.msk [vmem:[%s6989_s3 + $0x70] sm:$0xff] %vm7608_vm14, %v2818_v58 }
 0x2ed   :  { %2835 = vst.msk [vmem:[%s6989_s3 + $0x78] sm:$0xff] %vm7609_vm15, %v2819_v57 }

// kernel: aefnet_forward.5
= control target key start
LH: loop header
LB: loop body
LE: loop exit
PB: predicated region body
PF: predicated region fallthrough
CT: control target
= control target key end

     0   :  { %vm162_vm0 = vcmask 261120   ;;  %vm515_vm1 = vcmask 523264   ;;  %vm2005_vm5 = vmmov 0   ;;  %vm774_vm7 = vcmask 64512   ;;  %s2842_s1 = inlined_call_operand.vmem [shape: f32[800,64], index: 1, kind: input, shape index: {}]   ;;  %s2843_s0 = inlined_call_operand.vmem [shape: f32[32,800], index: 0, kind: input, shape index: {}]   ;;  %s2844_s3 = inlined_call_operand.vmem [shape: f32[64,512], index: 3, kind: input, shape index: {}]   ;;  %s2845_s2 = inlined_call_operand.vmem [shape: f32[2,64], index: 2, kind: input, shape index: {}]   ;;  %s2846_s9 = inlined_call_operand.vmem [shape: s32[8,64], index: 9, kind: output, shape index: {0}]   ;;  %s2847_s4 = inlined_call_operand.vmem [shape: f32[128,128], index: 4, kind: input, shape index: {}]   ;;  %s2848_s7 = inlined_call_operand.vmem [shape: f32[5,128], index: 7, kind: input, shape index: {}]   ;;  %s2849_s5 = inlined_call_operand.vmem [shape: f32[128,128], index: 5, kind: input, shape index: {}]   ;;  %s2850_s6 = inlined_call_operand.vmem [shape: f32[128,256], index: 6, kind: input, shape index: {}]   ;;  %s2851_s8 = inlined_call_operand.vmem [shape: f32[1,256], index: 8, kind: input, shape index: {}]   ;;  %s2852_s10 = inlined_call_operand.vmem [shape: f32[2,256], index: 10, kind: output, shape index: {1}]  }
   0x1   :  { %v78_v0 = vld [vmem:[%s2842_s1 + $0x80] sm:$0xff]  ;;  %v79_v1 = vld [vmem:[%s2842_s1 + $0x88] sm:$0xff]  ;;  %v80_v11 = vld [vmem:[%s2842_s1 + $0x90] sm:$0xff]  ;;  %vm1079_vm11 = vcmask 1041408  }
   0x2   :  { %v110_v2 = vld [vmem:[%s2842_s1 + $0x180] sm:$0xff]  ;;  %v1771_v3 = vpack.c.bf16 %v79_v1, %v78_v0  ;;  %v111_v4 = vld [vmem:[%s2842_s1 + $0x188] sm:$0xff]  ;;  %v81_v13 = vld [vmem:[%s2842_s1 + $0x98] sm:$0xff] }
   0x3   :  { %v62_v5 = vld [vmem:[%s2842_s1] sm:$0xff]  ;;  %v63_v6 = vld [vmem:[%s2842_s1 + $0x8] sm:$0xff]  ;;  %v1803_v7 = vpack.c.bf16 %v111_v4, %v110_v2  ;;  %v112_v14 = vld [vmem:[%s2842_s1 + $0x190] sm:$0xff]  ;;  %v1775_v16 = vpack.c.bf16 %v81_v13, %v80_v11 }
   0x4   :  { %v1773_v8 = vpack.c.bf16 %v63_v6, %v62_v5  ;;  %v94_v9 = vld [vmem:[%s2842_s1 + $0x100] sm:$0xff]  ;;  %v95_v10 = vld [vmem:[%s2842_s1 + $0x108] sm:$0xff]  ;;  %1772 = vmatprep.subr.bf16.mxu0 %v1771_v3  ;;  %v113_v15 = vld [vmem:[%s2842_s1 + $0x198] sm:$0xff] }
   0x5   :  { %v1805_v12 = vpack.c.bf16 %v95_v10, %v94_v9  ;;  %1804 = vmatprep.subr.bf16.mxu1 %v1803_v7  ;;  %v1807_v17 = vpack.c.bf16 %v113_v15, %v112_v14  ;;  %v64_v18 = vld [vmem:[%s2842_s1 + $0x10] sm:$0xff]  ;;  %v65_v19 = vld [vmem:[%s2842_s1 + $0x18] sm:$0xff]  ;;  %v82_v23 = vld [vmem:[%s2842_s1 + $0xa0] sm:$0xff] }
   0x6   :  { %1774 = vmatpush3.bf16.msra.mxu0 %v1773_v8  ;;  %v96_v20 = vld [vmem:[%s2842_s1 + $0x110] sm:$0xff]  ;;  %v1777_v21 = vpack.c.bf16 %v65_v19, %v64_v18  ;;  %v97_v22 = vld [vmem:[%s2842_s1 + $0x118] sm:$0xff]  ;;  %v83_v24 = vld [vmem:[%s2842_s1 + $0xa8] sm:$0xff] }
   0x7   :  { %1806 = vmatpush3.bf16.msra.mxu1 %v1805_v12  ;;  %1776 = vmatprep.subr.bf16.mxu0 %v1775_v16  ;;  %v1809_v25 = vpack.c.bf16 %v97_v22, %v96_v20  ;;  %v1779_v26 = vpack.c.bf16 %v83_v24, %v82_v23  ;;  %v114_v27 = vld [vmem:[%s2842_s1 + $0x1a0] sm:$0xff]  ;;  %v115_v28 = vld [vmem:[%s2842_s1 + $0x1a8] sm:$0xff]  ;;  %v84_v35 = vld [vmem:[%s2842_s1 + $0xb0] sm:$0xff] }
   0x8   :  { %1808 = vmatprep.subr.bf16.mxu1 %v1807_v17  ;;  %v66_v29 = vld [vmem:[%s2842_s1 + $0x20] sm:$0xff]  ;;  %v1811_v30 = vpack.c.bf16 %v115_v28, %v114_v27  ;;  %v67_v31 = vld [vmem:[%s2842_s1 + $0x28] sm:$0xff]  ;;  %v85_v36 = vld [vmem:[%s2842_s1 + $0xb8] sm:$0xff] }
   0x9   :  { %v98_v32 = vld [vmem:[%s2842_s1 + $0x120] sm:$0xff]  ;;  %v99_v33 = vld [vmem:[%s2842_s1 + $0x128] sm:$0xff]  ;;  %v1781_v34 = vpack.c.bf16 %v67_v31, %v66_v29  ;;  %v116_v37 = vld [vmem:[%s2842_s1 + $0x1b0] sm:$0xff]  ;;  %v1783_v39 = vpack.c.bf16 %v85_v36, %v84_v35 }
   0xa   :  { %1778 = vmatpush3.bf16.msra.mxu0 %v1777_v21  ;;  %v1813_v38 = vpack.c.bf16 %v99_v33, %v98_v32  ;;  %v117_v40 = vld [vmem:[%s2842_s1 + $0x1b8] sm:$0xff]  ;;  %v68_v41 = vld [vmem:[%s2842_s1 + $0x30] sm:$0xff]  ;;  %v86_v46 = vld [vmem:[%s2842_s1 + $0xc0] sm:$0xff] }
   0xb   :  { %1810 = vmatpush3.bf16.msra.mxu1 %v1809_v25  ;;  %1780 = vmatprep.subr.bf16.mxu0 %v1779_v26  ;;  %v69_v42 = vld [vmem:[%s2842_s1 + $0x38] sm:$0xff]  ;;  %v1815_v43 = vpack.c.bf16 %v117_v40, %v116_v37  ;;  %v100_v44 = vld [vmem:[%s2842_s1 + $0x130] sm:$0xff]  ;;  %v87_v47 = vld [vmem:[%s2842_s1 + $0xc8] sm:$0xff] }
   0xc   :  { %1812 = vmatprep.subr.bf16.mxu1 %v1811_v30  ;;  %v101_v45 = vld [vmem:[%s2842_s1 + $0x138] sm:$0xff]  ;;  %v118_v48 = vld [vmem:[%s2842_s1 + $0x1c0] sm:$0xff]  ;;  %v119_v49 = vld [vmem:[%s2842_s1 + $0x1c8] sm:$0xff]  ;;  %v1785_v50 = vpack.c.bf16 %v69_v42, %v68_v41  ;;  %v1787_v52 = vpack.c.bf16 %v87_v47, %v86_v46 }
   0xd   :  { %v1817_v51 = vpack.c.bf16 %v101_v45, %v100_v44  ;;  %v70_v53 = vld [vmem:[%s2842_s1 + $0x40] sm:$0xff]  ;;  %v71_v54 = vld [vmem:[%s2842_s1 + $0x48] sm:$0xff]  ;;  %v1819_v56 = vpack.c.bf16 %v119_v49, %v118_v48  ;;  %v88_v58 = vld [vmem:[%s2842_s1 + $0xd0] sm:$0xff] }
   0xe   :  { %1782 = vmatpush3.bf16.msra.mxu0 %v1781_v34  ;;  %v102_v55 = vld [vmem:[%s2842_s1 + $0x140] sm:$0xff]  ;;  %v103_v57 = vld [vmem:[%s2842_s1 + $0x148] sm:$0xff]  ;;  %v89_v59 = vld [vmem:[%s2842_s1 + $0xd8] sm:$0xff]  ;;  %v1789_v62 = vpack.c.bf16 %v71_v54, %v70_v53 }
   0xf   :  { %1814 = vmatpush3.bf16.msra.mxu1 %v1813_v38  ;;  %1784 = vmatprep.subr.bf16.mxu0 %v1783_v39  ;;  %v120_v60 = vld [vmem:[%s2842_s1 + $0x1d0] sm:$0xff]  ;;  %v121_v61 = vld [vmem:[%s2842_s1 + $0x1d8] sm:$0xff]  ;;  %v1821_v63 = vpack.c.bf16 %v103_v57, %v102_v55  ;;  %v1791_v0 = vpack.c.bf16 %v89_v59, %v88_v58  ;;  %v90_v6 = vld [vmem:[%s2842_s1 + $0xe0] sm:$0xff] }
  0x10   :  { %1816 = vmatprep.subr.bf16.mxu1 %v1815_v43  ;;  %v72_v1 = vld [vmem:[%s2842_s1 + $0x50] sm:$0xff]  ;;  %v73_v2 = vld [vmem:[%s2842_s1 + $0x58] sm:$0xff]  ;;  %v1823_v4 = vpack.c.bf16 %v121_v61, %v120_v60  ;;  %v91_v7 = vld [vmem:[%s2842_s1 + $0xe8] sm:$0xff] }
  0x11   :  { %v104_v3 = vld [vmem:[%s2842_s1 + $0x150] sm:$0xff]  ;;  %v105_v5 = vld [vmem:[%s2842_s1 + $0x158] sm:$0xff]  ;;  %v122_v8 = vld [vmem:[%s2842_s1 + $0x1e0] sm:$0xff]  ;;  %v1793_v10 = vpack.c.bf16 %v73_v2, %v72_v1  ;;  %v1795_v14 = vpack.c.bf16 %v91_v7, %v90_v6 }
  0x12   :  { %1786 = vmatpush3.bf16.msra.mxu0 %v1785_v50  ;;  %v123_v9 = vld [vmem:[%s2842_s1 + $0x1e8] sm:$0xff]  ;;  %v74_v11 = vld [vmem:[%s2842_s1 + $0x60] sm:$0xff]  ;;  %v1825_v13 = vpack.c.bf16 %v105_v5, %v104_v3  ;;  %v37_v17 = vld [vmem:[%s2843_s0 + $0x18] sm:$0xff] }
  0x13   :  { %1818 = vmatpush3.bf16.msra.mxu1 %v1817_v51  ;;  %1788 = vmatprep.subr.bf16.mxu0 %v1787_v52  ;;  %v75_v12 = vld [vmem:[%s2842_s1 + $0x68] sm:$0xff]  ;;  %v106_v15 = vld [vmem:[%s2842_s1 + $0x160] sm:$0xff]  ;;  %v1827_v18 = vpack.c.bf16 %v123_v9, %v122_v8  ;;  %v92_v20 = vld [vmem:[%s2842_s1 + $0xf0] sm:$0xff] }
  0x14   :  { %1820 = vmatprep.subr.bf16.mxu1 %v1819_v56  ;;  %v35_v16 = vld [vmem:[%s2843_s0 + $0x8] sm:$0xff]  ;;  %v93_v21 = vld [vmem:[%s2842_s1 + $0xf8] sm:$0xff]  ;;  %v124_v22 = vld [vmem:[%s2842_s1 + $0x1f0] sm:$0xff]  ;;  %324 = vmatprep.mubr.f32.mxu1 %v37_v17  ;;  %v1797_v24 = vpack.c.bf16 %v75_v12, %v74_v11 }
  0x15   :  { %v107_v19 = vld [vmem:[%s2842_s1 + $0x168] sm:$0xff]  ;;  %239 = vmatprep.mubr.f32.mxu0 %v35_v16  ;;  %v125_v23 = vld [vmem:[%s2842_s1 + $0x1f8] sm:$0xff]  ;;  %v1799_v26 = vpack.c.bf16 %v93_v21, %v92_v20  ;;  %v76_v27 = vld [vmem:[%s2842_s1 + $0x70] sm:$0xff] }
  0x16   :  { %1790 = vmatpush3.bf16.msra.mxu0 %v1789_v62  ;;  %v1829_v25 = vpack.c.bf16 %v107_v19, %v106_v15  ;;  %v77_v28 = vld [vmem:[%s2842_s1 + $0x78] sm:$0xff]  ;;  %v108_v29 = vld [vmem:[%s2842_s1 + $0x170] sm:$0xff]  ;;  %v1831_v30 = vpack.c.bf16 %v125_v23, %v124_v22  ;;  %v142_v32 = vld [vmem:[%s2842_s1 + $0x280] sm:$0xff] }
  0x17   :  { %1822 = vmatpush3.bf16.msra.mxu1 %v1821_v63  ;;  %1792 = vmatprep.subr.bf16.mxu0 %v1791_v0  ;;  %v109_v31 = vld [vmem:[%s2842_s1 + $0x178] sm:$0xff]  ;;  %v143_v33 = vld [vmem:[%s2842_s1 + $0x288] sm:$0xff]  ;;  %v1801_v34 = vpack.c.bf16 %v77_v28, %v76_v27  ;;  %v126_v37 = vld [vmem:[%s2842_s1 + $0x200] sm:$0xff] }
  0x18   :  { %1824 = vmatprep.subr.bf16.mxu1 %v1823_v4  ;;  %v1833_v35 = vpack.c.bf16 %v109_v31, %v108_v29  ;;  %v1835_v36 = vpack.c.bf16 %v143_v33, %v142_v32  ;;  %v127_v38 = vld [vmem:[%s2842_s1 + $0x208] sm:$0xff]  ;;  %v144_v39 = vld [vmem:[%s2842_s1 + $0x290] sm:$0xff]  ;;  %v145_v40 = vld [vmem:[%s2842_s1 + $0x298] sm:$0xff] }
  0x19   :  { %v34_v41 = vld [vmem:[%s2843_s0] sm:$0xff]  ;;  %v1837_v42 = vpack.c.bf16 %v127_v38, %v126_v37  ;;  %v36_v43 = vld [vmem:[%s2843_s0 + $0x10] sm:$0xff]  ;;  %v1839_v44 = vpack.c.bf16 %v145_v40, %v144_v39  ;;  %v129_v46 = vld [vmem:[%s2842_s1 + $0x218] sm:$0xff] }
  0x1a   :  { %1794 = vmatpush3.bf16.msra.mxu0 %v1793_v10  ;;  %v128_v45 = vld [vmem:[%s2842_s1 + $0x210] sm:$0xff]  ;;  %v146_v47 = vld [vmem:[%s2842_s1 + $0x2a0] sm:$0xff]  ;;  %v147_v48 = vld [vmem:[%s2842_s1 + $0x2a8] sm:$0xff] }
  0x1b   :  { %1826 = vmatpush3.bf16.msra.mxu1 %v1825_v13  ;;  %1796 = vmatprep.subr.bf16.mxu0 %v1795_v14  ;;  %v42_v49 = vld [vmem:[%s2843_s0 + $0x40] sm:$0xff]  ;;  %v44_v50 = vld [vmem:[%s2843_s0 + $0x50] sm:$0xff]  ;;  %v1841_v51 = vpack.c.bf16 %v129_v46, %v128_v45  ;;  %v41_v53 = vld [vmem:[%s2843_s0 + $0x38] sm:$0xff]  ;;  %v1843_v55 = vpack.c.bf16 %v147_v48, %v146_v47 }
  0x1c   :  { %1828 = vmatprep.subr.bf16.mxu1 %v1827_v18  ;;  %v130_v52 = vld [vmem:[%s2842_s1 + $0x220] sm:$0xff]  ;;  %v131_v56 = vld [vmem:[%s2842_s1 + $0x228] sm:$0xff]  ;;  %v148_v59 = vld [vmem:[%s2842_s1 + $0x2b0] sm:$0xff] }
  0x1d   :  { %v158_v54 = vld [vmem:[%s2842_s1 + $0x300] sm:$0xff]  ;;  %v43_v57 = vld [vmem:[%s2843_s0 + $0x48] sm:$0xff]  ;;  %v149_v60 = vld [vmem:[%s2842_s1 + $0x2b8] sm:$0xff]  ;;  %v1845_v2 = vpack.c.bf16 %v131_v56, %v130_v52 }
  0x1e   :  { %1798 = vmatpush3.bf16.msra.mxu0 %v1797_v24  ;;  %v159_v58 = vld [vmem:[%s2842_s1 + $0x308] sm:$0xff]  ;;  %v49_v61 = vld [vmem:[%s2843_s0 + $0x78] sm:$0xff]  ;;  %v160_v0 = vld [vmem:[%s2842_s1 + $0x310] sm:$0xff]  ;;  %v1847_v4 = vpack.c.bf16 %v149_v60, %v148_v59 }
  0x1f   :  { %1830 = vmatpush3.bf16.msra.mxu1 %v1829_v25  ;;  %1800 = vmatprep.subr.bf16.mxu0 %v1799_v26  ;;  %v1867_v62 = vpack.c.bf16 %v159_v58, %v158_v54  ;;  %v51_v63 = vld [vmem:[%s2843_s0 + $0x88] sm:$0xff]  ;;  %v161_v1 = vld [vmem:[%s2842_s1 + $0x318] sm:$0xff]  ;;  %v48_v3 = vld [vmem:[%s2843_s0 + $0x70] sm:$0xff] }
  0x20   :  { %1832 = vmatprep.subr.bf16.mxu1 %v1831_v30  ;;  %v132_v5 = vld [vmem:[%s2842_s1 + $0x230] sm:$0xff]  ;;  %v133_v6 = vld [vmem:[%s2842_s1 + $0x238] sm:$0xff]  ;;  %v50_v7 = vld [vmem:[%s2843_s0 + $0x80] sm:$0xff]  ;;  %v1871_v11 = vpack.c.bf16 %v161_v1, %v160_v0 }
  0x21   :  { %v150_v8 = vld [vmem:[%s2842_s1 + $0x2c0] sm:$0xff]  ;;  %v151_v9 = vld [vmem:[%s2842_s1 + $0x2c8] sm:$0xff]  ;;  %v56_v10 = vld [vmem:[%s2843_s0 + $0xb0] sm:$0xff]  ;;  %v1849_v13 = vpack.c.bf16 %v133_v6, %v132_v5 }
  0x22   :  { %1802 = vmatpush3.bf16.msra.mxu0 %v1801_v34  ;;  %v58_v12 = vld [vmem:[%s2843_s0 + $0xc0] sm:$0xff]  ;;  %v55_v14 = vld [vmem:[%s2843_s0 + $0xa8] sm:$0xff]  ;;  %v1851_v15 = vpack.c.bf16 %v151_v9, %v150_v8  ;;  %v57_v18 = vld [vmem:[%s2843_s0 + $0xb8] sm:$0xff] }
  0x23   :  { %1834 = vmatpush3.bf16.msra.mxu1 %v1833_v35  ;;  %1836 = vmatprep.subr.bf16.mxu0 %v1835_v36  ;;  %v134_v16 = vld [vmem:[%s2842_s1 + $0x240] sm:$0xff]  ;;  %v135_v17 = vld [vmem:[%s2842_s1 + $0x248] sm:$0xff]  ;;  %v152_v19 = vld [vmem:[%s2842_s1 + $0x2d0] sm:$0xff] }
  0x24   :  { %1868 = vmatprep.subr.bf16.mxu1 %v1867_v62  ;;  %v153_v20 = vld [vmem:[%s2842_s1 + $0x2d8] sm:$0xff]  ;;  %v39_v21 = vld [vmem:[%s2843_s0 + $0x28] sm:$0xff]  ;;  %v40_v22 = vld [vmem:[%s2843_s0 + $0x30] sm:$0xff]  ;;  %v1853_v23 = vpack.c.bf16 %v135_v17, %v134_v16 }
  0x25   :  { %240 = vmatmul.mubr.f32.vlgmr.msra.gmra.mrb[0].mxu0 %v34_v41  ;;  %v1855_v24 = vpack.c.bf16 %v153_v20, %v152_v19  ;;  %v136_v25 = vld [vmem:[%s2842_s1 + $0x250] sm:$0xff]  ;;  %v137_v26 = vld [vmem:[%s2842_s1 + $0x258] sm:$0xff]  ;;  %v47_v27 = vld [vmem:[%s2843_s0 + $0x68] sm:$0xff] }
  0x26   :  { %325 = vmatmul.mubr.f32.vlgmr.msra.gmra.mrb[0].mxu1 %v36_v43  ;;  %1838 = vmatpush3.bf16.msra.mxu0 %v1837_v42  ;;  %v154_v28 = vld [vmem:[%s2842_s1 + $0x2e0] sm:$0xff]  ;;  %v155_v29 = vld [vmem:[%s2842_s1 + $0x2e8] sm:$0xff]  ;;  %v1857_v31 = vpack.c.bf16 %v137_v26, %v136_v25  ;;  %v61_v35 = vld [vmem:[%s2843_s0 + $0xd8] sm:$0xff] }
  0x27   :  { %1840 = vmatprep.subr.bf16.mxu0 %v1839_v44  ;;  %244 = vmatprep.mubr.f32.mxu0 %v42_v49  ;;  %v54_v30 = vld [vmem:[%s2843_s0 + $0xa0] sm:$0xff]  ;;  %v1859_v32 = vpack.c.bf16 %v155_v29, %v154_v28  ;;  %v139_v34 = vld [vmem:[%s2842_s1 + $0x268] sm:$0xff]  ;;  %v156_v36 = vld [vmem:[%s2842_s1 + $0x2f0] sm:$0xff] }
  0x28   :  { %329 = vmatprep.mubr.f32.mxu1 %v44_v50  ;;  %1870 = vmatpush3.bf16.msra.mxu1 %v1867_v62  ;;  %v138_v33 = vld [vmem:[%s2842_s1 + $0x260] sm:$0xff]  ;;  %v157_v37 = vld [vmem:[%s2842_s1 + $0x2f8] sm:$0xff]  ;;  %v140_v40 = vld [vmem:[%s2842_s1 + $0x270] sm:$0xff] }
  0x29   :  { %245 = vmatmul.mubr.f32.gmra.mrb[2].mxu0 %v41_v53  ;;  %1872 = vmatprep.subr.bf16.mxu1 %v1871_v11  ;;  %v1861_v38 = vpack.c.bf16 %v139_v34, %v138_v33  ;;  %v1863_v39 = vpack.c.bf16 %v157_v37, %v156_v36  ;;  %v141_v41 = vld [vmem:[%s2842_s1 + $0x278] sm:$0xff]  ;;  %v38_v43 = vld [vmem:[%s2843_s0 + $0x20] sm:$0xff]  ;;  %v52_v47 = vld [vmem:[%s2843_s0 + $0x90] sm:$0xff] }
  0x2a   :  { %1842 = vmatpush3.bf16.msra.mxu0 %v1841_v51  ;;  %330 = vmatmul.mubr.f32.gmra.mrb[2].mxu1 %v43_v57  ;;  %v1865_v42 = vpack.c.bf16 %v141_v41, %v140_v40  ;;  %v46_v44 = vld [vmem:[%s2843_s0 + $0x60] sm:$0xff]  ;;  %v45_v45 = vld [vmem:[%s2843_s0 + $0x58] sm:$0xff]  ;;  %v60_v48 = vld [vmem:[%s2843_s0 + $0xd0] sm:$0xff] }
  0x2b   :  { %1844 = vmatprep.subr.bf16.mxu0 %v1843_v55  ;;  %249 = vmatprep.mubr.f32.mxu0 %v49_v61  ;;  %v53_v46 = vld [vmem:[%s2843_s0 + $0x98] sm:$0xff]  ;;  %v59_v49 = vld [vmem:[%s2843_s0 + $0xc8] sm:$0xff]  ;;  %v585_v53 = vld [vmem:[%s2844_s3] sm:$0xff] }
  0x2c   :  { %334 = vmatprep.mubr.f32.mxu1 %v51_v63  ;;  %1874 = vmatpush3.bf16.msra.mxu1 %v1871_v11  ;;  %v586_v50 = vld [vmem:[%s2844_s3 + $0x8] sm:$0xff]  ;;  %v589_v54 = vld [vmem:[%s2844_s3 + $0x20] sm:$0xff]  ;;  %v592_v11 = vld [vmem:[%s2844_s3 + $0x38] sm:$0xff] }
  0x2d   :  { %250 = vmatmul.mubr.f32.gmra.mrb[4].mxu0 %v48_v3  ;;  %v590_v51 = vld [vmem:[%s2844_s3 + $0x28] sm:$0xff]  ;;  %v1877_v55 = vpack.c.bf16 %v589_v54, %v585_v53  ;;  %v593_v59 = vld [vmem:[%s2844_s3 + $0x40] sm:$0xff] }
  0x2e   :  { %1846 = vmatpush3.bf16.msra.mxu0 %v1845_v2  ;;  %335 = vmatmul.mubr.f32.gmra.mrb[4].mxu1 %v50_v7  ;;  %v1875_v52 = vpack.c.bf16 %v590_v51, %v586_v50  ;;  %v594_v56 = vld [vmem:[%s2844_s3 + $0x48] sm:$0xff]  ;;  %v597_v60 = vld [vmem:[%s2844_s3 + $0x60] sm:$0xff] }
  0x2f   :  { %1848 = vmatprep.subr.bf16.mxu0 %v1847_v4  ;;  %254 = vmatprep.mubr.f32.mxu0 %v56_v10  ;;  %v598_v57 = vld [vmem:[%s2844_s3 + $0x68] sm:$0xff]  ;;  %v1881_v61 = vpack.c.bf16 %v597_v60, %v593_v59  ;;  %v601_v1 = vld [vmem:[%s2844_s3 + $0x80] sm:$0xff]  ;;  %v588_v10 = vld [vmem:[%s2844_s3 + $0x18] sm:$0xff] }
  0x30   :  { %339 = vmatprep.mubr.f32.mxu1 %v58_v12  ;;  %1876 = vmatprep.subr.bf16.mxu1 %v1875_v52  ;;  %v1879_v58 = vpack.c.bf16 %v598_v57, %v594_v56  ;;  %v602_v62 = vld [vmem:[%s2844_s3 + $0x88] sm:$0xff]  ;;  %v605_v2 = vld [vmem:[%s2844_s3 + $0xa0] sm:$0xff]  ;;  %v1891_v12 = vpack.c.bf16 %v592_v11, %v588_v10 }
  0x31   :  { %255 = vmatmul.mubr.f32.gmra.mrb[6].mxu0 %v55_v14  ;;  %v606_v63 = vld [vmem:[%s2844_s3 + $0xa8] sm:$0xff]  ;;  %v1885_v3 = vpack.c.bf16 %v605_v2, %v601_v1  ;;  %v609_v7 = vld [vmem:[%s2844_s3 + $0xc0] sm:$0xff] }
  0x32   :  { %1850 = vmatpush3.bf16.msra.mxu0 %v1849_v13  ;;  %340 = vmatmul.mubr.f32.gmra.mrb[6].mxu1 %v57_v18  ;;  %v1883_v0 = vpack.c.bf16 %v606_v63, %v602_v62  ;;  %v610_v4 = vld [vmem:[%s2844_s3 + $0xc8] sm:$0xff]  ;;  %v613_v8 = vld [vmem:[%s2844_s3 + $0xe0] sm:$0xff]  ;;  %v2003_v13 = vmov 0.0  }
  0x33   :  { %1852 = vmatprep.subr.bf16.mxu0 %v1851_v15  ;;  %409 = vmatprep.mubr.f32.mxu0 %v39_v21  ;;  %v614_v5 = vld [vmem:[%s2844_s3 + $0xe8] sm:$0xff]  ;;  %v1889_v9 = vpack.c.bf16 %v613_v8, %v609_v7 }
  0x34   :  { %1675 = vmatprep.mubr.msk.f32.mxu1 %vm162_vm0, %v40_v22  ;;  %v1887_v6 = vpack.c.bf16 %v614_v5, %v610_v4 }
  0x36   :  { %1854 = vmatpush3.bf16.msra.mxu0 %v1853_v23  ;;  %1676 = vmatmul.mubr.msk.f32.vlgmr.msra.gmra.mrb[8].mxu1 %vm162_vm0, %v47_v27 }
  0x37   :  { %1856 = vmatprep.subr.bf16.mxu0 %v1855_v24  ;;  %1678 = vmatprep.mubr.msk.f32.mxu1 %vm162_vm0, %v54_v30 }
  0x38   :  { %1878 = vmatpush1.bf16.msra.mxu1 %v1877_v55 }
  0x39   :  { %1880 = vmatprep.subr.bf16.mxu1 %v1879_v58 }
  0x3a   :  { %1858 = vmatpush3.bf16.msra.mxu0 %v1857_v31  ;;  %1679 = vmatmul.mubr.msk.f32.gmra.mrb[10].mxu1 %vm162_vm0, %v61_v35 }
  0x3b   :  { %1860 = vmatprep.subr.bf16.mxu0 %v1859_v32  ;;  %684 = vmatprep.mubr.f32.mxu1 %v2003_v13 }
  0x3c   :  { %1882 = vmatpush1.bf16.msra.mxu1 %v1881_v61 }
  0x3d   :  { %1884 = vmatprep.subr.bf16.mxu1 %v1883_v0 }
  0x3e   :  { %1862 = vmatpush3.bf16.msra.mxu0 %v1861_v38 }
  0x3f   :  { %1864 = vmatprep.subr.bf16.mxu0 %v1863_v39 }
  0x40   :  { %1886 = vmatpush1.bf16.msra.mxu1 %v1885_v3 }
  0x41   :  { %1888 = vmatprep.subr.bf16.mxu1 %v1887_v6 }
  0x42   :  { %1866 = vmatpush3.bf16.msra.mxu0 %v1865_v42 }
  0x44   :  { %1890 = vmatpush1.bf16.msra.mxu1 %v1889_v9 }
  0x45   :  { %410 = vmatmul.mubr.f32.vlgmr.msra.gmra.mrb[8].mxu0 %v38_v43  ;;  %1892 = vmatprep.subr.bf16.mxu1 %v1891_v12 }
  0x46   :  { %414 = vmatprep.mubr.f32.mxu0 %v46_v44 }
  0x49   :  { %415 = vmatmul.mubr.f32.gmra.mrb[10].mxu0 %v45_v45 }
  0x4a   :  { %419 = vmatprep.mubr.f32.mxu0 %v53_v46 }
  0x4d   :  { %420 = vmatmul.mubr.f32.gmra.mrb[12].mxu0 %v52_v47 }
  0x4e   :  { %424 = vmatprep.mubr.f32.mxu0 %v60_v48 }
  0x51   :  { %425 = vmatmul.mubr.f32.gmra.mrb[14].mxu0 %v59_v49 }
  0x52   :  { %1733 = vmatprep.mubr.msk.f32.mxu0 %vm2005_vm5, %v2003_v13 }
  0xf8   :  { %v1517_v14 = vpop.f32.mrb[0].mxu0 }
  0xf9   :  { %v1561_v15 = vpop.f32.mrb[0].mxu1  ;;  %v1518_v16 = vpop.f32.mrb[1].mxu0 }
  0xfa   :  { %v1519_v17 = vadd.f32 %v1518_v16, %v1517_v14  ;;  %v1562_v18 = vpop.f32.mrb[1].mxu1 }
  0xfb   :  { %v1563_v19 = vadd.f32 %v1562_v18, %v1561_v15 }
  0xfc   :  { %v1520_v20 = vpop.f32.mrb[2].mxu0 }
  0xfd   :  { %v327_v21 = vadd.f32 %v1563_v19, %v1519_v17  ;;  %v1564_v22 = vpop.f32.mrb[2].mxu1  ;;  %v1521_v23 = vpop.f32.mrb[3].mxu0 }
  0xfe   :  { %v1522_v24 = vadd.f32 %v1521_v23, %v1520_v20  ;;  %v1565_v25 = vpop.f32.mrb[3].mxu1 }
  0xff   :  { %v1566_v26 = vadd.f32 %v1565_v25, %v1564_v22 }
 0x100   :  { %v1523_v27 = vpop.f32.mrb[4].mxu0 }
 0x101   :  { %v332_v28 = vadd.f32 %v1566_v26, %v1522_v24  ;;  %v1567_v29 = vpop.f32.mrb[4].mxu1  ;;  %v1524_v30 = vpop.f32.mrb[5].mxu0 }
 0x102   :  { %v1525_v31 = vadd.f32 %v1524_v30, %v1523_v27  ;;  %v1568_v32 = vpop.f32.mrb[5].mxu1 }
 0x103   :  { %v1569_v33 = vadd.f32 %v1568_v32, %v1567_v29 }
 0x104   :  { %v1526_v34 = vpop.f32.mrb[6].mxu0 }
 0x105   :  { %v337_v35 = vadd.f32 %v1569_v33, %v1525_v31  ;;  %v1570_v36 = vpop.f32.mrb[6].mxu1  ;;  %v1527_v37 = vpop.f32.mrb[7].mxu0 }
 0x106   :  { %v1528_v38 = vadd.f32 %v1527_v37, %v1526_v34  ;;  %v1571_v39 = vpop.f32.mrb[7].mxu1 }
 0x107   :  { %v1572_v40 = vadd.f32 %v1571_v39, %v1570_v36  ;;  %v558_v39 = vlaneseq }
 0x109   :  { %v342_v41 = vadd.f32 %v1572_v40, %v1528_v38  ;;  %v1677_v42 = vpop.f32.mrb[8].mxu1  ;;  %v2514_v40 = vshrl.u32 %v558_v39, 7 }
 0x10a   :  { %v496_v43 = vpop.f32.mrb[9].mxu1 }
 0x10d   :  { %v1680_v44 = vpop.f32.mrb[10].mxu1 }
 0x10e   :  { %v506_v45 = vpop.f32.mrb[11].mxu1 }
 0x118   :  { %v1605_v46 = vpop.f32.mrb[8].mxu0 }
 0x119   :  { %v1606_v47 = vpop.f32.mrb[9].mxu0 }
 0x11a   :  { %v1607_v48 = vadd.f32 %v1606_v47, %v1605_v46 }
 0x11c   :  { %v1608_v49 = vpop.f32.mrb[10].mxu0  ;;  %v412_v50 = vadd.f32 %v1607_v48, %v327_v21 }
 0x11d   :  { %v1609_v51 = vpop.f32.mrb[11].mxu0 }
 0x11e   :  { %v1610_v52 = vadd.f32 %v1609_v51, %v1608_v49  ;;  %v497_v53 = vadd.f32 %v496_v43, %v412_v50 }
 0x120   :  { %v417_v54 = vadd.f32 %v1610_v52, %v332_v28  ;;  %v1611_v55 = vpop.f32.mrb[12].mxu0  ;;  %v530_v58 = vmul.f32 %v497_v53, %v497_v53  ;;  %v516_v61 = vsel %vm515_vm1, %v497_v53, 0.0 }
 0x121   :  { %v1612_v56 = vpop.f32.mrb[13].mxu0 }
 0x122   :  { %v502_v57 = vadd.f32 %v1677_v42, %v417_v54  ;;  %v1613_v59 = vadd.f32 %v1612_v56, %v1611_v55  ;;  %v534_v3 = vsel %vm515_vm1, %v530_v58, 0.0  ;;  %v2520_v42 = vsub.s32 0, %v2514_v40 }
 0x124   :  { %v531_v60 = vmul.f32 %v502_v57, %v502_v57  ;;  %v517_v62 = vsel %vm515_vm1, %v502_v57, 0.0  ;;  %v1614_v63 = vpop.f32.mrb[14].mxu0  ;;  %v422_v0 = vadd.f32 %v1613_v59, %v337_v35 }
 0x125   :  { %v518_v1 = vadd.f32 %v517_v62, %v516_v61  ;;  %v1615_v2 = vpop.f32.mrb[15].mxu0  ;;  %v2004_v61 = vmov 0  }
 0x126   :  { %v535_v4 = vsel %vm515_vm1, %v531_v60, 0.0  ;;  %v1616_v5 = vadd.f32 %v1615_v2, %v1614_v63  ;;  %v507_v6 = vadd.f32 %v506_v45, %v422_v0  ;;  %v555_v45 = vld [vmem:[%s2845_s2 + $0x1] sm:$0x1]  ;;  %v587_v63 = vld [vmem:[%s2844_s3 + $0x10] sm:$0xff]  ;;  %v600_v2 = vld [vmem:[%s2844_s3 + $0x78] sm:$0xff] }
 0x127   :  { %v536_v7 = vadd.f32 %v535_v4, %v534_v3 }
 0x128   :  { %v427_v8 = vadd.f32 %v1616_v5, %v342_v41  ;;  %v519_v9 = vsel %vm515_vm1, %v507_v6, 0.0  ;;  %v532_v10 = vmul.f32 %v507_v6, %v507_v6  ;;  %v551_v41 = vld [vmem:[%s2845_s2] sm:$0x1] }
 0x129   :  { %v520_v11 = vadd.f32 %v519_v9, %v518_v1  ;;  %v596_v1 = vld [vmem:[%s2844_s3 + $0x58] sm:$0xff]  ;;  %v599_v9 = vld [vmem:[%s2844_s3 + $0x70] sm:$0xff] }
 0x12a   :  { %v512_v12 = vadd.f32 %v1680_v44, %v427_v8  ;;  %v537_v14 = vsel %vm515_vm1, %v532_v10, 0.0  ;;  %v595_v8 = vld [vmem:[%s2844_s3 + $0x50] sm:$0xff]  ;;  %v604_v10 = vld [vmem:[%s2844_s3 + $0x98] sm:$0xff] }
 0x12b   :  { %v538_v15 = vadd.f32 %v537_v14, %v536_v7  ;;  %v1895_v7 = vpack.c.bf16 %v600_v2, %v596_v1 }
 0x12c   :  { %v533_v16 = vmul.f32 %v512_v12, %v512_v12  ;;  %v521_v17 = vsel %vm515_vm1, %v512_v12, 0.0 }
 0x12d   :  { %v522_v18 = vadd.f32 %v521_v17, %v520_v11  ;;  %v608_v11 = vld [vmem:[%s2844_s3 + $0xb8] sm:$0xff] }
 0x12e   :  { %v539_v19 = vsel %vm515_vm1, %v533_v16, 0.0  ;;  %v1899_v14 = vpack.c.bf16 %v608_v11, %v604_v10  ;;  %v607_v16 = vld [vmem:[%s2844_s3 + $0xb0] sm:$0xff]  ;;  %v612_v17 = vld [vmem:[%s2844_s3 + $0xd8] sm:$0xff] }
 0x12f   :  { %v523_v20 = vrot.slane %v522_v18, 4  ;;  %v540_v21 = vadd.f32 %v539_v19, %v538_v15  ;;  %v603_v15 = vld [vmem:[%s2844_s3 + $0x90] sm:$0xff] }
 0x130   :  { %v1901_v19 = vpack.c.bf16 %v607_v16, %v603_v15 }
 0x131   :  { %v524_v22 = vadd.f32 %v523_v20, %v522_v18  ;;  %v541_v23 = vrot.slane %v540_v21, 4  ;;  %v616_v18 = vld [vmem:[%s2844_s3 + $0xf8] sm:$0xff] }
 0x132   :  { %v1903_v20 = vpack.c.bf16 %v616_v18, %v612_v17 }
 0x133   :  { %v525_v24 = vrot.slane %v524_v22, 2  ;;  %v542_v25 = vadd.f32 %v541_v23, %v540_v21  ;;  %v611_v21 = vld [vmem:[%s2844_s3 + $0xd0] sm:$0xff] }
 0x135   :  { %v526_v26 = vadd.f32 %v525_v24, %v524_v22  ;;  %v543_v27 = vrot.slane %v542_v25, 2  ;;  %v615_v22 = vld [vmem:[%s2844_s3 + $0xf0] sm:$0xff]  ;;  %v766_v24 = vmul.u32 4, %v2514_v40 }
 0x136   :  { %v1905_v23 = vpack.c.bf16 %v615_v22, %v611_v21 }
 0x137   :  { %v527_v28 = vrot.slane %v526_v26, 1  ;;  %v544_v29 = vadd.f32 %v543_v27, %v542_v25  ;;  %v763_v25 = vand.u32 127, %v558_v39 }
 0x139   :  { %v528_v30 = vadd.f32 %v527_v28, %v526_v26  ;;  %v545_v31 = vrot.slane %v544_v29, 1  ;;  %v770_v26 = vadd.s32 1, %v766_v24  ;;  %vm767_vm8 = vcmp.eq.s32.totalorder %v763_v25, %v766_v24 }
 0x13b   :  { %v529_v32 = vmul.f32 0.03125, %v528_v30  ;;  %v546_v33 = vadd.f32 %v545_v31, %v544_v29  ;;  %vm771_vm6 = vcmp.eq.s32.totalorder %v763_v25, %v770_v26  ;;  %v1475_v30 = vsel %vm767_vm8, 1.0, %v2003_v13 }
 0x13c   :  { %v1476_v28 = vsel %vm771_vm6, 1.0, %v2003_v13  ;;  %v921_v31 = vadd.s32 2, %v766_v24 }
 0x13d   :  { %v547_v34 = vmul.f32 0.03125, %v546_v33  ;;  %v548_v35 = vmul.f32 %v529_v32, %v529_v32 }
 0x13e   :  { %vm922_vm9 = vcmp.eq.s32.totalorder %v763_v25, %v921_v31 }
 0x13f   :  { %v549_v36 = vsub.f32 %v547_v34, %v548_v35  ;;  %v1479_v33 = vsel %vm922_vm9, 1.0, %v2003_v13  ;;  %v999_v35 = vadd.s32 3, %v766_v24  ;;  %v1077_v24 = vld [vmem:[%s2848_s7] sm:$0x1] }
 0x141   :  { %v550_v37 = vmax.f32 %v549_v36, 0.0  ;;  %vm1000_vm10 = vcmp.eq.s32.totalorder %v763_v25, %v999_v35  ;;  %v1240_v35 = vld [vmem:[%s2849_s5] sm:$0xff] }
 0x142   :  { %v1481_v36 = vsel %vm1000_vm10, 1.0, %v2003_v13 }
 0x143   :  { %v552_v38 = vadd.f32 1e-05, %v550_v37  ;;  %v1116_v37 = vld [vmem:[%s2847_s4] sm:$0xff] }
 0x145   :  { %1997 = vrsqrt.f32 %v552_v38  ;;  %v1117_v38 = vld [vmem:[%s2847_s4 + $0x8] sm:$0xff] }
 0x146   :  { %v1908_v39 = vpack.c.bf16 %v1117_v38, %v1116_v37  ;;  %v1242_v38 = vld [vmem:[%s2849_s5 + $0x10] sm:$0xff] }
 0x14f   :  { %v1998_v43 = vpop.eup %1997 }
 0x150   :  { %v554_v44 = vmul.f32 %v1998_v43, %v551_v41  ;;  %v2006_v41 = vmov 0.0|0.0   ;;  %v1118_v43 = vld [vmem:[%s2847_s4 + $0x10] sm:$0xff] }
 0x151   :  { %1907 = vmatprep.subr.bf16.mxu0 %v2006_v41 }
 0x152   :  { %v556_v46 = vmul.f32 %v554_v44, %v529_v32  ;;  %v561_v47 = vrot.slane %v554_v44, %v2520_v42  ;;  %1909 = vmatpush3.bf16.msra.mxu0 %v1908_v39  ;;  %v1119_v44 = vld [vmem:[%s2847_s4 + $0x18] sm:$0xff] }
 0x153   :  { %1910 = vmatprep.subr.bf16.mxu0 %v2006_v41 }
 0x154   :  { %v557_v48 = vsub.f32 %v555_v45, %v556_v46  ;;  %v562_v49 = vmul.f32 %v561_v47, %v497_v53  ;;  %v568_v50 = vmul.f32 %v561_v47, %v502_v57  ;;  %v573_v51 = vmul.f32 %v561_v47, %v507_v6  ;;  %v591_v53 = vld [vmem:[%s2844_s3 + $0x30] sm:$0xff]  ;;  %v1120_v46 = vld [vmem:[%s2847_s4 + $0x20] sm:$0xff] }
 0x155   :  { %v578_v52 = vmul.f32 %v561_v47, %v512_v12  ;;  %v1893_v5 = vpack.c.bf16 %v591_v53, %v587_v63  ;;  %v1897_v12 = vpack.c.bf16 %v599_v9, %v595_v8  ;;  %v1911_v45 = vpack.c.bf16 %v1119_v44, %v1118_v43  ;;  %v1121_v47 = vld [vmem:[%s2847_s4 + $0x28] sm:$0xff]  ;;  %v1130_v63 = vld [vmem:[%s2847_s4 + $0x70] sm:$0xff]  ;;  %v1131_v53 = vld [vmem:[%s2847_s4 + $0x78] sm:$0xff] }
 0x156   :  { %v566_v54 = vrot.slane %v557_v48, %v2520_v42  ;;  %v1914_v48 = vpack.c.bf16 %v1121_v47, %v1120_v46  ;;  %v1244_v43 = vld [vmem:[%s2849_s5 + $0x20] sm:$0xff]  ;;  %v1245_v44 = vld [vmem:[%s2849_s5 + $0x28] sm:$0xff]  ;;  %v1246_v46 = vld [vmem:[%s2849_s5 + $0x30] sm:$0xff] }
 0x157   :  { %1912 = vmatpush3.bf16.msra.mxu0 %v1911_v45  ;;  %v1938_v45 = vpack.c.bf16 %v1245_v44, %v1244_v43  ;;  %v1247_v47 = vld [vmem:[%s2849_s5 + $0x38] sm:$0xff] }
 0x158   :  { %v567_v55 = vadd.f32 %v566_v54, %v562_v49  ;;  %v569_v56 = vadd.f32 %v568_v50, %v566_v54  ;;  %v574_v58 = vadd.f32 %v573_v51, %v566_v54  ;;  %v579_v59 = vadd.f32 %v578_v52, %v566_v54  ;;  %1913 = vmatprep.subr.bf16.mxu0 %v2006_v41  ;;  %v1122_v49 = vld [vmem:[%s2847_s4 + $0x30] sm:$0xff]  ;;  %v1123_v50 = vld [vmem:[%s2847_s4 + $0x38] sm:$0xff]  ;;  %v1124_v52 = vld [vmem:[%s2847_s4 + $0x40] sm:$0xff] }
 0x159   :  { %v1917_v51 = vpack.c.bf16 %v1123_v50, %v1122_v49  ;;  %v1125_v54 = vld [vmem:[%s2847_s4 + $0x48] sm:$0xff]  ;;  %v1248_v49 = vld [vmem:[%s2849_s5 + $0x40] sm:$0xff] }
 0x15a   :  { %vm570_vm2 = vcmp.gt.f32.partialorder %v569_v56, %v567_v55  ;;  %v1249_v50 = vld [vmem:[%s2849_s5 + $0x48] sm:$0xff] }
 0x15b   :  { %v571_v60 = vsel %vm570_vm2, %v569_v56, %v567_v55  ;;  %v572_v62 = vsel %vm570_vm2, 1, %v2004_v61  ;;  %1915 = vmatpush3.bf16.msra.mxu0 %v1914_v48  ;;  %v1920_v55 = vpack.c.bf16 %v1125_v54, %v1124_v52  ;;  %v1126_v56 = vld [vmem:[%s2847_s4 + $0x50] sm:$0xff]  ;;  %v1129_v61 = vld [vmem:[%s2847_s4 + $0x68] sm:$0xff]  ;;  %v1941_v48 = vpack.c.bf16 %v1247_v47, %v1246_v46  ;;  %v1251_v54 = vld [vmem:[%s2849_s5 + $0x58] sm:$0xff] }
 0x15c   :  { %vm575_vm3 = vcmp.gt.f32.partialorder %v574_v58, %v571_v60  ;;  %1916 = vmatprep.subr.bf16.mxu0 %v2006_v41  ;;  %v1250_v52 = vld [vmem:[%s2849_s5 + $0x50] sm:$0xff] }
 0x15d   :  { %v576_v57 = vsel %vm575_vm3, %v574_v58, %v571_v60  ;;  %v577_v0 = vsel %vm575_vm3, 2, %v572_v62  ;;  %v1127_v58 = vld [vmem:[%s2847_s4 + $0x58] sm:$0xff]  ;;  %v1128_v60 = vld [vmem:[%s2847_s4 + $0x60] sm:$0xff] }
 0x15e   :  { %vm580_vm4 = vcmp.gt.f32.partialorder %v579_v59, %v576_v57  ;;  %v1926_v62 = vpack.c.bf16 %v1129_v61, %v1128_v60  ;;  %v1254_v60 = vld [vmem:[%s2849_s5 + $0x70] sm:$0xff]  ;;  %v1255_v61 = vld [vmem:[%s2849_s5 + $0x78] sm:$0xff] }
 0x15f   :  { %v581_v3 = vsel %vm580_vm4, %v579_v59, %v576_v57  ;;  %v582_v4 = vsel %vm580_vm4, 3, %v577_v0  ;;  %1918 = vmatpush3.bf16.msra.mxu0 %v1917_v51  ;;  %v1923_v59 = vpack.c.bf16 %v1127_v58, %v1126_v56  ;;  %v1929_v57 = vpack.c.bf16 %v1131_v53, %v1130_v63  ;;  %v1252_v56 = vld [vmem:[%s2849_s5 + $0x60] sm:$0xff]  ;;  %v1253_v58 = vld [vmem:[%s2849_s5 + $0x68] sm:$0xff]  ;;  %v1335_v53 = vld [vmem:[%s2850_s6 + $0x18] sm:$0xff] }
 0x160   :  { %583 = vst.msk [vmem:[%s2846_s9] sm:$0xff] %vm515_vm1, %v582_v4  ;;  %v584_v6 = vmax.f32 %v581_v3, 0.0  ;;  %1919 = vmatprep.subr.bf16.mxu0 %v2006_v41  ;;  %v1944_v51 = vpack.c.bf16 %v1249_v50, %v1248_v49  ;;  %v1333_v63 = vld [vmem:[%s2850_s6 + $0x8] sm:$0xff] }
 0x162   :  { %1473 = vmatmul.mubr.msk.f32.vlgmr.msra.gmra.mrb[12].mxu1 %vm515_vm1, %v584_v6 }
 0x163   :  { %1894 = vmatpush1.bf16.msra.mxu1 %v1893_v5  ;;  %755 = vmatprep.mubr.f32.mxu1 %v2003_v13 }
 0x164   :  { %1896 = vmatprep.subr.bf16.mxu1 %v1895_v7  ;;  %1921 = vmatpush3.bf16.msra.mxu0 %v1920_v55  ;;  %v1947_v55 = vpack.c.bf16 %v1251_v54, %v1250_v52 }
 0x165   :  { %1922 = vmatprep.subr.bf16.mxu0 %v2006_v41 }
 0x167   :  { %1898 = vmatpush1.bf16.msra.mxu1 %v1897_v12 }
 0x168   :  { %1900 = vmatprep.subr.bf16.mxu1 %v1899_v14  ;;  %1924 = vmatpush3.bf16.msra.mxu0 %v1923_v59  ;;  %v1950_v59 = vpack.c.bf16 %v1253_v58, %v1252_v56 }
 0x169   :  { %1925 = vmatprep.subr.bf16.mxu0 %v2006_v41 }
 0x16b   :  { %1902 = vmatpush1.bf16.msra.mxu1 %v1901_v19 }
 0x16c   :  { %1904 = vmatprep.subr.bf16.mxu1 %v1903_v20  ;;  %1927 = vmatpush3.bf16.msra.mxu0 %v1926_v62  ;;  %v1953_v62 = vpack.c.bf16 %v1255_v61, %v1254_v60 }
 0x16d   :  { %1928 = vmatprep.subr.bf16.mxu0 %v2006_v41 }
 0x16f   :  { %1906 = vmatpush1.bf16.msra.mxu1 %v1905_v23 }
 0x170   :  { %1681 = vmatprep.subr.mxu1 %v2003_v13  ;;  %1930 = vmatpush3.bf16.msra.mxu0 %v1929_v57  ;;  %v1955_v57 = vpack.c.bf16 %v1335_v53, %v1333_v63 }
 0x172   :  { %1474 = vmatmul.mubr.msk.f32.vlgmr.msra.gmra.mrb[14].mxu1 %vm515_vm1, %v584_v6  ;;  %1956 = vmatprep.subr.bf16.mxu0 %v1955_v57  ;;  %v1202_v57 = vld [vmem:[%s2848_s7 + $0x2] sm:$0x1] }
 0x173   :  { %1683 = vmatprep.mubr.msk.f32.mxu1 %vm2005_vm5, %v2003_v13 }
 0x235   :  { %v686_v27 = vpop.f32.mrb[12].mxu1 }
 0x236   :  { %v688_v29 = vpop.f32.mrb[13].mxu1 }
 0x237   :  { %1682 = vmatpush3.msra.mxu1 %v688_v29 }
 0x238   :  { %1684 = vmatmul.mubr.msk.f32.vlgmr.msra.gmra.mrb[16].mxu1 %vm774_vm7, %v1476_v28  ;;  %1686 = vmatprep.subr.mxu1 %v2003_v13 }
 0x239   :  { %1687 = vmatpush3.msra.mxu1 %v686_v27  ;;  %1688 = vmatprep.mubr.msk.f32.mxu1 %vm2005_vm5, %v2003_v13  ;;  %v1078_v27 = vld [vmem:[%s2848_s7 + $0x1] sm:$0x1] }
 0x23a   :  { %1691 = vmatprep.subr.mxu1 %v2003_v13 }
 0x240   :  { %1689 = vmatmul.mubr.msk.f32.vlgmr.msra.gmra.mrb[16].mxu1 %vm774_vm7, %v1475_v30 }
 0x241   :  { %1693 = vmatprep.mubr.msk.f32.mxu1 %vm2005_vm5, %v2003_v13 }
 0x245   :  { %v757_v32 = vpop.f32.mrb[14].mxu1 }
 0x246   :  { %v759_v34 = vpop.f32.mrb[15].mxu1  ;;  %1692 = vmatpush3.msra.mxu1 %v757_v32 }
 0x247   :  { %1696 = vmatprep.subr.mxu1 %v2003_v13 }
 0x248   :  { %1694 = vmatmul.mubr.msk.f32.vlgmr.msra.gmra.mrb[16].mxu1 %vm774_vm7, %v1479_v33 }
 0x249   :  { %1697 = vmatpush3.msra.mxu1 %v759_v34  ;;  %1698 = vmatprep.mubr.msk.f32.mxu1 %vm2005_vm5, %v2003_v13 }
 0x24a   :  { %1931 = vmatprep.subr.bf16.mxu1 %v2006_v41 }
 0x250   :  { %1699 = vmatmul.mubr.msk.f32.vlgmr.msra.gmra.mrb[16].mxu1 %vm774_vm7, %v1481_v36  ;;  %v1241_v36 = vld [vmem:[%s2849_s5 + $0x8] sm:$0xff] }
 0x251   :  { %1768 = vmatprep.mubr.msk.f32.mxu1 %vm2005_vm5, %v2003_v13  ;;  %v1932_v37 = vpack.c.bf16 %v1241_v36, %v1240_v35  ;;  %v1356_v36 = vld [vmem:[%s2850_s6 + $0xc0] sm:$0xff] }
 0x253   :  { %1933 = vmatpush3.bf16.msra.mxu1 %v1932_v37  ;;  %v1358_v37 = vld [vmem:[%s2850_s6 + $0xd0] sm:$0xff] }
 0x254   :  { %1934 = vmatprep.subr.bf16.mxu1 %v2006_v41 }
 0x323   :  { %v1072_v0 = vpop.f32.mrb[16].mxu1 }
 0x324   :  { %v1080_v1 = vsel %vm1079_vm11, %v1072_v0, 0.0  ;;  %v1088_v2 = vmul.f32 %v1072_v0, %v1072_v0  ;;  %v1700_v3 = vpop.f32.mrb[17].mxu1 }
 0x325   :  { %v1081_v4 = vrot.slane %v1080_v1, 4 }
 0x326   :  { %v1089_v5 = vsel %vm1079_vm11, %v1088_v2, 0.0  ;;  %v1339_v2 = vld [vmem:[%s2850_s6 + $0x38] sm:$0xff] }
 0x327   :  { %v1082_v6 = vadd.f32 %v1081_v4, %v1080_v1  ;;  %v1090_v7 = vrot.slane %v1089_v5, 4  ;;  %v1337_v1 = vld [vmem:[%s2850_s6 + $0x28] sm:$0xff] }
 0x328   :  { %v1959_v4 = vpack.c.bf16 %v1339_v2, %v1337_v1  ;;  %v1203_v2 = vld [vmem:[%s2848_s7 + $0x3] sm:$0x1] }
 0x329   :  { %v1083_v8 = vrot.slane %v1082_v6, 2  ;;  %v1091_v9 = vadd.f32 %v1090_v7, %v1089_v5  ;;  %v1336_v5 = vld [vmem:[%s2850_s6 + $0x20] sm:$0xff]  ;;  %v1341_v7 = vld [vmem:[%s2850_s6 + $0x48] sm:$0xff] }
 0x32b   :  { %v1084_v10 = vadd.f32 %v1083_v8, %v1082_v6  ;;  %v1092_v11 = vrot.slane %v1091_v9, 2  ;;  %v1338_v6 = vld [vmem:[%s2850_s6 + $0x30] sm:$0xff]  ;;  %v1343_v8 = vld [vmem:[%s2850_s6 + $0x58] sm:$0xff] }
 0x32d   :  { %v1085_v12 = vrot.slane %v1084_v10, 1  ;;  %v1093_v14 = vadd.f32 %v1092_v11, %v1091_v9  ;;  %v1961_v9 = vpack.c.bf16 %v1338_v6, %v1336_v5  ;;  %v1340_v11 = vld [vmem:[%s2850_s6 + $0x40] sm:$0xff] }
 0x32f   :  { %v1086_v15 = vadd.f32 %v1085_v12, %v1084_v10  ;;  %v1094_v16 = vrot.slane %v1093_v14, 1  ;;  %v1963_v10 = vpack.c.bf16 %v1343_v8, %v1341_v7  ;;  %v1342_v12 = vld [vmem:[%s2850_s6 + $0x50] sm:$0xff] }
 0x331   :  { %v1087_v17 = vmul.f32 0.5, %v1086_v15  ;;  %v1095_v18 = vadd.f32 %v1094_v16, %v1093_v14  ;;  %v1345_v14 = vld [vmem:[%s2850_s6 + $0x68] sm:$0xff]  ;;  %v1347_v15 = vld [vmem:[%s2850_s6 + $0x78] sm:$0xff]  ;;  %v1965_v16 = vpack.c.bf16 %v1342_v12, %v1340_v11 }
 0x332   :  { %v1363_v11 = vld [vmem:[%s2850_s6 + $0xf8] sm:$0xff] }
 0x333   :  { %v1096_v19 = vmul.f32 0.5, %v1095_v18  ;;  %v1097_v20 = vmul.f32 %v1087_v17, %v1087_v17  ;;  %v1344_v18 = vld [vmem:[%s2850_s6 + $0x60] sm:$0xff] }
 0x335   :  { %v1098_v21 = vsub.f32 %v1096_v19, %v1097_v20  ;;  %v1346_v19 = vld [vmem:[%s2850_s6 + $0x70] sm:$0xff]  ;;  %v1349_v20 = vld [vmem:[%s2850_s6 + $0x88] sm:$0xff] }
 0x337   :  { %v1099_v22 = vmax.f32 %v1098_v21, 0.0  ;;  %v1351_v21 = vld [vmem:[%s2850_s6 + $0x98] sm:$0xff] }
 0x339   :  { %v1100_v23 = vadd.f32 1e-05, %v1099_v22  ;;  %v1969_v22 = vpack.c.bf16 %v1346_v19, %v1344_v18 }
 0x33b   :  { %1999 = vrsqrt.f32 %v1100_v23  ;;  %v1971_v23 = vpack.c.bf16 %v1351_v21, %v1349_v20 }
 0x345   :  { %v2000_v25 = vpop.eup %1999 }
 0x346   :  { %v1102_v26 = vmul.f32 %v2000_v25, %v1077_v24  ;;  %v1348_v24 = vld [vmem:[%s2850_s6 + $0x80] sm:$0xff]  ;;  %v1350_v25 = vld [vmem:[%s2850_s6 + $0x90] sm:$0xff] }
 0x348   :  { %v1106_v28 = vrot.slane %v1102_v26, %v2520_v42  ;;  %v1108_v29 = vmul.f32 %v1102_v26, %v1087_v17  ;;  %v1967_v17 = vpack.c.bf16 %v1347_v15, %v1345_v14  ;;  %v1353_v26 = vld [vmem:[%s2850_s6 + $0xa8] sm:$0xff]  ;;  %v1360_v14 = vld [vmem:[%s2850_s6 + $0xe0] sm:$0xff]  ;;  %v1362_v15 = vld [vmem:[%s2850_s6 + $0xf0] sm:$0xff] }
 0x34a   :  { %v1109_v30 = vsub.f32 %v1078_v27, %v1108_v29  ;;  %v1107_v31 = vmul.f32 %v1106_v28, %v1072_v0  ;;  %v1334_v0 = vld [vmem:[%s2850_s6 + $0x10] sm:$0xff]  ;;  %v1355_v27 = vld [vmem:[%s2850_s6 + $0xb8] sm:$0xff]  ;;  %v1973_v28 = vpack.c.bf16 %v1350_v25, %v1348_v24 }
 0x34b   :  { %v1975_v29 = vpack.c.bf16 %v1355_v27, %v1353_v26 }
 0x34c   :  { %v1113_v32 = vrot.slane %v1109_v30, %v2520_v42  ;;  %v1352_v30 = vld [vmem:[%s2850_s6 + $0xa0] sm:$0xff] }
 0x34e   :  { %v1114_v33 = vadd.f32 %v1113_v32, %v1107_v31  ;;  %v1354_v31 = vld [vmem:[%s2850_s6 + $0xb0] sm:$0xff]  ;;  %v1357_v32 = vld [vmem:[%s2850_s6 + $0xc8] sm:$0xff] }
 0x350   :  { %v1115_v34 = vmax.f32 %v1114_v33, 0.0  ;;  %v1359_v33 = vld [vmem:[%s2850_s6 + $0xd8] sm:$0xff] }
 0x351   :  { %v1979_v35 = vpack.c.bf16 %v1359_v33, %v1357_v32 }
 0x352   :  { %1734 = vmatmul.mubr.f32.vlgmr.msra.gmra.mrb[16].mxu0 %v1115_v34  ;;  %v1977_v34 = vpack.c.bf16 %v1354_v31, %v1352_v30 }
 0x353   :  { %1440 = vmatprep.mubr.f32.mxu0 %v2003_v13  ;;  %v1243_v13 = vld [vmem:[%s2849_s5 + $0x18] sm:$0xff] }
 0x354   :  { %v1935_v39 = vpack.c.bf16 %v1243_v13, %v1242_v38  ;;  %v1981_v38 = vpack.c.bf16 %v1358_v37, %v1356_v36 }
 0x356   :  { %1936 = vmatpush3.bf16.msra.mxu1 %v1935_v39 }
 0x357   :  { %1937 = vmatprep.subr.bf16.mxu1 %v2006_v41 }
 0x35a   :  { %1939 = vmatpush3.bf16.msra.mxu1 %v1938_v45 }
 0x35b   :  { %1940 = vmatprep.subr.bf16.mxu1 %v2006_v41 }
 0x35e   :  { %1942 = vmatpush3.bf16.msra.mxu1 %v1941_v48 }
 0x35f   :  { %1943 = vmatprep.subr.bf16.mxu1 %v2006_v41 }
 0x362   :  { %1945 = vmatpush3.bf16.msra.mxu1 %v1944_v51 }
 0x363   :  { %1946 = vmatprep.subr.bf16.mxu1 %v2006_v41 }
 0x366   :  { %1948 = vmatpush3.bf16.msra.mxu1 %v1947_v55 }
 0x367   :  { %1949 = vmatprep.subr.bf16.mxu1 %v2006_v41 }
 0x36a   :  { %1951 = vmatpush3.bf16.msra.mxu1 %v1950_v59 }
 0x36b   :  { %1952 = vmatprep.subr.bf16.mxu1 %v2006_v41  ;;  %v1332_v41 = vld [vmem:[%s2850_s6] sm:$0xff] }
 0x36c   :  { %v1957_v3 = vpack.c.bf16 %v1334_v0, %v1332_v41 }
 0x36e   :  { %1954 = vmatpush3.bf16.msra.mxu1 %v1953_v62  ;;  %1958 = vmatpush1.bf16.msra.mxu0 %v1957_v3 }
 0x36f   :  { %1960 = vmatprep.subr.bf16.mxu0 %v1959_v4 }
 0x372   :  { %1962 = vmatpush1.bf16.msra.mxu0 %v1961_v9 }
 0x373   :  { %1964 = vmatprep.subr.bf16.mxu0 %v1963_v10  ;;  %v1361_v10 = vld [vmem:[%s2850_s6 + $0xe8] sm:$0xff] }
 0x374   :  { %v1983_v12 = vpack.c.bf16 %v1363_v11, %v1361_v10 }
 0x376   :  { %1966 = vmatpush1.bf16.msra.mxu0 %v1965_v16  ;;  %v1985_v16 = vpack.c.bf16 %v1362_v15, %v1360_v14 }
 0x377   :  { %1968 = vmatprep.subr.bf16.mxu0 %v1967_v17  ;;  %v1483_v17 = vld [vmem:[%s2848_s7 + $0x4] ss:$0 sm:$0xff] }
 0x37a   :  { %1970 = vmatpush1.bf16.msra.mxu0 %v1969_v22  ;;  %v1364_v22 = vld [vmem:[%s2851_s8] sm:$0x3] }
 0x37b   :  { %1972 = vmatprep.subr.bf16.mxu0 %v1971_v23  ;;  %v1372_v23 = vsub.s32 1, %v2514_v40  ;;  %v1369_v24 = vrot.slane %v1364_v22, %v2520_v42 }
 0x37d   :  { %v1373_v25 = vrot.slane %v1364_v22, %v1372_v23 }
 0x37e   :  { %1974 = vmatpush1.bf16.msra.mxu0 %v1973_v28 }
 0x37f   :  { %1976 = vmatprep.subr.bf16.mxu0 %v1975_v29 }
 0x382   :  { %1978 = vmatpush1.bf16.msra.mxu0 %v1977_v34 }
 0x383   :  { %1980 = vmatprep.subr.bf16.mxu0 %v1979_v35 }
 0x386   :  { %1982 = vmatpush1.bf16.msra.mxu0 %v1981_v38 }
 0x387   :  { %1984 = vmatprep.subr.bf16.mxu0 %v1983_v12 }
 0x38a   :  { %1986 = vmatpush1.bf16.msra.mxu0 %v1985_v16 }
 0x425   :  { %v1198_v13 = vpop.f32.mrb[16].mxu0 }
 0x426   :  { %v1204_v39 = vsel %vm1079_vm11, %v1198_v13, 0.0  ;;  %v1212_v43 = vmul.f32 %v1198_v13, %v1198_v13  ;;  %v1735_v44 = vpop.f32.mrb[17].mxu0 }
 0x427   :  { %v1205_v45 = vrot.slane %v1204_v39, 4 }
 0x428   :  { %v1213_v46 = vsel %vm1079_vm11, %v1212_v43, 0.0 }
 0x429   :  { %v1206_v47 = vadd.f32 %v1205_v45, %v1204_v39  ;;  %v1214_v48 = vrot.slane %v1213_v46, 4 }
 0x42b   :  { %v1207_v49 = vrot.slane %v1206_v47, 2  ;;  %v1215_v50 = vadd.f32 %v1214_v48, %v1213_v46 }
 0x42d   :  { %v1208_v51 = vadd.f32 %v1207_v49, %v1206_v47  ;;  %v1216_v52 = vrot.slane %v1215_v50, 2 }
 0x42f   :  { %v1209_v54 = vrot.slane %v1208_v51, 1  ;;  %v1217_v55 = vadd.f32 %v1216_v52, %v1215_v50 }
 0x431   :  { %v1210_v56 = vadd.f32 %v1209_v54, %v1208_v51  ;;  %v1218_v58 = vrot.slane %v1217_v55, 1 }
 0x433   :  { %v1211_v59 = vmul.f32 0.5, %v1210_v56  ;;  %v1219_v60 = vadd.f32 %v1218_v58, %v1217_v55 }
 0x435   :  { %v1220_v61 = vmul.f32 0.5, %v1219_v60  ;;  %v1221_v62 = vmul.f32 %v1211_v59, %v1211_v59 }
 0x437   :  { %v1222_v63 = vsub.f32 %v1220_v61, %v1221_v62 }
 0x439   :  { %v1223_v53 = vmax.f32 %v1222_v63, 0.0 }
 0x43b   :  { %v1224_v41 = vadd.f32 1e-05, %v1223_v53 }
 0x43d   :  { %2001 = vrsqrt.f32 %v1224_v41 }
 0x447   :  { %v2002_v0 = vpop.eup %2001 }
 0x448   :  { %v1226_v1 = vmul.f32 %v2002_v0, %v1202_v57 }
 0x44a   :  { %v1230_v3 = vrot.slane %v1226_v1, %v2520_v42  ;;  %v1232_v4 = vmul.f32 %v1226_v1, %v1211_v59 }
 0x44c   :  { %v1233_v5 = vsub.f32 %v1203_v2, %v1232_v4  ;;  %v1231_v6 = vmul.f32 %v1230_v3, %v1198_v13 }
 0x44e   :  { %v1237_v7 = vrot.slane %v1233_v5, %v2520_v42 }
 0x450   :  { %v1238_v8 = vadd.f32 %v1237_v7, %v1231_v6 }
 0x452   :  { %v1239_v9 = vmax.f32 %v1238_v8, 0.0 }
 0x454   :  { %1769 = vmatmul.mubr.f32.vlgmr.msra.gmra.mrb[18].mxu1 %v1239_v9 }
 0x527   :  { %v1327_v18 = vpop.f32.mrb[18].mxu1 }
 0x528   :  { %v1328_v19 = vadd.f32 %v1483_v17, %v1327_v18  ;;  %v1770_v20 = vpop.f32.mrb[19].mxu1 }
 0x52a   :  { %v1331_v21 = vmax.f32 %v1328_v19, 0.0 }
 0x52c   :  { %1441 = vmatmul.mubr.f32.vlgmr.msra.gmra.mrb[18].mxu0 %v1331_v21 }
 0x5ff   :  { %v1442_v26 = vpop.f32.mrb[18].mxu0 }
 0x600   :  { %v1443_v27 = vadd.f32 %v1442_v26, %v1369_v24  ;;  %v1444_v28 = vpop.f32.mrb[19].mxu0 }
 0x601   :  { %v1445_v29 = vadd.f32 %v1444_v28, %v1373_v25 }
 0x602   :  { %v1447_v30 = vmax.f32 %v1443_v27, 0.0 }
 0x603   :  { %v1448_v31 = vmax.f32 %v1445_v29, 0.0 }
 0x605   :  { %v1451_v32 = vcombine.low %v1447_v30, %v1448_v31 }
 0x607   :  { %1484 = vst.sshfl [vmem:[%s2852_s10] sm:$0x33 pattern:$0x76325410] %v1451_v32 }

// kernel: aefnet_forward.6
= control target key start
LH: loop header
LB: loop body
LE: loop exit
PB: predicated region body
PF: predicated region fallthrough
CT: control target
= control target key end

     0   :  { %s1974_s12 = smov 0   ;;  %s2726_s0 = inlined_call_operand.vmem [shape: f32[128,1600], index: 0, kind: input, shape index: {}]   ;;  %s2727_s1 = inlined_call_operand.vmem [shape: f32[1600,32], index: 1, kind: input, shape index: {}]   ;;  %s2728_s2 = inlined_call_operand.vmem [shape: f32[1,32], index: 2, kind: input, shape index: {}]   ;;  %s2729_s3 = inlined_call_operand.vmem [shape: f32[128,32], index: 3, kind: output, shape index: {}]  }
   0x1 LB: > { %s1321_s13 = sadd.s32 4294967295, %s1952_s12   ;;  %p1325_p0 = scmp.ge.s32.totalorder %s1952_s12, 1  ;;  %s1952_s12 = sphi %s1974_s12, %s13_s12  }
   0x2   : > { %p139_p1 = scmp.lt.s32.totalorder %s1952_s12, 3 }
   0x4   : > { %p140_p2 = pnand %p1325_p0, %p139_p1 }
   0x5   : > { %v297_v0 = vld [vmem:[%s2727_s1 + $0x80] sm:$0xff] (!%p140_p2)  ;;  %v298_v1 = vld [vmem:[%s2727_s1 + $0x88] sm:$0xff] (!%p140_p2)  ;;  %v299_v11 = vld [vmem:[%s2727_s1 + $0x90] sm:$0xff] (!%p140_p2)  ;;  %s2018_s11 = sshll.u32 (!%p140_p2), %s1321_s13, 3  ;;  %vm488_vm0 = vcmask (!%p140_p2), 523264   ;;  %vm1256_vm1 = vcmask (!%p140_p2), 261120  }
   0x6   : > { %143 = sbr.rel (%p140_p2) target bundleno = 360 (0x168), region = 32  ;;  %v329_v2 = vld [vmem:[%s2727_s1 + $0x180] sm:$0xff] (!%p140_p2)  ;;  %v1721_v3 = vpack.c.bf16 (!%p140_p2), %v298_v1, %v297_v0  ;;  %v330_v4 = vld [vmem:[%s2727_s1 + $0x188] sm:$0xff] (!%p140_p2)  ;;  %v300_v13 = vld [vmem:[%s2727_s1 + $0x98] sm:$0xff] (!%p140_p2)  ;;  %p165_p3 = scmp.lt.s32.totalorder (!%p140_p2), %s2018_s11, 15 }
   0x7   : > { %v281_v5 = vld [vmem:[%s2727_s1] sm:$0xff] (!%p140_p2)  ;;  %v282_v6 = vld [vmem:[%s2727_s1 + $0x8] sm:$0xff] (!%p140_p2)  ;;  %v1753_v7 = vpack.c.bf16 (!%p140_p2), %v330_v4, %v329_v2  ;;  %v331_v14 = vld [vmem:[%s2727_s1 + $0x190] sm:$0xff] (!%p140_p2)  ;;  %v1725_v16 = vpack.c.bf16 (!%p140_p2), %v300_v13, %v299_v11 }
   0x8   : > { %v1723_v8 = vpack.c.bf16 (!%p140_p2), %v282_v6, %v281_v5  ;;  %v313_v9 = vld [vmem:[%s2727_s1 + $0x100] sm:$0xff] (!%p140_p2)  ;;  %v314_v10 = vld [vmem:[%s2727_s1 + $0x108] sm:$0xff] (!%p140_p2)  ;;  %1722 = vmatprep.subr.bf16.mxu0 (!%p140_p2), %v1721_v3  ;;  %v332_v15 = vld [vmem:[%s2727_s1 + $0x198] sm:$0xff] (!%p140_p2) }
   0x9   : > { %v1755_v12 = vpack.c.bf16 (!%p140_p2), %v314_v10, %v313_v9  ;;  %1754 = vmatprep.subr.bf16.mxu1 (!%p140_p2), %v1753_v7  ;;  %v1757_v17 = vpack.c.bf16 (!%p140_p2), %v332_v15, %v331_v14  ;;  %v283_v18 = vld [vmem:[%s2727_s1 + $0x10] sm:$0xff] (!%p140_p2)  ;;  %v284_v19 = vld [vmem:[%s2727_s1 + $0x18] sm:$0xff] (!%p140_p2)  ;;  %v301_v23 = vld [vmem:[%s2727_s1 + $0xa0] sm:$0xff] (!%p140_p2) }
   0xa   : > { %1724 = vmatpush3.bf16.msra.mxu0 (!%p140_p2), %v1723_v8  ;;  %v315_v20 = vld [vmem:[%s2727_s1 + $0x110] sm:$0xff] (!%p140_p2)  ;;  %v1727_v21 = vpack.c.bf16 (!%p140_p2), %v284_v19, %v283_v18  ;;  %v316_v22 = vld [vmem:[%s2727_s1 + $0x118] sm:$0xff] (!%p140_p2)  ;;  %v302_v24 = vld [vmem:[%s2727_s1 + $0xa8] sm:$0xff] (!%p140_p2) }
   0xb   : > { %1756 = vmatpush3.bf16.msra.mxu1 (!%p140_p2), %v1755_v12  ;;  %1726 = vmatprep.subr.bf16.mxu0 (!%p140_p2), %v1725_v16  ;;  %v1759_v25 = vpack.c.bf16 (!%p140_p2), %v316_v22, %v315_v20  ;;  %v1729_v26 = vpack.c.bf16 (!%p140_p2), %v302_v24, %v301_v23  ;;  %v333_v27 = vld [vmem:[%s2727_s1 + $0x1a0] sm:$0xff] (!%p140_p2)  ;;  %v334_v28 = vld [vmem:[%s2727_s1 + $0x1a8] sm:$0xff] (!%p140_p2)  ;;  %v303_v35 = vld [vmem:[%s2727_s1 + $0xb0] sm:$0xff] (!%p140_p2) }
   0xc   : > { %1758 = vmatprep.subr.bf16.mxu1 (!%p140_p2), %v1757_v17  ;;  %v285_v29 = vld [vmem:[%s2727_s1 + $0x20] sm:$0xff] (!%p140_p2)  ;;  %v1761_v30 = vpack.c.bf16 (!%p140_p2), %v334_v28, %v333_v27  ;;  %v286_v31 = vld [vmem:[%s2727_s1 + $0x28] sm:$0xff] (!%p140_p2)  ;;  %v304_v36 = vld [vmem:[%s2727_s1 + $0xb8] sm:$0xff] (!%p140_p2) }
   0xd   : > { %v317_v32 = vld [vmem:[%s2727_s1 + $0x120] sm:$0xff]  ;;  %v318_v33 = vld [vmem:[%s2727_s1 + $0x128] sm:$0xff]  ;;  %v1731_v34 = vpack.c.bf16 %v286_v31, %v285_v29  ;;  %v335_v37 = vld [vmem:[%s2727_s1 + $0x1b0] sm:$0xff]  ;;  %v1733_v39 = vpack.c.bf16 %v304_v36, %v303_v35  ;;  %s2731_s11 = smov (!%p165_p3, %s2018_s11), 15 }
   0xe   : > { %1728 = vmatpush3.bf16.msra.mxu0 %v1727_v21  ;;  %v1763_v38 = vpack.c.bf16 %v318_v33, %v317_v32  ;;  %v336_v40 = vld [vmem:[%s2727_s1 + $0x1b8] sm:$0xff]  ;;  %v287_v41 = vld [vmem:[%s2727_s1 + $0x30] sm:$0xff]  ;;  %v305_v46 = vld [vmem:[%s2727_s1 + $0xc0] sm:$0xff]  ;;  %s1937_s23 = smul.u32 104, %s2731_s11 }
   0xf   : > { %1760 = vmatpush3.bf16.msra.mxu1 %v1759_v25  ;;  %1730 = vmatprep.subr.bf16.mxu0 %v1729_v26  ;;  %v288_v42 = vld [vmem:[%s2727_s1 + $0x38] sm:$0xff]  ;;  %v1765_v43 = vpack.c.bf16 %v336_v40, %v335_v37  ;;  %v319_v44 = vld [vmem:[%s2727_s1 + $0x130] sm:$0xff]  ;;  %v306_v47 = vld [vmem:[%s2727_s1 + $0xc8] sm:$0xff] }
  0x10   : > { %1762 = vmatprep.subr.bf16.mxu1 %v1761_v30  ;;  %v320_v45 = vld [vmem:[%s2727_s1 + $0x138] sm:$0xff]  ;;  %v337_v48 = vld [vmem:[%s2727_s1 + $0x1c0] sm:$0xff]  ;;  %v338_v49 = vld [vmem:[%s2727_s1 + $0x1c8] sm:$0xff]  ;;  %v1735_v50 = vpack.c.bf16 %v288_v42, %v287_v41  ;;  %v1737_v52 = vpack.c.bf16 %v306_v47, %v305_v46  ;;  %s2144_s18 = scalar_lea.vmem %s2726_s0, %s1937_s23 }
  0x11   : > { %v1767_v51 = vpack.c.bf16 %v320_v45, %v319_v44  ;;  %v289_v53 = vld [vmem:[%s2727_s1 + $0x40] sm:$0xff]  ;;  %v290_v54 = vld [vmem:[%s2727_s1 + $0x48] sm:$0xff]  ;;  %v1769_v56 = vpack.c.bf16 %v338_v49, %v337_v48  ;;  %v307_v58 = vld [vmem:[%s2727_s1 + $0xd0] sm:$0xff] }
  0x12   : > { %1732 = vmatpush3.bf16.msra.mxu0 %v1731_v34  ;;  %v321_v55 = vld [vmem:[%s2727_s1 + $0x140] sm:$0xff]  ;;  %v322_v57 = vld [vmem:[%s2727_s1 + $0x148] sm:$0xff]  ;;  %v308_v59 = vld [vmem:[%s2727_s1 + $0xd8] sm:$0xff]  ;;  %v1739_v62 = vpack.c.bf16 %v290_v54, %v289_v53 }
  0x13   : > { %1764 = vmatpush3.bf16.msra.mxu1 %v1763_v38  ;;  %1734 = vmatprep.subr.bf16.mxu0 %v1733_v39  ;;  %v339_v60 = vld [vmem:[%s2727_s1 + $0x1d0] sm:$0xff]  ;;  %v340_v61 = vld [vmem:[%s2727_s1 + $0x1d8] sm:$0xff]  ;;  %v1771_v63 = vpack.c.bf16 %v322_v57, %v321_v55  ;;  %v1741_v0 = vpack.c.bf16 %v308_v59, %v307_v58  ;;  %v309_v6 = vld [vmem:[%s2727_s1 + $0xe0] sm:$0xff] }
  0x14   : > { %1766 = vmatprep.subr.bf16.mxu1 %v1765_v43  ;;  %v291_v1 = vld [vmem:[%s2727_s1 + $0x50] sm:$0xff]  ;;  %v292_v2 = vld [vmem:[%s2727_s1 + $0x58] sm:$0xff]  ;;  %v1773_v4 = vpack.c.bf16 %v340_v61, %v339_v60  ;;  %v310_v7 = vld [vmem:[%s2727_s1 + $0xe8] sm:$0xff] }
  0x15   : > { %v323_v3 = vld [vmem:[%s2727_s1 + $0x150] sm:$0xff]  ;;  %v324_v5 = vld [vmem:[%s2727_s1 + $0x158] sm:$0xff]  ;;  %v341_v8 = vld [vmem:[%s2727_s1 + $0x1e0] sm:$0xff]  ;;  %v1743_v10 = vpack.c.bf16 %v292_v2, %v291_v1  ;;  %v1745_v14 = vpack.c.bf16 %v310_v7, %v309_v6 }
  0x16   : > { %1736 = vmatpush3.bf16.msra.mxu0 %v1735_v50  ;;  %v342_v9 = vld [vmem:[%s2727_s1 + $0x1e8] sm:$0xff]  ;;  %v293_v11 = vld [vmem:[%s2727_s1 + $0x60] sm:$0xff]  ;;  %v1775_v13 = vpack.c.bf16 %v324_v5, %v323_v3  ;;  %v180_v17 = vld [vmem:[%s2144_s18 + $0x18] sm:$0xff] }
  0x17   : > { %1768 = vmatpush3.bf16.msra.mxu1 %v1767_v51  ;;  %1738 = vmatprep.subr.bf16.mxu0 %v1737_v52  ;;  %v294_v12 = vld [vmem:[%s2727_s1 + $0x68] sm:$0xff]  ;;  %v325_v15 = vld [vmem:[%s2727_s1 + $0x160] sm:$0xff]  ;;  %v1777_v18 = vpack.c.bf16 %v342_v9, %v341_v8  ;;  %v311_v20 = vld [vmem:[%s2727_s1 + $0xf0] sm:$0xff] }
  0x18   : > { %1770 = vmatprep.subr.bf16.mxu1 %v1769_v56  ;;  %v178_v16 = vld [vmem:[%s2144_s18 + $0x8] sm:$0xff]  ;;  %v312_v21 = vld [vmem:[%s2727_s1 + $0xf8] sm:$0xff]  ;;  %v343_v22 = vld [vmem:[%s2727_s1 + $0x1f0] sm:$0xff]  ;;  %682 = vmatprep.mubr.f32.mxu1 %v180_v17  ;;  %v1747_v24 = vpack.c.bf16 %v294_v12, %v293_v11 }
  0x19   : > { %v326_v19 = vld [vmem:[%s2727_s1 + $0x168] sm:$0xff]  ;;  %577 = vmatprep.mubr.f32.mxu0 %v178_v16  ;;  %v344_v23 = vld [vmem:[%s2727_s1 + $0x1f8] sm:$0xff]  ;;  %v1749_v26 = vpack.c.bf16 %v312_v21, %v311_v20  ;;  %v295_v27 = vld [vmem:[%s2727_s1 + $0x70] sm:$0xff] }
  0x1a   : > { %1740 = vmatpush3.bf16.msra.mxu0 %v1739_v62  ;;  %v1779_v25 = vpack.c.bf16 %v326_v19, %v325_v15  ;;  %v296_v28 = vld [vmem:[%s2727_s1 + $0x78] sm:$0xff]  ;;  %v327_v29 = vld [vmem:[%s2727_s1 + $0x170] sm:$0xff]  ;;  %v1781_v30 = vpack.c.bf16 %v344_v23, %v343_v22  ;;  %v361_v32 = vld [vmem:[%s2727_s1 + $0x280] sm:$0xff] }
  0x1b   : > { %1772 = vmatpush3.bf16.msra.mxu1 %v1771_v63  ;;  %1742 = vmatprep.subr.bf16.mxu0 %v1741_v0  ;;  %v328_v31 = vld [vmem:[%s2727_s1 + $0x178] sm:$0xff]  ;;  %v362_v33 = vld [vmem:[%s2727_s1 + $0x288] sm:$0xff]  ;;  %v393_v34 = vld [vmem:[%s2727_s1 + $0x380] sm:$0xff]  ;;  %v1751_v36 = vpack.c.bf16 %v296_v28, %v295_v27 }
  0x1c   : > { %1774 = vmatprep.subr.bf16.mxu1 %v1773_v4  ;;  %v394_v35 = vld [vmem:[%s2727_s1 + $0x388] sm:$0xff]  ;;  %v1783_v37 = vpack.c.bf16 %v328_v31, %v327_v29  ;;  %v1785_v38 = vpack.c.bf16 %v362_v33, %v361_v32  ;;  %v345_v39 = vld [vmem:[%s2727_s1 + $0x200] sm:$0xff]  ;;  %v363_v44 = vld [vmem:[%s2727_s1 + $0x290] sm:$0xff] }
  0x1d   : > { %v346_v40 = vld [vmem:[%s2727_s1 + $0x208] sm:$0xff]  ;;  %v1817_v41 = vpack.c.bf16 %v394_v35, %v393_v34  ;;  %v377_v42 = vld [vmem:[%s2727_s1 + $0x300] sm:$0xff]  ;;  %v364_v45 = vld [vmem:[%s2727_s1 + $0x298] sm:$0xff] }
  0x1e   : > { %1744 = vmatpush3.bf16.msra.mxu0 %v1743_v10  ;;  %v378_v43 = vld [vmem:[%s2727_s1 + $0x308] sm:$0xff]  ;;  %v177_v46 = vld [vmem:[%s2144_s18] sm:$0xff]  ;;  %v1787_v47 = vpack.c.bf16 %v346_v40, %v345_v39  ;;  %v395_v48 = vld [vmem:[%s2727_s1 + $0x390] sm:$0xff]  ;;  %v1789_v55 = vpack.c.bf16 %v364_v45, %v363_v44 }
  0x1f   : > { %1776 = vmatpush3.bf16.msra.mxu1 %v1775_v13  ;;  %1746 = vmatprep.subr.bf16.mxu0 %v1745_v14  ;;  %v396_v49 = vld [vmem:[%s2727_s1 + $0x398] sm:$0xff]  ;;  %v179_v50 = vld [vmem:[%s2144_s18 + $0x10] sm:$0xff]  ;;  %v1819_v51 = vpack.c.bf16 %v378_v43, %v377_v42  ;;  %v193_v58 = vld [vmem:[%s2144_s18 + $0x80] sm:$0xff] }
  0x20   : > { %1778 = vmatprep.subr.bf16.mxu1 %v1777_v18  ;;  %v347_v52 = vld [vmem:[%s2727_s1 + $0x210] sm:$0xff]  ;;  %v348_v53 = vld [vmem:[%s2727_s1 + $0x218] sm:$0xff]  ;;  %v1821_v59 = vpack.c.bf16 %v396_v49, %v395_v48  ;;  %v365_v60 = vld [vmem:[%s2727_s1 + $0x2a0] sm:$0xff] }
  0x21   : > { %v191_v54 = vld [vmem:[%s2144_s18 + $0x70] sm:$0xff]  ;;  %v380_v57 = vld [vmem:[%s2727_s1 + $0x318] sm:$0xff]  ;;  %v366_v61 = vld [vmem:[%s2727_s1 + $0x2a8] sm:$0xff]  ;;  %v1791_v63 = vpack.c.bf16 %v348_v53, %v347_v52 }
  0x22   : > { %1748 = vmatpush3.bf16.msra.mxu0 %v1747_v24  ;;  %v379_v56 = vld [vmem:[%s2727_s1 + $0x310] sm:$0xff]  ;;  %v190_v62 = vld [vmem:[%s2144_s18 + $0x68] sm:$0xff]  ;;  %v397_v0 = vld [vmem:[%s2727_s1 + $0x3a0] sm:$0xff]  ;;  %v1793_v7 = vpack.c.bf16 %v366_v61, %v365_v60 }
  0x23   : > { %1780 = vmatpush3.bf16.msra.mxu1 %v1779_v25  ;;  %1750 = vmatprep.subr.bf16.mxu0 %v1749_v26  ;;  %v398_v1 = vld [vmem:[%s2727_s1 + $0x3a8] sm:$0xff]  ;;  %v192_v2 = vld [vmem:[%s2144_s18 + $0x78] sm:$0xff]  ;;  %v1823_v3 = vpack.c.bf16 %v380_v57, %v379_v56  ;;  %v349_v4 = vld [vmem:[%s2727_s1 + $0x220] sm:$0xff] }
  0x24   : > { %1782 = vmatprep.subr.bf16.mxu1 %v1781_v30  ;;  %v350_v5 = vld [vmem:[%s2727_s1 + $0x228] sm:$0xff]  ;;  %v204_v6 = vld [vmem:[%s2144_s18 + $0xd8] sm:$0xff]  ;;  %v381_v8 = vld [vmem:[%s2727_s1 + $0x320] sm:$0xff]  ;;  %v1825_v11 = vpack.c.bf16 %v398_v1, %v397_v0 }
  0x25   : > { %v382_v9 = vld [vmem:[%s2727_s1 + $0x328] sm:$0xff]  ;;  %v367_v12 = vld [vmem:[%s2727_s1 + $0x2b0] sm:$0xff]  ;;  %v368_v13 = vld [vmem:[%s2727_s1 + $0x2b8] sm:$0xff]  ;;  %v1795_v15 = vpack.c.bf16 %v350_v5, %v349_v4 }
  0x26   : > { %1752 = vmatpush3.bf16.msra.mxu0 %v1751_v36  ;;  %v206_v10 = vld [vmem:[%s2144_s18 + $0xe8] sm:$0xff]  ;;  %v203_v14 = vld [vmem:[%s2144_s18 + $0xd0] sm:$0xff]  ;;  %v400_v17 = vld [vmem:[%s2727_s1 + $0x3b8] sm:$0xff]  ;;  %v1827_v19 = vpack.c.bf16 %v382_v9, %v381_v8  ;;  %v1797_v23 = vpack.c.bf16 %v368_v13, %v367_v12 }
  0x27   : > { %1784 = vmatpush3.bf16.msra.mxu1 %v1783_v37  ;;  %1786 = vmatprep.subr.bf16.mxu0 %v1785_v38  ;;  %v399_v16 = vld [vmem:[%s2727_s1 + $0x3b0] sm:$0xff]  ;;  %v205_v18 = vld [vmem:[%s2144_s18 + $0xe0] sm:$0xff]  ;;  %v352_v21 = vld [vmem:[%s2727_s1 + $0x238] sm:$0xff] }
  0x28   : > { %1818 = vmatprep.subr.bf16.mxu1 %v1817_v41  ;;  %v351_v20 = vld [vmem:[%s2727_s1 + $0x230] sm:$0xff]  ;;  %v217_v22 = vld [vmem:[%s2144_s18 + $0x140] sm:$0xff]  ;;  %v384_v25 = vld [vmem:[%s2727_s1 + $0x338] sm:$0xff]  ;;  %v1829_v27 = vpack.c.bf16 %v400_v17, %v399_v16 }
  0x29   : > { %578 = vmatmul.mubr.f32.vlgmr.msra.gmra.mrb[0].mxu0 %v177_v46  ;;  %v383_v24 = vld [vmem:[%s2727_s1 + $0x330] sm:$0xff]  ;;  %v369_v28 = vld [vmem:[%s2727_s1 + $0x2c0] sm:$0xff]  ;;  %v370_v29 = vld [vmem:[%s2727_s1 + $0x2c8] sm:$0xff]  ;;  %v1799_v31 = vpack.c.bf16 %v352_v21, %v351_v20 }
  0x2a   : > { %683 = vmatmul.mubr.f32.vlgmr.msra.gmra.mrb[0].mxu1 %v179_v50  ;;  %1788 = vmatpush3.bf16.msra.mxu0 %v1787_v47  ;;  %v219_v26 = vld [vmem:[%s2144_s18 + $0x150] sm:$0xff]  ;;  %v216_v30 = vld [vmem:[%s2144_s18 + $0x138] sm:$0xff]  ;;  %v401_v32 = vld [vmem:[%s2727_s1 + $0x3c0] sm:$0xff]  ;;  %v1831_v35 = vpack.c.bf16 %v384_v25, %v383_v24  ;;  %v1801_v39 = vpack.c.bf16 %v370_v29, %v369_v28 }
  0x2b   : > { %1820 = vmatpush3.bf16.msra.mxu1 %v1819_v51  ;;  %582 = vmatprep.mubr.f32.mxu0 %v191_v54  ;;  %v402_v33 = vld [vmem:[%s2727_s1 + $0x3c8] sm:$0xff]  ;;  %v353_v36 = vld [vmem:[%s2727_s1 + $0x240] sm:$0xff]  ;;  %v232_v42 = vld [vmem:[%s2144_s18 + $0x1b8] sm:$0xff] }
  0x2c   : > { %687 = vmatprep.mubr.f32.mxu1 %v193_v58  ;;  %1790 = vmatprep.subr.bf16.mxu0 %v1789_v55  ;;  %v218_v34 = vld [vmem:[%s2144_s18 + $0x148] sm:$0xff]  ;;  %v385_v40 = vld [vmem:[%s2727_s1 + $0x340] sm:$0xff]  ;;  %v1833_v43 = vpack.c.bf16 %v402_v33, %v401_v32  ;;  %v371_v44 = vld [vmem:[%s2727_s1 + $0x2d0] sm:$0xff] }
  0x2d   : > { %583 = vmatmul.mubr.f32.gmra.mrb[2].mxu0 %v190_v62  ;;  %1822 = vmatprep.subr.bf16.mxu1 %v1821_v59  ;;  %v354_v37 = vld [vmem:[%s2727_s1 + $0x248] sm:$0xff]  ;;  %v372_v45 = vld [vmem:[%s2727_s1 + $0x2d8] sm:$0xff]  ;;  %v229_v46 = vld [vmem:[%s2144_s18 + $0x1a0] sm:$0xff] }
  0x2e   : > { %688 = vmatmul.mubr.f32.gmra.mrb[2].mxu1 %v192_v2  ;;  %1792 = vmatpush3.bf16.msra.mxu0 %v1791_v63  ;;  %v230_v38 = vld [vmem:[%s2144_s18 + $0x1a8] sm:$0xff]  ;;  %v1803_v47 = vpack.c.bf16 %v354_v37, %v353_v36  ;;  %v403_v48 = vld [vmem:[%s2727_s1 + $0x3d0] sm:$0xff]  ;;  %v404_v49 = vld [vmem:[%s2727_s1 + $0x3d8] sm:$0xff]  ;;  %v1805_v55 = vpack.c.bf16 %v372_v45, %v371_v44 }
  0x2f   : > { %1824 = vmatpush3.bf16.msra.mxu1 %v1823_v3  ;;  %587 = vmatprep.mubr.f32.mxu0 %v204_v6  ;;  %v386_v41 = vld [vmem:[%s2727_s1 + $0x348] sm:$0xff]  ;;  %v231_v50 = vld [vmem:[%s2144_s18 + $0x1b0] sm:$0xff]  ;;  %v356_v53 = vld [vmem:[%s2727_s1 + $0x258] sm:$0xff]  ;;  %v1837_v59 = vpack.c.bf16 %v404_v49, %v403_v48 }
  0x30   : > { %692 = vmatprep.mubr.f32.mxu1 %v206_v10  ;;  %1794 = vmatprep.subr.bf16.mxu0 %v1793_v7  ;;  %v1835_v51 = vpack.c.bf16 %v386_v41, %v385_v40  ;;  %v355_v52 = vld [vmem:[%s2727_s1 + $0x250] sm:$0xff]  ;;  %v388_v57 = vld [vmem:[%s2727_s1 + $0x358] sm:$0xff]  ;;  %v245_v58 = vld [vmem:[%s2144_s18 + $0x220] sm:$0xff] }
  0x31   : > { %588 = vmatmul.mubr.f32.gmra.mrb[4].mxu0 %v203_v14  ;;  %1826 = vmatprep.subr.bf16.mxu1 %v1825_v11  ;;  %v243_v54 = vld [vmem:[%s2144_s18 + $0x210] sm:$0xff]  ;;  %v373_v60 = vld [vmem:[%s2727_s1 + $0x2e0] sm:$0xff]  ;;  %v374_v61 = vld [vmem:[%s2727_s1 + $0x2e8] sm:$0xff]  ;;  %v1807_v63 = vpack.c.bf16 %v356_v53, %v355_v52 }
  0x32   : > { %693 = vmatmul.mubr.f32.gmra.mrb[4].mxu1 %v205_v18  ;;  %1796 = vmatpush3.bf16.msra.mxu0 %v1795_v15  ;;  %v387_v56 = vld [vmem:[%s2727_s1 + $0x350] sm:$0xff]  ;;  %v242_v62 = vld [vmem:[%s2144_s18 + $0x208] sm:$0xff]  ;;  %v405_v0 = vld [vmem:[%s2727_s1 + $0x3e0] sm:$0xff]  ;;  %v1809_v7 = vpack.c.bf16 %v374_v61, %v373_v60 }
  0x33   : > { %1828 = vmatpush3.bf16.msra.mxu1 %v1827_v19  ;;  %592 = vmatprep.mubr.f32.mxu0 %v217_v22  ;;  %v406_v1 = vld [vmem:[%s2727_s1 + $0x3e8] sm:$0xff]  ;;  %v244_v2 = vld [vmem:[%s2144_s18 + $0x218] sm:$0xff]  ;;  %v1839_v3 = vpack.c.bf16 %v388_v57, %v387_v56  ;;  %v357_v4 = vld [vmem:[%s2727_s1 + $0x260] sm:$0xff] }
  0x34   : > { %697 = vmatprep.mubr.f32.mxu1 %v219_v26  ;;  %1798 = vmatprep.subr.bf16.mxu0 %v1797_v23  ;;  %v358_v5 = vld [vmem:[%s2727_s1 + $0x268] sm:$0xff]  ;;  %v256_v6 = vld [vmem:[%s2144_s18 + $0x278] sm:$0xff]  ;;  %v389_v8 = vld [vmem:[%s2727_s1 + $0x360] sm:$0xff]  ;;  %v1841_v11 = vpack.c.bf16 %v406_v1, %v405_v0 }
  0x35   : > { %593 = vmatmul.mubr.f32.gmra.mrb[6].mxu0 %v216_v30  ;;  %1830 = vmatprep.subr.bf16.mxu1 %v1829_v27  ;;  %v390_v9 = vld [vmem:[%s2727_s1 + $0x368] sm:$0xff]  ;;  %v375_v12 = vld [vmem:[%s2727_s1 + $0x2f0] sm:$0xff]  ;;  %v376_v13 = vld [vmem:[%s2727_s1 + $0x2f8] sm:$0xff]  ;;  %v1811_v15 = vpack.c.bf16 %v358_v5, %v357_v4 }
  0x36   : > { %698 = vmatmul.mubr.f32.gmra.mrb[6].mxu1 %v218_v34  ;;  %1800 = vmatpush3.bf16.msra.mxu0 %v1799_v31  ;;  %v258_v10 = vld [vmem:[%s2144_s18 + $0x288] sm:$0xff]  ;;  %v255_v14 = vld [vmem:[%s2144_s18 + $0x270] sm:$0xff]  ;;  %v408_v17 = vld [vmem:[%s2727_s1 + $0x3f8] sm:$0xff]  ;;  %v1843_v19 = vpack.c.bf16 %v390_v9, %v389_v8  ;;  %v1813_v23 = vpack.c.bf16 %v376_v13, %v375_v12 }
  0x37   : > { %1832 = vmatpush3.bf16.msra.mxu1 %v1831_v35  ;;  %597 = vmatprep.mubr.f32.mxu0 %v230_v38  ;;  %v407_v16 = vld [vmem:[%s2727_s1 + $0x3f0] sm:$0xff]  ;;  %v257_v18 = vld [vmem:[%s2144_s18 + $0x280] sm:$0xff]  ;;  %v360_v21 = vld [vmem:[%s2727_s1 + $0x278] sm:$0xff] }
  0x38   : > { %702 = vmatprep.mubr.f32.mxu1 %v232_v42  ;;  %1802 = vmatprep.subr.bf16.mxu0 %v1801_v39  ;;  %v359_v20 = vld [vmem:[%s2727_s1 + $0x270] sm:$0xff]  ;;  %v269_v22 = vld [vmem:[%s2144_s18 + $0x2e0] sm:$0xff]  ;;  %v392_v25 = vld [vmem:[%s2727_s1 + $0x378] sm:$0xff]  ;;  %v1845_v27 = vpack.c.bf16 %v408_v17, %v407_v16 }
  0x39   : > { %598 = vmatmul.mubr.f32.gmra.mrb[8].mxu0 %v229_v46  ;;  %1834 = vmatprep.subr.bf16.mxu1 %v1833_v43  ;;  %v391_v24 = vld [vmem:[%s2727_s1 + $0x370] sm:$0xff]  ;;  %v425_v28 = vld [vmem:[%s2727_s1 + $0x480] sm:$0xff]  ;;  %v426_v29 = vld [vmem:[%s2727_s1 + $0x488] sm:$0xff]  ;;  %v1815_v31 = vpack.c.bf16 %v360_v21, %v359_v20 }
  0x3a   : > { %703 = vmatmul.mubr.f32.gmra.mrb[8].mxu1 %v231_v50  ;;  %1804 = vmatpush3.bf16.msra.mxu0 %v1803_v47  ;;  %v271_v26 = vld [vmem:[%s2144_s18 + $0x2f0] sm:$0xff]  ;;  %v268_v30 = vld [vmem:[%s2144_s18 + $0x2d8] sm:$0xff]  ;;  %v457_v32 = vld [vmem:[%s2727_s1 + $0x580] sm:$0xff]  ;;  %v1847_v35 = vpack.c.bf16 %v392_v25, %v391_v24  ;;  %v1849_v39 = vpack.c.bf16 %v426_v29, %v425_v28 }
  0x3b   : > { %1836 = vmatpush3.bf16.msra.mxu1 %v1835_v51  ;;  %602 = vmatprep.mubr.f32.mxu0 %v243_v54  ;;  %v458_v33 = vld [vmem:[%s2727_s1 + $0x588] sm:$0xff]  ;;  %v409_v36 = vld [vmem:[%s2727_s1 + $0x400] sm:$0xff]  ;;  %v184_v42 = vld [vmem:[%s2144_s18 + $0x38] sm:$0xff] }
  0x3c   : > { %707 = vmatprep.mubr.f32.mxu1 %v245_v58  ;;  %1806 = vmatprep.subr.bf16.mxu0 %v1805_v55  ;;  %v270_v34 = vld [vmem:[%s2144_s18 + $0x2e8] sm:$0xff]  ;;  %v441_v40 = vld [vmem:[%s2727_s1 + $0x500] sm:$0xff]  ;;  %v1881_v43 = vpack.c.bf16 %v458_v33, %v457_v32  ;;  %v427_v44 = vld [vmem:[%s2727_s1 + $0x490] sm:$0xff] }
  0x3d   : > { %603 = vmatmul.mubr.f32.gmra.mrb[10].mxu0 %v242_v62  ;;  %1838 = vmatprep.subr.bf16.mxu1 %v1837_v59  ;;  %v410_v37 = vld [vmem:[%s2727_s1 + $0x408] sm:$0xff]  ;;  %v428_v45 = vld [vmem:[%s2727_s1 + $0x498] sm:$0xff]  ;;  %v181_v46 = vld [vmem:[%s2144_s18 + $0x20] sm:$0xff] }
  0x3e   : > { %708 = vmatmul.mubr.f32.gmra.mrb[10].mxu1 %v244_v2  ;;  %1808 = vmatpush3.bf16.msra.mxu0 %v1807_v63  ;;  %v182_v38 = vld [vmem:[%s2144_s18 + $0x28] sm:$0xff]  ;;  %v1851_v47 = vpack.c.bf16 %v410_v37, %v409_v36  ;;  %v459_v48 = vld [vmem:[%s2727_s1 + $0x590] sm:$0xff]  ;;  %v460_v49 = vld [vmem:[%s2727_s1 + $0x598] sm:$0xff]  ;;  %v1853_v55 = vpack.c.bf16 %v428_v45, %v427_v44 }
  0x3f   : > { %1840 = vmatpush3.bf16.msra.mxu1 %v1839_v3  ;;  %607 = vmatprep.mubr.f32.mxu0 %v256_v6  ;;  %v442_v41 = vld [vmem:[%s2727_s1 + $0x508] sm:$0xff]  ;;  %v183_v50 = vld [vmem:[%s2144_s18 + $0x30] sm:$0xff]  ;;  %v412_v53 = vld [vmem:[%s2727_s1 + $0x418] sm:$0xff]  ;;  %v1885_v59 = vpack.c.bf16 %v460_v49, %v459_v48 }
  0x40   : > { %712 = vmatprep.mubr.f32.mxu1 %v258_v10  ;;  %1810 = vmatprep.subr.bf16.mxu0 %v1809_v7  ;;  %v1883_v51 = vpack.c.bf16 %v442_v41, %v441_v40  ;;  %v411_v52 = vld [vmem:[%s2727_s1 + $0x410] sm:$0xff]  ;;  %v444_v57 = vld [vmem:[%s2727_s1 + $0x518] sm:$0xff]  ;;  %v197_v58 = vld [vmem:[%s2144_s18 + $0xa0] sm:$0xff] }
  0x41   : > { %608 = vmatmul.mubr.f32.gmra.mrb[12].mxu0 %v255_v14  ;;  %1842 = vmatprep.subr.bf16.mxu1 %v1841_v11  ;;  %v195_v54 = vld [vmem:[%s2144_s18 + $0x90] sm:$0xff]  ;;  %v429_v60 = vld [vmem:[%s2727_s1 + $0x4a0] sm:$0xff]  ;;  %v430_v61 = vld [vmem:[%s2727_s1 + $0x4a8] sm:$0xff]  ;;  %v1855_v63 = vpack.c.bf16 %v412_v53, %v411_v52 }
  0x42   : > { %713 = vmatmul.mubr.f32.gmra.mrb[12].mxu1 %v257_v18  ;;  %1812 = vmatpush3.bf16.msra.mxu0 %v1811_v15  ;;  %v443_v56 = vld [vmem:[%s2727_s1 + $0x510] sm:$0xff]  ;;  %v194_v62 = vld [vmem:[%s2144_s18 + $0x88] sm:$0xff]  ;;  %v461_v0 = vld [vmem:[%s2727_s1 + $0x5a0] sm:$0xff]  ;;  %v1857_v7 = vpack.c.bf16 %v430_v61, %v429_v60 }
  0x43   : > { %1844 = vmatpush3.bf16.msra.mxu1 %v1843_v19  ;;  %612 = vmatprep.mubr.f32.mxu0 %v269_v22  ;;  %v462_v1 = vld [vmem:[%s2727_s1 + $0x5a8] sm:$0xff]  ;;  %v196_v2 = vld [vmem:[%s2144_s18 + $0x98] sm:$0xff]  ;;  %v1887_v3 = vpack.c.bf16 %v444_v57, %v443_v56  ;;  %v413_v4 = vld [vmem:[%s2727_s1 + $0x420] sm:$0xff] }
  0x44   : > { %717 = vmatprep.mubr.f32.mxu1 %v271_v26  ;;  %1814 = vmatprep.subr.bf16.mxu0 %v1813_v23  ;;  %v414_v5 = vld [vmem:[%s2727_s1 + $0x428] sm:$0xff]  ;;  %v208_v6 = vld [vmem:[%s2144_s18 + $0xf8] sm:$0xff]  ;;  %v445_v8 = vld [vmem:[%s2727_s1 + $0x520] sm:$0xff]  ;;  %v1889_v11 = vpack.c.bf16 %v462_v1, %v461_v0 }
  0x45   : > { %613 = vmatmul.mubr.f32.gmra.mrb[14].mxu0 %v268_v30  ;;  %1846 = vmatprep.subr.bf16.mxu1 %v1845_v27  ;;  %v446_v9 = vld [vmem:[%s2727_s1 + $0x528] sm:$0xff]  ;;  %v431_v12 = vld [vmem:[%s2727_s1 + $0x4b0] sm:$0xff]  ;;  %v432_v13 = vld [vmem:[%s2727_s1 + $0x4b8] sm:$0xff]  ;;  %v1859_v15 = vpack.c.bf16 %v414_v5, %v413_v4 }
  0x46   : > { %718 = vmatmul.mubr.f32.gmra.mrb[14].mxu1 %v270_v34  ;;  %1816 = vmatpush3.bf16.msra.mxu0 %v1815_v31  ;;  %v210_v10 = vld [vmem:[%s2144_s18 + $0x108] sm:$0xff]  ;;  %v207_v14 = vld [vmem:[%s2144_s18 + $0xf0] sm:$0xff]  ;;  %v464_v17 = vld [vmem:[%s2727_s1 + $0x5b8] sm:$0xff]  ;;  %v1891_v19 = vpack.c.bf16 %v446_v9, %v445_v8  ;;  %v1861_v23 = vpack.c.bf16 %v432_v13, %v431_v12 }
  0x47   : > { %1848 = vmatpush3.bf16.msra.mxu1 %v1847_v35  ;;  %787 = vmatprep.mubr.f32.mxu0 %v182_v38  ;;  %v463_v16 = vld [vmem:[%s2727_s1 + $0x5b0] sm:$0xff]  ;;  %v209_v18 = vld [vmem:[%s2144_s18 + $0x100] sm:$0xff]  ;;  %v416_v21 = vld [vmem:[%s2727_s1 + $0x438] sm:$0xff] }
  0x48   : > { %892 = vmatprep.mubr.f32.mxu1 %v184_v42  ;;  %1850 = vmatprep.subr.bf16.mxu0 %v1849_v39  ;;  %v415_v20 = vld [vmem:[%s2727_s1 + $0x430] sm:$0xff]  ;;  %v221_v22 = vld [vmem:[%s2144_s18 + $0x160] sm:$0xff]  ;;  %v448_v25 = vld [vmem:[%s2727_s1 + $0x538] sm:$0xff]  ;;  %v1893_v27 = vpack.c.bf16 %v464_v17, %v463_v16 }
  0x49   : > { %788 = vmatmul.mubr.f32.vlgmr.msra.gmra.mrb[16].mxu0 %v181_v46  ;;  %1882 = vmatprep.subr.bf16.mxu1 %v1881_v43  ;;  %v447_v24 = vld [vmem:[%s2727_s1 + $0x530] sm:$0xff]  ;;  %v433_v28 = vld [vmem:[%s2727_s1 + $0x4c0] sm:$0xff]  ;;  %v434_v29 = vld [vmem:[%s2727_s1 + $0x4c8] sm:$0xff]  ;;  %v1863_v31 = vpack.c.bf16 %v416_v21, %v415_v20 }
  0x4a   : > { %893 = vmatmul.mubr.f32.vlgmr.msra.gmra.mrb[16].mxu1 %v183_v50  ;;  %1852 = vmatpush3.bf16.msra.mxu0 %v1851_v47  ;;  %v223_v26 = vld [vmem:[%s2144_s18 + $0x170] sm:$0xff]  ;;  %v220_v30 = vld [vmem:[%s2144_s18 + $0x158] sm:$0xff]  ;;  %v465_v32 = vld [vmem:[%s2727_s1 + $0x5c0] sm:$0xff]  ;;  %v1895_v35 = vpack.c.bf16 %v448_v25, %v447_v24  ;;  %v1865_v39 = vpack.c.bf16 %v434_v29, %v433_v28 }
  0x4b   : > { %1884 = vmatpush3.bf16.msra.mxu1 %v1883_v51  ;;  %792 = vmatprep.mubr.f32.mxu0 %v195_v54  ;;  %v466_v33 = vld [vmem:[%s2727_s1 + $0x5c8] sm:$0xff]  ;;  %v417_v36 = vld [vmem:[%s2727_s1 + $0x440] sm:$0xff]  ;;  %v236_v42 = vld [vmem:[%s2144_s18 + $0x1d8] sm:$0xff] }
  0x4c   : > { %897 = vmatprep.mubr.f32.mxu1 %v197_v58  ;;  %1854 = vmatprep.subr.bf16.mxu0 %v1853_v55  ;;  %v222_v34 = vld [vmem:[%s2144_s18 + $0x168] sm:$0xff]  ;;  %v449_v40 = vld [vmem:[%s2727_s1 + $0x540] sm:$0xff]  ;;  %v1897_v43 = vpack.c.bf16 %v466_v33, %v465_v32  ;;  %v435_v44 = vld [vmem:[%s2727_s1 + $0x4d0] sm:$0xff] }
  0x4d   : > { %793 = vmatmul.mubr.f32.gmra.mrb[18].mxu0 %v194_v62  ;;  %1886 = vmatprep.subr.bf16.mxu1 %v1885_v59  ;;  %v418_v37 = vld [vmem:[%s2727_s1 + $0x448] sm:$0xff]  ;;  %v436_v45 = vld [vmem:[%s2727_s1 + $0x4d8] sm:$0xff]  ;;  %v233_v46 = vld [vmem:[%s2144_s18 + $0x1c0] sm:$0xff] }
  0x4e   : > { %898 = vmatmul.mubr.f32.gmra.mrb[18].mxu1 %v196_v2  ;;  %1856 = vmatpush3.bf16.msra.mxu0 %v1855_v63  ;;  %v234_v38 = vld [vmem:[%s2144_s18 + $0x1c8] sm:$0xff]  ;;  %v1867_v47 = vpack.c.bf16 %v418_v37, %v417_v36  ;;  %v467_v48 = vld [vmem:[%s2727_s1 + $0x5d0] sm:$0xff]  ;;  %v468_v49 = vld [vmem:[%s2727_s1 + $0x5d8] sm:$0xff]  ;;  %v1869_v55 = vpack.c.bf16 %v436_v45, %v435_v44 }
  0x4f   : > { %1888 = vmatpush3.bf16.msra.mxu1 %v1887_v3  ;;  %797 = vmatprep.mubr.f32.mxu0 %v208_v6  ;;  %v450_v41 = vld [vmem:[%s2727_s1 + $0x548] sm:$0xff]  ;;  %v235_v50 = vld [vmem:[%s2144_s18 + $0x1d0] sm:$0xff]  ;;  %v420_v53 = vld [vmem:[%s2727_s1 + $0x458] sm:$0xff]  ;;  %v1901_v59 = vpack.c.bf16 %v468_v49, %v467_v48 }
  0x50   : > { %902 = vmatprep.mubr.f32.mxu1 %v210_v10  ;;  %1858 = vmatprep.subr.bf16.mxu0 %v1857_v7  ;;  %v1899_v51 = vpack.c.bf16 %v450_v41, %v449_v40  ;;  %v419_v52 = vld [vmem:[%s2727_s1 + $0x450] sm:$0xff]  ;;  %v452_v57 = vld [vmem:[%s2727_s1 + $0x558] sm:$0xff]  ;;  %v249_v58 = vld [vmem:[%s2144_s18 + $0x240] sm:$0xff] }
  0x51   : > { %798 = vmatmul.mubr.f32.gmra.mrb[20].mxu0 %v207_v14  ;;  %1890 = vmatprep.subr.bf16.mxu1 %v1889_v11  ;;  %v247_v54 = vld [vmem:[%s2144_s18 + $0x230] sm:$0xff]  ;;  %v437_v60 = vld [vmem:[%s2727_s1 + $0x4e0] sm:$0xff]  ;;  %v438_v61 = vld [vmem:[%s2727_s1 + $0x4e8] sm:$0xff]  ;;  %v1871_v63 = vpack.c.bf16 %v420_v53, %v419_v52 }
  0x52   : > { %903 = vmatmul.mubr.f32.gmra.mrb[20].mxu1 %v209_v18  ;;  %1860 = vmatpush3.bf16.msra.mxu0 %v1859_v15  ;;  %v451_v56 = vld [vmem:[%s2727_s1 + $0x550] sm:$0xff]  ;;  %v246_v62 = vld [vmem:[%s2144_s18 + $0x228] sm:$0xff]  ;;  %v469_v0 = vld [vmem:[%s2727_s1 + $0x5e0] sm:$0xff]  ;;  %v1873_v7 = vpack.c.bf16 %v438_v61, %v437_v60 }
  0x53   : > { %1892 = vmatpush3.bf16.msra.mxu1 %v1891_v19  ;;  %802 = vmatprep.mubr.f32.mxu0 %v221_v22  ;;  %v470_v1 = vld [vmem:[%s2727_s1 + $0x5e8] sm:$0xff]  ;;  %v248_v2 = vld [vmem:[%s2144_s18 + $0x238] sm:$0xff]  ;;  %v1903_v3 = vpack.c.bf16 %v452_v57, %v451_v56  ;;  %v421_v4 = vld [vmem:[%s2727_s1 + $0x460] sm:$0xff] }
  0x54   : > { %907 = vmatprep.mubr.f32.mxu1 %v223_v26  ;;  %1862 = vmatprep.subr.bf16.mxu0 %v1861_v23  ;;  %v422_v5 = vld [vmem:[%s2727_s1 + $0x468] sm:$0xff]  ;;  %v260_v6 = vld [vmem:[%s2144_s18 + $0x298] sm:$0xff]  ;;  %v453_v8 = vld [vmem:[%s2727_s1 + $0x560] sm:$0xff]  ;;  %v1905_v11 = vpack.c.bf16 %v470_v1, %v469_v0 }
  0x55   : > { %803 = vmatmul.mubr.f32.gmra.mrb[22].mxu0 %v220_v30  ;;  %1894 = vmatprep.subr.bf16.mxu1 %v1893_v27  ;;  %v454_v9 = vld [vmem:[%s2727_s1 + $0x568] sm:$0xff]  ;;  %v439_v12 = vld [vmem:[%s2727_s1 + $0x4f0] sm:$0xff]  ;;  %v440_v13 = vld [vmem:[%s2727_s1 + $0x4f8] sm:$0xff]  ;;  %v1875_v15 = vpack.c.bf16 %v422_v5, %v421_v4 }
  0x56   : > { %908 = vmatmul.mubr.f32.gmra.mrb[22].mxu1 %v222_v34  ;;  %1864 = vmatpush3.bf16.msra.mxu0 %v1863_v31  ;;  %v262_v10 = vld [vmem:[%s2144_s18 + $0x2a8] sm:$0xff]  ;;  %v259_v14 = vld [vmem:[%s2144_s18 + $0x290] sm:$0xff]  ;;  %v472_v17 = vld [vmem:[%s2727_s1 + $0x5f8] sm:$0xff]  ;;  %v1907_v19 = vpack.c.bf16 %v454_v9, %v453_v8  ;;  %v1877_v23 = vpack.c.bf16 %v440_v13, %v439_v12 }
  0x57   : > { %1896 = vmatpush3.bf16.msra.mxu1 %v1895_v35  ;;  %807 = vmatprep.mubr.f32.mxu0 %v234_v38  ;;  %v471_v16 = vld [vmem:[%s2727_s1 + $0x5f0] sm:$0xff]  ;;  %v261_v18 = vld [vmem:[%s2144_s18 + $0x2a0] sm:$0xff]  ;;  %v424_v21 = vld [vmem:[%s2727_s1 + $0x478] sm:$0xff] }
  0x58   : > { %912 = vmatprep.mubr.f32.mxu1 %v236_v42  ;;  %1866 = vmatprep.subr.bf16.mxu0 %v1865_v39  ;;  %v423_v20 = vld [vmem:[%s2727_s1 + $0x470] sm:$0xff]  ;;  %v273_v22 = vld [vmem:[%s2144_s18 + $0x300] sm:$0xff]  ;;  %v456_v25 = vld [vmem:[%s2727_s1 + $0x578] sm:$0xff]  ;;  %v1909_v27 = vpack.c.bf16 %v472_v17, %v471_v16 }
  0x59   : > { %808 = vmatmul.mubr.f32.gmra.mrb[24].mxu0 %v233_v46  ;;  %1898 = vmatprep.subr.bf16.mxu1 %v1897_v43  ;;  %v455_v24 = vld [vmem:[%s2727_s1 + $0x570] sm:$0xff]  ;;  %v473_v28 = vld [vmem:[%s2727_s1 + $0x600] sm:$0xff]  ;;  %v474_v29 = vld [vmem:[%s2727_s1 + $0x608] sm:$0xff]  ;;  %v1879_v31 = vpack.c.bf16 %v424_v21, %v423_v20 }
  0x5a   : > { %913 = vmatmul.mubr.f32.gmra.mrb[24].mxu1 %v235_v50  ;;  %1868 = vmatpush3.bf16.msra.mxu0 %v1867_v47  ;;  %v275_v26 = vld [vmem:[%s2144_s18 + $0x310] sm:$0xff]  ;;  %v272_v30 = vld [vmem:[%s2144_s18 + $0x2f8] sm:$0xff]  ;;  %v274_v32 = vld [vmem:[%s2144_s18 + $0x308] sm:$0xff]  ;;  %v1911_v33 = vpack.c.bf16 %v456_v25, %v455_v24  ;;  %v1913_v35 = vpack.c.bf16 %v474_v29, %v473_v28 }
  0x5b   : > { %1900 = vmatpush3.bf16.msra.mxu1 %v1899_v51  ;;  %812 = vmatprep.mubr.f32.mxu0 %v247_v54  ;;  %v186_v34 = vld [vmem:[%s2144_s18 + $0x48] sm:$0xff]  ;;  %v188_v36 = vld [vmem:[%s2144_s18 + $0x58] sm:$0xff]  ;;  %v475_v37 = vld [vmem:[%s2727_s1 + $0x610] sm:$0xff] }
  0x5c   : > { %917 = vmatprep.mubr.f32.mxu1 %v249_v58  ;;  %1870 = vmatprep.subr.bf16.mxu0 %v1869_v55  ;;  %v476_v38 = vld [vmem:[%s2727_s1 + $0x618] sm:$0xff]  ;;  %v185_v39 = vld [vmem:[%s2144_s18 + $0x40] sm:$0xff]  ;;  %v187_v40 = vld [vmem:[%s2144_s18 + $0x50] sm:$0xff] }
  0x5d   : > { %813 = vmatmul.mubr.f32.gmra.mrb[26].mxu0 %v246_v62  ;;  %1902 = vmatprep.subr.bf16.mxu1 %v1901_v59  ;;  %v199_v41 = vld [vmem:[%s2144_s18 + $0xb0] sm:$0xff]  ;;  %v1917_v42 = vpack.c.bf16 %v476_v38, %v475_v37  ;;  %v201_v43 = vld [vmem:[%s2144_s18 + $0xc0] sm:$0xff]  ;;  %v478_v45 = vld [vmem:[%s2727_s1 + $0x628] sm:$0xff] }
  0x5e   : > { %918 = vmatmul.mubr.f32.gmra.mrb[26].mxu1 %v248_v2  ;;  %1872 = vmatpush3.bf16.msra.mxu0 %v1871_v63  ;;  %v477_v44 = vld [vmem:[%s2727_s1 + $0x620] sm:$0xff]  ;;  %v198_v46 = vld [vmem:[%s2144_s18 + $0xa8] sm:$0xff]  ;;  %v200_v47 = vld [vmem:[%s2144_s18 + $0xb8] sm:$0xff] }
  0x5f   : > { %1904 = vmatpush3.bf16.msra.mxu1 %v1903_v3  ;;  %817 = vmatprep.mubr.f32.mxu0 %v260_v6  ;;  %v212_v48 = vld [vmem:[%s2144_s18 + $0x118] sm:$0xff]  ;;  %v214_v49 = vld [vmem:[%s2144_s18 + $0x128] sm:$0xff]  ;;  %v1921_v50 = vpack.c.bf16 %v478_v45, %v477_v44  ;;  %v479_v51 = vld [vmem:[%s2727_s1 + $0x630] sm:$0xff] }
  0x60   : > { %922 = vmatprep.mubr.f32.mxu1 %v262_v10  ;;  %1874 = vmatprep.subr.bf16.mxu0 %v1873_v7  ;;  %v480_v52 = vld [vmem:[%s2727_s1 + $0x638] sm:$0xff]  ;;  %v211_v53 = vld [vmem:[%s2144_s18 + $0x110] sm:$0xff]  ;;  %v213_v54 = vld [vmem:[%s2144_s18 + $0x120] sm:$0xff] }
  0x61   : > { %818 = vmatmul.mubr.f32.gmra.mrb[28].mxu0 %v259_v14  ;;  %1906 = vmatprep.subr.bf16.mxu1 %v1905_v11  ;;  %v225_v55 = vld [vmem:[%s2144_s18 + $0x180] sm:$0xff]  ;;  %v227_v56 = vld [vmem:[%s2144_s18 + $0x190] sm:$0xff]  ;;  %v1925_v57 = vpack.c.bf16 %v480_v52, %v479_v51  ;;  %v224_v58 = vld [vmem:[%s2144_s18 + $0x178] sm:$0xff] }
  0x62   : > { %923 = vmatmul.mubr.f32.gmra.mrb[28].mxu1 %v261_v18  ;;  %1876 = vmatpush3.bf16.msra.mxu0 %v1875_v15  ;;  %v226_v59 = vld [vmem:[%s2144_s18 + $0x188] sm:$0xff]  ;;  %v240_v61 = vld [vmem:[%s2144_s18 + $0x1f8] sm:$0xff]  ;;  %v237_v62 = vld [vmem:[%s2144_s18 + $0x1e0] sm:$0xff] }
  0x63   : > { %1908 = vmatpush3.bf16.msra.mxu1 %v1907_v19  ;;  %822 = vmatprep.mubr.f32.mxu0 %v273_v22  ;;  %v238_v60 = vld [vmem:[%s2144_s18 + $0x1e8] sm:$0xff]  ;;  %v239_v63 = vld [vmem:[%s2144_s18 + $0x1f0] sm:$0xff]  ;;  %v253_v1 = vld [vmem:[%s2144_s18 + $0x260] sm:$0xff] }
  0x64   : > { %927 = vmatprep.mubr.f32.mxu1 %v275_v26  ;;  %1878 = vmatprep.subr.bf16.mxu0 %v1877_v23  ;;  %v251_v0 = vld [vmem:[%s2144_s18 + $0x250] sm:$0xff]  ;;  %v250_v2 = vld [vmem:[%s2144_s18 + $0x248] sm:$0xff]  ;;  %v252_v3 = vld [vmem:[%s2144_s18 + $0x258] sm:$0xff] }
  0x65   : > { %823 = vmatmul.mubr.f32.gmra.mrb[30].mxu0 %v272_v30  ;;  %1910 = vmatprep.subr.bf16.mxu1 %v1909_v27  ;;  %v264_v4 = vld [vmem:[%s2144_s18 + $0x2b8] sm:$0xff]  ;;  %v266_v5 = vld [vmem:[%s2144_s18 + $0x2c8] sm:$0xff]  ;;  %v263_v6 = vld [vmem:[%s2144_s18 + $0x2b0] sm:$0xff] }
  0x66   : > { %928 = vmatmul.mubr.f32.gmra.mrb[30].mxu1 %v274_v32  ;;  %1880 = vmatpush3.bf16.msra.mxu0 %v1879_v31  ;;  %v265_v7 = vld [vmem:[%s2144_s18 + $0x2c0] sm:$0xff]  ;;  %v279_v9 = vld [vmem:[%s2144_s18 + $0x330] sm:$0xff]  ;;  %v276_v10 = vld [vmem:[%s2144_s18 + $0x318] sm:$0xff] }
  0x67   : > { %1912 = vmatpush3.bf16.msra.mxu1 %v1911_v33  ;;  %997 = vmatprep.mubr.f32.mxu0 %v186_v34  ;;  %v277_v8 = vld [vmem:[%s2144_s18 + $0x320] sm:$0xff]  ;;  %v278_v11 = vld [vmem:[%s2144_s18 + $0x328] sm:$0xff]  ;;  %v215_v16 = vld [vmem:[%s2144_s18 + $0x130] sm:$0xff] }
  0x68   : > { %1102 = vmatprep.mubr.f32.mxu1 %v188_v36  ;;  %1914 = vmatprep.subr.bf16.mxu0 %v1913_v35  ;;  %v189_v12 = vld [vmem:[%s2144_s18 + $0x60] sm:$0xff]  ;;  %v202_v14 = vld [vmem:[%s2144_s18 + $0xc8] sm:$0xff]  ;;  %v267_v17 = vld [vmem:[%s2144_s18 + $0x2d0] sm:$0xff] }
  0x69   : > { %998 = vmatmul.mubr.f32.vlgmr.msra.gmra.mrb[32].mxu0 %v185_v39  ;;  %1929 = vmatprep.subr.bf16.mxu1 %v1913_v35  ;;  %v241_v13 = vld [vmem:[%s2144_s18 + $0x200] sm:$0xff]  ;;  %v254_v15 = vld [vmem:[%s2144_s18 + $0x268] sm:$0xff]  ;;  %v228_v18 = vld [vmem:[%s2144_s18 + $0x198] sm:$0xff] }
  0x6a   : > { %1103 = vmatmul.mubr.f32.vlgmr.msra.gmra.mrb[32].mxu1 %v187_v40  ;;  %1916 = vmatpush3.bf16.msra.mxu0 %v1913_v35  ;;  %v280_v19 = vld [vmem:[%s2144_s18 + $0x338] sm:$0xff]  ;;  %v1330_v22 = vld [vmem:[%s2728_s2] ss:$0 sm:$0xff]  ;;  %s1329_s18 = sshll.u32 %s2731_s11, 3 }
  0x6b   : > { %1933 = vmatpush3.bf16.msra.mxu1 %v1913_v35  ;;  %1002 = vmatprep.mubr.f32.mxu0 %v199_v41  ;;  %s175_s7 = scalar_lea.vmem %s2729_s3, %s1329_s18 }
  0x6c   : > { %1107 = vmatprep.mubr.f32.mxu1 %v201_v43  ;;  %1918 = vmatprep.subr.bf16.mxu0 %v1917_v42 }
  0x6d   : > { %1003 = vmatmul.mubr.f32.gmra.mrb[34].mxu0 %v198_v46  ;;  %1930 = vmatprep.subr.bf16.mxu1 %v1917_v42 }
  0x6e   : > { %1108 = vmatmul.mubr.f32.gmra.mrb[34].mxu1 %v200_v47  ;;  %1007 = vmatprep.mubr.f32.mxu0 %v212_v48 }
  0x6f   : > { %1112 = vmatprep.mubr.f32.mxu1 %v214_v49  ;;  %1920 = vmatpush3.bf16.msra.mxu0 %v1917_v42 }
  0x70   : > { %1934 = vmatpush3.bf16.msra.mxu1 %v1917_v42  ;;  %1922 = vmatprep.subr.bf16.mxu0 %v1921_v50 }
  0x71   : > { %1008 = vmatmul.mubr.f32.gmra.mrb[36].mxu0 %v211_v53  ;;  %1931 = vmatprep.subr.bf16.mxu1 %v1921_v50 }
  0x72   : > { %1113 = vmatmul.mubr.f32.gmra.mrb[36].mxu1 %v213_v54  ;;  %1012 = vmatprep.mubr.f32.mxu0 %v225_v55 }
  0x73   : > { %1117 = vmatprep.mubr.f32.mxu1 %v227_v56  ;;  %1924 = vmatpush3.bf16.msra.mxu0 %v1921_v50 }
  0x74   : > { %1935 = vmatpush3.bf16.msra.mxu1 %v1921_v50  ;;  %1926 = vmatprep.subr.bf16.mxu0 %v1925_v57 }
  0x75   : > { %1013 = vmatmul.mubr.f32.gmra.mrb[38].mxu0 %v224_v58  ;;  %1932 = vmatprep.subr.bf16.mxu1 %v1925_v57 }
  0x76   : > { %1118 = vmatmul.mubr.f32.gmra.mrb[38].mxu1 %v226_v59  ;;  %1017 = vmatprep.mubr.f32.mxu0 %v238_v60 }
  0x77   : > { %1122 = vmatprep.mubr.f32.mxu1 %v240_v61  ;;  %1928 = vmatpush3.bf16.msra.mxu0 %v1925_v57 }
  0x78   : > { %1936 = vmatpush3.bf16.msra.mxu1 %v1925_v57 }
  0x79   : > { %1018 = vmatmul.mubr.f32.gmra.mrb[40].mxu0 %v237_v62 }
  0x7a   : > { %1123 = vmatmul.mubr.f32.gmra.mrb[40].mxu1 %v239_v63  ;;  %1022 = vmatprep.mubr.f32.mxu0 %v251_v0 }
  0x7b   : > { %1127 = vmatprep.mubr.f32.mxu1 %v253_v1 }
  0x7d   : > { %1023 = vmatmul.mubr.f32.gmra.mrb[42].mxu0 %v250_v2 }
  0x7e   : > { %1128 = vmatmul.mubr.f32.gmra.mrb[42].mxu1 %v252_v3  ;;  %1027 = vmatprep.mubr.f32.mxu0 %v264_v4 }
  0x7f   : > { %1132 = vmatprep.mubr.f32.mxu1 %v266_v5 }
  0x81   : > { %1028 = vmatmul.mubr.f32.gmra.mrb[44].mxu0 %v263_v6 }
  0x82   : > { %1133 = vmatmul.mubr.f32.gmra.mrb[44].mxu1 %v265_v7  ;;  %1032 = vmatprep.mubr.f32.mxu0 %v277_v8 }
  0x83   : > { %1137 = vmatprep.mubr.f32.mxu1 %v279_v9 }
  0x85   : > { %1033 = vmatmul.mubr.f32.gmra.mrb[46].mxu0 %v276_v10 }
  0x86   : > { %1138 = vmatmul.mubr.f32.gmra.mrb[46].mxu1 %v278_v11  ;;  %1709 = vmatprep.mubr.msk.f32.mxu0 %vm488_vm0, %v189_v12 }
  0x87   : > { %1715 = vmatprep.mubr.msk.f32.mxu1 %vm488_vm0, %v241_v13 }
  0x89   : > { %1710 = vmatmul.mubr.msk.f32.vlgmr.msra.gmra.mrb[48].mxu0 %vm488_vm0, %v202_v14 }
  0x8a   : > { %1716 = vmatmul.mubr.msk.f32.vlgmr.msra.gmra.mrb[48].mxu1 %vm488_vm0, %v254_v15  ;;  %1712 = vmatprep.mubr.msk.f32.mxu0 %vm488_vm0, %v215_v16 }
  0x8b   : > { %1718 = vmatprep.mubr.msk.f32.mxu1 %vm488_vm0, %v267_v17 }
  0x8d   : > { %1713 = vmatmul.mubr.msk.f32.gmra.mrb[50].mxu0 %vm488_vm0, %v228_v18 }
  0x8e   : > { %1719 = vmatmul.mubr.msk.f32.gmra.mrb[50].mxu1 %vm488_vm0, %v280_v19 }
  0xfc   : > { %v1373_v20 = vpop.f32.mrb[0].mxu0 }
  0xfd   : > { %v1429_v21 = vpop.f32.mrb[0].mxu1  ;;  %v1374_v23 = vpop.f32.mrb[1].mxu0 }
  0xfe   : > { %v1375_v24 = vadd.f32 %v1374_v23, %v1373_v20  ;;  %v1430_v25 = vpop.f32.mrb[1].mxu1 }
  0xff   : > { %v1431_v26 = vadd.f32 %v1430_v25, %v1429_v21 }
 0x100   : > { %v580_v27 = vadd.f32 %v1375_v24, %v1330_v22  ;;  %v1376_v28 = vpop.f32.mrb[2].mxu0 }
 0x101   : > { %v1432_v29 = vpop.f32.mrb[2].mxu1  ;;  %v1377_v30 = vpop.f32.mrb[3].mxu0 }
 0x102   : > { %v685_v31 = vadd.f32 %v1431_v26, %v580_v27  ;;  %v1378_v32 = vadd.f32 %v1377_v30, %v1376_v28  ;;  %v1433_v33 = vpop.f32.mrb[3].mxu1 }
 0x103   : > { %v1434_v34 = vadd.f32 %v1433_v33, %v1432_v29 }
 0x104   : > { %v585_v35 = vadd.f32 %v1378_v32, %v1330_v22  ;;  %v1379_v36 = vpop.f32.mrb[4].mxu0 }
 0x105   : > { %v1435_v37 = vpop.f32.mrb[4].mxu1  ;;  %v1380_v38 = vpop.f32.mrb[5].mxu0 }
 0x106   : > { %v690_v39 = vadd.f32 %v1434_v34, %v585_v35  ;;  %v1381_v40 = vadd.f32 %v1380_v38, %v1379_v36  ;;  %v1436_v41 = vpop.f32.mrb[5].mxu1 }
 0x107   : > { %v1437_v42 = vadd.f32 %v1436_v41, %v1435_v37 }
 0x108   : > { %v590_v43 = vadd.f32 %v1381_v40, %v1330_v22  ;;  %v1382_v44 = vpop.f32.mrb[6].mxu0 }
 0x109   : > { %v1438_v45 = vpop.f32.mrb[6].mxu1  ;;  %v1383_v46 = vpop.f32.mrb[7].mxu0 }
 0x10a   : > { %v695_v47 = vadd.f32 %v1437_v42, %v590_v43  ;;  %v1384_v48 = vadd.f32 %v1383_v46, %v1382_v44  ;;  %v1439_v49 = vpop.f32.mrb[7].mxu1 }
 0x10b   : > { %v1440_v50 = vadd.f32 %v1439_v49, %v1438_v45 }
 0x10c   : > { %v595_v51 = vadd.f32 %v1384_v48, %v1330_v22  ;;  %v1385_v52 = vpop.f32.mrb[8].mxu0 }
 0x10d   : > { %v1441_v53 = vpop.f32.mrb[8].mxu1  ;;  %v1386_v54 = vpop.f32.mrb[9].mxu0 }
 0x10e   : > { %v700_v55 = vadd.f32 %v1440_v50, %v595_v51  ;;  %v1387_v56 = vadd.f32 %v1386_v54, %v1385_v52  ;;  %v1442_v57 = vpop.f32.mrb[9].mxu1 }
 0x10f   : > { %v1443_v58 = vadd.f32 %v1442_v57, %v1441_v53 }
 0x110   : > { %v600_v59 = vadd.f32 %v1387_v56, %v1330_v22  ;;  %v1388_v60 = vpop.f32.mrb[10].mxu0 }
 0x111   : > { %v1444_v61 = vpop.f32.mrb[10].mxu1  ;;  %v1389_v62 = vpop.f32.mrb[11].mxu0 }
 0x112   : > { %v705_v63 = vadd.f32 %v1443_v58, %v600_v59  ;;  %v1390_v0 = vadd.f32 %v1389_v62, %v1388_v60  ;;  %v1445_v1 = vpop.f32.mrb[11].mxu1 }
 0x113   : > { %v1446_v2 = vadd.f32 %v1445_v1, %v1444_v61 }
 0x114   : > { %v605_v3 = vadd.f32 %v1390_v0, %v1330_v22  ;;  %v1391_v4 = vpop.f32.mrb[12].mxu0 }
 0x115   : > { %v1447_v5 = vpop.f32.mrb[12].mxu1  ;;  %v1392_v6 = vpop.f32.mrb[13].mxu0 }
 0x116   : > { %v710_v7 = vadd.f32 %v1446_v2, %v605_v3  ;;  %v1393_v8 = vadd.f32 %v1392_v6, %v1391_v4  ;;  %v1448_v9 = vpop.f32.mrb[13].mxu1 }
 0x117   : > { %v1449_v10 = vadd.f32 %v1448_v9, %v1447_v5 }
 0x118   : > { %v610_v11 = vadd.f32 %v1393_v8, %v1330_v22  ;;  %v1394_v12 = vpop.f32.mrb[14].mxu0 }
 0x119   : > { %v1450_v13 = vpop.f32.mrb[14].mxu1  ;;  %v1395_v14 = vpop.f32.mrb[15].mxu0 }
 0x11a   : > { %v715_v15 = vadd.f32 %v1449_v10, %v610_v11  ;;  %v1396_v16 = vadd.f32 %v1395_v14, %v1394_v12  ;;  %v1451_v17 = vpop.f32.mrb[15].mxu1 }
 0x11b   : > { %v1452_v18 = vadd.f32 %v1451_v17, %v1450_v13 }
 0x11c   : > { %v615_v19 = vadd.f32 %v1396_v16, %v1330_v22  ;;  %v1485_v20 = vpop.f32.mrb[16].mxu0 }
 0x11d   : > { %v1541_v21 = vpop.f32.mrb[16].mxu1  ;;  %v1486_v23 = vpop.f32.mrb[17].mxu0 }
 0x11e   : > { %v720_v24 = vadd.f32 %v1452_v18, %v615_v19  ;;  %v1487_v25 = vadd.f32 %v1486_v23, %v1485_v20  ;;  %v1542_v26 = vpop.f32.mrb[17].mxu1 }
 0x11f   : > { %v1543_v27 = vadd.f32 %v1542_v26, %v1541_v21 }
 0x120   : > { %v790_v28 = vadd.f32 %v1487_v25, %v685_v31  ;;  %v1488_v29 = vpop.f32.mrb[18].mxu0 }
 0x121   : > { %v1544_v30 = vpop.f32.mrb[18].mxu1  ;;  %v1489_v32 = vpop.f32.mrb[19].mxu0 }
 0x122   : > { %v895_v33 = vadd.f32 %v1543_v27, %v790_v28  ;;  %v1490_v34 = vadd.f32 %v1489_v32, %v1488_v29  ;;  %v1545_v35 = vpop.f32.mrb[19].mxu1 }
 0x123   : > { %v1546_v36 = vadd.f32 %v1545_v35, %v1544_v30 }
 0x124   : > { %v795_v37 = vadd.f32 %v1490_v34, %v690_v39  ;;  %v1491_v38 = vpop.f32.mrb[20].mxu0 }
 0x125   : > { %v1547_v40 = vpop.f32.mrb[20].mxu1  ;;  %v1492_v41 = vpop.f32.mrb[21].mxu0 }
 0x126   : > { %v900_v22 = vadd.f32 %v1546_v36, %v795_v37  ;;  %v1493_v42 = vadd.f32 %v1492_v41, %v1491_v38  ;;  %v1548_v43 = vpop.f32.mrb[21].mxu1 }
 0x127   : > { %v1549_v44 = vadd.f32 %v1548_v43, %v1547_v40 }
 0x128   : > { %v800_v45 = vadd.f32 %v1493_v42, %v695_v47  ;;  %v1494_v46 = vpop.f32.mrb[22].mxu0 }
 0x129   : > { %v1550_v48 = vpop.f32.mrb[22].mxu1  ;;  %v1495_v49 = vpop.f32.mrb[23].mxu0 }
 0x12a   : > { %v905_v31 = vadd.f32 %v1549_v44, %v800_v45  ;;  %v1496_v50 = vadd.f32 %v1495_v49, %v1494_v46  ;;  %v1551_v51 = vpop.f32.mrb[23].mxu1 }
 0x12b   : > { %v1552_v52 = vadd.f32 %v1551_v51, %v1550_v48 }
 0x12c   : > { %v805_v53 = vadd.f32 %v1496_v50, %v700_v55  ;;  %v1497_v54 = vpop.f32.mrb[24].mxu0 }
 0x12d   : > { %v1553_v56 = vpop.f32.mrb[24].mxu1  ;;  %v1498_v57 = vpop.f32.mrb[25].mxu0 }
 0x12e   : > { %v910_v39 = vadd.f32 %v1552_v52, %v805_v53  ;;  %v1499_v58 = vadd.f32 %v1498_v57, %v1497_v54  ;;  %v1554_v59 = vpop.f32.mrb[25].mxu1 }
 0x12f   : > { %v1555_v60 = vadd.f32 %v1554_v59, %v1553_v56 }
 0x130   : > { %v810_v61 = vadd.f32 %v1499_v58, %v705_v63  ;;  %v1500_v62 = vpop.f32.mrb[26].mxu0 }
 0x131   : > { %v1556_v0 = vpop.f32.mrb[26].mxu1  ;;  %v1501_v1 = vpop.f32.mrb[27].mxu0 }
 0x132   : > { %v915_v47 = vadd.f32 %v1555_v60, %v810_v61  ;;  %v1502_v2 = vadd.f32 %v1501_v1, %v1500_v62  ;;  %v1557_v3 = vpop.f32.mrb[27].mxu1 }
 0x133   : > { %v1558_v4 = vadd.f32 %v1557_v3, %v1556_v0 }
 0x134   : > { %v815_v5 = vadd.f32 %v1502_v2, %v710_v7  ;;  %v1503_v6 = vpop.f32.mrb[28].mxu0 }
 0x135   : > { %v1559_v8 = vpop.f32.mrb[28].mxu1  ;;  %v1504_v9 = vpop.f32.mrb[29].mxu0 }
 0x136   : > { %v920_v55 = vadd.f32 %v1558_v4, %v815_v5  ;;  %v1505_v10 = vadd.f32 %v1504_v9, %v1503_v6  ;;  %v1560_v11 = vpop.f32.mrb[29].mxu1 }
 0x137   : > { %v1561_v12 = vadd.f32 %v1560_v11, %v1559_v8 }
 0x138   : > { %v820_v13 = vadd.f32 %v1505_v10, %v715_v15  ;;  %v1506_v14 = vpop.f32.mrb[30].mxu0 }
 0x139   : > { %v1562_v16 = vpop.f32.mrb[30].mxu1  ;;  %v1507_v17 = vpop.f32.mrb[31].mxu0 }
 0x13a   : > { %v925_v63 = vadd.f32 %v1561_v12, %v820_v13  ;;  %v1508_v18 = vadd.f32 %v1507_v17, %v1506_v14  ;;  %v1563_v19 = vpop.f32.mrb[31].mxu1 }
 0x13b   : > { %v1564_v20 = vadd.f32 %v1563_v19, %v1562_v16 }
 0x13c   : > { %v825_v21 = vadd.f32 %v1508_v18, %v720_v24  ;;  %v1597_v23 = vpop.f32.mrb[32].mxu0 }
 0x13d   : > { %v1653_v25 = vpop.f32.mrb[32].mxu1  ;;  %v1598_v26 = vpop.f32.mrb[33].mxu0 }
 0x13e   : > { %v930_v7 = vadd.f32 %v1564_v20, %v825_v21  ;;  %v1599_v27 = vadd.f32 %v1598_v26, %v1597_v23  ;;  %v1654_v28 = vpop.f32.mrb[33].mxu1 }
 0x13f   : > { %v1655_v29 = vadd.f32 %v1654_v28, %v1653_v25 }
 0x140   : > { %v1000_v30 = vadd.f32 %v1599_v27, %v895_v33  ;;  %v1600_v32 = vpop.f32.mrb[34].mxu0 }
 0x141   : > { %v1656_v34 = vpop.f32.mrb[34].mxu1  ;;  %v1601_v35 = vpop.f32.mrb[35].mxu0 }
 0x142   : > { %v1602_v15 = vadd.f32 %v1601_v35, %v1600_v32  ;;  %v1657_v36 = vpop.f32.mrb[35].mxu1  ;;  %v1105_v37 = vadd.f32 %v1655_v29, %v1000_v30 }
 0x143   : > { %v1658_v38 = vadd.f32 %v1657_v36, %v1656_v34 }
 0x144   : > { %v1005_v40 = vadd.f32 %v1602_v15, %v900_v22  ;;  %v1603_v41 = vpop.f32.mrb[36].mxu0 }
 0x145   : > { %v1659_v42 = vpop.f32.mrb[36].mxu1  ;;  %v1604_v43 = vpop.f32.mrb[37].mxu0 }
 0x146   : > { %v1605_v24 = vadd.f32 %v1604_v43, %v1603_v41  ;;  %v1660_v44 = vpop.f32.mrb[37].mxu1  ;;  %v1110_v45 = vadd.f32 %v1658_v38, %v1005_v40 }
 0x147   : > { %v1661_v46 = vadd.f32 %v1660_v44, %v1659_v42 }
 0x148   : > { %v1010_v48 = vadd.f32 %v1605_v24, %v905_v31  ;;  %v1606_v49 = vpop.f32.mrb[38].mxu0 }
 0x149   : > { %v1662_v50 = vpop.f32.mrb[38].mxu1  ;;  %v1607_v51 = vpop.f32.mrb[39].mxu0 }
 0x14a   : > { %v1608_v33 = vadd.f32 %v1607_v51, %v1606_v49  ;;  %v1663_v52 = vpop.f32.mrb[39].mxu1  ;;  %v1115_v53 = vadd.f32 %v1661_v46, %v1010_v48 }
 0x14b   : > { %v1664_v54 = vadd.f32 %v1663_v52, %v1662_v50 }
 0x14c   : > { %v1015_v56 = vadd.f32 %v1608_v33, %v910_v39  ;;  %v1609_v57 = vpop.f32.mrb[40].mxu0 }
 0x14d   : > { %v1665_v58 = vpop.f32.mrb[40].mxu1  ;;  %v1610_v59 = vpop.f32.mrb[41].mxu0 }
 0x14e   : > { %v1611_v22 = vadd.f32 %v1610_v59, %v1609_v57  ;;  %v1666_v60 = vpop.f32.mrb[41].mxu1  ;;  %v1120_v61 = vadd.f32 %v1664_v54, %v1015_v56 }
 0x14f   : > { %v1667_v62 = vadd.f32 %v1666_v60, %v1665_v58 }
 0x150   : > { %v1020_v0 = vadd.f32 %v1611_v22, %v915_v47  ;;  %v1612_v1 = vpop.f32.mrb[42].mxu0 }
 0x151   : > { %v1668_v2 = vpop.f32.mrb[42].mxu1  ;;  %v1613_v3 = vpop.f32.mrb[43].mxu0 }
 0x152   : > { %v1614_v31 = vadd.f32 %v1613_v3, %v1612_v1  ;;  %v1669_v4 = vpop.f32.mrb[43].mxu1  ;;  %v1125_v5 = vadd.f32 %v1667_v62, %v1020_v0 }
 0x153   : > { %v1670_v6 = vadd.f32 %v1669_v4, %v1668_v2 }
 0x154   : > { %v1025_v8 = vadd.f32 %v1614_v31, %v920_v55  ;;  %v1615_v9 = vpop.f32.mrb[44].mxu0 }
 0x155   : > { %v1671_v10 = vpop.f32.mrb[44].mxu1  ;;  %v1616_v39 = vpop.f32.mrb[45].mxu0 }
 0x156   : > { %v1617_v11 = vadd.f32 %v1616_v39, %v1615_v9  ;;  %v1672_v12 = vpop.f32.mrb[45].mxu1  ;;  %v1130_v13 = vadd.f32 %v1670_v6, %v1025_v8 }
 0x157   : > { %v1673_v14 = vadd.f32 %v1672_v12, %v1671_v10 }
 0x158   : > { %v1030_v16 = vadd.f32 %v1617_v11, %v925_v63  ;;  %v1618_v17 = vpop.f32.mrb[46].mxu0 }
 0x159   : > { %v1674_v18 = vpop.f32.mrb[46].mxu1  ;;  %v1619_v47 = vpop.f32.mrb[47].mxu0 }
 0x15a   : > { %v1620_v19 = vadd.f32 %v1619_v47, %v1618_v17  ;;  %v1675_v20 = vpop.f32.mrb[47].mxu1  ;;  %v1135_v21 = vadd.f32 %v1673_v14, %v1030_v16 }
 0x15b   : > { %v1676_v23 = vadd.f32 %v1675_v20, %v1674_v18 }
 0x15c   : > { %v1035_v25 = vadd.f32 %v1620_v19, %v930_v7  ;;  %v1711_v26 = vpop.f32.mrb[48].mxu0 }
 0x15d   : > { %v1215_v55 = vadd.f32 %v1711_v26, %v1110_v45  ;;  %v1717_v27 = vpop.f32.mrb[48].mxu1  ;;  %v1209_v28 = vpop.f32.mrb[49].mxu0 }
 0x15e   : > { %v1235_v29 = vadd.f32 %v1717_v27, %v1130_v13  ;;  %v1210_v63 = vadd.f32 %v1209_v28, %v1105_v37  ;;  %v1229_v30 = vpop.f32.mrb[49].mxu1  ;;  %v1140_v32 = vadd.f32 %v1676_v23, %v1035_v25 }
 0x15f   : > { %v1249_v34 = vmax.f32 %v1215_v55, 0.0  ;;  %v1230_v35 = vadd.f32 %v1229_v30, %v1125_v5 }
 0x160   : > { %v1253_v15 = vmax.f32 %v1235_v29, 0.0  ;;  %v1248_v36 = vmax.f32 %v1210_v63, 0.0  ;;  %v1714_v38 = vpop.f32.mrb[50].mxu0 }
 0x161   : > { %1258 = vst.msk [vmem:[%s175_s7 + $0x8] sm:$0xff] %vm1256_vm1, %v1249_v34  ;;  %v1252_v7 = vmax.f32 %v1230_v35, 0.0  ;;  %v1225_v40 = vadd.f32 %v1714_v38, %v1120_v61  ;;  %v1720_v41 = vpop.f32.mrb[50].mxu1  ;;  %v1219_v42 = vpop.f32.mrb[51].mxu0 }
 0x162   : > { %1262 = vst.msk [vmem:[%s175_s7 + $0x28] sm:$0xff] %vm1256_vm1, %v1253_v15  ;;  %1257 = vst.msk [vmem:[%s175_s7] sm:$0xff] %vm1256_vm1, %v1248_v36  ;;  %v1245_v43 = vadd.f32 %v1720_v41, %v1140_v32  ;;  %v1220_v24 = vadd.f32 %v1219_v42, %v1115_v53  ;;  %v1239_v37 = vpop.f32.mrb[51].mxu1 }
 0x163   : > { %1261 = vst.msk [vmem:[%s175_s7 + $0x20] sm:$0xff] %vm1256_vm1, %v1252_v7  ;;  %v1251_v44 = vmax.f32 %v1225_v40, 0.0  ;;  %v1240_v45 = vadd.f32 %v1239_v37, %v1135_v21 }
 0x164   : > { %v1255_v46 = vmax.f32 %v1245_v43, 0.0  ;;  %v1250_v48 = vmax.f32 %v1220_v24, 0.0 }
 0x165   : > { %1260 = vst.msk [vmem:[%s175_s7 + $0x18] sm:$0xff] %vm1256_vm1, %v1251_v44  ;;  %v1254_v49 = vmax.f32 %v1240_v45, 0.0 }
 0x166   : > { %1264 = vst.msk [vmem:[%s175_s7 + $0x38] sm:$0xff] %vm1256_vm1, %v1255_v46  ;;  %1259 = vst.msk [vmem:[%s175_s7 + $0x10] sm:$0xff] %vm1256_vm1, %v1250_v48 }
 0x167   : > { %1263 = vst.msk [vmem:[%s175_s7 + $0x30] sm:$0xff] %vm1256_vm1, %v1254_v49 }
 0x168 PF: > { %s13_s12 = sadd.s32 1, %s1952_s12  }
 0x169   : > { %p10_p4 = scmp.ge.s32.totalorder %s13_s12, 4  }
 0x16b   :  { %12 = sbr.rel (!%p10_p4) target bundleno = 1 (0x1), region = 62 }

// kernel: aefnet_forward.7
= control target key start
LH: loop header
LB: loop body
LE: loop exit
PB: predicated region body
PF: predicated region fallthrough
CT: control target
= control target key end

     0   :  { %s2875_s12 = smov 0   ;;  %s3892_s0 = inlined_call_operand.vmem [shape: f32[1568,800], index: 0, kind: input, shape index: {}]   ;;  %s3893_s1 = inlined_call_operand.vmem [shape: f32[800,8], index: 1, kind: input, shape index: {}]   ;;  %s3894_s2 = inlined_call_operand.vmem [shape: f32[1,8], index: 2, kind: input, shape index: {}]   ;;  %s3895_s3 = inlined_call_operand.vmem [shape: f32[1568,8], index: 3, kind: output, shape index: {}]  }
   0x1 LB: > { %s2121_s13 = sadd.s32 4294967295, %s2850_s12   ;;  %p2125_p0 = scmp.ge.s32.totalorder %s2850_s12, 1  ;;  %s2850_s12 = sphi %s2875_s12, %s13_s12  }
   0x2   : > { %p139_p1 = scmp.lt.s32.totalorder %s2850_s12, 5 }
   0x4   : > { %p140_p2 = pnand %p2125_p0, %p139_p1 }
   0x5   : > { %v520_v0 = vld [vmem:[%s3893_s1] sm:$0xff] (!%p140_p2)  ;;  %v521_v1 = vld [vmem:[%s3893_s1 + $0x8] sm:$0xff] (!%p140_p2)  ;;  %v2852_v3 = vmov (!%p140_p2), 0.0|0.0   ;;  %v522_v6 = vld [vmem:[%s3893_s1 + $0x10] sm:$0xff] (!%p140_p2)  ;;  %s164_s30 = smul.u32 (!%p140_p2), 49, %s2121_s13  ;;  %vm2853_vm0 = vmmov (!%p140_p2), 0  }
   0x6   : > { %143 = sbr.rel (%p140_p2) target bundleno = 676 (0x2a4), region = 32  ;;  %v584_v2 = vld [vmem:[%s3893_s1 + $0x200] sm:$0xff] (!%p140_p2)  ;;  %2388 = vmatprep.subr.bf16.mxu1 (!%p140_p2), %v2852_v3  ;;  %2484 = vmatprep.subr.bf16.mxu0 (!%p140_p2), %v2852_v3  ;;  %v2389_v4 = vpack.c.bf16 (!%p140_p2), %v521_v1, %v520_v0  ;;  %v585_v5 = vld [vmem:[%s3893_s1 + $0x208] sm:$0xff] (!%p140_p2)  ;;  %v523_v7 = vld [vmem:[%s3893_s1 + $0x18] sm:$0xff] (!%p140_p2)  ;;  %vm627_vm1 = vcmask (!%p140_p2), 261120   ;;  %vm2015_vm2 = vcmask (!%p140_p2), 64512  }
   0x7   : > { %v2485_v8 = vpack.c.bf16 (!%p140_p2), %v585_v5, %v584_v2  ;;  %v586_v9 = vld [vmem:[%s3893_s1 + $0x210] sm:$0xff] (!%p140_p2)  ;;  %v587_v10 = vld [vmem:[%s3893_s1 + $0x218] sm:$0xff] (!%p140_p2)  ;;  %v2392_v11 = vpack.c.bf16 (!%p140_p2), %v523_v7, %v522_v6  ;;  %v524_v13 = vld [vmem:[%s3893_s1 + $0x20] sm:$0xff] (!%p140_p2)  ;;  %p165_p3 = scmp.lt.s32.totalorder (!%p140_p2), %s164_s30, 195 }
   0x8   : > { %2390 = vmatpush1.bf16.msra.mxu1 (!%p140_p2), %v2389_v4  ;;  %v2488_v12 = vpack.c.bf16 (!%p140_p2), %v587_v10, %v586_v9  ;;  %v525_v14 = vld [vmem:[%s3893_s1 + $0x28] sm:$0xff] (!%p140_p2)  ;;  %v588_v15 = vld [vmem:[%s3893_s1 + $0x220] sm:$0xff] (!%p140_p2)  ;;  %v526_v19 = vld [vmem:[%s3893_s1 + $0x30] sm:$0xff] (!%p140_p2) }
   0x9   : > { %2486 = vmatpush1.bf16.msra.mxu0 (!%p140_p2), %v2485_v8  ;;  %2391 = vmatprep.subr.bf16.mxu1 (!%p140_p2), %v2852_v3  ;;  %v589_v16 = vld [vmem:[%s3893_s1 + $0x228] sm:$0xff] (!%p140_p2)  ;;  %v2395_v17 = vpack.c.bf16 (!%p140_p2), %v525_v14, %v524_v13  ;;  %v527_v20 = vld [vmem:[%s3893_s1 + $0x38] sm:$0xff] (!%p140_p2)  ;;  %v590_v21 = vld [vmem:[%s3893_s1 + $0x230] sm:$0xff] (!%p140_p2) }
   0xa   : > { %2487 = vmatprep.subr.bf16.mxu0 (!%p140_p2), %v2852_v3  ;;  %v2491_v18 = vpack.c.bf16 (!%p140_p2), %v589_v16, %v588_v15  ;;  %v591_v22 = vld [vmem:[%s3893_s1 + $0x238] sm:$0xff] (!%p140_p2)  ;;  %v2398_v23 = vpack.c.bf16 (!%p140_p2), %v527_v20, %v526_v19  ;;  %v528_v25 = vld [vmem:[%s3893_s1 + $0x40] sm:$0xff] (!%p140_p2)  ;;  %v529_v26 = vld [vmem:[%s3893_s1 + $0x48] sm:$0xff] (!%p140_p2) }
   0xb   : > { %v2494_v24 = vpack.c.bf16 (!%p140_p2), %v591_v22, %v590_v21  ;;  %v592_v27 = vld [vmem:[%s3893_s1 + $0x240] sm:$0xff] (!%p140_p2)  ;;  %v593_v28 = vld [vmem:[%s3893_s1 + $0x248] sm:$0xff] (!%p140_p2)  ;;  %v2401_v29 = vpack.c.bf16 (!%p140_p2), %v529_v26, %v528_v25  ;;  %v530_v31 = vld [vmem:[%s3893_s1 + $0x50] sm:$0xff] (!%p140_p2) }
   0xc   : > { %2393 = vmatpush1.bf16.msra.mxu1 (!%p140_p2), %v2392_v11  ;;  %v2497_v30 = vpack.c.bf16 (!%p140_p2), %v593_v28, %v592_v27  ;;  %v531_v32 = vld [vmem:[%s3893_s1 + $0x58] sm:$0xff] (!%p140_p2)  ;;  %v594_v33 = vld [vmem:[%s3893_s1 + $0x250] sm:$0xff] (!%p140_p2)  ;;  %v532_v37 = vld [vmem:[%s3893_s1 + $0x60] sm:$0xff] (!%p140_p2) }
   0xd   : > { %2489 = vmatpush1.bf16.msra.mxu0 %v2488_v12  ;;  %2394 = vmatprep.subr.bf16.mxu1 %v2852_v3  ;;  %s3897_s30 = smov (!%p165_p3, %s164_s30), 195  ;;  %v595_v34 = vld [vmem:[%s3893_s1 + $0x258] sm:$0xff]  ;;  %v2404_v35 = vpack.c.bf16 %v531_v32, %v530_v31  ;;  %v533_v38 = vld [vmem:[%s3893_s1 + $0x68] sm:$0xff]  ;;  %v596_v39 = vld [vmem:[%s3893_s1 + $0x260] sm:$0xff] }
   0xe   : > { %2490 = vmatprep.subr.bf16.mxu0 %v2852_v3  ;;  %s2832_s29 = smul.u32 56, %s3897_s30  ;;  %v2500_v36 = vpack.c.bf16 %v595_v34, %v594_v33  ;;  %v597_v40 = vld [vmem:[%s3893_s1 + $0x268] sm:$0xff]  ;;  %v2407_v43 = vpack.c.bf16 %v533_v38, %v532_v37  ;;  %v534_v45 = vld [vmem:[%s3893_s1 + $0x70] sm:$0xff]  ;;  %v535_v46 = vld [vmem:[%s3893_s1 + $0x78] sm:$0xff]  ;;  %s2127_s26 = sshll.u32 %s3897_s30, 3 }
   0xf   : > { %v2503_v44 = vpack.c.bf16 %v597_v40, %v596_v39  ;;  %v598_v47 = vld [vmem:[%s3893_s1 + $0x270] sm:$0xff]  ;;  %v599_v48 = vld [vmem:[%s3893_s1 + $0x278] sm:$0xff]  ;;  %v2410_v49 = vpack.c.bf16 %v535_v46, %v534_v45  ;;  %v536_v51 = vld [vmem:[%s3893_s1 + $0x80] sm:$0xff] }
  0x10   : > { %2396 = vmatpush1.bf16.msra.mxu1 %v2395_v17  ;;  %s2971_s15 = scalar_lea.vmem %s3892_s0, %s2832_s29  ;;  %v2506_v50 = vpack.c.bf16 %v599_v48, %v598_v47  ;;  %v537_v52 = vld [vmem:[%s3893_s1 + $0x88] sm:$0xff]  ;;  %v600_v53 = vld [vmem:[%s3893_s1 + $0x280] sm:$0xff]  ;;  %v538_v57 = vld [vmem:[%s3893_s1 + $0x90] sm:$0xff]  ;;  %s3741_s29 = scalar_lea.vmem %s3895_s3, %s2127_s26 }
  0x11   : > { %2492 = vmatpush1.bf16.msra.mxu0 %v2491_v18  ;;  %2397 = vmatprep.subr.bf16.mxu1 %v2852_v3  ;;  %v178_v41 = vld [vmem:[%s2971_s15 + $0x8] sm:$0xff]  ;;  %v2413_v55 = vpack.c.bf16 %v537_v52, %v536_v51  ;;  %v539_v58 = vld [vmem:[%s3893_s1 + $0x98] sm:$0xff]  ;;  %v602_v59 = vld [vmem:[%s3893_s1 + $0x290] sm:$0xff] }
  0x12   : > { %2493 = vmatprep.subr.bf16.mxu0 %v2852_v3  ;;  %v182_v42 = vld [vmem:[%s2971_s15 + $0x28] sm:$0xff]  ;;  %839 = vmatprep.mubr.f32.mxu1 %v178_v41  ;;  %v603_v60 = vld [vmem:[%s3893_s1 + $0x298] sm:$0xff]  ;;  %v2416_v61 = vpack.c.bf16 %v539_v58, %v538_v57  ;;  %v540_v63 = vld [vmem:[%s3893_s1 + $0xa0] sm:$0xff] }
  0x13   : > { %1459 = vmatprep.mubr.f32.mxu0 %v182_v42  ;;  %v601_v54 = vld [vmem:[%s3893_s1 + $0x288] sm:$0xff]  ;;  %v2512_v62 = vpack.c.bf16 %v603_v60, %v602_v59  ;;  %v604_v1 = vld [vmem:[%s3893_s1 + $0x2a0] sm:$0xff]  ;;  %v542_v6 = vld [vmem:[%s3893_s1 + $0xb0] sm:$0xff] }
  0x14   : > { %2399 = vmatpush1.bf16.msra.mxu1 %v2398_v23  ;;  %v2509_v56 = vpack.c.bf16 %v601_v54, %v600_v53  ;;  %v541_v0 = vld [vmem:[%s3893_s1 + $0xa8] sm:$0xff]  ;;  %v543_v7 = vld [vmem:[%s3893_s1 + $0xb8] sm:$0xff]  ;;  %v606_v8 = vld [vmem:[%s3893_s1 + $0x2b0] sm:$0xff] }
  0x15   : > { %2495 = vmatpush1.bf16.msra.mxu0 %v2494_v24  ;;  %2400 = vmatprep.subr.bf16.mxu1 %v2852_v3  ;;  %v605_v2 = vld [vmem:[%s3893_s1 + $0x2a8] sm:$0xff]  ;;  %v2419_v4 = vpack.c.bf16 %v541_v0, %v540_v63  ;;  %v607_v9 = vld [vmem:[%s3893_s1 + $0x2b8] sm:$0xff]  ;;  %v2422_v10 = vpack.c.bf16 %v543_v7, %v542_v6  ;;  %v544_v12 = vld [vmem:[%s3893_s1 + $0xc0] sm:$0xff] }
  0x16   : > { %2496 = vmatprep.subr.bf16.mxu0 %v2852_v3  ;;  %v2515_v5 = vpack.c.bf16 %v605_v2, %v604_v1  ;;  %v2518_v11 = vpack.c.bf16 %v607_v9, %v606_v8  ;;  %v545_v13 = vld [vmem:[%s3893_s1 + $0xc8] sm:$0xff]  ;;  %v608_v14 = vld [vmem:[%s3893_s1 + $0x2c0] sm:$0xff]  ;;  %v546_v18 = vld [vmem:[%s3893_s1 + $0xd0] sm:$0xff] }
  0x17   : > { %v609_v15 = vld [vmem:[%s3893_s1 + $0x2c8] sm:$0xff]  ;;  %v2425_v16 = vpack.c.bf16 %v545_v13, %v544_v12  ;;  %v547_v19 = vld [vmem:[%s3893_s1 + $0xd8] sm:$0xff]  ;;  %v610_v20 = vld [vmem:[%s3893_s1 + $0x2d0] sm:$0xff] }
  0x18   : > { %2402 = vmatpush1.bf16.msra.mxu1 %v2401_v29  ;;  %v2521_v17 = vpack.c.bf16 %v609_v15, %v608_v14  ;;  %v611_v21 = vld [vmem:[%s3893_s1 + $0x2d8] sm:$0xff]  ;;  %v2428_v22 = vpack.c.bf16 %v547_v19, %v546_v18  ;;  %v548_v24 = vld [vmem:[%s3893_s1 + $0xe0] sm:$0xff]  ;;  %v549_v25 = vld [vmem:[%s3893_s1 + $0xe8] sm:$0xff] }
  0x19   : > { %2498 = vmatpush1.bf16.msra.mxu0 %v2497_v30  ;;  %2403 = vmatprep.subr.bf16.mxu1 %v2852_v3  ;;  %v2524_v23 = vpack.c.bf16 %v611_v21, %v610_v20  ;;  %v612_v26 = vld [vmem:[%s3893_s1 + $0x2e0] sm:$0xff]  ;;  %v613_v27 = vld [vmem:[%s3893_s1 + $0x2e8] sm:$0xff]  ;;  %v2431_v28 = vpack.c.bf16 %v549_v25, %v548_v24  ;;  %v550_v30 = vld [vmem:[%s3893_s1 + $0xf0] sm:$0xff] }
  0x1a   : > { %2499 = vmatprep.subr.bf16.mxu0 %v2852_v3  ;;  %v2527_v29 = vpack.c.bf16 %v613_v27, %v612_v26  ;;  %v551_v31 = vld [vmem:[%s3893_s1 + $0xf8] sm:$0xff]  ;;  %v614_v32 = vld [vmem:[%s3893_s1 + $0x2f0] sm:$0xff]  ;;  %v553_v37 = vld [vmem:[%s3893_s1 + $0x108] sm:$0xff] }
  0x1b   : > { %v615_v33 = vld [vmem:[%s3893_s1 + $0x2f8] sm:$0xff]  ;;  %v2434_v34 = vpack.c.bf16 %v551_v31, %v550_v30  ;;  %v616_v38 = vld [vmem:[%s3893_s1 + $0x300] sm:$0xff]  ;;  %v617_v39 = vld [vmem:[%s3893_s1 + $0x308] sm:$0xff] }
  0x1c   : > { %2405 = vmatpush1.bf16.msra.mxu1 %v2404_v35  ;;  %v2530_v35 = vpack.c.bf16 %v615_v33, %v614_v32  ;;  %v177_v40 = vld [vmem:[%s2971_s15] sm:$0xff]  ;;  %v2533_v45 = vpack.c.bf16 %v617_v39, %v616_v38  ;;  %v554_v46 = vld [vmem:[%s3893_s1 + $0x110] sm:$0xff]  ;;  %v555_v47 = vld [vmem:[%s3893_s1 + $0x118] sm:$0xff] }
  0x1d   : > { %2501 = vmatpush1.bf16.msra.mxu0 %v2500_v36  ;;  %2406 = vmatprep.subr.bf16.mxu1 %v2852_v3  ;;  %v552_v36 = vld [vmem:[%s3893_s1 + $0x100] sm:$0xff]  ;;  %v618_v48 = vld [vmem:[%s3893_s1 + $0x310] sm:$0xff]  ;;  %v188_v51 = vld [vmem:[%s2971_s15 + $0x58] sm:$0xff]  ;;  %v2440_v53 = vpack.c.bf16 %v555_v47, %v554_v46 }
  0x1e   : > { %2502 = vmatprep.subr.bf16.mxu0 %v2852_v3  ;;  %v2437_v41 = vpack.c.bf16 %v553_v37, %v552_v36  ;;  %v181_v42 = vld [vmem:[%s2971_s15 + $0x20] sm:$0xff]  ;;  %v192_v52 = vld [vmem:[%s2971_s15 + $0x78] sm:$0xff]  ;;  %v191_v58 = vld [vmem:[%s2971_s15 + $0x70] sm:$0xff] }
  0x1f   : > { %v196_v54 = vld [vmem:[%s2971_s15 + $0x98] sm:$0xff]  ;;  %v195_v59 = vld [vmem:[%s2971_s15 + $0x90] sm:$0xff]  ;;  %v198_v1 = vld [vmem:[%s2971_s15 + $0xa8] sm:$0xff] }
  0x20   : > { %2408 = vmatpush1.bf16.msra.mxu1 %v2407_v43  ;;  %v185_v43 = vld [vmem:[%s2971_s15 + $0x40] sm:$0xff]  ;;  %v199_v60 = vld [vmem:[%s2971_s15 + $0xb0] sm:$0xff]  ;;  %v559_v0 = vld [vmem:[%s3893_s1 + $0x138] sm:$0xff] }
  0x21   : > { %2504 = vmatpush1.bf16.msra.mxu0 %v2503_v44  ;;  %2409 = vmatprep.subr.bf16.mxu1 %v2852_v3  ;;  %v189_v44 = vld [vmem:[%s2971_s15 + $0x60] sm:$0xff]  ;;  %v558_v63 = vld [vmem:[%s3893_s1 + $0x130] sm:$0xff]  ;;  %v202_v2 = vld [vmem:[%s2971_s15 + $0xc8] sm:$0xff] }
  0x22   : > { %2505 = vmatprep.subr.bf16.mxu0 %v2852_v3  ;;  %v210_v6 = vld [vmem:[%s2971_s15 + $0x108] sm:$0xff]  ;;  %v560_v7 = vld [vmem:[%s3893_s1 + $0x140] sm:$0xff]  ;;  %v562_v14 = vld [vmem:[%s3893_s1 + $0x150] sm:$0xff] }
  0x23   : > { %v561_v8 = vld [vmem:[%s3893_s1 + $0x148] sm:$0xff]  ;;  %v205_v9 = vld [vmem:[%s2971_s15 + $0xe0] sm:$0xff]  ;;  %v563_v15 = vld [vmem:[%s3893_s1 + $0x158] sm:$0xff] }
  0x24   : > { %2411 = vmatpush1.bf16.msra.mxu1 %v2410_v49  ;;  %v619_v49 = vld [vmem:[%s3893_s1 + $0x318] sm:$0xff]  ;;  %v2449_v12 = vpack.c.bf16 %v561_v8, %v560_v7  ;;  %v217_v13 = vld [vmem:[%s2971_s15 + $0x140] sm:$0xff]  ;;  %v2452_v19 = vpack.c.bf16 %v563_v15, %v562_v14  ;;  %v223_v24 = vld [vmem:[%s2971_s15 + $0x170] sm:$0xff] }
  0x25   : > { %2507 = vmatpush1.bf16.msra.mxu0 %v2506_v50  ;;  %2412 = vmatprep.subr.bf16.mxu1 %v2852_v3  ;;  %v184_v50 = vld [vmem:[%s2971_s15 + $0x38] sm:$0xff]  ;;  %v2536_v57 = vpack.c.bf16 %v619_v49, %v618_v48  ;;  %v564_v21 = vld [vmem:[%s3893_s1 + $0x160] sm:$0xff]  ;;  %v227_v25 = vld [vmem:[%s2971_s15 + $0x190] sm:$0xff] }
  0x26   : > { %2508 = vmatprep.subr.bf16.mxu0 %v2852_v3  ;;  %v220_v18 = vld [vmem:[%s2971_s15 + $0x158] sm:$0xff]  ;;  %v231_v27 = vld [vmem:[%s2971_s15 + $0x1b0] sm:$0xff]  ;;  %v226_v30 = vld [vmem:[%s2971_s15 + $0x188] sm:$0xff] }
  0x27   : > { %v224_v20 = vld [vmem:[%s2971_s15 + $0x178] sm:$0xff]  ;;  %v230_v31 = vld [vmem:[%s2971_s15 + $0x1a8] sm:$0xff]  ;;  %v233_v37 = vld [vmem:[%s2971_s15 + $0x1c0] sm:$0xff] }
  0x28   : > { %2414 = vmatpush1.bf16.msra.mxu1 %v2413_v55  ;;  %v556_v55 = vld [vmem:[%s3893_s1 + $0x120] sm:$0xff]  ;;  %v234_v32 = vld [vmem:[%s2971_s15 + $0x1c8] sm:$0xff]  ;;  %v248_v46 = vld [vmem:[%s2971_s15 + $0x238] sm:$0xff] }
  0x29   : > { %2510 = vmatpush1.bf16.msra.mxu0 %v2509_v56  ;;  %2415 = vmatprep.subr.bf16.mxu1 %v2852_v3  ;;  %v557_v56 = vld [vmem:[%s3893_s1 + $0x128] sm:$0xff]  ;;  %v237_v38 = vld [vmem:[%s2971_s15 + $0x1e0] sm:$0xff]  ;;  %v252_v48 = vld [vmem:[%s2971_s15 + $0x258] sm:$0xff] }
  0x2a   : > { %2511 = vmatprep.subr.bf16.mxu0 %v2852_v3  ;;  %v569_v36 = vld [vmem:[%s3893_s1 + $0x188] sm:$0xff]  ;;  %v241_v39 = vld [vmem:[%s2971_s15 + $0x200] sm:$0xff]  ;;  %v578_v7 = vld [vmem:[%s3893_s1 + $0x1d0] sm:$0xff] }
  0x2b   : > { %v572_v49 = vld [vmem:[%s3893_s1 + $0x1a0] sm:$0xff]  ;;  %v579_v8 = vld [vmem:[%s3893_s1 + $0x1d8] sm:$0xff]  ;;  %v581_v15 = vld [vmem:[%s3893_s1 + $0x1e8] sm:$0xff] }
  0x2c   : > { %2417 = vmatpush1.bf16.msra.mxu1 %v2416_v61  ;;  %v2443_v61 = vpack.c.bf16 %v557_v56, %v556_v55  ;;  %v259_v55 = vld [vmem:[%s2971_s15 + $0x290] sm:$0xff]  ;;  %v580_v14 = vld [vmem:[%s3893_s1 + $0x1e0] sm:$0xff] }
  0x2d   : > { %2513 = vmatpush1.bf16.msra.mxu0 %v2512_v62  ;;  %2418 = vmatprep.subr.bf16.mxu1 %v2852_v3  ;;  %v203_v62 = vld [vmem:[%s2971_s15 + $0xd0] sm:$0xff] }
  0x2e   : > { %2514 = vmatprep.subr.bf16.mxu0 %v2852_v3  ;;  %v574_v56 = vld [vmem:[%s3893_s1 + $0x1b0] sm:$0xff] }
  0x30   : > { %2420 = vmatpush1.bf16.msra.mxu1 %v2419_v4  ;;  %v206_v4 = vld [vmem:[%s2971_s15 + $0xe8] sm:$0xff] }
  0x31   : > { %2516 = vmatpush1.bf16.msra.mxu0 %v2515_v5  ;;  %2421 = vmatprep.subr.bf16.mxu1 %v2852_v3  ;;  %v2446_v5 = vpack.c.bf16 %v559_v0, %v558_v63  ;;  %v576_v63 = vld [vmem:[%s3893_s1 + $0x1c0] sm:$0xff]  ;;  %v577_v0 = vld [vmem:[%s3893_s1 + $0x1c8] sm:$0xff] }
  0x32   : > { %2517 = vmatprep.subr.bf16.mxu0 %v2852_v3 }
  0x34   : > { %2423 = vmatpush1.bf16.msra.mxu1 %v2422_v10  ;;  %v209_v10 = vld [vmem:[%s2971_s15 + $0x100] sm:$0xff] }
  0x35   : > { %2519 = vmatpush1.bf16.msra.mxu0 %v2518_v11  ;;  %2424 = vmatprep.subr.bf16.mxu1 %v2852_v3  ;;  %v213_v11 = vld [vmem:[%s2971_s15 + $0x120] sm:$0xff] }
  0x36   : > { %2520 = vmatprep.subr.bf16.mxu0 %v2852_v3 }
  0x38   : > { %2426 = vmatpush1.bf16.msra.mxu1 %v2425_v16  ;;  %v212_v16 = vld [vmem:[%s2971_s15 + $0x118] sm:$0xff] }
  0x39   : > { %2522 = vmatpush1.bf16.msra.mxu0 %v2521_v17  ;;  %2427 = vmatprep.subr.bf16.mxu1 %v2852_v3  ;;  %v216_v17 = vld [vmem:[%s2971_s15 + $0x138] sm:$0xff] }
  0x3a   : > { %2523 = vmatprep.subr.bf16.mxu0 %v2852_v3 }
  0x3c   : > { %2429 = vmatpush1.bf16.msra.mxu1 %v2428_v22  ;;  %v565_v22 = vld [vmem:[%s3893_s1 + $0x168] sm:$0xff] }
  0x3d   : > { %2525 = vmatpush1.bf16.msra.mxu0 %v2524_v23  ;;  %2430 = vmatprep.subr.bf16.mxu1 %v2852_v3  ;;  %v219_v23 = vld [vmem:[%s2971_s15 + $0x150] sm:$0xff]  ;;  %v2455_v26 = vpack.c.bf16 %v565_v22, %v564_v21  ;;  %v282_v21 = vld [vmem:[%s2971_s15 + $0x348] sm:$0xff] }
  0x3e   : > { %2526 = vmatprep.subr.bf16.mxu0 %v2852_v3  ;;  %v582_v22 = vld [vmem:[%s3893_s1 + $0x1f0] sm:$0xff] }
  0x40   : > { %2432 = vmatpush1.bf16.msra.mxu1 %v2431_v28  ;;  %v566_v28 = vld [vmem:[%s3893_s1 + $0x170] sm:$0xff] }
  0x41   : > { %2528 = vmatpush1.bf16.msra.mxu0 %v2527_v29  ;;  %2433 = vmatprep.subr.bf16.mxu1 %v2852_v3  ;;  %v567_v29 = vld [vmem:[%s3893_s1 + $0x178] sm:$0xff] }
  0x42   : > { %2529 = vmatprep.subr.bf16.mxu0 %v2852_v3  ;;  %v2458_v33 = vpack.c.bf16 %v567_v29, %v566_v28  ;;  %v289_v28 = vld [vmem:[%s2971_s15 + $0x380] sm:$0xff] }
  0x43   : > { %v293_v29 = vld [vmem:[%s2971_s15 + $0x3a0] sm:$0xff] }
  0x44   : > { %2435 = vmatpush1.bf16.msra.mxu1 %v2434_v34  ;;  %v238_v34 = vld [vmem:[%s2971_s15 + $0x1e8] sm:$0xff] }
  0x45   : > { %2531 = vmatpush1.bf16.msra.mxu0 %v2530_v35  ;;  %2436 = vmatprep.subr.bf16.mxu1 %v2852_v3  ;;  %v568_v35 = vld [vmem:[%s3893_s1 + $0x180] sm:$0xff] }
  0x46   : > { %2532 = vmatprep.subr.bf16.mxu0 %v2852_v3 }
  0x47   : > { %840 = vmatmul.mubr.f32.vlgmr.msra.gmra.mrb[0].mxu1 %v177_v40  ;;  %v2461_v40 = vpack.c.bf16 %v569_v36, %v568_v35  ;;  %v303_v35 = vld [vmem:[%s2971_s15 + $0x3f0] sm:$0xff] }
  0x48   : > { %1460 = vmatmul.mubr.f32.vlgmr.msra.gmra.mrb[0].mxu0 %v181_v42  ;;  %2438 = vmatpush1.bf16.msra.mxu1 %v2437_v41  ;;  %v245_v41 = vld [vmem:[%s2971_s15 + $0x220] sm:$0xff]  ;;  %v570_v42 = vld [vmem:[%s3893_s1 + $0x190] sm:$0xff] }
  0x49   : > { %844 = vmatprep.mubr.f32.mxu1 %v185_v43  ;;  %1464 = vmatprep.mubr.f32.mxu0 %v189_v44  ;;  %v571_v43 = vld [vmem:[%s3893_s1 + $0x198] sm:$0xff]  ;;  %v307_v36 = vld [vmem:[%s2971_s15 + $0x410] sm:$0xff] }
  0x4a   : > { %2534 = vmatpush3.bf16.msra.mxu0 %v2533_v45  ;;  %2439 = vmatprep.subr.bf16.mxu1 %v2852_v3  ;;  %v240_v44 = vld [vmem:[%s2971_s15 + $0x1f8] sm:$0xff]  ;;  %v2464_v47 = vpack.c.bf16 %v571_v43, %v570_v42  ;;  %v322_v42 = vld [vmem:[%s2971_s15 + $0x488] sm:$0xff]  ;;  %v317_v43 = vld [vmem:[%s2971_s15 + $0x460] sm:$0xff] }
  0x4b   : > { %845 = vmatmul.mubr.f32.gmra.mrb[2].mxu1 %v184_v50  ;;  %2535 = vmatprep.subr.bf16.mxu0 %v2852_v3  ;;  %v244_v45 = vld [vmem:[%s2971_s15 + $0x218] sm:$0xff]  ;;  %v573_v50 = vld [vmem:[%s3893_s1 + $0x1a8] sm:$0xff] }
  0x4c   : > { %1465 = vmatmul.mubr.f32.gmra.mrb[2].mxu0 %v188_v51  ;;  %849 = vmatprep.mubr.f32.mxu1 %v192_v52  ;;  %v247_v51 = vld [vmem:[%s2971_s15 + $0x230] sm:$0xff] }
  0x4d   : > { %1469 = vmatprep.mubr.f32.mxu0 %v196_v54  ;;  %2441 = vmatpush1.bf16.msra.mxu1 %v2440_v53  ;;  %v251_v52 = vld [vmem:[%s2971_s15 + $0x250] sm:$0xff]  ;;  %v2467_v54 = vpack.c.bf16 %v573_v50, %v572_v49  ;;  %v332_v49 = vld [vmem:[%s2971_s15 + $0x4d8] sm:$0xff] }
  0x4e   : > { %2442 = vmatprep.subr.bf16.mxu1 %v2852_v3  ;;  %2537 = vmatpush3.bf16.msra.mxu0 %v2536_v57  ;;  %v255_v53 = vld [vmem:[%s2971_s15 + $0x270] sm:$0xff]  ;;  %v575_v57 = vld [vmem:[%s3893_s1 + $0x1b8] sm:$0xff] }
  0x4f   : > { %850 = vmatmul.mubr.f32.gmra.mrb[4].mxu1 %v191_v58  ;;  %v254_v58 = vld [vmem:[%s2971_s15 + $0x268] sm:$0xff]  ;;  %v336_v50 = vld [vmem:[%s2971_s15 + $0x4f8] sm:$0xff] }
  0x50   : > { %1470 = vmatmul.mubr.f32.gmra.mrb[4].mxu0 %v195_v59  ;;  %854 = vmatprep.mubr.f32.mxu1 %v199_v60  ;;  %v258_v59 = vld [vmem:[%s2971_s15 + $0x288] sm:$0xff] }
  0x51   : > { %1474 = vmatprep.mubr.f32.mxu0 %v203_v62  ;;  %2444 = vmatpush1.bf16.msra.mxu1 %v2443_v61  ;;  %v262_v60 = vld [vmem:[%s2971_s15 + $0x2a8] sm:$0xff]  ;;  %v2470_v61 = vpack.c.bf16 %v575_v57, %v574_v56 }
  0x52   : > { %2445 = vmatprep.subr.bf16.mxu1 %v2852_v3  ;;  %v266_v62 = vld [vmem:[%s2971_s15 + $0x2c8] sm:$0xff] }
  0x53   : > { %855 = vmatmul.mubr.f32.gmra.mrb[6].mxu1 %v198_v1  ;;  %v261_v1 = vld [vmem:[%s2971_s15 + $0x2a0] sm:$0xff]  ;;  %v342_v56 = vld [vmem:[%s2971_s15 + $0x528] sm:$0xff] }
  0x54   : > { %1475 = vmatmul.mubr.f32.gmra.mrb[6].mxu0 %v202_v2  ;;  %859 = vmatprep.mubr.f32.mxu1 %v206_v4  ;;  %v265_v2 = vld [vmem:[%s2971_s15 + $0x2c0] sm:$0xff]  ;;  %v346_v57 = vld [vmem:[%s2971_s15 + $0x548] sm:$0xff] }
  0x55   : > { %1479 = vmatprep.mubr.f32.mxu0 %v210_v6  ;;  %2447 = vmatpush1.bf16.msra.mxu1 %v2446_v5  ;;  %v269_v4 = vld [vmem:[%s2971_s15 + $0x2e0] sm:$0xff]  ;;  %v2473_v5 = vpack.c.bf16 %v577_v0, %v576_v63  ;;  %v352_v63 = vld [vmem:[%s2971_s15 + $0x578] sm:$0xff] }
  0x56   : > { %2448 = vmatprep.subr.bf16.mxu1 %v2852_v3  ;;  %v273_v6 = vld [vmem:[%s2971_s15 + $0x300] sm:$0xff]  ;;  %v356_v0 = vld [vmem:[%s2971_s15 + $0x598] sm:$0xff] }
  0x57   : > { %860 = vmatmul.mubr.f32.gmra.mrb[8].mxu1 %v205_v9  ;;  %v268_v9 = vld [vmem:[%s2971_s15 + $0x2d8] sm:$0xff] }
  0x58   : > { %1480 = vmatmul.mubr.f32.gmra.mrb[8].mxu0 %v209_v10  ;;  %864 = vmatprep.mubr.f32.mxu1 %v213_v11  ;;  %v272_v10 = vld [vmem:[%s2971_s15 + $0x2f8] sm:$0xff] }
  0x59   : > { %1484 = vmatprep.mubr.f32.mxu0 %v217_v13  ;;  %2450 = vmatpush1.bf16.msra.mxu1 %v2449_v12  ;;  %v276_v11 = vld [vmem:[%s2971_s15 + $0x318] sm:$0xff]  ;;  %v2476_v12 = vpack.c.bf16 %v579_v8, %v578_v7  ;;  %v371_v7 = vld [vmem:[%s2971_s15 + $0x610] sm:$0xff]  ;;  %v366_v8 = vld [vmem:[%s2971_s15 + $0x5e8] sm:$0xff] }
  0x5a   : > { %2451 = vmatprep.subr.bf16.mxu1 %v2852_v3  ;;  %v280_v13 = vld [vmem:[%s2971_s15 + $0x338] sm:$0xff] }
  0x5b   : > { %865 = vmatmul.mubr.f32.gmra.mrb[10].mxu1 %v212_v16  ;;  %v275_v16 = vld [vmem:[%s2971_s15 + $0x310] sm:$0xff] }
  0x5c   : > { %1485 = vmatmul.mubr.f32.gmra.mrb[10].mxu0 %v216_v17  ;;  %869 = vmatprep.mubr.f32.mxu1 %v220_v18  ;;  %v279_v17 = vld [vmem:[%s2971_s15 + $0x330] sm:$0xff] }
  0x5d   : > { %1489 = vmatprep.mubr.f32.mxu0 %v224_v20  ;;  %2453 = vmatpush1.bf16.msra.mxu1 %v2452_v19  ;;  %v283_v18 = vld [vmem:[%s2971_s15 + $0x350] sm:$0xff]  ;;  %v2479_v19 = vpack.c.bf16 %v581_v15, %v580_v14  ;;  %v381_v14 = vld [vmem:[%s2971_s15 + $0x660] sm:$0xff] }
  0x5e   : > { %2454 = vmatprep.subr.bf16.mxu1 %v2852_v3  ;;  %v287_v20 = vld [vmem:[%s2971_s15 + $0x370] sm:$0xff]  ;;  %v385_v15 = vld [vmem:[%s2971_s15 + $0x680] sm:$0xff] }
  0x5f   : > { %870 = vmatmul.mubr.f32.gmra.mrb[12].mxu1 %v219_v23  ;;  %v583_v23 = vld [vmem:[%s3893_s1 + $0x1f8] sm:$0xff] }
  0x60   : > { %1490 = vmatmul.mubr.f32.gmra.mrb[12].mxu0 %v223_v24  ;;  %874 = vmatprep.mubr.f32.mxu1 %v227_v25  ;;  %v286_v24 = vld [vmem:[%s2971_s15 + $0x368] sm:$0xff] }
  0x61   : > { %1494 = vmatprep.mubr.f32.mxu0 %v231_v27  ;;  %2456 = vmatpush1.bf16.msra.mxu1 %v2455_v26  ;;  %v290_v25 = vld [vmem:[%s2971_s15 + $0x388] sm:$0xff]  ;;  %v2482_v26 = vpack.c.bf16 %v583_v23, %v582_v22  ;;  %v395_v22 = vld [vmem:[%s2971_s15 + $0x6d0] sm:$0xff] }
  0x62   : > { %2457 = vmatprep.subr.bf16.mxu1 %v2852_v3  ;;  %v294_v27 = vld [vmem:[%s2971_s15 + $0x3a8] sm:$0xff]  ;;  %v399_v23 = vld [vmem:[%s2971_s15 + $0x6f0] sm:$0xff] }
  0x63   : > { %875 = vmatmul.mubr.f32.gmra.mrb[14].mxu1 %v226_v30  ;;  %v297_v30 = vld [vmem:[%s2971_s15 + $0x3c0] sm:$0xff] }
  0x64   : > { %1495 = vmatmul.mubr.f32.gmra.mrb[14].mxu0 %v230_v31  ;;  %879 = vmatprep.mubr.f32.mxu1 %v234_v32  ;;  %v301_v31 = vld [vmem:[%s2971_s15 + $0x3e0] sm:$0xff]  ;;  %v296_v32 = vld [vmem:[%s2971_s15 + $0x3b8] sm:$0xff] }
  0x65   : > { %1499 = vmatprep.mubr.f32.mxu0 %v238_v34  ;;  %2459 = vmatpush1.bf16.msra.mxu1 %v2458_v33  ;;  %v304_v33 = vld [vmem:[%s2971_s15 + $0x3f8] sm:$0xff] }
  0x66   : > { %2460 = vmatprep.subr.bf16.mxu1 %v2852_v3  ;;  %v308_v34 = vld [vmem:[%s2971_s15 + $0x418] sm:$0xff] }
  0x67   : > { %880 = vmatmul.mubr.f32.gmra.mrb[16].mxu1 %v233_v37  ;;  %v311_v37 = vld [vmem:[%s2971_s15 + $0x430] sm:$0xff] }
  0x68   : > { %1500 = vmatmul.mubr.f32.gmra.mrb[16].mxu0 %v237_v38  ;;  %884 = vmatprep.mubr.f32.mxu1 %v241_v39  ;;  %v315_v38 = vld [vmem:[%s2971_s15 + $0x450] sm:$0xff]  ;;  %v310_v39 = vld [vmem:[%s2971_s15 + $0x428] sm:$0xff] }
  0x69   : > { %1504 = vmatprep.mubr.f32.mxu0 %v245_v41  ;;  %2462 = vmatpush1.bf16.msra.mxu1 %v2461_v40  ;;  %v314_v40 = vld [vmem:[%s2971_s15 + $0x448] sm:$0xff] }
  0x6a   : > { %2463 = vmatprep.subr.bf16.mxu1 %v2852_v3  ;;  %v318_v41 = vld [vmem:[%s2971_s15 + $0x468] sm:$0xff] }
  0x6b   : > { %885 = vmatmul.mubr.f32.gmra.mrb[18].mxu1 %v240_v44  ;;  %v321_v44 = vld [vmem:[%s2971_s15 + $0x480] sm:$0xff] }
  0x6c   : > { %1505 = vmatmul.mubr.f32.gmra.mrb[18].mxu0 %v244_v45  ;;  %889 = vmatprep.mubr.f32.mxu1 %v248_v46  ;;  %v325_v45 = vld [vmem:[%s2971_s15 + $0x4a0] sm:$0xff] }
  0x6d   : > { %1509 = vmatprep.mubr.f32.mxu0 %v252_v48  ;;  %2465 = vmatpush1.bf16.msra.mxu1 %v2464_v47  ;;  %v329_v46 = vld [vmem:[%s2971_s15 + $0x4c0] sm:$0xff]  ;;  %v324_v47 = vld [vmem:[%s2971_s15 + $0x498] sm:$0xff] }
  0x6e   : > { %2466 = vmatprep.subr.bf16.mxu1 %v2852_v3  ;;  %v328_v48 = vld [vmem:[%s2971_s15 + $0x4b8] sm:$0xff] }
  0x6f   : > { %890 = vmatmul.mubr.f32.gmra.mrb[20].mxu1 %v247_v51  ;;  %v331_v51 = vld [vmem:[%s2971_s15 + $0x4d0] sm:$0xff] }
  0x70   : > { %1510 = vmatmul.mubr.f32.gmra.mrb[20].mxu0 %v251_v52  ;;  %894 = vmatprep.mubr.f32.mxu1 %v255_v53  ;;  %v335_v52 = vld [vmem:[%s2971_s15 + $0x4f0] sm:$0xff] }
  0x71   : > { %1514 = vmatprep.mubr.f32.mxu0 %v259_v55  ;;  %2468 = vmatpush1.bf16.msra.mxu1 %v2467_v54  ;;  %v339_v53 = vld [vmem:[%s2971_s15 + $0x510] sm:$0xff]  ;;  %v338_v55 = vld [vmem:[%s2971_s15 + $0x508] sm:$0xff] }
  0x72   : > { %2469 = vmatprep.subr.bf16.mxu1 %v2852_v3  ;;  %v343_v54 = vld [vmem:[%s2971_s15 + $0x530] sm:$0xff] }
  0x73   : > { %895 = vmatmul.mubr.f32.gmra.mrb[22].mxu1 %v254_v58  ;;  %v350_v58 = vld [vmem:[%s2971_s15 + $0x568] sm:$0xff] }
  0x74   : > { %1515 = vmatmul.mubr.f32.gmra.mrb[22].mxu0 %v258_v59  ;;  %899 = vmatprep.mubr.f32.mxu1 %v262_v60  ;;  %v345_v59 = vld [vmem:[%s2971_s15 + $0x540] sm:$0xff] }
  0x75   : > { %1519 = vmatprep.mubr.f32.mxu0 %v266_v62  ;;  %2471 = vmatpush1.bf16.msra.mxu1 %v2470_v61  ;;  %v349_v60 = vld [vmem:[%s2971_s15 + $0x560] sm:$0xff] }
  0x76   : > { %2472 = vmatprep.subr.bf16.mxu1 %v2852_v3  ;;  %v353_v61 = vld [vmem:[%s2971_s15 + $0x580] sm:$0xff] }
  0x77   : > { %900 = vmatmul.mubr.f32.gmra.mrb[24].mxu1 %v261_v1  ;;  %v357_v62 = vld [vmem:[%s2971_s15 + $0x5a0] sm:$0xff]  ;;  %v360_v1 = vld [vmem:[%s2971_s15 + $0x5b8] sm:$0xff] }
  0x78   : > { %1520 = vmatmul.mubr.f32.gmra.mrb[24].mxu0 %v265_v2  ;;  %904 = vmatprep.mubr.f32.mxu1 %v269_v4  ;;  %v364_v2 = vld [vmem:[%s2971_s15 + $0x5d8] sm:$0xff]  ;;  %v359_v4 = vld [vmem:[%s2971_s15 + $0x5b0] sm:$0xff] }
  0x79   : > { %1524 = vmatprep.mubr.f32.mxu0 %v273_v6  ;;  %2474 = vmatpush1.bf16.msra.mxu1 %v2473_v5  ;;  %v363_v5 = vld [vmem:[%s2971_s15 + $0x5d0] sm:$0xff] }
  0x7a   : > { %2475 = vmatprep.subr.bf16.mxu1 %v2852_v3  ;;  %v367_v6 = vld [vmem:[%s2971_s15 + $0x5f0] sm:$0xff] }
  0x7b   : > { %905 = vmatmul.mubr.f32.gmra.mrb[26].mxu1 %v268_v9  ;;  %v370_v9 = vld [vmem:[%s2971_s15 + $0x608] sm:$0xff] }
  0x7c   : > { %1525 = vmatmul.mubr.f32.gmra.mrb[26].mxu0 %v272_v10  ;;  %909 = vmatprep.mubr.f32.mxu1 %v276_v11  ;;  %v374_v10 = vld [vmem:[%s2971_s15 + $0x628] sm:$0xff] }
  0x7d   : > { %1529 = vmatprep.mubr.f32.mxu0 %v280_v13  ;;  %2477 = vmatpush1.bf16.msra.mxu1 %v2476_v12  ;;  %v378_v11 = vld [vmem:[%s2971_s15 + $0x648] sm:$0xff]  ;;  %v373_v12 = vld [vmem:[%s2971_s15 + $0x620] sm:$0xff] }
  0x7e   : > { %2478 = vmatprep.subr.bf16.mxu1 %v2852_v3  ;;  %v377_v13 = vld [vmem:[%s2971_s15 + $0x640] sm:$0xff] }
  0x7f   : > { %910 = vmatmul.mubr.f32.gmra.mrb[28].mxu1 %v275_v16  ;;  %v380_v16 = vld [vmem:[%s2971_s15 + $0x658] sm:$0xff] }
  0x80   : > { %1530 = vmatmul.mubr.f32.gmra.mrb[28].mxu0 %v279_v17  ;;  %914 = vmatprep.mubr.f32.mxu1 %v283_v18  ;;  %v384_v17 = vld [vmem:[%s2971_s15 + $0x678] sm:$0xff] }
  0x81   : > { %1534 = vmatprep.mubr.f32.mxu0 %v287_v20  ;;  %2480 = vmatpush1.bf16.msra.mxu1 %v2479_v19  ;;  %v388_v18 = vld [vmem:[%s2971_s15 + $0x698] sm:$0xff]  ;;  %v387_v20 = vld [vmem:[%s2971_s15 + $0x690] sm:$0xff] }
  0x82   : > { %2481 = vmatprep.subr.bf16.mxu1 %v2852_v3  ;;  %v300_v3 = vld [vmem:[%s2971_s15 + $0x3d8] sm:$0xff] }
  0x83   : > { %915 = vmatmul.mubr.f32.gmra.mrb[30].mxu1 %v282_v21  ;;  %v392_v19 = vld [vmem:[%s2971_s15 + $0x6b8] sm:$0xff]  ;;  %v391_v21 = vld [vmem:[%s2971_s15 + $0x6b0] sm:$0xff] }
  0x84   : > { %1535 = vmatmul.mubr.f32.gmra.mrb[30].mxu0 %v286_v24  ;;  %919 = vmatprep.mubr.f32.mxu1 %v290_v25  ;;  %v394_v24 = vld [vmem:[%s2971_s15 + $0x6c8] sm:$0xff] }
  0x85   : > { %1539 = vmatprep.mubr.f32.mxu0 %v294_v27  ;;  %2483 = vmatpush1.bf16.msra.mxu1 %v2482_v26  ;;  %v398_v25 = vld [vmem:[%s2971_s15 + $0x6e8] sm:$0xff] }
  0x86   : > { %v402_v26 = vld [vmem:[%s2971_s15 + $0x708] sm:$0xff] }
  0x87   : > { %920 = vmatmul.mubr.f32.gmra.mrb[32].mxu1 %v289_v28  ;;  %v406_v27 = vld [vmem:[%s2971_s15 + $0x728] sm:$0xff]  ;;  %v401_v28 = vld [vmem:[%s2971_s15 + $0x700] sm:$0xff] }
  0x88   : > { %1540 = vmatmul.mubr.f32.gmra.mrb[32].mxu0 %v293_v29  ;;  %924 = vmatprep.mubr.f32.mxu1 %v297_v30  ;;  %v405_v29 = vld [vmem:[%s2971_s15 + $0x720] sm:$0xff] }
  0x89   : > { %1544 = vmatprep.mubr.f32.mxu0 %v301_v31  ;;  %v409_v30 = vld [vmem:[%s2971_s15 + $0x740] sm:$0xff] }
  0x8a   : > { %v413_v31 = vld [vmem:[%s2971_s15 + $0x760] sm:$0xff] }
  0x8b   : > { %925 = vmatmul.mubr.f32.gmra.mrb[34].mxu1 %v296_v32  ;;  %v408_v32 = vld [vmem:[%s2971_s15 + $0x738] sm:$0xff] }
  0x8c   : > { %1545 = vmatmul.mubr.f32.gmra.mrb[34].mxu0 %v300_v3  ;;  %929 = vmatprep.mubr.f32.mxu1 %v304_v33  ;;  %v412_v3 = vld [vmem:[%s2971_s15 + $0x758] sm:$0xff] }
  0x8d   : > { %1549 = vmatprep.mubr.f32.mxu0 %v308_v34  ;;  %v416_v33 = vld [vmem:[%s2971_s15 + $0x778] sm:$0xff] }
  0x8e   : > { %v420_v34 = vld [vmem:[%s2971_s15 + $0x798] sm:$0xff] }
  0x8f   : > { %930 = vmatmul.mubr.f32.gmra.mrb[36].mxu1 %v303_v35  ;;  %v415_v35 = vld [vmem:[%s2971_s15 + $0x770] sm:$0xff] }
  0x90   : > { %1550 = vmatmul.mubr.f32.gmra.mrb[36].mxu0 %v307_v36  ;;  %934 = vmatprep.mubr.f32.mxu1 %v311_v37  ;;  %v419_v36 = vld [vmem:[%s2971_s15 + $0x790] sm:$0xff] }
  0x91   : > { %1554 = vmatprep.mubr.f32.mxu0 %v315_v38  ;;  %v423_v37 = vld [vmem:[%s2971_s15 + $0x7b0] sm:$0xff] }
  0x92   : > { %v427_v38 = vld [vmem:[%s2971_s15 + $0x7d0] sm:$0xff] }
  0x93   : > { %935 = vmatmul.mubr.f32.gmra.mrb[38].mxu1 %v310_v39  ;;  %v422_v39 = vld [vmem:[%s2971_s15 + $0x7a8] sm:$0xff] }
  0x94   : > { %1555 = vmatmul.mubr.f32.gmra.mrb[38].mxu0 %v314_v40  ;;  %939 = vmatprep.mubr.f32.mxu1 %v318_v41  ;;  %v426_v40 = vld [vmem:[%s2971_s15 + $0x7c8] sm:$0xff] }
  0x95   : > { %1559 = vmatprep.mubr.f32.mxu0 %v322_v42  ;;  %v430_v41 = vld [vmem:[%s2971_s15 + $0x7e8] sm:$0xff] }
  0x96   : > { %v434_v42 = vld [vmem:[%s2971_s15 + $0x808] sm:$0xff] }
  0x97   : > { %940 = vmatmul.mubr.f32.gmra.mrb[40].mxu1 %v317_v43  ;;  %v429_v43 = vld [vmem:[%s2971_s15 + $0x7e0] sm:$0xff] }
  0x98   : > { %1560 = vmatmul.mubr.f32.gmra.mrb[40].mxu0 %v321_v44  ;;  %944 = vmatprep.mubr.f32.mxu1 %v325_v45  ;;  %v433_v44 = vld [vmem:[%s2971_s15 + $0x800] sm:$0xff] }
  0x99   : > { %1564 = vmatprep.mubr.f32.mxu0 %v329_v46  ;;  %v437_v45 = vld [vmem:[%s2971_s15 + $0x820] sm:$0xff] }
  0x9a   : > { %v441_v46 = vld [vmem:[%s2971_s15 + $0x840] sm:$0xff] }
  0x9b   : > { %945 = vmatmul.mubr.f32.gmra.mrb[42].mxu1 %v324_v47  ;;  %v436_v47 = vld [vmem:[%s2971_s15 + $0x818] sm:$0xff] }
  0x9c   : > { %1565 = vmatmul.mubr.f32.gmra.mrb[42].mxu0 %v328_v48  ;;  %949 = vmatprep.mubr.f32.mxu1 %v332_v49  ;;  %v440_v48 = vld [vmem:[%s2971_s15 + $0x838] sm:$0xff] }
  0x9d   : > { %1569 = vmatprep.mubr.f32.mxu0 %v336_v50  ;;  %v444_v49 = vld [vmem:[%s2971_s15 + $0x858] sm:$0xff] }
  0x9e   : > { %v448_v50 = vld [vmem:[%s2971_s15 + $0x878] sm:$0xff] }
  0x9f   : > { %950 = vmatmul.mubr.f32.gmra.mrb[44].mxu1 %v331_v51  ;;  %v443_v51 = vld [vmem:[%s2971_s15 + $0x850] sm:$0xff] }
  0xa0   : > { %1570 = vmatmul.mubr.f32.gmra.mrb[44].mxu0 %v335_v52  ;;  %954 = vmatprep.mubr.f32.mxu1 %v339_v53  ;;  %v447_v52 = vld [vmem:[%s2971_s15 + $0x870] sm:$0xff] }
  0xa1   : > { %1574 = vmatprep.mubr.f32.mxu0 %v343_v54  ;;  %v451_v53 = vld [vmem:[%s2971_s15 + $0x890] sm:$0xff] }
  0xa2   : > { %v455_v54 = vld [vmem:[%s2971_s15 + $0x8b0] sm:$0xff] }
  0xa3   : > { %955 = vmatmul.mubr.f32.gmra.mrb[46].mxu1 %v338_v55  ;;  %v450_v55 = vld [vmem:[%s2971_s15 + $0x888] sm:$0xff] }
  0xa4   : > { %1575 = vmatmul.mubr.f32.gmra.mrb[46].mxu0 %v342_v56  ;;  %959 = vmatprep.mubr.f32.mxu1 %v346_v57  ;;  %v454_v56 = vld [vmem:[%s2971_s15 + $0x8a8] sm:$0xff] }
  0xa5   : > { %1579 = vmatprep.mubr.f32.mxu0 %v350_v58  ;;  %v458_v57 = vld [vmem:[%s2971_s15 + $0x8c8] sm:$0xff] }
  0xa6   : > { %v462_v58 = vld [vmem:[%s2971_s15 + $0x8e8] sm:$0xff] }
  0xa7   : > { %960 = vmatmul.mubr.f32.gmra.mrb[48].mxu1 %v345_v59  ;;  %v457_v59 = vld [vmem:[%s2971_s15 + $0x8c0] sm:$0xff] }
  0xa8   : > { %1580 = vmatmul.mubr.f32.gmra.mrb[48].mxu0 %v349_v60  ;;  %964 = vmatprep.mubr.f32.mxu1 %v353_v61  ;;  %v461_v60 = vld [vmem:[%s2971_s15 + $0x8e0] sm:$0xff] }
  0xa9   : > { %1584 = vmatprep.mubr.f32.mxu0 %v357_v62  ;;  %v465_v61 = vld [vmem:[%s2971_s15 + $0x900] sm:$0xff] }
  0xaa   : > { %v469_v62 = vld [vmem:[%s2971_s15 + $0x920] sm:$0xff] }
  0xab   : > { %965 = vmatmul.mubr.f32.gmra.mrb[50].mxu1 %v352_v63  ;;  %v464_v63 = vld [vmem:[%s2971_s15 + $0x8f8] sm:$0xff] }
  0xac   : > { %1585 = vmatmul.mubr.f32.gmra.mrb[50].mxu0 %v356_v0  ;;  %969 = vmatprep.mubr.f32.mxu1 %v360_v1  ;;  %v468_v0 = vld [vmem:[%s2971_s15 + $0x918] sm:$0xff] }
  0xad   : > { %1589 = vmatprep.mubr.f32.mxu0 %v364_v2  ;;  %v472_v1 = vld [vmem:[%s2971_s15 + $0x938] sm:$0xff] }
  0xae   : > { %v476_v2 = vld [vmem:[%s2971_s15 + $0x958] sm:$0xff] }
  0xaf   : > { %970 = vmatmul.mubr.f32.gmra.mrb[52].mxu1 %v359_v4  ;;  %v471_v4 = vld [vmem:[%s2971_s15 + $0x930] sm:$0xff] }
  0xb0   : > { %1590 = vmatmul.mubr.f32.gmra.mrb[52].mxu0 %v363_v5  ;;  %974 = vmatprep.mubr.f32.mxu1 %v367_v6  ;;  %v475_v5 = vld [vmem:[%s2971_s15 + $0x950] sm:$0xff] }
  0xb1   : > { %1594 = vmatprep.mubr.f32.mxu0 %v371_v7  ;;  %v479_v6 = vld [vmem:[%s2971_s15 + $0x970] sm:$0xff] }
  0xb2   : > { %v483_v7 = vld [vmem:[%s2971_s15 + $0x990] sm:$0xff] }
  0xb3   : > { %975 = vmatmul.mubr.f32.gmra.mrb[54].mxu1 %v366_v8  ;;  %v478_v8 = vld [vmem:[%s2971_s15 + $0x968] sm:$0xff] }
  0xb4   : > { %1595 = vmatmul.mubr.f32.gmra.mrb[54].mxu0 %v370_v9  ;;  %979 = vmatprep.mubr.f32.mxu1 %v374_v10  ;;  %v482_v9 = vld [vmem:[%s2971_s15 + $0x988] sm:$0xff] }
  0xb5   : > { %1599 = vmatprep.mubr.f32.mxu0 %v378_v11  ;;  %v486_v10 = vld [vmem:[%s2971_s15 + $0x9a8] sm:$0xff] }
  0xb6   : > { %v490_v11 = vld [vmem:[%s2971_s15 + $0x9c8] sm:$0xff] }
  0xb7   : > { %980 = vmatmul.mubr.f32.gmra.mrb[56].mxu1 %v373_v12  ;;  %v485_v12 = vld [vmem:[%s2971_s15 + $0x9a0] sm:$0xff] }
  0xb8   : > { %1600 = vmatmul.mubr.f32.gmra.mrb[56].mxu0 %v377_v13  ;;  %984 = vmatprep.mubr.f32.mxu1 %v381_v14  ;;  %v489_v13 = vld [vmem:[%s2971_s15 + $0x9c0] sm:$0xff] }
  0xb9   : > { %1604 = vmatprep.mubr.f32.mxu0 %v385_v15  ;;  %v493_v14 = vld [vmem:[%s2971_s15 + $0x9e0] sm:$0xff] }
  0xba   : > { %v497_v15 = vld [vmem:[%s2971_s15 + $0xa00] sm:$0xff] }
  0xbb   : > { %985 = vmatmul.mubr.f32.gmra.mrb[58].mxu1 %v380_v16  ;;  %v492_v16 = vld [vmem:[%s2971_s15 + $0x9d8] sm:$0xff] }
  0xbc   : > { %1605 = vmatmul.mubr.f32.gmra.mrb[58].mxu0 %v384_v17  ;;  %989 = vmatprep.mubr.f32.mxu1 %v388_v18  ;;  %v496_v17 = vld [vmem:[%s2971_s15 + $0x9f8] sm:$0xff] }
  0xbd   : > { %1609 = vmatprep.mubr.f32.mxu0 %v392_v19  ;;  %v500_v18 = vld [vmem:[%s2971_s15 + $0xa18] sm:$0xff] }
  0xbe   : > { %v504_v19 = vld [vmem:[%s2971_s15 + $0xa38] sm:$0xff] }
  0xbf   : > { %990 = vmatmul.mubr.f32.gmra.mrb[60].mxu1 %v387_v20  ;;  %v499_v20 = vld [vmem:[%s2971_s15 + $0xa10] sm:$0xff] }
  0xc0   : > { %1610 = vmatmul.mubr.f32.gmra.mrb[60].mxu0 %v391_v21  ;;  %994 = vmatprep.mubr.f32.mxu1 %v395_v22  ;;  %v503_v21 = vld [vmem:[%s2971_s15 + $0xa30] sm:$0xff] }
  0xc1   : > { %1614 = vmatprep.mubr.f32.mxu0 %v399_v23  ;;  %v507_v22 = vld [vmem:[%s2971_s15 + $0xa50] sm:$0xff] }
  0xc2   : > { %v511_v23 = vld [vmem:[%s2971_s15 + $0xa70] sm:$0xff] }
  0xc3   : > { %995 = vmatmul.mubr.f32.gmra.mrb[62].mxu1 %v394_v24  ;;  %v506_v24 = vld [vmem:[%s2971_s15 + $0xa48] sm:$0xff] }
  0xc4   : > { %1615 = vmatmul.mubr.f32.gmra.mrb[62].mxu0 %v398_v25  ;;  %999 = vmatprep.mubr.f32.mxu1 %v402_v26  ;;  %v510_v25 = vld [vmem:[%s2971_s15 + $0xa68] sm:$0xff] }
  0xc5   : > { %1619 = vmatprep.mubr.f32.mxu0 %v406_v27  ;;  %v514_v26 = vld [vmem:[%s2971_s15 + $0xa88] sm:$0xff] }
  0xc6   : > { %v518_v27 = vld [vmem:[%s2971_s15 + $0xaa8] sm:$0xff] }
  0xc7   : > { %1000 = vmatmul.mubr.f32.gmra.mrb[64].mxu1 %v401_v28  ;;  %v513_v28 = vld [vmem:[%s2971_s15 + $0xa80] sm:$0xff] }
  0xc8   : > { %1620 = vmatmul.mubr.f32.gmra.mrb[64].mxu0 %v405_v29  ;;  %1004 = vmatprep.mubr.f32.mxu1 %v409_v30  ;;  %v517_v29 = vld [vmem:[%s2971_s15 + $0xaa0] sm:$0xff]  ;;  %v180_v30 = vld [vmem:[%s2971_s15 + $0x18] sm:$0xff] }
  0xc9   : > { %1624 = vmatprep.mubr.f32.mxu0 %v413_v31  ;;  %v179_v31 = vld [vmem:[%s2971_s15 + $0x10] sm:$0xff] }
  0xcb   : > { %1005 = vmatmul.mubr.f32.gmra.mrb[66].mxu1 %v408_v32  ;;  %v2854_v32 = vmov 0.0  }
  0xcc   : > { %1625 = vmatmul.mubr.f32.gmra.mrb[66].mxu0 %v412_v3  ;;  %1009 = vmatprep.mubr.f32.mxu1 %v416_v33  ;;  %v183_v3 = vld [vmem:[%s2971_s15 + $0x30] sm:$0xff] }
  0xcd   : > { %1629 = vmatprep.mubr.f32.mxu0 %v420_v34  ;;  %v187_v33 = vld [vmem:[%s2971_s15 + $0x50] sm:$0xff]  ;;  %v186_v34 = vld [vmem:[%s2971_s15 + $0x48] sm:$0xff] }
  0xcf   : > { %1010 = vmatmul.mubr.f32.gmra.mrb[68].mxu1 %v415_v35  ;;  %v190_v35 = vld [vmem:[%s2971_s15 + $0x68] sm:$0xff] }
  0xd0   : > { %1630 = vmatmul.mubr.f32.gmra.mrb[68].mxu0 %v419_v36  ;;  %1014 = vmatprep.mubr.f32.mxu1 %v423_v37  ;;  %v194_v36 = vld [vmem:[%s2971_s15 + $0x88] sm:$0xff]  ;;  %v193_v37 = vld [vmem:[%s2971_s15 + $0x80] sm:$0xff] }
  0xd1   : > { %1634 = vmatprep.mubr.f32.mxu0 %v427_v38  ;;  %v197_v38 = vld [vmem:[%s2971_s15 + $0xa0] sm:$0xff] }
  0xd3   : > { %1015 = vmatmul.mubr.f32.gmra.mrb[70].mxu1 %v422_v39  ;;  %v201_v39 = vld [vmem:[%s2971_s15 + $0xc0] sm:$0xff] }
  0xd4   : > { %1635 = vmatmul.mubr.f32.gmra.mrb[70].mxu0 %v426_v40  ;;  %1019 = vmatprep.mubr.f32.mxu1 %v430_v41  ;;  %v200_v40 = vld [vmem:[%s2971_s15 + $0xb8] sm:$0xff] }
  0xd5   : > { %1639 = vmatprep.mubr.f32.mxu0 %v434_v42  ;;  %v204_v41 = vld [vmem:[%s2971_s15 + $0xd8] sm:$0xff] }
  0xd6   : > { %v208_v42 = vld [vmem:[%s2971_s15 + $0xf8] sm:$0xff] }
  0xd7   : > { %1020 = vmatmul.mubr.f32.gmra.mrb[72].mxu1 %v429_v43  ;;  %v207_v43 = vld [vmem:[%s2971_s15 + $0xf0] sm:$0xff] }
  0xd8   : > { %1640 = vmatmul.mubr.f32.gmra.mrb[72].mxu0 %v433_v44  ;;  %1024 = vmatprep.mubr.f32.mxu1 %v437_v45  ;;  %v211_v44 = vld [vmem:[%s2971_s15 + $0x110] sm:$0xff] }
  0xd9   : > { %1644 = vmatprep.mubr.f32.mxu0 %v441_v46  ;;  %v215_v45 = vld [vmem:[%s2971_s15 + $0x130] sm:$0xff]  ;;  %v214_v46 = vld [vmem:[%s2971_s15 + $0x128] sm:$0xff] }
  0xdb   : > { %1025 = vmatmul.mubr.f32.gmra.mrb[74].mxu1 %v436_v47  ;;  %v218_v47 = vld [vmem:[%s2971_s15 + $0x148] sm:$0xff] }
  0xdc   : > { %1645 = vmatmul.mubr.f32.gmra.mrb[74].mxu0 %v440_v48  ;;  %1029 = vmatprep.mubr.f32.mxu1 %v444_v49  ;;  %v222_v48 = vld [vmem:[%s2971_s15 + $0x168] sm:$0xff]  ;;  %v221_v49 = vld [vmem:[%s2971_s15 + $0x160] sm:$0xff] }
  0xdd   : > { %1649 = vmatprep.mubr.f32.mxu0 %v448_v50  ;;  %v225_v50 = vld [vmem:[%s2971_s15 + $0x180] sm:$0xff] }
  0xdf   : > { %1030 = vmatmul.mubr.f32.gmra.mrb[76].mxu1 %v443_v51  ;;  %v229_v51 = vld [vmem:[%s2971_s15 + $0x1a0] sm:$0xff] }
  0xe0   : > { %1650 = vmatmul.mubr.f32.gmra.mrb[76].mxu0 %v447_v52  ;;  %1034 = vmatprep.mubr.f32.mxu1 %v451_v53  ;;  %v228_v52 = vld [vmem:[%s2971_s15 + $0x198] sm:$0xff] }
  0xe1   : > { %1654 = vmatprep.mubr.f32.mxu0 %v455_v54  ;;  %v232_v53 = vld [vmem:[%s2971_s15 + $0x1b8] sm:$0xff] }
  0xe2   : > { %v236_v54 = vld [vmem:[%s2971_s15 + $0x1d8] sm:$0xff] }
  0xe3   : > { %1035 = vmatmul.mubr.f32.gmra.mrb[78].mxu1 %v450_v55  ;;  %v235_v55 = vld [vmem:[%s2971_s15 + $0x1d0] sm:$0xff] }
  0xe4   : > { %1655 = vmatmul.mubr.f32.gmra.mrb[78].mxu0 %v454_v56  ;;  %1039 = vmatprep.mubr.f32.mxu1 %v458_v57  ;;  %v239_v56 = vld [vmem:[%s2971_s15 + $0x1f0] sm:$0xff] }
  0xe5   : > { %1659 = vmatprep.mubr.f32.mxu0 %v462_v58  ;;  %v243_v57 = vld [vmem:[%s2971_s15 + $0x210] sm:$0xff]  ;;  %v242_v58 = vld [vmem:[%s2971_s15 + $0x208] sm:$0xff] }
  0xe7   : > { %1040 = vmatmul.mubr.f32.gmra.mrb[80].mxu1 %v457_v59  ;;  %v246_v59 = vld [vmem:[%s2971_s15 + $0x228] sm:$0xff] }
  0xe8   : > { %1660 = vmatmul.mubr.f32.gmra.mrb[80].mxu0 %v461_v60  ;;  %1044 = vmatprep.mubr.f32.mxu1 %v465_v61  ;;  %v250_v60 = vld [vmem:[%s2971_s15 + $0x248] sm:$0xff]  ;;  %v249_v61 = vld [vmem:[%s2971_s15 + $0x240] sm:$0xff] }
  0xe9   : > { %1664 = vmatprep.mubr.f32.mxu0 %v469_v62  ;;  %v253_v62 = vld [vmem:[%s2971_s15 + $0x260] sm:$0xff] }
  0xeb   : > { %1045 = vmatmul.mubr.f32.gmra.mrb[82].mxu1 %v464_v63  ;;  %v257_v63 = vld [vmem:[%s2971_s15 + $0x280] sm:$0xff] }
  0xec   : > { %1665 = vmatmul.mubr.f32.gmra.mrb[82].mxu0 %v468_v0  ;;  %1049 = vmatprep.mubr.f32.mxu1 %v472_v1  ;;  %v256_v0 = vld [vmem:[%s2971_s15 + $0x278] sm:$0xff] }
  0xed   : > { %1669 = vmatprep.mubr.f32.mxu0 %v476_v2  ;;  %v260_v1 = vld [vmem:[%s2971_s15 + $0x298] sm:$0xff] }
  0xee   : > { %v264_v2 = vld [vmem:[%s2971_s15 + $0x2b8] sm:$0xff] }
  0xef   : > { %1050 = vmatmul.mubr.f32.gmra.mrb[84].mxu1 %v471_v4  ;;  %v263_v4 = vld [vmem:[%s2971_s15 + $0x2b0] sm:$0xff] }
  0xf0   : > { %1670 = vmatmul.mubr.f32.gmra.mrb[84].mxu0 %v475_v5  ;;  %1054 = vmatprep.mubr.f32.mxu1 %v479_v6  ;;  %v267_v5 = vld [vmem:[%s2971_s15 + $0x2d0] sm:$0xff] }
  0xf1   : > { %1674 = vmatprep.mubr.f32.mxu0 %v483_v7  ;;  %v271_v6 = vld [vmem:[%s2971_s15 + $0x2f0] sm:$0xff]  ;;  %v270_v7 = vld [vmem:[%s2971_s15 + $0x2e8] sm:$0xff] }
  0xf3   : > { %1055 = vmatmul.mubr.f32.gmra.mrb[86].mxu1 %v478_v8  ;;  %v274_v8 = vld [vmem:[%s2971_s15 + $0x308] sm:$0xff] }
  0xf4   : > { %1675 = vmatmul.mubr.f32.gmra.mrb[86].mxu0 %v482_v9  ;;  %1059 = vmatprep.mubr.f32.mxu1 %v486_v10  ;;  %v278_v9 = vld [vmem:[%s2971_s15 + $0x328] sm:$0xff]  ;;  %v277_v10 = vld [vmem:[%s2971_s15 + $0x320] sm:$0xff] }
  0xf5   : > { %1679 = vmatprep.mubr.f32.mxu0 %v490_v11  ;;  %v281_v11 = vld [vmem:[%s2971_s15 + $0x340] sm:$0xff] }
  0xf7   : > { %1060 = vmatmul.mubr.f32.gmra.mrb[88].mxu1 %v485_v12  ;;  %v285_v12 = vld [vmem:[%s2971_s15 + $0x360] sm:$0xff] }
  0xf8   : > { %1680 = vmatmul.mubr.f32.gmra.mrb[88].mxu0 %v489_v13  ;;  %1064 = vmatprep.mubr.f32.mxu1 %v493_v14  ;;  %v284_v13 = vld [vmem:[%s2971_s15 + $0x358] sm:$0xff] }
  0xf9   : > { %1684 = vmatprep.mubr.f32.mxu0 %v497_v15  ;;  %v288_v14 = vld [vmem:[%s2971_s15 + $0x378] sm:$0xff] }
  0xfa   : > { %v292_v15 = vld [vmem:[%s2971_s15 + $0x398] sm:$0xff] }
  0xfb   : > { %1065 = vmatmul.mubr.f32.gmra.mrb[90].mxu1 %v492_v16  ;;  %v291_v16 = vld [vmem:[%s2971_s15 + $0x390] sm:$0xff] }
  0xfc   : > { %1685 = vmatmul.mubr.f32.gmra.mrb[90].mxu0 %v496_v17  ;;  %1069 = vmatprep.mubr.f32.mxu1 %v500_v18  ;;  %v295_v17 = vld [vmem:[%s2971_s15 + $0x3b0] sm:$0xff] }
  0xfd   : > { %1689 = vmatprep.mubr.f32.mxu0 %v504_v19  ;;  %v299_v18 = vld [vmem:[%s2971_s15 + $0x3d0] sm:$0xff]  ;;  %v298_v19 = vld [vmem:[%s2971_s15 + $0x3c8] sm:$0xff] }
  0xff   : > { %1070 = vmatmul.mubr.f32.gmra.mrb[92].mxu1 %v499_v20  ;;  %v302_v20 = vld [vmem:[%s2971_s15 + $0x3e8] sm:$0xff] }
 0x100   : > { %1690 = vmatmul.mubr.f32.gmra.mrb[92].mxu0 %v503_v21  ;;  %1074 = vmatprep.mubr.f32.mxu1 %v507_v22  ;;  %v306_v21 = vld [vmem:[%s2971_s15 + $0x408] sm:$0xff]  ;;  %v305_v22 = vld [vmem:[%s2971_s15 + $0x400] sm:$0xff] }
 0x101   : > { %1694 = vmatprep.mubr.f32.mxu0 %v511_v23  ;;  %v309_v23 = vld [vmem:[%s2971_s15 + $0x420] sm:$0xff] }
 0x103   : > { %1075 = vmatmul.mubr.f32.gmra.mrb[94].mxu1 %v506_v24  ;;  %v313_v24 = vld [vmem:[%s2971_s15 + $0x440] sm:$0xff] }
 0x104   : > { %1695 = vmatmul.mubr.f32.gmra.mrb[94].mxu0 %v510_v25  ;;  %1079 = vmatprep.mubr.f32.mxu1 %v514_v26  ;;  %v312_v25 = vld [vmem:[%s2971_s15 + $0x438] sm:$0xff] }
 0x105   : > { %1699 = vmatprep.mubr.f32.mxu0 %v518_v27  ;;  %v316_v26 = vld [vmem:[%s2971_s15 + $0x458] sm:$0xff] }
 0x106   : > { %v320_v27 = vld [vmem:[%s2971_s15 + $0x478] sm:$0xff] }
 0x107   : > { %1080 = vmatmul.mubr.f32.gmra.mrb[96].mxu1 %v513_v28  ;;  %v319_v28 = vld [vmem:[%s2971_s15 + $0x470] sm:$0xff] }
 0x108   : > { %1700 = vmatmul.mubr.f32.gmra.mrb[96].mxu0 %v517_v29  ;;  %1149 = vmatprep.mubr.f32.mxu1 %v180_v30  ;;  %v323_v29 = vld [vmem:[%s2971_s15 + $0x490] sm:$0xff] }
 0x109   : > { %2241 = vmatprep.mubr.msk.f32.mxu0 %vm2853_vm0, %v2854_v32  ;;  %v327_v30 = vld [vmem:[%s2971_s15 + $0x4b0] sm:$0xff] }
 0x10b   : > { %1150 = vmatmul.mubr.f32.vlgmr.msra.gmra.mrb[0].mxu1 %v179_v31  ;;  %v326_v31 = vld [vmem:[%s2971_s15 + $0x4a8] sm:$0xff] }
 0x10c   : > { %2242 = vmatmul.mubr.msk.f32.vlgmr.msra.gmra.mrb[0].mxu0 %vm627_vm1, %v183_v3  ;;  %1154 = vmatprep.mubr.f32.mxu1 %v187_v33  ;;  %v330_v3 = vld [vmem:[%s2971_s15 + $0x4c8] sm:$0xff] }
 0x10d   : > { %2244 = vmatprep.mubr.msk.f32.mxu0 %vm2853_vm0, %v2854_v32  ;;  %v334_v33 = vld [vmem:[%s2971_s15 + $0x4e8] sm:$0xff] }
 0x10f   : > { %1155 = vmatmul.mubr.f32.gmra.mrb[2].mxu1 %v186_v34  ;;  %v333_v34 = vld [vmem:[%s2971_s15 + $0x4e0] sm:$0xff] }
 0x110   : > { %2245 = vmatmul.mubr.msk.f32.gmra.mrb[2].mxu0 %vm627_vm1, %v190_v35  ;;  %1159 = vmatprep.mubr.f32.mxu1 %v194_v36  ;;  %v337_v35 = vld [vmem:[%s2971_s15 + $0x500] sm:$0xff] }
 0x111   : > { %2247 = vmatprep.mubr.msk.f32.mxu0 %vm2853_vm0, %v2854_v32  ;;  %v341_v36 = vld [vmem:[%s2971_s15 + $0x520] sm:$0xff] }
 0x113   : > { %1160 = vmatmul.mubr.f32.gmra.mrb[4].mxu1 %v193_v37  ;;  %v340_v37 = vld [vmem:[%s2971_s15 + $0x518] sm:$0xff] }
 0x114   : > { %2248 = vmatmul.mubr.msk.f32.gmra.mrb[4].mxu0 %vm627_vm1, %v197_v38  ;;  %1164 = vmatprep.mubr.f32.mxu1 %v201_v39  ;;  %v344_v38 = vld [vmem:[%s2971_s15 + $0x538] sm:$0xff] }
 0x115   : > { %2250 = vmatprep.mubr.msk.f32.mxu0 %vm2853_vm0, %v2854_v32  ;;  %v348_v39 = vld [vmem:[%s2971_s15 + $0x558] sm:$0xff] }
 0x117   : > { %1165 = vmatmul.mubr.f32.gmra.mrb[6].mxu1 %v200_v40  ;;  %v347_v40 = vld [vmem:[%s2971_s15 + $0x550] sm:$0xff] }
 0x118   : > { %2251 = vmatmul.mubr.msk.f32.gmra.mrb[6].mxu0 %vm627_vm1, %v204_v41  ;;  %1169 = vmatprep.mubr.f32.mxu1 %v208_v42  ;;  %v351_v41 = vld [vmem:[%s2971_s15 + $0x570] sm:$0xff] }
 0x119   : > { %2253 = vmatprep.mubr.msk.f32.mxu0 %vm2853_vm0, %v2854_v32  ;;  %v355_v42 = vld [vmem:[%s2971_s15 + $0x590] sm:$0xff] }
 0x11b   : > { %1170 = vmatmul.mubr.f32.gmra.mrb[8].mxu1 %v207_v43  ;;  %v354_v43 = vld [vmem:[%s2971_s15 + $0x588] sm:$0xff] }
 0x11c   : > { %2254 = vmatmul.mubr.msk.f32.gmra.mrb[8].mxu0 %vm627_vm1, %v211_v44  ;;  %1174 = vmatprep.mubr.f32.mxu1 %v215_v45  ;;  %v358_v44 = vld [vmem:[%s2971_s15 + $0x5a8] sm:$0xff] }
 0x11d   : > { %2256 = vmatprep.mubr.msk.f32.mxu0 %vm2853_vm0, %v2854_v32  ;;  %v362_v45 = vld [vmem:[%s2971_s15 + $0x5c8] sm:$0xff] }
 0x11f   : > { %1175 = vmatmul.mubr.f32.gmra.mrb[10].mxu1 %v214_v46  ;;  %v361_v46 = vld [vmem:[%s2971_s15 + $0x5c0] sm:$0xff] }
 0x120   : > { %2257 = vmatmul.mubr.msk.f32.gmra.mrb[10].mxu0 %vm627_vm1, %v218_v47  ;;  %1179 = vmatprep.mubr.f32.mxu1 %v222_v48  ;;  %v365_v47 = vld [vmem:[%s2971_s15 + $0x5e0] sm:$0xff] }
 0x121   : > { %2259 = vmatprep.mubr.msk.f32.mxu0 %vm2853_vm0, %v2854_v32  ;;  %v369_v48 = vld [vmem:[%s2971_s15 + $0x600] sm:$0xff] }
 0x123   : > { %1180 = vmatmul.mubr.f32.gmra.mrb[12].mxu1 %v221_v49  ;;  %v368_v49 = vld [vmem:[%s2971_s15 + $0x5f8] sm:$0xff] }
 0x124   : > { %2260 = vmatmul.mubr.msk.f32.gmra.mrb[12].mxu0 %vm627_vm1, %v225_v50  ;;  %1184 = vmatprep.mubr.f32.mxu1 %v229_v51  ;;  %v372_v50 = vld [vmem:[%s2971_s15 + $0x618] sm:$0xff] }
 0x125   : > { %2262 = vmatprep.mubr.msk.f32.mxu0 %vm2853_vm0, %v2854_v32  ;;  %v376_v51 = vld [vmem:[%s2971_s15 + $0x638] sm:$0xff] }
 0x127   : > { %1185 = vmatmul.mubr.f32.gmra.mrb[14].mxu1 %v228_v52  ;;  %v375_v52 = vld [vmem:[%s2971_s15 + $0x630] sm:$0xff] }
 0x128   : > { %2263 = vmatmul.mubr.msk.f32.gmra.mrb[14].mxu0 %vm627_vm1, %v232_v53  ;;  %1189 = vmatprep.mubr.f32.mxu1 %v236_v54  ;;  %v379_v53 = vld [vmem:[%s2971_s15 + $0x650] sm:$0xff] }
 0x129   : > { %2265 = vmatprep.mubr.msk.f32.mxu0 %vm2853_vm0, %v2854_v32  ;;  %v383_v54 = vld [vmem:[%s2971_s15 + $0x670] sm:$0xff] }
 0x12b   : > { %1190 = vmatmul.mubr.f32.gmra.mrb[16].mxu1 %v235_v55  ;;  %v382_v55 = vld [vmem:[%s2971_s15 + $0x668] sm:$0xff] }
 0x12c   : > { %2266 = vmatmul.mubr.msk.f32.gmra.mrb[16].mxu0 %vm627_vm1, %v239_v56  ;;  %1194 = vmatprep.mubr.f32.mxu1 %v243_v57  ;;  %v386_v56 = vld [vmem:[%s2971_s15 + $0x688] sm:$0xff] }
 0x12d   : > { %2268 = vmatprep.mubr.msk.f32.mxu0 %vm2853_vm0, %v2854_v32  ;;  %v390_v57 = vld [vmem:[%s2971_s15 + $0x6a8] sm:$0xff] }
 0x12f   : > { %1195 = vmatmul.mubr.f32.gmra.mrb[18].mxu1 %v242_v58  ;;  %v389_v58 = vld [vmem:[%s2971_s15 + $0x6a0] sm:$0xff] }
 0x130   : > { %2269 = vmatmul.mubr.msk.f32.gmra.mrb[18].mxu0 %vm627_vm1, %v246_v59  ;;  %1199 = vmatprep.mubr.f32.mxu1 %v250_v60  ;;  %v393_v59 = vld [vmem:[%s2971_s15 + $0x6c0] sm:$0xff] }
 0x131   : > { %2271 = vmatprep.mubr.msk.f32.mxu0 %vm2853_vm0, %v2854_v32  ;;  %v397_v60 = vld [vmem:[%s2971_s15 + $0x6e0] sm:$0xff] }
 0x133   : > { %1200 = vmatmul.mubr.f32.gmra.mrb[20].mxu1 %v249_v61  ;;  %v396_v61 = vld [vmem:[%s2971_s15 + $0x6d8] sm:$0xff] }
 0x134   : > { %2272 = vmatmul.mubr.msk.f32.gmra.mrb[20].mxu0 %vm627_vm1, %v253_v62  ;;  %1204 = vmatprep.mubr.f32.mxu1 %v257_v63  ;;  %v400_v62 = vld [vmem:[%s2971_s15 + $0x6f8] sm:$0xff] }
 0x135   : > { %2274 = vmatprep.mubr.msk.f32.mxu0 %vm2853_vm0, %v2854_v32  ;;  %v404_v63 = vld [vmem:[%s2971_s15 + $0x718] sm:$0xff] }
 0x137   : > { %1205 = vmatmul.mubr.f32.gmra.mrb[22].mxu1 %v256_v0  ;;  %v403_v0 = vld [vmem:[%s2971_s15 + $0x710] sm:$0xff] }
 0x138   : > { %2275 = vmatmul.mubr.msk.f32.gmra.mrb[22].mxu0 %vm627_vm1, %v260_v1  ;;  %1209 = vmatprep.mubr.f32.mxu1 %v264_v2  ;;  %v407_v1 = vld [vmem:[%s2971_s15 + $0x730] sm:$0xff] }
 0x139   : > { %2277 = vmatprep.mubr.msk.f32.mxu0 %vm2853_vm0, %v2854_v32  ;;  %v411_v2 = vld [vmem:[%s2971_s15 + $0x750] sm:$0xff] }
 0x13b   : > { %1210 = vmatmul.mubr.f32.gmra.mrb[24].mxu1 %v263_v4  ;;  %v410_v4 = vld [vmem:[%s2971_s15 + $0x748] sm:$0xff] }
 0x13c   : > { %2278 = vmatmul.mubr.msk.f32.gmra.mrb[24].mxu0 %vm627_vm1, %v267_v5  ;;  %1214 = vmatprep.mubr.f32.mxu1 %v271_v6  ;;  %v414_v5 = vld [vmem:[%s2971_s15 + $0x768] sm:$0xff] }
 0x13d   : > { %2280 = vmatprep.mubr.msk.f32.mxu0 %vm2853_vm0, %v2854_v32  ;;  %v418_v6 = vld [vmem:[%s2971_s15 + $0x788] sm:$0xff] }
 0x13f   : > { %1215 = vmatmul.mubr.f32.gmra.mrb[26].mxu1 %v270_v7  ;;  %v417_v7 = vld [vmem:[%s2971_s15 + $0x780] sm:$0xff] }
 0x140   : > { %2281 = vmatmul.mubr.msk.f32.gmra.mrb[26].mxu0 %vm627_vm1, %v274_v8  ;;  %1219 = vmatprep.mubr.f32.mxu1 %v278_v9  ;;  %v421_v8 = vld [vmem:[%s2971_s15 + $0x7a0] sm:$0xff] }
 0x141   : > { %2283 = vmatprep.mubr.msk.f32.mxu0 %vm2853_vm0, %v2854_v32  ;;  %v425_v9 = vld [vmem:[%s2971_s15 + $0x7c0] sm:$0xff] }
 0x143   : > { %1220 = vmatmul.mubr.f32.gmra.mrb[28].mxu1 %v277_v10  ;;  %v424_v10 = vld [vmem:[%s2971_s15 + $0x7b8] sm:$0xff] }
 0x144   : > { %2284 = vmatmul.mubr.msk.f32.gmra.mrb[28].mxu0 %vm627_vm1, %v281_v11  ;;  %1224 = vmatprep.mubr.f32.mxu1 %v285_v12  ;;  %v428_v11 = vld [vmem:[%s2971_s15 + $0x7d8] sm:$0xff] }
 0x145   : > { %2286 = vmatprep.mubr.msk.f32.mxu0 %vm2853_vm0, %v2854_v32  ;;  %v432_v12 = vld [vmem:[%s2971_s15 + $0x7f8] sm:$0xff] }
 0x147   : > { %1225 = vmatmul.mubr.f32.gmra.mrb[30].mxu1 %v284_v13  ;;  %v431_v13 = vld [vmem:[%s2971_s15 + $0x7f0] sm:$0xff] }
 0x148   : > { %2287 = vmatmul.mubr.msk.f32.gmra.mrb[30].mxu0 %vm627_vm1, %v288_v14  ;;  %1229 = vmatprep.mubr.f32.mxu1 %v292_v15  ;;  %v435_v14 = vld [vmem:[%s2971_s15 + $0x810] sm:$0xff] }
 0x149   : > { %2289 = vmatprep.mubr.msk.f32.mxu0 %vm2853_vm0, %v2854_v32  ;;  %v439_v15 = vld [vmem:[%s2971_s15 + $0x830] sm:$0xff] }
 0x14b   : > { %1230 = vmatmul.mubr.f32.gmra.mrb[32].mxu1 %v291_v16  ;;  %v438_v16 = vld [vmem:[%s2971_s15 + $0x828] sm:$0xff] }
 0x14c   : > { %2290 = vmatmul.mubr.msk.f32.gmra.mrb[32].mxu0 %vm627_vm1, %v295_v17  ;;  %1234 = vmatprep.mubr.f32.mxu1 %v299_v18  ;;  %v442_v17 = vld [vmem:[%s2971_s15 + $0x848] sm:$0xff] }
 0x14d   : > { %2292 = vmatprep.mubr.msk.f32.mxu0 %vm2853_vm0, %v2854_v32  ;;  %v446_v18 = vld [vmem:[%s2971_s15 + $0x868] sm:$0xff] }
 0x14f   : > { %1235 = vmatmul.mubr.f32.gmra.mrb[34].mxu1 %v298_v19  ;;  %v445_v19 = vld [vmem:[%s2971_s15 + $0x860] sm:$0xff] }
 0x150   : > { %2293 = vmatmul.mubr.msk.f32.gmra.mrb[34].mxu0 %vm627_vm1, %v302_v20  ;;  %1239 = vmatprep.mubr.f32.mxu1 %v306_v21  ;;  %v449_v20 = vld [vmem:[%s2971_s15 + $0x880] sm:$0xff] }
 0x151   : > { %2295 = vmatprep.mubr.msk.f32.mxu0 %vm2853_vm0, %v2854_v32  ;;  %v453_v21 = vld [vmem:[%s2971_s15 + $0x8a0] sm:$0xff] }
 0x153   : > { %1240 = vmatmul.mubr.f32.gmra.mrb[36].mxu1 %v305_v22  ;;  %v452_v22 = vld [vmem:[%s2971_s15 + $0x898] sm:$0xff] }
 0x154   : > { %2296 = vmatmul.mubr.msk.f32.gmra.mrb[36].mxu0 %vm627_vm1, %v309_v23  ;;  %1244 = vmatprep.mubr.f32.mxu1 %v313_v24  ;;  %v456_v23 = vld [vmem:[%s2971_s15 + $0x8b8] sm:$0xff] }
 0x155   : > { %2298 = vmatprep.mubr.msk.f32.mxu0 %vm2853_vm0, %v2854_v32  ;;  %v460_v24 = vld [vmem:[%s2971_s15 + $0x8d8] sm:$0xff] }
 0x157   : > { %1245 = vmatmul.mubr.f32.gmra.mrb[38].mxu1 %v312_v25  ;;  %v459_v25 = vld [vmem:[%s2971_s15 + $0x8d0] sm:$0xff] }
 0x158   : > { %2299 = vmatmul.mubr.msk.f32.gmra.mrb[38].mxu0 %vm627_vm1, %v316_v26  ;;  %1249 = vmatprep.mubr.f32.mxu1 %v320_v27  ;;  %v463_v26 = vld [vmem:[%s2971_s15 + $0x8f0] sm:$0xff] }
 0x159   : > { %2301 = vmatprep.mubr.msk.f32.mxu0 %vm2853_vm0, %v2854_v32  ;;  %v467_v27 = vld [vmem:[%s2971_s15 + $0x910] sm:$0xff] }
 0x15b   : > { %1250 = vmatmul.mubr.f32.gmra.mrb[40].mxu1 %v319_v28  ;;  %v466_v28 = vld [vmem:[%s2971_s15 + $0x908] sm:$0xff] }
 0x15c   : > { %2302 = vmatmul.mubr.msk.f32.gmra.mrb[40].mxu0 %vm627_vm1, %v323_v29  ;;  %1254 = vmatprep.mubr.f32.mxu1 %v327_v30  ;;  %v470_v29 = vld [vmem:[%s2971_s15 + $0x928] sm:$0xff] }
 0x15d   : > { %2304 = vmatprep.mubr.msk.f32.mxu0 %vm2853_vm0, %v2854_v32  ;;  %v474_v30 = vld [vmem:[%s2971_s15 + $0x948] sm:$0xff] }
 0x15f   : > { %1255 = vmatmul.mubr.f32.gmra.mrb[42].mxu1 %v326_v31  ;;  %v473_v31 = vld [vmem:[%s2971_s15 + $0x940] sm:$0xff] }
 0x160   : > { %2305 = vmatmul.mubr.msk.f32.gmra.mrb[42].mxu0 %vm627_vm1, %v330_v3  ;;  %1259 = vmatprep.mubr.f32.mxu1 %v334_v33  ;;  %v477_v3 = vld [vmem:[%s2971_s15 + $0x960] sm:$0xff] }
 0x161   : > { %2307 = vmatprep.mubr.msk.f32.mxu0 %vm2853_vm0, %v2854_v32  ;;  %v481_v33 = vld [vmem:[%s2971_s15 + $0x980] sm:$0xff] }
 0x163   : > { %1260 = vmatmul.mubr.f32.gmra.mrb[44].mxu1 %v333_v34  ;;  %v480_v34 = vld [vmem:[%s2971_s15 + $0x978] sm:$0xff] }
 0x164   : > { %2308 = vmatmul.mubr.msk.f32.gmra.mrb[44].mxu0 %vm627_vm1, %v337_v35  ;;  %1264 = vmatprep.mubr.f32.mxu1 %v341_v36  ;;  %v484_v35 = vld [vmem:[%s2971_s15 + $0x998] sm:$0xff] }
 0x165   : > { %2310 = vmatprep.mubr.msk.f32.mxu0 %vm2853_vm0, %v2854_v32  ;;  %v488_v36 = vld [vmem:[%s2971_s15 + $0x9b8] sm:$0xff] }
 0x167   : > { %1265 = vmatmul.mubr.f32.gmra.mrb[46].mxu1 %v340_v37  ;;  %v487_v37 = vld [vmem:[%s2971_s15 + $0x9b0] sm:$0xff] }
 0x168   : > { %2311 = vmatmul.mubr.msk.f32.gmra.mrb[46].mxu0 %vm627_vm1, %v344_v38  ;;  %1269 = vmatprep.mubr.f32.mxu1 %v348_v39  ;;  %v491_v38 = vld [vmem:[%s2971_s15 + $0x9d0] sm:$0xff] }
 0x169   : > { %2313 = vmatprep.mubr.msk.f32.mxu0 %vm2853_vm0, %v2854_v32  ;;  %v495_v39 = vld [vmem:[%s2971_s15 + $0x9f0] sm:$0xff] }
 0x16b   : > { %1270 = vmatmul.mubr.f32.gmra.mrb[48].mxu1 %v347_v40  ;;  %v494_v40 = vld [vmem:[%s2971_s15 + $0x9e8] sm:$0xff] }
 0x16c   : > { %2314 = vmatmul.mubr.msk.f32.gmra.mrb[48].mxu0 %vm627_vm1, %v351_v41  ;;  %1274 = vmatprep.mubr.f32.mxu1 %v355_v42  ;;  %v498_v41 = vld [vmem:[%s2971_s15 + $0xa08] sm:$0xff] }
 0x16d   : > { %2316 = vmatprep.mubr.msk.f32.mxu0 %vm2853_vm0, %v2854_v32  ;;  %v502_v42 = vld [vmem:[%s2971_s15 + $0xa28] sm:$0xff] }
 0x16f   : > { %1275 = vmatmul.mubr.f32.gmra.mrb[50].mxu1 %v354_v43  ;;  %v501_v43 = vld [vmem:[%s2971_s15 + $0xa20] sm:$0xff] }
 0x170   : > { %2317 = vmatmul.mubr.msk.f32.gmra.mrb[50].mxu0 %vm627_vm1, %v358_v44  ;;  %1279 = vmatprep.mubr.f32.mxu1 %v362_v45  ;;  %v505_v44 = vld [vmem:[%s2971_s15 + $0xa40] sm:$0xff] }
 0x171   : > { %2319 = vmatprep.mubr.msk.f32.mxu0 %vm2853_vm0, %v2854_v32  ;;  %v509_v45 = vld [vmem:[%s2971_s15 + $0xa60] sm:$0xff] }
 0x173   : > { %1280 = vmatmul.mubr.f32.gmra.mrb[52].mxu1 %v361_v46  ;;  %v508_v46 = vld [vmem:[%s2971_s15 + $0xa58] sm:$0xff] }
 0x174   : > { %2320 = vmatmul.mubr.msk.f32.gmra.mrb[52].mxu0 %vm627_vm1, %v365_v47  ;;  %1284 = vmatprep.mubr.f32.mxu1 %v369_v48  ;;  %v512_v47 = vld [vmem:[%s2971_s15 + $0xa78] sm:$0xff] }
 0x175   : > { %2322 = vmatprep.mubr.msk.f32.mxu0 %vm2853_vm0, %v2854_v32  ;;  %v516_v48 = vld [vmem:[%s2971_s15 + $0xa98] sm:$0xff] }
 0x177   : > { %1285 = vmatmul.mubr.f32.gmra.mrb[54].mxu1 %v368_v49  ;;  %v515_v49 = vld [vmem:[%s2971_s15 + $0xa90] sm:$0xff] }
 0x178   : > { %2323 = vmatmul.mubr.msk.f32.gmra.mrb[54].mxu0 %vm627_vm1, %v372_v50  ;;  %1289 = vmatprep.mubr.f32.mxu1 %v376_v51  ;;  %v519_v50 = vld [vmem:[%s2971_s15 + $0xab0] sm:$0xff]  ;;  %v3734_v51 = vld [vmem:[%s3894_s2] ss:$0 sm:$0xff] }
 0x179   : > { %2325 = vmatprep.mubr.msk.f32.mxu0 %vm2853_vm0, %v2854_v32 }
 0x17b   : > { %1290 = vmatmul.mubr.f32.gmra.mrb[56].mxu1 %v375_v52 }
 0x17c   : > { %2326 = vmatmul.mubr.msk.f32.gmra.mrb[56].mxu0 %vm627_vm1, %v379_v53  ;;  %1294 = vmatprep.mubr.f32.mxu1 %v383_v54 }
 0x17d   : > { %2328 = vmatprep.mubr.msk.f32.mxu0 %vm2853_vm0, %v2854_v32 }
 0x17f   : > { %1295 = vmatmul.mubr.f32.gmra.mrb[58].mxu1 %v382_v55 }
 0x180   : > { %2329 = vmatmul.mubr.msk.f32.gmra.mrb[58].mxu0 %vm627_vm1, %v386_v56  ;;  %1299 = vmatprep.mubr.f32.mxu1 %v390_v57 }
 0x181   : > { %2331 = vmatprep.mubr.msk.f32.mxu0 %vm2853_vm0, %v2854_v32 }
 0x183   : > { %1300 = vmatmul.mubr.f32.gmra.mrb[60].mxu1 %v389_v58 }
 0x184   : > { %2332 = vmatmul.mubr.msk.f32.gmra.mrb[60].mxu0 %vm627_vm1, %v393_v59  ;;  %1304 = vmatprep.mubr.f32.mxu1 %v397_v60 }
 0x185   : > { %2334 = vmatprep.mubr.msk.f32.mxu0 %vm2853_vm0, %v2854_v32 }
 0x187   : > { %1305 = vmatmul.mubr.f32.gmra.mrb[62].mxu1 %v396_v61 }
 0x188   : > { %2335 = vmatmul.mubr.msk.f32.gmra.mrb[62].mxu0 %vm627_vm1, %v400_v62  ;;  %1309 = vmatprep.mubr.f32.mxu1 %v404_v63 }
 0x189   : > { %2337 = vmatprep.mubr.msk.f32.mxu0 %vm2853_vm0, %v2854_v32 }
 0x18b   : > { %1310 = vmatmul.mubr.f32.gmra.mrb[64].mxu1 %v403_v0 }
 0x18c   : > { %2338 = vmatmul.mubr.msk.f32.gmra.mrb[64].mxu0 %vm627_vm1, %v407_v1  ;;  %1314 = vmatprep.mubr.f32.mxu1 %v411_v2 }
 0x18d   : > { %2340 = vmatprep.mubr.msk.f32.mxu0 %vm2853_vm0, %v2854_v32 }
 0x18f   : > { %1315 = vmatmul.mubr.f32.gmra.mrb[66].mxu1 %v410_v4 }
 0x190   : > { %2341 = vmatmul.mubr.msk.f32.gmra.mrb[66].mxu0 %vm627_vm1, %v414_v5  ;;  %1319 = vmatprep.mubr.f32.mxu1 %v418_v6 }
 0x191   : > { %2343 = vmatprep.mubr.msk.f32.mxu0 %vm2853_vm0, %v2854_v32 }
 0x193   : > { %1320 = vmatmul.mubr.f32.gmra.mrb[68].mxu1 %v417_v7 }
 0x194   : > { %2344 = vmatmul.mubr.msk.f32.gmra.mrb[68].mxu0 %vm627_vm1, %v421_v8  ;;  %1324 = vmatprep.mubr.f32.mxu1 %v425_v9 }
 0x195   : > { %2346 = vmatprep.mubr.msk.f32.mxu0 %vm2853_vm0, %v2854_v32 }
 0x197   : > { %1325 = vmatmul.mubr.f32.gmra.mrb[70].mxu1 %v424_v10 }
 0x198   : > { %2347 = vmatmul.mubr.msk.f32.gmra.mrb[70].mxu0 %vm627_vm1, %v428_v11  ;;  %1329 = vmatprep.mubr.f32.mxu1 %v432_v12 }
 0x199   : > { %2349 = vmatprep.mubr.msk.f32.mxu0 %vm2853_vm0, %v2854_v32 }
 0x19b   : > { %1330 = vmatmul.mubr.f32.gmra.mrb[72].mxu1 %v431_v13 }
 0x19c   : > { %2350 = vmatmul.mubr.msk.f32.gmra.mrb[72].mxu0 %vm627_vm1, %v435_v14  ;;  %1334 = vmatprep.mubr.f32.mxu1 %v439_v15 }
 0x19d   : > { %2352 = vmatprep.mubr.msk.f32.mxu0 %vm2853_vm0, %v2854_v32 }
 0x19f   : > { %1335 = vmatmul.mubr.f32.gmra.mrb[74].mxu1 %v438_v16 }
 0x1a0   : > { %2353 = vmatmul.mubr.msk.f32.gmra.mrb[74].mxu0 %vm627_vm1, %v442_v17  ;;  %1339 = vmatprep.mubr.f32.mxu1 %v446_v18 }
 0x1a1   : > { %2355 = vmatprep.mubr.msk.f32.mxu0 %vm2853_vm0, %v2854_v32 }
 0x1a3   : > { %1340 = vmatmul.mubr.f32.gmra.mrb[76].mxu1 %v445_v19 }
 0x1a4   : > { %2356 = vmatmul.mubr.msk.f32.gmra.mrb[76].mxu0 %vm627_vm1, %v449_v20  ;;  %1344 = vmatprep.mubr.f32.mxu1 %v453_v21 }
 0x1a5   : > { %2358 = vmatprep.mubr.msk.f32.mxu0 %vm2853_vm0, %v2854_v32 }
 0x1a7   : > { %1345 = vmatmul.mubr.f32.gmra.mrb[78].mxu1 %v452_v22 }
 0x1a8   : > { %2359 = vmatmul.mubr.msk.f32.gmra.mrb[78].mxu0 %vm627_vm1, %v456_v23  ;;  %1349 = vmatprep.mubr.f32.mxu1 %v460_v24 }
 0x1a9   : > { %2361 = vmatprep.mubr.msk.f32.mxu0 %vm2853_vm0, %v2854_v32 }
 0x1ab   : > { %1350 = vmatmul.mubr.f32.gmra.mrb[80].mxu1 %v459_v25 }
 0x1ac   : > { %2362 = vmatmul.mubr.msk.f32.gmra.mrb[80].mxu0 %vm627_vm1, %v463_v26  ;;  %1354 = vmatprep.mubr.f32.mxu1 %v467_v27 }
 0x1ad   : > { %2364 = vmatprep.mubr.msk.f32.mxu0 %vm2853_vm0, %v2854_v32 }
 0x1af   : > { %1355 = vmatmul.mubr.f32.gmra.mrb[82].mxu1 %v466_v28 }
 0x1b0   : > { %2365 = vmatmul.mubr.msk.f32.gmra.mrb[82].mxu0 %vm627_vm1, %v470_v29  ;;  %1359 = vmatprep.mubr.f32.mxu1 %v474_v30 }
 0x1b1   : > { %2367 = vmatprep.mubr.msk.f32.mxu0 %vm2853_vm0, %v2854_v32 }
 0x1b3   : > { %1360 = vmatmul.mubr.f32.gmra.mrb[84].mxu1 %v473_v31 }
 0x1b4   : > { %2368 = vmatmul.mubr.msk.f32.gmra.mrb[84].mxu0 %vm627_vm1, %v477_v3  ;;  %1364 = vmatprep.mubr.f32.mxu1 %v481_v33 }
 0x1b5   : > { %2370 = vmatprep.mubr.msk.f32.mxu0 %vm2853_vm0, %v2854_v32 }
 0x1b7   : > { %1365 = vmatmul.mubr.f32.gmra.mrb[86].mxu1 %v480_v34 }
 0x1b8   : > { %2371 = vmatmul.mubr.msk.f32.gmra.mrb[86].mxu0 %vm627_vm1, %v484_v35  ;;  %1369 = vmatprep.mubr.f32.mxu1 %v488_v36 }
 0x1b9   : > { %2373 = vmatprep.mubr.msk.f32.mxu0 %vm2853_vm0, %v2854_v32 }
 0x1bb   : > { %1370 = vmatmul.mubr.f32.gmra.mrb[88].mxu1 %v487_v37 }
 0x1bc   : > { %2374 = vmatmul.mubr.msk.f32.gmra.mrb[88].mxu0 %vm627_vm1, %v491_v38  ;;  %1374 = vmatprep.mubr.f32.mxu1 %v495_v39 }
 0x1bd   : > { %2376 = vmatprep.mubr.msk.f32.mxu0 %vm2853_vm0, %v2854_v32 }
 0x1bf   : > { %1375 = vmatmul.mubr.f32.gmra.mrb[90].mxu1 %v494_v40 }
 0x1c0   : > { %2377 = vmatmul.mubr.msk.f32.gmra.mrb[90].mxu0 %vm627_vm1, %v498_v41  ;;  %1379 = vmatprep.mubr.f32.mxu1 %v502_v42 }
 0x1c1   : > { %2379 = vmatprep.mubr.msk.f32.mxu0 %vm2853_vm0, %v2854_v32 }
 0x1c3   : > { %1380 = vmatmul.mubr.f32.gmra.mrb[92].mxu1 %v501_v43 }
 0x1c4   : > { %2380 = vmatmul.mubr.msk.f32.gmra.mrb[92].mxu0 %vm627_vm1, %v505_v44  ;;  %1384 = vmatprep.mubr.f32.mxu1 %v509_v45 }
 0x1c5   : > { %2382 = vmatprep.mubr.msk.f32.mxu0 %vm2853_vm0, %v2854_v32 }
 0x1c7   : > { %1385 = vmatmul.mubr.f32.gmra.mrb[94].mxu1 %v508_v46 }
 0x1c8   : > { %2383 = vmatmul.mubr.msk.f32.gmra.mrb[94].mxu0 %vm627_vm1, %v512_v47  ;;  %1389 = vmatprep.mubr.f32.mxu1 %v516_v48 }
 0x1c9   : > { %2385 = vmatprep.mubr.msk.f32.mxu0 %vm2853_vm0, %v2854_v32 }
 0x1cb   : > { %1390 = vmatmul.mubr.f32.gmra.mrb[96].mxu1 %v515_v49 }
 0x1cc   : > { %2386 = vmatmul.mubr.msk.f32.gmra.mrb[96].mxu0 %vm627_vm1, %v519_v50 }
 0x1de   : > { %v1151_v52 = vpop.f32.mrb[0].mxu1 }
 0x1df   : > { %v2538_v53 = vadd.f32 %v3734_v51, %v1151_v52  ;;  %v1771_v54 = vpop.f32.mrb[0].mxu0  ;;  %v1153_v55 = vpop.f32.mrb[1].mxu1 }
 0x1e0   : > { %v2243_v32 = vpop.f32.mrb[1].mxu0 }
 0x1e1   : > { %v2539_v56 = vadd.f32 %v2538_v53, %v1771_v54 }
 0x1e2   : > { %v1156_v57 = vpop.f32.mrb[2].mxu1 }
 0x1e3   : > { %2016 = vst.msk [vmem:[%s3741_s29] sm:$0xff] %vm2015_vm2, %v2539_v56  ;;  %v2540_v58 = vadd.f32 %v3734_v51, %v1156_v57  ;;  %v1776_v59 = vpop.f32.mrb[2].mxu0  ;;  %v1158_v60 = vpop.f32.mrb[3].mxu1 }
 0x1e4   : > { %v2246_v61 = vpop.f32.mrb[3].mxu0 }
 0x1e5   : > { %v2541_v62 = vadd.f32 %v2540_v58, %v1776_v59 }
 0x1e6   : > { %v1161_v63 = vpop.f32.mrb[4].mxu1 }
 0x1e7   : > { %2017 = vst.msk [vmem:[%s3741_s29 + $0x8] sm:$0xff] %vm2015_vm2, %v2541_v62  ;;  %v2542_v0 = vadd.f32 %v3734_v51, %v1161_v63  ;;  %v1781_v1 = vpop.f32.mrb[4].mxu0  ;;  %v1163_v2 = vpop.f32.mrb[5].mxu1 }
 0x1e8   : > { %v2249_v4 = vpop.f32.mrb[5].mxu0 }
 0x1e9   : > { %v2543_v5 = vadd.f32 %v2542_v0, %v1781_v1 }
 0x1ea   : > { %v1166_v6 = vpop.f32.mrb[6].mxu1 }
 0x1eb   : > { %2018 = vst.msk [vmem:[%s3741_s29 + $0x10] sm:$0xff] %vm2015_vm2, %v2543_v5  ;;  %v2544_v7 = vadd.f32 %v3734_v51, %v1166_v6  ;;  %v1786_v8 = vpop.f32.mrb[6].mxu0  ;;  %v1168_v9 = vpop.f32.mrb[7].mxu1 }
 0x1ec   : > { %v2252_v10 = vpop.f32.mrb[7].mxu0 }
 0x1ed   : > { %v2545_v11 = vadd.f32 %v2544_v7, %v1786_v8 }
 0x1ee   : > { %v1171_v12 = vpop.f32.mrb[8].mxu1 }
 0x1ef   : > { %2019 = vst.msk [vmem:[%s3741_s29 + $0x18] sm:$0xff] %vm2015_vm2, %v2545_v11  ;;  %v2546_v13 = vadd.f32 %v3734_v51, %v1171_v12  ;;  %v1791_v14 = vpop.f32.mrb[8].mxu0  ;;  %v1173_v15 = vpop.f32.mrb[9].mxu1 }
 0x1f0   : > { %v2255_v16 = vpop.f32.mrb[9].mxu0 }
 0x1f1   : > { %v2547_v17 = vadd.f32 %v2546_v13, %v1791_v14 }
 0x1f2   : > { %v1176_v18 = vpop.f32.mrb[10].mxu1 }
 0x1f3   : > { %2020 = vst.msk [vmem:[%s3741_s29 + $0x20] sm:$0xff] %vm2015_vm2, %v2547_v17  ;;  %v2548_v19 = vadd.f32 %v3734_v51, %v1176_v18  ;;  %v1796_v20 = vpop.f32.mrb[10].mxu0  ;;  %v1178_v21 = vpop.f32.mrb[11].mxu1 }
 0x1f4   : > { %v2258_v22 = vpop.f32.mrb[11].mxu0 }
 0x1f5   : > { %v2549_v23 = vadd.f32 %v2548_v19, %v1796_v20 }
 0x1f6   : > { %v1181_v24 = vpop.f32.mrb[12].mxu1 }
 0x1f7   : > { %2021 = vst.msk [vmem:[%s3741_s29 + $0x28] sm:$0xff] %vm2015_vm2, %v2549_v23  ;;  %v2550_v25 = vadd.f32 %v3734_v51, %v1181_v24  ;;  %v1801_v26 = vpop.f32.mrb[12].mxu0  ;;  %v1183_v27 = vpop.f32.mrb[13].mxu1 }
 0x1f8   : > { %v2261_v28 = vpop.f32.mrb[13].mxu0 }
 0x1f9   : > { %v2551_v29 = vadd.f32 %v2550_v25, %v1801_v26 }
 0x1fa   : > { %v1186_v30 = vpop.f32.mrb[14].mxu1 }
 0x1fb   : > { %2022 = vst.msk [vmem:[%s3741_s29 + $0x30] sm:$0xff] %vm2015_vm2, %v2551_v29  ;;  %v2552_v31 = vadd.f32 %v3734_v51, %v1186_v30  ;;  %v1806_v3 = vpop.f32.mrb[14].mxu0  ;;  %v1188_v33 = vpop.f32.mrb[15].mxu1 }
 0x1fc   : > { %v2264_v34 = vpop.f32.mrb[15].mxu0 }
 0x1fd   : > { %v2553_v35 = vadd.f32 %v2552_v31, %v1806_v3 }
 0x1fe   : > { %v1191_v36 = vpop.f32.mrb[16].mxu1 }
 0x1ff   : > { %2023 = vst.msk [vmem:[%s3741_s29 + $0x38] sm:$0xff] %vm2015_vm2, %v2553_v35  ;;  %v2554_v37 = vadd.f32 %v3734_v51, %v1191_v36  ;;  %v1811_v38 = vpop.f32.mrb[16].mxu0  ;;  %v1193_v39 = vpop.f32.mrb[17].mxu1 }
 0x200   : > { %v2267_v40 = vpop.f32.mrb[17].mxu0 }
 0x201   : > { %v2555_v41 = vadd.f32 %v2554_v37, %v1811_v38 }
 0x202   : > { %v1196_v42 = vpop.f32.mrb[18].mxu1 }
 0x203   : > { %2024 = vst.msk [vmem:[%s3741_s29 + $0x40] sm:$0xff] %vm2015_vm2, %v2555_v41  ;;  %v2556_v43 = vadd.f32 %v3734_v51, %v1196_v42  ;;  %v1816_v44 = vpop.f32.mrb[18].mxu0  ;;  %v1198_v45 = vpop.f32.mrb[19].mxu1 }
 0x204   : > { %v2270_v46 = vpop.f32.mrb[19].mxu0 }
 0x205   : > { %v2557_v47 = vadd.f32 %v2556_v43, %v1816_v44 }
 0x206   : > { %v1201_v48 = vpop.f32.mrb[20].mxu1 }
 0x207   : > { %2025 = vst.msk [vmem:[%s3741_s29 + $0x48] sm:$0xff] %vm2015_vm2, %v2557_v47  ;;  %v2558_v49 = vadd.f32 %v3734_v51, %v1201_v48  ;;  %v1821_v50 = vpop.f32.mrb[20].mxu0  ;;  %v1203_v52 = vpop.f32.mrb[21].mxu1 }
 0x208   : > { %v2273_v53 = vpop.f32.mrb[21].mxu0 }
 0x209   : > { %v2559_v54 = vadd.f32 %v2558_v49, %v1821_v50 }
 0x20a   : > { %v1206_v55 = vpop.f32.mrb[22].mxu1 }
 0x20b   : > { %2026 = vst.msk [vmem:[%s3741_s29 + $0x50] sm:$0xff] %vm2015_vm2, %v2559_v54  ;;  %v2560_v32 = vadd.f32 %v3734_v51, %v1206_v55  ;;  %v1826_v56 = vpop.f32.mrb[22].mxu0  ;;  %v1208_v57 = vpop.f32.mrb[23].mxu1 }
 0x20c   : > { %v2276_v58 = vpop.f32.mrb[23].mxu0 }
 0x20d   : > { %v2561_v59 = vadd.f32 %v2560_v32, %v1826_v56 }
 0x20e   : > { %v1211_v60 = vpop.f32.mrb[24].mxu1 }
 0x20f   : > { %2027 = vst.msk [vmem:[%s3741_s29 + $0x58] sm:$0xff] %vm2015_vm2, %v2561_v59  ;;  %v2562_v61 = vadd.f32 %v3734_v51, %v1211_v60  ;;  %v1831_v62 = vpop.f32.mrb[24].mxu0  ;;  %v1213_v63 = vpop.f32.mrb[25].mxu1 }
 0x210   : > { %v2279_v0 = vpop.f32.mrb[25].mxu0 }
 0x211   : > { %v2563_v1 = vadd.f32 %v2562_v61, %v1831_v62 }
 0x212   : > { %v1216_v2 = vpop.f32.mrb[26].mxu1 }
 0x213   : > { %2028 = vst.msk [vmem:[%s3741_s29 + $0x60] sm:$0xff] %vm2015_vm2, %v2563_v1  ;;  %v2564_v4 = vadd.f32 %v3734_v51, %v1216_v2  ;;  %v1836_v5 = vpop.f32.mrb[26].mxu0  ;;  %v1218_v6 = vpop.f32.mrb[27].mxu1 }
 0x214   : > { %v2282_v7 = vpop.f32.mrb[27].mxu0 }
 0x215   : > { %v2565_v8 = vadd.f32 %v2564_v4, %v1836_v5 }
 0x216   : > { %v1221_v9 = vpop.f32.mrb[28].mxu1 }
 0x217   : > { %2029 = vst.msk [vmem:[%s3741_s29 + $0x68] sm:$0xff] %vm2015_vm2, %v2565_v8  ;;  %v2566_v10 = vadd.f32 %v3734_v51, %v1221_v9  ;;  %v1841_v11 = vpop.f32.mrb[28].mxu0  ;;  %v1223_v12 = vpop.f32.mrb[29].mxu1 }
 0x218   : > { %v2285_v13 = vpop.f32.mrb[29].mxu0 }
 0x219   : > { %v2567_v14 = vadd.f32 %v2566_v10, %v1841_v11 }
 0x21a   : > { %v1226_v15 = vpop.f32.mrb[30].mxu1 }
 0x21b   : > { %2030 = vst.msk [vmem:[%s3741_s29 + $0x70] sm:$0xff] %vm2015_vm2, %v2567_v14  ;;  %v2568_v16 = vadd.f32 %v3734_v51, %v1226_v15  ;;  %v1846_v17 = vpop.f32.mrb[30].mxu0  ;;  %v1228_v18 = vpop.f32.mrb[31].mxu1 }
 0x21c   : > { %v2288_v19 = vpop.f32.mrb[31].mxu0 }
 0x21d   : > { %v2569_v20 = vadd.f32 %v2568_v16, %v1846_v17 }
 0x21e   : > { %v1231_v21 = vpop.f32.mrb[32].mxu1 }
 0x21f   : > { %2031 = vst.msk [vmem:[%s3741_s29 + $0x78] sm:$0xff] %vm2015_vm2, %v2569_v20  ;;  %v2570_v22 = vadd.f32 %v3734_v51, %v1231_v21  ;;  %v1851_v23 = vpop.f32.mrb[32].mxu0  ;;  %v1233_v24 = vpop.f32.mrb[33].mxu1 }
 0x220   : > { %v2291_v25 = vpop.f32.mrb[33].mxu0 }
 0x221   : > { %v2571_v26 = vadd.f32 %v2570_v22, %v1851_v23 }
 0x222   : > { %v1236_v27 = vpop.f32.mrb[34].mxu1 }
 0x223   : > { %2032 = vst.msk [vmem:[%s3741_s29 + $0x80] sm:$0xff] %vm2015_vm2, %v2571_v26  ;;  %v2572_v28 = vadd.f32 %v3734_v51, %v1236_v27  ;;  %v1856_v29 = vpop.f32.mrb[34].mxu0  ;;  %v1238_v30 = vpop.f32.mrb[35].mxu1 }
 0x224   : > { %v2294_v31 = vpop.f32.mrb[35].mxu0 }
 0x225   : > { %v2573_v3 = vadd.f32 %v2572_v28, %v1856_v29 }
 0x226   : > { %v1241_v33 = vpop.f32.mrb[36].mxu1 }
 0x227   : > { %2033 = vst.msk [vmem:[%s3741_s29 + $0x88] sm:$0xff] %vm2015_vm2, %v2573_v3  ;;  %v2574_v34 = vadd.f32 %v3734_v51, %v1241_v33  ;;  %v1861_v35 = vpop.f32.mrb[36].mxu0  ;;  %v1243_v36 = vpop.f32.mrb[37].mxu1 }
 0x228   : > { %v2297_v37 = vpop.f32.mrb[37].mxu0 }
 0x229   : > { %v2575_v38 = vadd.f32 %v2574_v34, %v1861_v35 }
 0x22a   : > { %v1246_v39 = vpop.f32.mrb[38].mxu1 }
 0x22b   : > { %2034 = vst.msk [vmem:[%s3741_s29 + $0x90] sm:$0xff] %vm2015_vm2, %v2575_v38  ;;  %v2576_v40 = vadd.f32 %v3734_v51, %v1246_v39  ;;  %v1866_v41 = vpop.f32.mrb[38].mxu0  ;;  %v1248_v42 = vpop.f32.mrb[39].mxu1 }
 0x22c   : > { %v2300_v43 = vpop.f32.mrb[39].mxu0 }
 0x22d   : > { %v2577_v44 = vadd.f32 %v2576_v40, %v1866_v41 }
 0x22e   : > { %v1251_v45 = vpop.f32.mrb[40].mxu1 }
 0x22f   : > { %2035 = vst.msk [vmem:[%s3741_s29 + $0x98] sm:$0xff] %vm2015_vm2, %v2577_v44  ;;  %v2578_v46 = vadd.f32 %v3734_v51, %v1251_v45  ;;  %v1871_v47 = vpop.f32.mrb[40].mxu0  ;;  %v1253_v48 = vpop.f32.mrb[41].mxu1 }
 0x230   : > { %v2303_v49 = vpop.f32.mrb[41].mxu0 }
 0x231   : > { %v2579_v50 = vadd.f32 %v2578_v46, %v1871_v47 }
 0x232   : > { %v1256_v52 = vpop.f32.mrb[42].mxu1 }
 0x233   : > { %2036 = vst.msk [vmem:[%s3741_s29 + $0xa0] sm:$0xff] %vm2015_vm2, %v2579_v50  ;;  %v2580_v53 = vadd.f32 %v3734_v51, %v1256_v52  ;;  %v1876_v54 = vpop.f32.mrb[42].mxu0  ;;  %v1258_v55 = vpop.f32.mrb[43].mxu1 }
 0x234   : > { %v2306_v32 = vpop.f32.mrb[43].mxu0 }
 0x235   : > { %v2581_v56 = vadd.f32 %v2580_v53, %v1876_v54 }
 0x236   : > { %v1261_v57 = vpop.f32.mrb[44].mxu1 }
 0x237   : > { %2037 = vst.msk [vmem:[%s3741_s29 + $0xa8] sm:$0xff] %vm2015_vm2, %v2581_v56  ;;  %v2582_v58 = vadd.f32 %v3734_v51, %v1261_v57  ;;  %v1881_v59 = vpop.f32.mrb[44].mxu0  ;;  %v1263_v60 = vpop.f32.mrb[45].mxu1 }
 0x238   : > { %v2309_v61 = vpop.f32.mrb[45].mxu0 }
 0x239   : > { %v2583_v62 = vadd.f32 %v2582_v58, %v1881_v59 }
 0x23a   : > { %v1266_v63 = vpop.f32.mrb[46].mxu1 }
 0x23b   : > { %2038 = vst.msk [vmem:[%s3741_s29 + $0xb0] sm:$0xff] %vm2015_vm2, %v2583_v62  ;;  %v2584_v0 = vadd.f32 %v3734_v51, %v1266_v63  ;;  %v1886_v1 = vpop.f32.mrb[46].mxu0  ;;  %v1268_v2 = vpop.f32.mrb[47].mxu1 }
 0x23c   : > { %v2312_v4 = vpop.f32.mrb[47].mxu0 }
 0x23d   : > { %v2585_v5 = vadd.f32 %v2584_v0, %v1886_v1 }
 0x23e   : > { %v1271_v6 = vpop.f32.mrb[48].mxu1 }
 0x23f   : > { %2039 = vst.msk [vmem:[%s3741_s29 + $0xb8] sm:$0xff] %vm2015_vm2, %v2585_v5  ;;  %v2586_v7 = vadd.f32 %v3734_v51, %v1271_v6  ;;  %v1891_v8 = vpop.f32.mrb[48].mxu0  ;;  %v1273_v9 = vpop.f32.mrb[49].mxu1 }
 0x240   : > { %v2315_v10 = vpop.f32.mrb[49].mxu0 }
 0x241   : > { %v2587_v11 = vadd.f32 %v2586_v7, %v1891_v8 }
 0x242   : > { %v1276_v12 = vpop.f32.mrb[50].mxu1 }
 0x243   : > { %2040 = vst.msk [vmem:[%s3741_s29 + $0xc0] sm:$0xff] %vm2015_vm2, %v2587_v11  ;;  %v2588_v13 = vadd.f32 %v3734_v51, %v1276_v12  ;;  %v1896_v14 = vpop.f32.mrb[50].mxu0  ;;  %v1278_v15 = vpop.f32.mrb[51].mxu1 }
 0x244   : > { %v2318_v16 = vpop.f32.mrb[51].mxu0 }
 0x245   : > { %v2589_v17 = vadd.f32 %v2588_v13, %v1896_v14 }
 0x246   : > { %v1281_v18 = vpop.f32.mrb[52].mxu1 }
 0x247   : > { %2041 = vst.msk [vmem:[%s3741_s29 + $0xc8] sm:$0xff] %vm2015_vm2, %v2589_v17  ;;  %v2590_v19 = vadd.f32 %v3734_v51, %v1281_v18  ;;  %v1901_v20 = vpop.f32.mrb[52].mxu0  ;;  %v1283_v21 = vpop.f32.mrb[53].mxu1 }
 0x248   : > { %v2321_v22 = vpop.f32.mrb[53].mxu0 }
 0x249   : > { %v2591_v23 = vadd.f32 %v2590_v19, %v1901_v20 }
 0x24a   : > { %v1286_v24 = vpop.f32.mrb[54].mxu1 }
 0x24b   : > { %2042 = vst.msk [vmem:[%s3741_s29 + $0xd0] sm:$0xff] %vm2015_vm2, %v2591_v23  ;;  %v2592_v25 = vadd.f32 %v3734_v51, %v1286_v24  ;;  %v1906_v26 = vpop.f32.mrb[54].mxu0  ;;  %v1288_v27 = vpop.f32.mrb[55].mxu1 }
 0x24c   : > { %v2324_v28 = vpop.f32.mrb[55].mxu0 }
 0x24d   : > { %v2593_v29 = vadd.f32 %v2592_v25, %v1906_v26 }
 0x24e   : > { %v1291_v30 = vpop.f32.mrb[56].mxu1 }
 0x24f   : > { %2043 = vst.msk [vmem:[%s3741_s29 + $0xd8] sm:$0xff] %vm2015_vm2, %v2593_v29  ;;  %v2594_v31 = vadd.f32 %v3734_v51, %v1291_v30  ;;  %v1911_v3 = vpop.f32.mrb[56].mxu0  ;;  %v1293_v33 = vpop.f32.mrb[57].mxu1 }
 0x250   : > { %v2327_v34 = vpop.f32.mrb[57].mxu0 }
 0x251   : > { %v2595_v35 = vadd.f32 %v2594_v31, %v1911_v3 }
 0x252   : > { %v1296_v36 = vpop.f32.mrb[58].mxu1 }
 0x253   : > { %2044 = vst.msk [vmem:[%s3741_s29 + $0xe0] sm:$0xff] %vm2015_vm2, %v2595_v35  ;;  %v2596_v37 = vadd.f32 %v3734_v51, %v1296_v36  ;;  %v1916_v38 = vpop.f32.mrb[58].mxu0  ;;  %v1298_v39 = vpop.f32.mrb[59].mxu1 }
 0x254   : > { %v2330_v40 = vpop.f32.mrb[59].mxu0 }
 0x255   : > { %v2597_v41 = vadd.f32 %v2596_v37, %v1916_v38 }
 0x256   : > { %v1301_v42 = vpop.f32.mrb[60].mxu1 }
 0x257   : > { %2045 = vst.msk [vmem:[%s3741_s29 + $0xe8] sm:$0xff] %vm2015_vm2, %v2597_v41  ;;  %v2598_v43 = vadd.f32 %v3734_v51, %v1301_v42  ;;  %v1921_v44 = vpop.f32.mrb[60].mxu0  ;;  %v1303_v45 = vpop.f32.mrb[61].mxu1 }
 0x258   : > { %v2333_v46 = vpop.f32.mrb[61].mxu0 }
 0x259   : > { %v2599_v47 = vadd.f32 %v2598_v43, %v1921_v44 }
 0x25a   : > { %v1306_v48 = vpop.f32.mrb[62].mxu1 }
 0x25b   : > { %2046 = vst.msk [vmem:[%s3741_s29 + $0xf0] sm:$0xff] %vm2015_vm2, %v2599_v47  ;;  %v2600_v49 = vadd.f32 %v3734_v51, %v1306_v48  ;;  %v1926_v50 = vpop.f32.mrb[62].mxu0  ;;  %v1308_v52 = vpop.f32.mrb[63].mxu1 }
 0x25c   : > { %v2336_v53 = vpop.f32.mrb[63].mxu0 }
 0x25d   : > { %v2601_v54 = vadd.f32 %v2600_v49, %v1926_v50 }
 0x25e   : > { %v1311_v55 = vpop.f32.mrb[64].mxu1 }
 0x25f   : > { %2047 = vst.msk [vmem:[%s3741_s29 + $0xf8] sm:$0xff] %vm2015_vm2, %v2601_v54  ;;  %v2602_v32 = vadd.f32 %v3734_v51, %v1311_v55  ;;  %v1931_v56 = vpop.f32.mrb[64].mxu0  ;;  %v1313_v57 = vpop.f32.mrb[65].mxu1 }
 0x260   : > { %v2339_v58 = vpop.f32.mrb[65].mxu0 }
 0x261   : > { %v2603_v59 = vadd.f32 %v2602_v32, %v1931_v56 }
 0x262   : > { %v1316_v60 = vpop.f32.mrb[66].mxu1 }
 0x263   : > { %2048 = vst.msk [vmem:[%s3741_s29 + $0x100] sm:$0xff] %vm2015_vm2, %v2603_v59  ;;  %v2604_v61 = vadd.f32 %v3734_v51, %v1316_v60  ;;  %v1936_v62 = vpop.f32.mrb[66].mxu0  ;;  %v1318_v63 = vpop.f32.mrb[67].mxu1 }
 0x264   : > { %v2342_v0 = vpop.f32.mrb[67].mxu0 }
 0x265   : > { %v2605_v1 = vadd.f32 %v2604_v61, %v1936_v62 }
 0x266   : > { %v1321_v2 = vpop.f32.mrb[68].mxu1 }
 0x267   : > { %2049 = vst.msk [vmem:[%s3741_s29 + $0x108] sm:$0xff] %vm2015_vm2, %v2605_v1  ;;  %v2606_v4 = vadd.f32 %v3734_v51, %v1321_v2  ;;  %v1941_v5 = vpop.f32.mrb[68].mxu0  ;;  %v1323_v6 = vpop.f32.mrb[69].mxu1 }
 0x268   : > { %v2345_v7 = vpop.f32.mrb[69].mxu0 }
 0x269   : > { %v2607_v8 = vadd.f32 %v2606_v4, %v1941_v5 }
 0x26a   : > { %v1326_v9 = vpop.f32.mrb[70].mxu1 }
 0x26b   : > { %2050 = vst.msk [vmem:[%s3741_s29 + $0x110] sm:$0xff] %vm2015_vm2, %v2607_v8  ;;  %v2608_v10 = vadd.f32 %v3734_v51, %v1326_v9  ;;  %v1946_v11 = vpop.f32.mrb[70].mxu0  ;;  %v1328_v12 = vpop.f32.mrb[71].mxu1 }
 0x26c   : > { %v2348_v13 = vpop.f32.mrb[71].mxu0 }
 0x26d   : > { %v2609_v14 = vadd.f32 %v2608_v10, %v1946_v11 }
 0x26e   : > { %v1331_v15 = vpop.f32.mrb[72].mxu1 }
 0x26f   : > { %2051 = vst.msk [vmem:[%s3741_s29 + $0x118] sm:$0xff] %vm2015_vm2, %v2609_v14  ;;  %v2610_v16 = vadd.f32 %v3734_v51, %v1331_v15  ;;  %v1951_v17 = vpop.f32.mrb[72].mxu0  ;;  %v1333_v18 = vpop.f32.mrb[73].mxu1 }
 0x270   : > { %v2351_v19 = vpop.f32.mrb[73].mxu0 }
 0x271   : > { %v2611_v20 = vadd.f32 %v2610_v16, %v1951_v17 }
 0x272   : > { %v1336_v21 = vpop.f32.mrb[74].mxu1 }
 0x273   : > { %2052 = vst.msk [vmem:[%s3741_s29 + $0x120] sm:$0xff] %vm2015_vm2, %v2611_v20  ;;  %v2612_v22 = vadd.f32 %v3734_v51, %v1336_v21  ;;  %v1956_v23 = vpop.f32.mrb[74].mxu0  ;;  %v1338_v24 = vpop.f32.mrb[75].mxu1 }
 0x274   : > { %v2354_v25 = vpop.f32.mrb[75].mxu0 }
 0x275   : > { %v2613_v26 = vadd.f32 %v2612_v22, %v1956_v23 }
 0x276   : > { %v1341_v27 = vpop.f32.mrb[76].mxu1 }
 0x277   : > { %2053 = vst.msk [vmem:[%s3741_s29 + $0x128] sm:$0xff] %vm2015_vm2, %v2613_v26  ;;  %v2614_v28 = vadd.f32 %v3734_v51, %v1341_v27  ;;  %v1961_v29 = vpop.f32.mrb[76].mxu0  ;;  %v1343_v30 = vpop.f32.mrb[77].mxu1 }
 0x278   : > { %v2357_v31 = vpop.f32.mrb[77].mxu0 }
 0x279   : > { %v2615_v3 = vadd.f32 %v2614_v28, %v1961_v29 }
 0x27a   : > { %v1346_v33 = vpop.f32.mrb[78].mxu1 }
 0x27b   : > { %2054 = vst.msk [vmem:[%s3741_s29 + $0x130] sm:$0xff] %vm2015_vm2, %v2615_v3  ;;  %v2616_v34 = vadd.f32 %v3734_v51, %v1346_v33  ;;  %v1966_v35 = vpop.f32.mrb[78].mxu0  ;;  %v1348_v36 = vpop.f32.mrb[79].mxu1 }
 0x27c   : > { %v2360_v37 = vpop.f32.mrb[79].mxu0 }
 0x27d   : > { %v2617_v38 = vadd.f32 %v2616_v34, %v1966_v35 }
 0x27e   : > { %v1351_v39 = vpop.f32.mrb[80].mxu1 }
 0x27f   : > { %2055 = vst.msk [vmem:[%s3741_s29 + $0x138] sm:$0xff] %vm2015_vm2, %v2617_v38  ;;  %v2618_v40 = vadd.f32 %v3734_v51, %v1351_v39  ;;  %v1971_v41 = vpop.f32.mrb[80].mxu0  ;;  %v1353_v42 = vpop.f32.mrb[81].mxu1 }
 0x280   : > { %v2363_v43 = vpop.f32.mrb[81].mxu0 }
 0x281   : > { %v2619_v44 = vadd.f32 %v2618_v40, %v1971_v41 }
 0x282   : > { %v1356_v45 = vpop.f32.mrb[82].mxu1 }
 0x283   : > { %2056 = vst.msk [vmem:[%s3741_s29 + $0x140] sm:$0xff] %vm2015_vm2, %v2619_v44  ;;  %v2620_v46 = vadd.f32 %v3734_v51, %v1356_v45  ;;  %v1976_v47 = vpop.f32.mrb[82].mxu0  ;;  %v1358_v48 = vpop.f32.mrb[83].mxu1 }
 0x284   : > { %v2366_v49 = vpop.f32.mrb[83].mxu0 }
 0x285   : > { %v2621_v50 = vadd.f32 %v2620_v46, %v1976_v47 }
 0x286   : > { %v1361_v52 = vpop.f32.mrb[84].mxu1 }
 0x287   : > { %2057 = vst.msk [vmem:[%s3741_s29 + $0x148] sm:$0xff] %vm2015_vm2, %v2621_v50  ;;  %v2622_v53 = vadd.f32 %v3734_v51, %v1361_v52  ;;  %v1981_v54 = vpop.f32.mrb[84].mxu0  ;;  %v1363_v55 = vpop.f32.mrb[85].mxu1 }
 0x288   : > { %v2369_v32 = vpop.f32.mrb[85].mxu0 }
 0x289   : > { %v2623_v56 = vadd.f32 %v2622_v53, %v1981_v54 }
 0x28a   : > { %v1366_v57 = vpop.f32.mrb[86].mxu1 }
 0x28b   : > { %2058 = vst.msk [vmem:[%s3741_s29 + $0x150] sm:$0xff] %vm2015_vm2, %v2623_v56  ;;  %v2624_v58 = vadd.f32 %v3734_v51, %v1366_v57  ;;  %v1986_v59 = vpop.f32.mrb[86].mxu0  ;;  %v1368_v60 = vpop.f32.mrb[87].mxu1 }
 0x28c   : > { %v2372_v61 = vpop.f32.mrb[87].mxu0 }
 0x28d   : > { %v2625_v62 = vadd.f32 %v2624_v58, %v1986_v59 }
 0x28e   : > { %v1371_v63 = vpop.f32.mrb[88].mxu1 }
 0x28f   : > { %2059 = vst.msk [vmem:[%s3741_s29 + $0x158] sm:$0xff] %vm2015_vm2, %v2625_v62  ;;  %v2626_v0 = vadd.f32 %v3734_v51, %v1371_v63  ;;  %v1991_v1 = vpop.f32.mrb[88].mxu0  ;;  %v1373_v2 = vpop.f32.mrb[89].mxu1 }
 0x290   : > { %v2375_v4 = vpop.f32.mrb[89].mxu0 }
 0x291   : > { %v2627_v5 = vadd.f32 %v2626_v0, %v1991_v1 }
 0x292   : > { %v1376_v6 = vpop.f32.mrb[90].mxu1 }
 0x293   : > { %2060 = vst.msk [vmem:[%s3741_s29 + $0x160] sm:$0xff] %vm2015_vm2, %v2627_v5  ;;  %v2628_v7 = vadd.f32 %v3734_v51, %v1376_v6  ;;  %v1996_v8 = vpop.f32.mrb[90].mxu0  ;;  %v1378_v9 = vpop.f32.mrb[91].mxu1 }
 0x294   : > { %v2378_v10 = vpop.f32.mrb[91].mxu0 }
 0x295   : > { %v2629_v11 = vadd.f32 %v2628_v7, %v1996_v8 }
 0x296   : > { %v1381_v12 = vpop.f32.mrb[92].mxu1 }
 0x297   : > { %2061 = vst.msk [vmem:[%s3741_s29 + $0x168] sm:$0xff] %vm2015_vm2, %v2629_v11  ;;  %v2630_v13 = vadd.f32 %v3734_v51, %v1381_v12  ;;  %v2001_v14 = vpop.f32.mrb[92].mxu0  ;;  %v1383_v15 = vpop.f32.mrb[93].mxu1 }
 0x298   : > { %v2381_v16 = vpop.f32.mrb[93].mxu0 }
 0x299   : > { %v2631_v17 = vadd.f32 %v2630_v13, %v2001_v14 }
 0x29a   : > { %v1386_v18 = vpop.f32.mrb[94].mxu1 }
 0x29b   : > { %2062 = vst.msk [vmem:[%s3741_s29 + $0x170] sm:$0xff] %vm2015_vm2, %v2631_v17  ;;  %v2632_v19 = vadd.f32 %v3734_v51, %v1386_v18  ;;  %v2006_v20 = vpop.f32.mrb[94].mxu0  ;;  %v1388_v21 = vpop.f32.mrb[95].mxu1 }
 0x29c   : > { %v2384_v22 = vpop.f32.mrb[95].mxu0 }
 0x29d   : > { %v2633_v23 = vadd.f32 %v2632_v19, %v2006_v20 }
 0x29e   : > { %v1391_v24 = vpop.f32.mrb[96].mxu1 }
 0x29f   : > { %2063 = vst.msk [vmem:[%s3741_s29 + $0x178] sm:$0xff] %vm2015_vm2, %v2633_v23  ;;  %v2634_v25 = vadd.f32 %v3734_v51, %v1391_v24  ;;  %v2011_v26 = vpop.f32.mrb[96].mxu0  ;;  %v1393_v27 = vpop.f32.mrb[97].mxu1 }
 0x2a0   : > { %v2387_v28 = vpop.f32.mrb[97].mxu0 }
 0x2a1   : > { %v2635_v29 = vadd.f32 %v2634_v25, %v2011_v26 }
 0x2a3   : > { %2064 = vst.msk [vmem:[%s3741_s29 + $0x180] sm:$0xff] %vm2015_vm2, %v2635_v29 }
 0x2a4 PF: > { %s13_s12 = sadd.s32 1, %s2850_s12  }
 0x2a5   : > { %p10_p4 = scmp.ge.s32.totalorder %s13_s12, 6  }
 0x2a7   :  { %12 = sbr.rel (!%p10_p4) target bundleno = 1 (0x1), region = 62 }

// kernel: squeeze.0
= control target key start
LH: loop header
LB: loop body
LE: loop exit
PB: predicated region body
PF: predicated region fallthrough
CT: control target
= control target key end

     0   :  { %s236_s6 = smov 3  ;;  %s239_s7 = smov 3  ;;  %vm241_vm0 = vcmask 850944   ;;  %vm280_vm1 = vcmask 916480   ;;  %vm261_vm2 = vcmask 883712   ;;  %vm298_vm3 = vcmask 949248   ;;  %s1052_s0 = inlined_call_operand.vmem [shape: f32[1568], index: 0, kind: input, shape index: {}]   ;;  %s1053_s1 = inlined_call_operand.hbm [shape: f32[2,1,28,28], index: 1, kind: output, shape index: {}]  }
   0x1   :  { %v769_v0 = vld [vmem:[%s1052_s0 + $0x4] ss:$7 sm:%s236_s6]   ;;  %v770_v1 = vld [vmem:[%s1052_s0 + $0x5] ss:$7 sm:%s239_s7]   ;;  %s275_s12 = smov 3  ;;  %s278_s15 = smov 3 }
   0x2   :  { %v242_v2 = vsel %vm241_vm0, %v770_v1, %v769_v0  ;;  %v276_v3 = vld [vmem:[%s1052_s0] ss:$7 sm:%s275_s12]   ;;  %v774_v4 = vld [vmem:[%s1052_s0 + $0x5] sm:$0x1]   ;;  %s836_s18 = smov 24   ;;  %s256_s21 = smov 3 }
   0x3   :  { %243 = vrot.lane.b32.xlu0 %v242_v2, %s836_s18  ;;  %v773_v5 = vld [vmem:[%s1052_s0 + $0x1] ss:$7 sm:%s278_s15]   ;;  %s259_s22 = smov 3  ;;  %v775_v6 = vld [vmem:[%s1052_s0 + $0x6] sm:$0x1]   ;;  %s837_s29 = smov 16  }
   0x4   :  { %v281_v7 = vsel %vm280_vm1, %v773_v5, %v276_v3  ;;  %v771_v8 = vld [vmem:[%s1052_s0 + $0x2] ss:$7 sm:%s256_s21]   ;;  %v772_v9 = vld [vmem:[%s1052_s0 + $0x3] ss:$7 sm:%s259_s22]   ;;  %s309_s30 = smov 3  ;;  %s312_s2 = smov 3  ;;  %v299_v11 = vsel %vm298_vm3, %v775_v6, %v774_v4 }
   0x5   :  { %282 = vrot.lane.b32.xlu1 %v281_v7, %s837_s29  ;;  %v262_v10 = vsel %vm261_vm2, %v772_v9, %v771_v8  ;;  %vm314_vm4 = vcmask 982016   ;;  %v776_v12 = vld [vmem:[%s1052_s0 + $0x3] ss:$7 sm:%s309_s30]   ;;  %s329_s7 = smov 3  ;;  %s838_s8 = smov 20   ;;  %vm334_vm5 = vcmask 1014784  }
   0x6   :  { %v777_v13 = vld [vmem:[%s1052_s0 + $0x4] ss:$7 sm:%s312_s2]   ;;  %s332_s11 = smov 3  ;;  %s839_s14 = smov 12   ;;  %v750_v21 = vld [vmem:[%s1052_s0 + $0x6] sm:$0x1]  }
   0x7   :  { %263 = vrot.lane.b32.xlu0 %v262_v10, %s838_s8  ;;  %v778_v14 = vld [vmem:[%s1052_s0 + $0x1] ss:$7 sm:%s329_s7]   ;;  %v315_v15 = vsel %vm314_vm4, %v777_v13, %v776_v12  ;;  %s10_s15 = smov 3  ;;  %s840_s16 = smov 8  }
   0x8   :  { %v779_v16 = vld [vmem:[%s1052_s0 + $0x2] ss:$7 sm:%s332_s11]   ;;  %s20_s17 = smov 3  ;;  %s841_s20 = smov 4  }
   0x9   :  { %300 = vrot.lane.b32.xlu1 %v299_v11, %s839_s14  ;;  %v335_v17 = vsel %vm334_vm5, %v779_v16, %v778_v14  ;;  %v747_v18 = vld [vmem:[%s1052_s0 + $0x5] ss:$7 sm:%s10_s15]   ;;  %s30_s21 = smov 3  ;;  %s842_s24 = smov 124  }
   0xa   :  { %v748_v19 = vld [vmem:[%s1052_s0 + $0x3] ss:$7 sm:%s20_s17]   ;;  %v749_v20 = vld [vmem:[%s1052_s0 + $0x1] ss:$7 sm:%s30_s21]   ;;  %s843_s27 = smov 120   ;;  %s47_s28 = smov 3 }
   0xb   :  { %316 = vrot.lane.b32.xlu0 %v315_v15, %s840_s16  ;;  %s844_s2 = smov 116   ;;  %s57_s3 = smov 3 }
   0xd   :  { %336 = vrot.lane.b32.xlu1 %v335_v17, %s841_s20 }
   0xf   :  { %12 = vrot.lane.b32.xlu0 %v747_v18, %s842_s24 }
  0x11   :  { %22 = vrot.lane.b32.xlu1 %v748_v19, %s843_s27 }
  0x13   :  { %32 = vrot.lane.b32.xlu0 %v749_v20, %s844_s2 }
  0x14   :  { %2 = vsyncpa [#allocation1], 0  ;;  %v751_v22 = vld [vmem:[%s1052_s0 + $0x4] ss:$7 sm:%s47_s28]   ;;  %s845_s6 = smov 112   ;;  %s66_s7 = smov 3 }
  0x15   :  { %41 = vrot.lane.b32.xlu1 %v750_v21, %s845_s6  ;;  %v752_v23 = vld [vmem:[%s1052_s0 + $0x2] ss:$7 sm:%s57_s3]   ;;  %s846_s10 = smov 108   ;;  %s847_s13 = smov 104   ;;  %v756_v28 = vld [vmem:[%s1052_s0 + $0x6] sm:$0x1]  }
  0x16   :  { %v67_v24 = vld [vmem:[%s1052_s0] ss:$7 sm:%s66_s7]   ;;  %s83_s14 = smov 3  ;;  %v753_v25 = vld [vmem:[%s1052_s0 + $0x5] sm:$0x1]   ;;  %s848_s17 = smov 100  }
  0x17   :  { %49 = vrot.lane.b32.xlu0 %v751_v22, %s846_s10  ;;  %s93_s18 = smov 3  ;;  %v754_v26 = vld [vmem:[%s1052_s0 + $0x3] ss:$7 sm:%s83_s14]   ;;  %s849_s21 = smov 96   ;;  %v759_v32 = vld [vmem:[%s1052_s0 + $0x5] sm:$0x1]  }
  0x18   :  { %v755_v27 = vld [vmem:[%s1052_s0 + $0x1] ss:$7 sm:%s93_s18]   ;;  %s850_s24 = smov 92   ;;  %s110_s25 = smov 3  ;;  %v762_v35 = vld [vmem:[%s1052_s0 + $0x6] sm:$0x1]  }
  0x19   :  { %59 = vrot.lane.b32.xlu1 %v752_v23, %s847_s13  ;;  %s851_s28 = smov 88   ;;  %s120_s29 = smov 3  ;;  %v757_v29 = vld [vmem:[%s1052_s0 + $0x4] ss:$7 sm:%s110_s25]   ;;  %vm5_vm6 = vcmask 228352   ;;  %vm245_vm7 = vcmask 195584  }
  0x1a   :  { %s852_s3 = smov 84   ;;  %s129_s4 = smov 3  ;;  %v758_v30 = vld [vmem:[%s1052_s0 + $0x2] ss:$7 sm:%s120_s29]   ;;  %v768_v45 = vld [vmem:[%s1052_s0 + $0x6] sm:$0x1]  }
  0x1b   :  { %68 = vrot.lane.b32.xlu0 %v67_v24, %s848_s17  ;;  %s853_s7 = smov 80   ;;  %v130_v31 = vld [vmem:[%s1052_s0] ss:$7 sm:%s129_s4]   ;;  %s854_s10 = smov 76   ;;  %v765_v40 = vld [vmem:[%s1052_s0 + $0x5] sm:$0x1]  }
  0x1c   :  { %s146_s11 = smov 3  ;;  %s855_s14 = smov 72   ;;  %vm250_vm8 = vcmask 228544   ;;  %vm284_vm9 = vcmask 130048   ;;  %vm289_vm10 = vcmask 228480   ;;  %vm265_vm11 = vcmask 162816  }
  0x1d   :  { %77 = vrot.lane.b32.xlu1 %v753_v25, %s849_s21  ;;  %s156_s15 = smov 3  ;;  %v760_v33 = vld [vmem:[%s1052_s0 + $0x3] ss:$7 sm:%s146_s11]   ;;  %s856_s18 = smov 68   ;;  %vm270_vm12 = vcmask 228512   ;;  %vm302_vm13 = vcmask 97280  }
  0x1e   :  { %v761_v34 = vld [vmem:[%s1052_s0 + $0x1] ss:$7 sm:%s156_s15]   ;;  %s857_s21 = smov 64   ;;  %s173_s22 = smov 3  ;;  %vm305_vm14 = vcmask 228448   ;;  %vm318_vm15 = vcmask 64512  }
  0x1f   :  { %85 = vrot.lane.b32.xlu0 %v754_v26, %s850_s24  ;;  %s858_s25 = smov 60   ;;  %s183_s26 = smov 3  ;;  %v763_v36 = vld [vmem:[%s1052_s0 + $0x4] ss:$7 sm:%s173_s22]   ;;  %vm323_vm0 = vcmask 228416   ;;  %vm338_vm1 = vcmask 31744  }
  0x20   :  { %s3_s29 = smov 3  ;;  %s859_s30 = smov 56   ;;  %v764_v38 = vld [vmem:[%s1052_s0 + $0x2] ss:$7 sm:%s183_s26]   ;;  %vm343_vm2 = vcmask 228384  }
  0x21   :  { %95 = vrot.lane.b32.xlu1 %v755_v27, %s851_s28  ;;  %s192_s2 = smov 3  ;;  %v4_v37 = vld [vmem:[%s1052_s0] ss:$7 sm:%s3_s29]   ;;  %s209_s11 = smov 3 }
  0x22   :  { %6 = vst.msk [vmem:[#allocation2] sm:$0x1] %vm5_vm6, %v4_v37   ;;  %8 = vst.msk [vmem:[#allocation2 + $0xff] sm:$0x2] %vm5_vm6, %v4_v37   ;;  %v193_v39 = vld [vmem:[%s1052_s0] ss:$7 sm:%s192_s2]  }
  0x23   :  { %104 = vrot.lane.b32.xlu0 %v756_v28, %s852_s3  ;;  %s219_s15 = smov 3  ;;  %v766_v41 = vld [vmem:[%s1052_s0 + $0x3] ss:$7 sm:%s209_s11]   ;;  %s866_s24 = smov 28  }
  0x24   :  { %v767_v44 = vld [vmem:[%s1052_s0 + $0x1] ss:$7 sm:%s219_s15]   ;;  %s865_s0 = smov 32  }
  0x25   :  { %112 = vrot.lane.b32.xlu1 %v757_v29, %s853_s7  ;;  %s860_s7 = smov 52  }
  0x27   :  { %122 = vrot.lane.b32.xlu0 %v758_v30, %s854_s10  ;;  %s861_s10 = smov 48  }
  0x29   :  { %131 = vrot.lane.b32.xlu1 %v130_v31, %s855_s14  ;;  %s862_s14 = smov 44   ;;  %v351_v42 = vld [vmem:[#allocation2] sm:$0x1] }
  0x2a   :  { %v540_v43 = vld [vmem:[#allocation2 + $0x100] sm:$0x1]  ;;  %353 = vst [vmem:[#allocation0] sm:$0x1] %v351_v42 }
  0x2b   :  { %140 = vrot.lane.b32.xlu0 %v759_v32, %s856_s18  ;;  %s863_s18 = smov 40   ;;  %544 = vst [vmem:[#allocation0 + $0x20] sm:$0x1] %v540_v43 }
  0x2d   :  { %148 = vrot.lane.b32.xlu1 %v760_v33, %s857_s21  ;;  %s864_s21 = smov 36  }
  0x2f   :  { %158 = vrot.lane.b32.xlu0 %v761_v34, %s858_s25  ;;  %s867_s25 = smov [#allocation0]  }
  0x30   :  { %s687_s26 = sshll.u32 %s867_s25, 4  ;;  %s688_s26 = int_to_ptr.vmem [resolvable:$true] %s687_s26 }
  0x31   :  { %167 = vrot.lane.b32.xlu1 %v762_v35, %s859_s30  ;;  %s812_s27 = scalar_lea.vmem %s688_s26, 896  ;;  %p817_p1 = scmp.lt.s32.totalorder %s688_s26, %s688_s26 }
  0x32   :  { %p813_p0 = scmp.ne.s32.totalorder %s688_s26, %s812_s27  ;;  %p818_p2 = scmp.lt.s32.totalorder %s812_s27, %s812_s27 }
  0x33   :  { %175 = vrot.lane.b32.xlu0 %v763_v36, %s860_s7 }
  0x34   :  { %p819_p3 = por %p818_p2, %p817_p1 }
  0x35   :  { %185 = vrot.lane.b32.xlu1 %v764_v38, %s861_s10 }
  0x36   :  { %p820_p4 = pnand %p819_p3, %p813_p0 }
  0x37   :  { %194 = vrot.lane.b32.xlu0 %v193_v39, %s862_s14 }
  0x39   :  { %203 = vrot.lane.b32.xlu1 %v765_v40, %s863_s18 }
  0x3b   :  { %211 = vrot.lane.b32.xlu0 %v766_v41, %s864_s21 }
  0x3d   :  { %221 = vrot.lane.b32.xlu1 %v767_v44, %s865_s0 }
  0x3f   :  { %230 = vrot.lane.b32.xlu0 %v768_v45, %s866_s24 }
  0x75   :  { %v244_v46 = vpop.permute.xlu0 %243  }
  0x76   :  { %247 = vst.msk [vmem:[#allocation2 + $0xb0] sm:$0x1] %vm245_vm7, %v244_v46   ;;  %249 = vst.msk [vmem:[#allocation2 + $0x1af] sm:$0x2] %vm245_vm7, %v244_v46  }
  0x77   :  { %252 = vst.msk [vmem:[#allocation2 + $0xb0] sm:$0x1] %vm250_vm8, %v244_v46   ;;  %254 = vst.msk [vmem:[#allocation2 + $0x1af] sm:$0x2] %vm250_vm8, %v244_v46   ;;  %v283_v47 = vpop.permute.xlu1 %282  }
  0x78   :  { %286 = vst.msk [vmem:[#allocation2 + $0x20] sm:$0x1] %vm284_vm9, %v283_v47   ;;  %288 = vst.msk [vmem:[#allocation2 + $0x11f] sm:$0x2] %vm284_vm9, %v283_v47  }
  0x79   :  { %291 = vst.msk [vmem:[#allocation2 + $0x20] sm:$0x1] %vm289_vm10, %v283_v47   ;;  %293 = vst.msk [vmem:[#allocation2 + $0x11f] sm:$0x2] %vm289_vm10, %v283_v47   ;;  %v264_v48 = vpop.permute.xlu0 %263  }
  0x7a   :  { %267 = vst.msk [vmem:[#allocation2 + $0x68] sm:$0x1] %vm265_vm11, %v264_v48   ;;  %269 = vst.msk [vmem:[#allocation2 + $0x167] sm:$0x2] %vm265_vm11, %v264_v48  }
  0x7b   :  { %272 = vst.msk [vmem:[#allocation2 + $0x68] sm:$0x1] %vm270_vm12, %v264_v48   ;;  %274 = vst.msk [vmem:[#allocation2 + $0x167] sm:$0x2] %vm270_vm12, %v264_v48   ;;  %v301_v49 = vpop.permute.xlu1 %300  }
  0x7c   :  { %304 = vst.msk [vmem:[#allocation2 + $0xd8] sm:$0x1] %vm302_vm13, %v301_v49  }
  0x7d   :  { %307 = vst.msk [vmem:[#allocation2 + $0xd8] sm:$0x1] %vm305_vm14, %v301_v49   ;;  %v317_v50 = vpop.permute.xlu0 %316  }
  0x7e   :  { %v480_v51 = vld [vmem:[#allocation2 + $0xb0] sm:$0x1]  ;;  %320 = vst.msk [vmem:[#allocation2 + $0x90] sm:$0x1] %vm318_vm15, %v317_v50   ;;  %322 = vst.msk [vmem:[#allocation2 + $0x18f] sm:$0x2] %vm318_vm15, %v317_v50  }
  0x7f   :  { %v672_v52 = vld [vmem:[#allocation2 + $0x1b0] sm:$0x1]  ;;  %484 = vst [vmem:[#allocation0 + $0x16] sm:$0x1] %v480_v51  ;;  %325 = vst.msk [vmem:[#allocation2 + $0x90] sm:$0x1] %vm323_vm0, %v317_v50   ;;  %v337_v53 = vpop.permute.xlu1 %336  }
  0x80   :  { %676 = vst [vmem:[#allocation0 + $0x36] sm:$0x1] %v672_v52  ;;  %327 = vst.msk [vmem:[#allocation2 + $0x18f] sm:$0x2] %vm323_vm0, %v317_v50   ;;  %v372_v54 = vld [vmem:[#allocation2 + $0x20] sm:$0x1] }
  0x81   :  { %v564_v55 = vld [vmem:[#allocation2 + $0x120] sm:$0x1]  ;;  %340 = vst.msk [vmem:[#allocation2 + $0x48] sm:$0x1] %vm338_vm1, %v337_v53   ;;  %342 = vst.msk [vmem:[#allocation2 + $0x147] sm:$0x2] %vm338_vm1, %v337_v53   ;;  %v13_v56 = vpop.permute.xlu0 %12  }
  0x82   :  { %376 = vst [vmem:[#allocation0 + $0x4] sm:$0x1] %v372_v54  ;;  %568 = vst [vmem:[#allocation0 + $0x24] sm:$0x1] %v564_v55  ;;  %v426_v57 = vld [vmem:[#allocation2 + $0x68] sm:$0x1] }
  0x83   :  { %345 = vst.msk [vmem:[#allocation2 + $0x48] sm:$0x1] %vm343_vm2, %v337_v53   ;;  %347 = vst.msk [vmem:[#allocation2 + $0x147] sm:$0x2] %vm343_vm2, %v337_v53   ;;  %v618_v58 = vld [vmem:[#allocation2 + $0x168] sm:$0x1]  ;;  %v23_v59 = vpop.permute.xlu1 %22  }
  0x84   :  { %16 = vst.msk [vmem:[#allocation2 + $0xb8] sm:$0x1] %vm5_vm6, %v13_v56   ;;  %18 = vst.msk [vmem:[#allocation2 + $0x1b7] sm:$0x2] %vm5_vm6, %v13_v56   ;;  %v510_v60 = vld [vmem:[#allocation2 + $0xd8] sm:$0x1] }
  0x85   :  { %430 = vst [vmem:[#allocation0 + $0xd] sm:$0x1] %v426_v57  ;;  %622 = vst [vmem:[#allocation0 + $0x2d] sm:$0x1] %v618_v58  ;;  %v33_v61 = vpop.permute.xlu0 %32  }
  0x86   :  { %26 = vst.msk [vmem:[#allocation2 + $0x70] sm:$0x1] %vm5_vm6, %v23_v59   ;;  %28 = vst.msk [vmem:[#allocation2 + $0x16f] sm:$0x2] %vm5_vm6, %v23_v59   ;;  %v456_v62 = vld [vmem:[#allocation2 + $0x90] sm:$0x1] }
  0x87   :  { %514 = vst [vmem:[#allocation0 + $0x1b] sm:$0x1] %v510_v60  ;;  %v648_v63 = vld [vmem:[#allocation2 + $0x190] sm:$0x1]  ;;  %36 = vst.msk [vmem:[#allocation2 + $0x28] sm:$0x1] %vm5_vm6, %v33_v61   ;;  %v42_v0 = vpop.permute.xlu1 %41  }
  0x88   :  { %38 = vst.msk [vmem:[#allocation2 + $0x127] sm:$0x2] %vm5_vm6, %v33_v61   ;;  %460 = vst [vmem:[#allocation0 + $0x12] sm:$0x1] %v456_v62 }
  0x89   :  { %652 = vst [vmem:[#allocation0 + $0x32] sm:$0x1] %v648_v63  ;;  %45 = vst.msk [vmem:[#allocation2 + $0xe0] sm:$0x1] %vm5_vm6, %v42_v0   ;;  %v50_v5 = vpop.permute.xlu0 %49  }
  0x8a   :  { %v402_v1 = vld [vmem:[#allocation2 + $0x48] sm:$0x1]  ;;  %53 = vst.msk [vmem:[#allocation2 + $0x98] sm:$0x1] %vm5_vm6, %v50_v5   ;;  %55 = vst.msk [vmem:[#allocation2 + $0x197] sm:$0x2] %vm5_vm6, %v50_v5  }
  0x8b   :  { %v594_v2 = vld [vmem:[#allocation2 + $0x148] sm:$0x1]  ;;  %406 = vst [vmem:[#allocation0 + $0x9] sm:$0x1] %v402_v1  ;;  %v486_v3 = vld [vmem:[#allocation2 + $0xb8] sm:$0x1]  ;;  %v60_v8 = vpop.permute.xlu1 %59  }
  0x8c   :  { %598 = vst [vmem:[#allocation0 + $0x29] sm:$0x1] %v594_v2  ;;  %v678_v4 = vld [vmem:[#allocation2 + $0x1b8] sm:$0x1]  ;;  %490 = vst [vmem:[#allocation0 + $0x17] sm:$0x1] %v486_v3 }
  0x8d   :  { %682 = vst [vmem:[#allocation0 + $0x37] sm:$0x1] %v678_v4  ;;  %v432_v6 = vld [vmem:[#allocation2 + $0x70] sm:$0x1]  ;;  %63 = vst.msk [vmem:[#allocation2 + $0x50] sm:$0x1] %vm5_vm6, %v60_v8   ;;  %v69_v11 = vpop.permute.xlu0 %68  }
  0x8e   :  { %v624_v7 = vld [vmem:[#allocation2 + $0x170] sm:$0x1]  ;;  %436 = vst [vmem:[#allocation0 + $0xe] sm:$0x1] %v432_v6  ;;  %65 = vst.msk [vmem:[#allocation2 + $0x14f] sm:$0x2] %vm5_vm6, %v60_v8  }
  0x8f   :  { %628 = vst [vmem:[#allocation0 + $0x2e] sm:$0x1] %v624_v7  ;;  %v378_v9 = vld [vmem:[#allocation2 + $0x28] sm:$0x1]  ;;  %72 = vst.msk [vmem:[#allocation2 + $0x8] sm:$0x1] %vm5_vm6, %v69_v11   ;;  %v78_v13 = vpop.permute.xlu1 %77  }
  0x90   :  { %v570_v10 = vld [vmem:[#allocation2 + $0x128] sm:$0x1]  ;;  %382 = vst [vmem:[#allocation0 + $0x5] sm:$0x1] %v378_v9  ;;  %74 = vst.msk [vmem:[#allocation2 + $0x107] sm:$0x2] %vm5_vm6, %v69_v11  }
  0x91   :  { %574 = vst [vmem:[#allocation0 + $0x25] sm:$0x1] %v570_v10  ;;  %v516_v12 = vld [vmem:[#allocation2 + $0xe0] sm:$0x1]  ;;  %81 = vst.msk [vmem:[#allocation2 + $0xc0] sm:$0x1] %vm5_vm6, %v78_v13   ;;  %v86_v16 = vpop.permute.xlu0 %85  }
  0x92   :  { %520 = vst [vmem:[#allocation0 + $0x1c] sm:$0x1] %v516_v12  ;;  %v462_v14 = vld [vmem:[#allocation2 + $0x98] sm:$0x1]  ;;  %89 = vst.msk [vmem:[#allocation2 + $0x78] sm:$0x1] %vm5_vm6, %v86_v16  }
  0x93   :  { %v654_v15 = vld [vmem:[#allocation2 + $0x198] sm:$0x1]  ;;  %466 = vst [vmem:[#allocation0 + $0x13] sm:$0x1] %v462_v14  ;;  %91 = vst.msk [vmem:[#allocation2 + $0x177] sm:$0x2] %vm5_vm6, %v86_v16   ;;  %v96_v19 = vpop.permute.xlu1 %95  }
  0x94   :  { %658 = vst [vmem:[#allocation0 + $0x33] sm:$0x1] %v654_v15  ;;  %v408_v17 = vld [vmem:[#allocation2 + $0x50] sm:$0x1]  ;;  %99 = vst.msk [vmem:[#allocation2 + $0x30] sm:$0x1] %vm5_vm6, %v96_v19  }
  0x95   :  { %v600_v18 = vld [vmem:[#allocation2 + $0x150] sm:$0x1]  ;;  %412 = vst [vmem:[#allocation0 + $0xa] sm:$0x1] %v408_v17  ;;  %101 = vst.msk [vmem:[#allocation2 + $0x12f] sm:$0x2] %vm5_vm6, %v96_v19   ;;  %v105_v22 = vpop.permute.xlu0 %104  }
  0x96   :  { %604 = vst [vmem:[#allocation0 + $0x2a] sm:$0x1] %v600_v18  ;;  %v355_v20 = vld [vmem:[#allocation2 + $0x8] sm:$0x1]  ;;  %108 = vst.msk [vmem:[#allocation2 + $0xe8] sm:$0x1] %vm5_vm6, %v105_v22  }
  0x97   :  { %v546_v21 = vld [vmem:[#allocation2 + $0x108] sm:$0x1]  ;;  %358 = vst [vmem:[#allocation0 + $0x1] sm:$0x1] %v355_v20  ;;  %v113_v24 = vpop.permute.xlu1 %112  }
  0x98   :  { %550 = vst [vmem:[#allocation0 + $0x21] sm:$0x1] %v546_v21  ;;  %v492_v23 = vld [vmem:[#allocation2 + $0xc0] sm:$0x1]  ;;  %116 = vst.msk [vmem:[#allocation2 + $0xa0] sm:$0x1] %vm5_vm6, %v113_v24  }
  0x99   :  { %496 = vst [vmem:[#allocation0 + $0x18] sm:$0x1] %v492_v23  ;;  %118 = vst.msk [vmem:[#allocation2 + $0x19f] sm:$0x2] %vm5_vm6, %v113_v24   ;;  %v438_v25 = vld [vmem:[#allocation2 + $0x78] sm:$0x1]  ;;  %v123_v27 = vpop.permute.xlu0 %122  }
  0x9a   :  { %v630_v26 = vld [vmem:[#allocation2 + $0x178] sm:$0x1]  ;;  %442 = vst [vmem:[#allocation0 + $0xf] sm:$0x1] %v438_v25  ;;  %126 = vst.msk [vmem:[#allocation2 + $0x58] sm:$0x1] %vm5_vm6, %v123_v27  }
  0x9b   :  { %634 = vst [vmem:[#allocation0 + $0x2f] sm:$0x1] %v630_v26  ;;  %128 = vst.msk [vmem:[#allocation2 + $0x157] sm:$0x2] %vm5_vm6, %v123_v27   ;;  %v384_v28 = vld [vmem:[#allocation2 + $0x30] sm:$0x1]  ;;  %v132_v30 = vpop.permute.xlu1 %131  }
  0x9c   :  { %v576_v29 = vld [vmem:[#allocation2 + $0x130] sm:$0x1]  ;;  %388 = vst [vmem:[#allocation0 + $0x6] sm:$0x1] %v384_v28  ;;  %135 = vst.msk [vmem:[#allocation2 + $0x10] sm:$0x1] %vm5_vm6, %v132_v30  }
  0x9d   :  { %580 = vst [vmem:[#allocation0 + $0x26] sm:$0x1] %v576_v29  ;;  %137 = vst.msk [vmem:[#allocation2 + $0x10f] sm:$0x2] %vm5_vm6, %v132_v30   ;;  %v522_v31 = vld [vmem:[#allocation2 + $0xe8] sm:$0x1]  ;;  %v141_v32 = vpop.permute.xlu0 %140  }
  0x9e   :  { %526 = vst [vmem:[#allocation0 + $0x1d] sm:$0x1] %v522_v31  ;;  %144 = vst.msk [vmem:[#allocation2 + $0xc8] sm:$0x1] %vm5_vm6, %v141_v32  }
  0x9f   :  { %v468_v33 = vld [vmem:[#allocation2 + $0xa0] sm:$0x1]  ;;  %v149_v35 = vpop.permute.xlu1 %148  }
  0xa0   :  { %v660_v34 = vld [vmem:[#allocation2 + $0x1a0] sm:$0x1]  ;;  %472 = vst [vmem:[#allocation0 + $0x14] sm:$0x1] %v468_v33  ;;  %152 = vst.msk [vmem:[#allocation2 + $0x80] sm:$0x1] %vm5_vm6, %v149_v35  }
  0xa1   :  { %664 = vst [vmem:[#allocation0 + $0x34] sm:$0x1] %v660_v34  ;;  %154 = vst.msk [vmem:[#allocation2 + $0x17f] sm:$0x2] %vm5_vm6, %v149_v35   ;;  %v414_v36 = vld [vmem:[#allocation2 + $0x58] sm:$0x1]  ;;  %v159_v38 = vpop.permute.xlu0 %158  }
  0xa2   :  { %v606_v37 = vld [vmem:[#allocation2 + $0x158] sm:$0x1]  ;;  %418 = vst [vmem:[#allocation0 + $0xb] sm:$0x1] %v414_v36  ;;  %162 = vst.msk [vmem:[#allocation2 + $0x38] sm:$0x1] %vm5_vm6, %v159_v38  }
  0xa3   :  { %610 = vst [vmem:[#allocation0 + $0x2b] sm:$0x1] %v606_v37  ;;  %164 = vst.msk [vmem:[#allocation2 + $0x137] sm:$0x2] %vm5_vm6, %v159_v38   ;;  %v360_v39 = vld [vmem:[#allocation2 + $0x10] sm:$0x1]  ;;  %v168_v41 = vpop.permute.xlu1 %167  }
  0xa4   :  { %v552_v40 = vld [vmem:[#allocation2 + $0x110] sm:$0x1]  ;;  %364 = vst [vmem:[#allocation0 + $0x2] sm:$0x1] %v360_v39  ;;  %171 = vst.msk [vmem:[#allocation2 + $0xf0] sm:$0x1] %vm5_vm6, %v168_v41  }
  0xa5   :  { %556 = vst [vmem:[#allocation0 + $0x22] sm:$0x1] %v552_v40  ;;  %v498_v42 = vld [vmem:[#allocation2 + $0xc8] sm:$0x1]  ;;  %v176_v43 = vpop.permute.xlu0 %175  }
  0xa6   :  { %502 = vst [vmem:[#allocation0 + $0x19] sm:$0x1] %v498_v42  ;;  %179 = vst.msk [vmem:[#allocation2 + $0xa8] sm:$0x1] %vm5_vm6, %v176_v43  }
  0xa7   :  { %181 = vst.msk [vmem:[#allocation2 + $0x1a7] sm:$0x2] %vm5_vm6, %v176_v43   ;;  %v444_v44 = vld [vmem:[#allocation2 + $0x80] sm:$0x1]  ;;  %v186_v46 = vpop.permute.xlu1 %185  }
  0xa8   :  { %v636_v45 = vld [vmem:[#allocation2 + $0x180] sm:$0x1]  ;;  %448 = vst [vmem:[#allocation0 + $0x10] sm:$0x1] %v444_v44  ;;  %189 = vst.msk [vmem:[#allocation2 + $0x60] sm:$0x1] %vm5_vm6, %v186_v46  }
  0xa9   :  { %640 = vst [vmem:[#allocation0 + $0x30] sm:$0x1] %v636_v45  ;;  %191 = vst.msk [vmem:[#allocation2 + $0x15f] sm:$0x2] %vm5_vm6, %v186_v46   ;;  %v390_v47 = vld [vmem:[#allocation2 + $0x38] sm:$0x1]  ;;  %v195_v49 = vpop.permute.xlu0 %194  }
  0xaa   :  { %v582_v48 = vld [vmem:[#allocation2 + $0x138] sm:$0x1]  ;;  %394 = vst [vmem:[#allocation0 + $0x7] sm:$0x1] %v390_v47  ;;  %198 = vst.msk [vmem:[#allocation2 + $0x18] sm:$0x1] %vm5_vm6, %v195_v49  }
  0xab   :  { %586 = vst [vmem:[#allocation0 + $0x27] sm:$0x1] %v582_v48  ;;  %200 = vst.msk [vmem:[#allocation2 + $0x117] sm:$0x2] %vm5_vm6, %v195_v49   ;;  %v528_v50 = vld [vmem:[#allocation2 + $0xf0] sm:$0x1]  ;;  %v204_v51 = vpop.permute.xlu1 %203  }
  0xac   :  { %532 = vst [vmem:[#allocation0 + $0x1e] sm:$0x1] %v528_v50  ;;  %207 = vst.msk [vmem:[#allocation2 + $0xd0] sm:$0x1] %vm5_vm6, %v204_v51  }
  0xad   :  { %v474_v52 = vld [vmem:[#allocation2 + $0xa8] sm:$0x1]  ;;  %v212_v54 = vpop.permute.xlu0 %211  }
  0xae   :  { %v666_v53 = vld [vmem:[#allocation2 + $0x1a8] sm:$0x1]  ;;  %478 = vst [vmem:[#allocation0 + $0x15] sm:$0x1] %v474_v52  ;;  %215 = vst.msk [vmem:[#allocation2 + $0x88] sm:$0x1] %vm5_vm6, %v212_v54  }
  0xaf   :  { %670 = vst [vmem:[#allocation0 + $0x35] sm:$0x1] %v666_v53  ;;  %217 = vst.msk [vmem:[#allocation2 + $0x187] sm:$0x2] %vm5_vm6, %v212_v54   ;;  %v420_v55 = vld [vmem:[#allocation2 + $0x60] sm:$0x1]  ;;  %v222_v57 = vpop.permute.xlu1 %221  }
  0xb0   :  { %v612_v56 = vld [vmem:[#allocation2 + $0x160] sm:$0x1]  ;;  %424 = vst [vmem:[#allocation0 + $0xc] sm:$0x1] %v420_v55  ;;  %225 = vst.msk [vmem:[#allocation2 + $0x40] sm:$0x1] %vm5_vm6, %v222_v57  }
  0xb1   :  { %616 = vst [vmem:[#allocation0 + $0x2c] sm:$0x1] %v612_v56  ;;  %227 = vst.msk [vmem:[#allocation2 + $0x13f] sm:$0x2] %vm5_vm6, %v222_v57   ;;  %v366_v58 = vld [vmem:[#allocation2 + $0x18] sm:$0x1]  ;;  %v231_v60 = vpop.permute.xlu0 %230  }
  0xb2   :  { %v558_v59 = vld [vmem:[#allocation2 + $0x118] sm:$0x1]  ;;  %370 = vst [vmem:[#allocation0 + $0x3] sm:$0x1] %v366_v58  ;;  %234 = vst.msk [vmem:[#allocation2 + $0xf8] sm:$0x1] %vm5_vm6, %v231_v60  }
  0xb3   :  { %562 = vst [vmem:[#allocation0 + $0x23] sm:$0x1] %v558_v59  ;;  %v504_v61 = vld [vmem:[#allocation2 + $0xd0] sm:$0x1] }
  0xb4   :  { %508 = vst [vmem:[#allocation0 + $0x1a] sm:$0x1] %v504_v61 }
  0xb5   :  { %v450_v62 = vld [vmem:[#allocation2 + $0x88] sm:$0x1] }
  0xb6   :  { %v642_v63 = vld [vmem:[#allocation2 + $0x188] sm:$0x1]  ;;  %454 = vst [vmem:[#allocation0 + $0x11] sm:$0x1] %v450_v62 }
  0xb7   :  { %646 = vst [vmem:[#allocation0 + $0x31] sm:$0x1] %v642_v63  ;;  %v396_v0 = vld [vmem:[#allocation2 + $0x40] sm:$0x1] }
  0xb8   :  { %v588_v1 = vld [vmem:[#allocation2 + $0x140] sm:$0x1]  ;;  %400 = vst [vmem:[#allocation0 + $0x8] sm:$0x1] %v396_v0 }
  0xb9   :  { %592 = vst [vmem:[#allocation0 + $0x28] sm:$0x1] %v588_v1  ;;  %v534_v2 = vld [vmem:[#allocation2 + $0xf8] sm:$0x1] }
  0xba   :  { %538 = vst [vmem:[#allocation0 + $0x1f] sm:$0x1] %v534_v2 }
  0xbb   :  { %823 = shalt.err (!%p820_p4)
}
  0xbc   :  { %s824_s30 = scalar_lea.hbm %s1053_s1, 896 }
  0xbd   :  { %p825_p5 = scmp.ne.s32.totalorder %s1053_s1, %s824_s30  ;;  %p828_p6 = scmp.lt.u32.totalorder %s824_s30, %s1053_s1 }
  0xbf   :  { %p830_p7 = pnand %p828_p6, %p825_p5 }
  0xc1   :  { %833 = shalt.err (!%p830_p7)
}
  0xc2   :  { %690 = dma.vmem_to_hbm [thread:$0]  %s688_s26, 896, %s1053_s1, [#allocation1]  }
  0xc3   :  { %834 = dma.done.wait [#allocation1], 896  }
  0xc4   :  { %835 = vsyncadd [#allocation1], 4294966400 }
  0xc5   :  { %692 = vsyncpa [#allocation1], 1 }

</bundles_post_ra>
